<compile_context>
chip_gen: v5e
topology: v5e:2x2
jax: 0.10.0
libtpu: 0.0.40
codegen_flags: <defaults>
</compile_context>

<pallas_src>
import functools

import jax
import jax.numpy as jnp
from jax.experimental import pallas as pl
from jax.experimental.pallas import tpu as pltpu

# Scaled-down "BERT base"-style config (real PubMedBERT: hidden=768, layers=12,
# heads=12, intermediate=3072, vocab=30522, max_pos=512).
CFG = dict(vocab=64, max_pos=64, type_vocab=2, hidden=128, heads=4,
           layers=2, intermediate=256, num_labels=2)

_VMEM_LIMIT = 32 * 1024 * 1024      # explicit scoped-VMEM cap, safe on v5e/v6e/v7x


def _cparams(semantics):
    return pltpu.CompilerParams(dimension_semantics=semantics,
                                vmem_limit_bytes=_VMEM_LIMIT)


def _pick_tile(m, target=256):
    """Largest token tile <= target dividing m, multiple of 16 (bf16 sublane pack)."""
    if m <= target:
        return m
    t = target
    while t >= 16:
        if m % t == 0:
            return t
        t -= 16
    return m


def _erf(x):
    # Exact erf via Abramowitz & Stegun 7.1.26 (|abs err| < 1.5e-7).
    a1, a2, a3, a4, a5 = 0.254829592, -0.284496736, 1.421413741, -1.453152027, 1.061405429
    p = 0.3275911
    ax = jnp.abs(x)
    t = 1.0 / (1.0 + p * ax)
    poly = ((((a5 * t + a4) * t + a3) * t + a2) * t + a1) * t
    e = 1.0 - poly * jnp.exp(-ax * ax)
    return jnp.where(x >= 0, e, -e)


# ------------------------------ Pallas kernels ------------------------------

def _linear_kernel(x_ref, w_ref, b_ref, o_ref, *, activation):
    # y = x @ w + b  (bf16 x bf16 -> f32 accumulate), optional activation.
    y = jnp.dot(x_ref[...], w_ref[...], preferred_element_type=jnp.float32) + b_ref[...]
    if activation == "gelu":            # exact erf-GELU (HF BERT "gelu")
        y = 0.5 * y * (1.0 + _erf(y * 0.7071067811865476))
    elif activation == "tanh":          # BERT pooler activation
        y = jnp.tanh(y)
    o_ref[...] = y.astype(o_ref.dtype)


def _linear_res_ln_kernel(x_ref, w_ref, b_ref, r_ref, g_ref, beta_ref, o_ref):
    # Fused: (x @ w + b) + residual, then LayerNorm(eps=1e-12) * gamma + beta.
    y = jnp.dot(x_ref[...], w_ref[...], preferred_element_type=jnp.float32) + b_ref[...]
    y = y + r_ref[...].astype(jnp.float32)
    mean = jnp.mean(y, axis=-1, keepdims=True)
    var = jnp.mean((y - mean) ** 2, axis=-1, keepdims=True)
    inv = jax.lax.rsqrt(var + 1e-12)
    o_ref[...] = ((y - mean) * inv * g_ref[...] + beta_ref[...]).astype(o_ref.dtype)


def _ln_kernel(x_ref, g_ref, b_ref, o_ref):
    x = x_ref[...].astype(jnp.float32)
    mean = jnp.mean(x, axis=-1, keepdims=True)
    var = jnp.mean((x - mean) ** 2, axis=-1, keepdims=True)
    inv = jax.lax.rsqrt(var + 1e-12)
    o_ref[...] = ((x - mean) * inv * g_ref[...] + b_ref[...]).astype(o_ref.dtype)


def _attn_kernel(qkv_ref, m_ref, o_ref, *, num_heads, head_dim, hidden):
    # One batch element per grid step: fused QKV tile (S, 3H) in, per-head
    # context (num_heads, S, head_dim) out.  1/sqrt(head_dim) is pre-folded
    # into the Q projection weights; the (1, S) additive mask is broadcast
    # in-register (never materialized as (heads, S, S) in HBM).
    qkv = qkv_ref[0]                                    # (S, 3H) bf16
    mask = m_ref[0]                                     # (1, S)  f32 additive
    for h in range(num_heads):
        q = qkv[:, h * head_dim:(h + 1) * head_dim]
        k = qkv[:, hidden + h * head_dim:hidden + (h + 1) * head_dim]
        v = qkv[:, 2 * hidden + h * head_dim:2 * hidden + (h + 1) * head_dim]
        s = jax.lax.dot_general(q, k, (((1,), (1,)), ((), ())),
                                preferred_element_type=jnp.float32)     # (S, S)
        s = s + mask
        mx = jnp.max(s, axis=-1, keepdims=True)
        e = jnp.exp(s - mx)
        p = e * pl.reciprocal(jnp.sum(e, axis=-1, keepdims=True), approx=True)
        o_ref[0, h] = jnp.dot(p.astype(qkv.dtype), v,
                              preferred_element_type=jnp.float32).astype(o_ref.dtype)


def _cls_ce_kernel(x_ref, w_ref, b_ref, lbl_ref, logits_ref, loss_ref):
    # Fused classifier Linear(H -> num_labels) + mean softmax cross-entropy.
    logits = jnp.dot(x_ref[...], w_ref[...],
                     preferred_element_type=jnp.float32) + b_ref[...]     # (B, C)
    logits_ref[...] = logits
    m = jnp.max(logits, axis=-1, keepdims=True)
    lse = m + jnp.log(jnp.sum(jnp.exp(logits - m), axis=-1, keepdims=True))
    classes = jax.lax.broadcasted_iota(jnp.int32, logits.shape, 1)
    onehot = (classes == lbl_ref[...]).astype(jnp.float32)
    true_logit = jnp.sum(logits * onehot, axis=-1, keepdims=True)
    per_ex = lse - true_logit                                             # (B, 1)
    loss_ref[...] = jnp.sum(per_ex, axis=0, keepdims=True) / logits.shape[0]


# ------------------------------ Pallas wrappers ------------------------------

def linear(x, w, b, activation="none", out_dtype=jnp.bfloat16, tile=256):
    M, K = x.shape
    N = w.shape[1]
    tm = _pick_tile(M, tile)
    return pl.pallas_call(
        functools.partial(_linear_kernel, activation=activation),
        out_shape=jax.ShapeDtypeStruct((M, N), out_dtype),
        grid=(M // tm,),
        in_specs=[pl.BlockSpec((tm, K), lambda i: (i, 0)),
                  pl.BlockSpec((K, N), lambda i: (0, 0)),
                  pl.BlockSpec((1, N), lambda i: (0, 0))],
        out_specs=pl.BlockSpec((tm, N), lambda i: (i, 0)),
        compiler_params=_cparams(("parallel",)),
    )(x, w, b.reshape(1, N))


def linear_res_ln(x, w, b, res, gamma, beta, out_dtype=jnp.bfloat16, tile=256):
    M, K = x.shape
    N = w.shape[1]
    tm = _pick_tile(M, tile)
    return pl.pallas_call(
        _linear_res_ln_kernel,
        out_shape=jax.ShapeDtypeStruct((M, N), out_dtype),
        grid=(M // tm,),
        in_specs=[pl.BlockSpec((tm, K), lambda i: (i, 0)),
                  pl.BlockSpec((K, N), lambda i: (0, 0)),
                  pl.BlockSpec((1, N), lambda i: (0, 0)),
                  pl.BlockSpec((tm, N), lambda i: (i, 0)),
                  pl.BlockSpec((1, N), lambda i: (0, 0)),
                  pl.BlockSpec((1, N), lambda i: (0, 0))],
        out_specs=pl.BlockSpec((tm, N), lambda i: (i, 0)),
        compiler_params=_cparams(("parallel",)),
    )(x, w, b.reshape(1, N), res, gamma.reshape(1, N), beta.reshape(1, N))


def layernorm(x, gamma, beta, out_dtype=jnp.bfloat16, tile=256):
    M, H = x.shape
    tm = _pick_tile(M, tile)
    return pl.pallas_call(
        _ln_kernel,
        out_shape=jax.ShapeDtypeStruct((M, H), out_dtype),
        grid=(M // tm,),
        in_specs=[pl.BlockSpec((tm, H), lambda i: (i, 0)),
                  pl.BlockSpec((1, H), lambda i: (0, 0)),
                  pl.BlockSpec((1, H), lambda i: (0, 0))],
        out_specs=pl.BlockSpec((tm, H), lambda i: (i, 0)),
        compiler_params=_cparams(("parallel",)),
    )(x, gamma.reshape(1, H), beta.reshape(1, H))


def attention(qkv, ext_mask, *, num_heads):
    # qkv: (B, S, 3H) bf16 (Q pre-scaled) ; ext_mask: (B, 1, S) f32 additive.
    B, S, H3 = qkv.shape
    H = H3 // 3
    dH = H // num_heads
    return pl.pallas_call(
        functools.partial(_attn_kernel, num_heads=num_heads, head_dim=dH, hidden=H),
        out_shape=jax.ShapeDtypeStruct((B, num_heads, S, dH), jnp.bfloat16),
        grid=(B,),
        in_specs=[pl.BlockSpec((1, S, H3), lambda b: (b, 0, 0)),
                  pl.BlockSpec((1, 1, S), lambda b: (b, 0, 0))],
        out_specs=pl.BlockSpec((1, num_heads, S, dH), lambda b: (b, 0, 0, 0)),
        compiler_params=_cparams(("parallel",)),
    )(qkv, ext_mask)


def classifier_ce(pooled, w, b, labels):
    B, H = pooled.shape
    C = w.shape[1]
    logits, loss = pl.pallas_call(
        _cls_ce_kernel,
        out_shape=(jax.ShapeDtypeStruct((B, C), jnp.float32),
                   jax.ShapeDtypeStruct((1, 1), jnp.float32)),
        grid=(1,),
        in_specs=[pl.BlockSpec((B, H), lambda i: (0, 0)),
                  pl.BlockSpec((H, C), lambda i: (0, 0)),
                  pl.BlockSpec((1, C), lambda i: (0, 0)),
                  pl.BlockSpec((B, 1), lambda i: (0, 0))],
        out_specs=(pl.BlockSpec((B, C), lambda i: (0, 0)),
                   pl.BlockSpec((1, 1), lambda i: (0, 0))),
        compiler_params=_cparams(("arbitrary",)),
    )(pooled, w, b.reshape(1, C), labels.astype(jnp.int32).reshape(B, 1))
    return logits, loss[0, 0]


# ------------------------------ model ------------------------------

def init_params(key):
    H, I, nH = CFG["hidden"], CFG["intermediate"], CFG["heads"]
    dH = H // nH
    q_scale = 1.0 / (dH ** 0.5)
    keys = iter(jax.random.split(key, 256))

    def nrm(shape):
        return (0.02 * jax.random.normal(next(keys), shape)).astype(jnp.float32)

    params = dict(
        word_emb=nrm((CFG["vocab"], H)),
        pos_emb=nrm((CFG["max_pos"], H)),
        type_emb=nrm((CFG["type_vocab"], H)),
        emb_ln_g=jnp.ones((H,), jnp.float32),
        emb_ln_b=jnp.zeros((H,), jnp.float32),
        pool_w=nrm((H, H)).astype(jnp.bfloat16),
        pool_b=jnp.zeros((H,), jnp.float32),
        fc_w=nrm((H, CFG["num_labels"])),
        fc_b=jnp.zeros((CFG["num_labels"],), jnp.float32),
        layers=[],
    )
    for _ in range(CFG["layers"]):
        wq, wk, wv = nrm((H, H)), nrm((H, H)), nrm((H, H))
        bq = jnp.zeros((H,), jnp.float32)
        bk = jnp.zeros((H,), jnp.float32)
        bv = jnp.zeros((H,), jnp.float32)
        params["layers"].append(dict(
            # Q/K/V fused into a single [H, 3H] weight; 1/sqrt(head_dim) folded
            # into the Q columns so the attention kernel needs no scaling.
            wqkv=jnp.concatenate([wq * q_scale, wk, wv], axis=1).astype(jnp.bfloat16),
            bqkv=jnp.concatenate([bq * q_scale, bk, bv], axis=0),
            wo=nrm((H, H)).astype(jnp.bfloat16), bo=jnp.zeros((H,), jnp.float32),
            ln1_g=jnp.ones((H,), jnp.float32), ln1_b=jnp.zeros((H,), jnp.float32),
            wi=nrm((H, I)).astype(jnp.bfloat16), bi=jnp.zeros((I,), jnp.float32),
            wout=nrm((I, H)).astype(jnp.bfloat16), bout=jnp.zeros((H,), jnp.float32),
            ln2_g=jnp.ones((H,), jnp.float32), ln2_b=jnp.zeros((H,), jnp.float32),
        ))
    return params


def forward(params, input_ids, token_type_ids, attention_mask, labels=None):
    B, S = input_ids.shape
    H, nH = CFG["hidden"], CFG["heads"]
    M = B * S

    # --- embeddings (gathers = glue) + LayerNorm (Pallas, no zero residual) ---
    pos = jnp.arange(S)[None, :]
    emb = (jnp.take(params["word_emb"], input_ids, axis=0)
           + jnp.take(params["pos_emb"], pos, axis=0)
           + jnp.take(params["type_emb"], token_type_ids, axis=0)).astype(jnp.float32)
    x = layernorm(emb.reshape(M, H), params["emb_ln_g"], params["emb_ln_b"])  # (M,H) bf16

    # HF-style extended additive mask kept tiny: (B, 1, S), broadcast in-kernel.
    ext_mask = ((1.0 - attention_mask.astype(jnp.float32)) * -1e9).reshape(B, 1, S)

    # --- transformer encoder layers ---
    for lyr in params["layers"]:
        res = x
        qkv = linear(x, lyr["wqkv"], lyr["bqkv"])                     # (M, 3H) bf16
        ctx = attention(qkv.reshape(B, S, 3 * H), ext_mask, num_heads=nH)
        ctx = ctx.transpose(0, 2, 1, 3).reshape(M, H)                 # merge heads (glue)
        x = linear_res_ln(ctx, lyr["wo"], lyr["bo"],
                          res, lyr["ln1_g"], lyr["ln1_b"])            # attn out + LN1

        res2 = x
        inter = linear(x, lyr["wi"], lyr["bi"], activation="gelu")    # (M, I) bf16
        x = linear_res_ln(inter, lyr["wout"], lyr["bout"],
                          res2, lyr["ln2_g"], lyr["ln2_b"])           # FFN out + LN2

    # --- pooler: tanh(W * h_[CLS] + b) ---
    cls = x.reshape(B, S, H)[:, 0, :]                                 # (B, H) bf16
    pooled = linear(cls, params["pool_w"], params["pool_b"],
                    activation="tanh", out_dtype=jnp.float32)         # (B, H) f32

    # nn.Dropout(0.1) is identity at inference.
    # TODO(synk): training-time dropout not implemented.
    if labels is None:
        logits = linear(pooled, params["fc_w"], params["fc_b"], out_dtype=jnp.float32)
        return logits, None
    logits, loss = classifier_ce(pooled, params["fc_w"], params["fc_b"], labels)
    return logits, loss


# ------------------------------ main ------------------------------

if __name__ == "__main__":
    key = jax.random.PRNGKey(0)
    pkey, dkey = jax.random.split(key)
    params = init_params(pkey)

    B, S = 8, 64
    k1, k2 = jax.random.split(dkey)
    input_ids = jax.random.randint(k1, (B, S), 0, CFG["vocab"], dtype=jnp.int32)
    token_type_ids = jnp.zeros((B, S), jnp.int32)
    attention_mask = jnp.ones((B, S), jnp.int32).at[1, 48:].set(0)    # pad tail of ex 1
    labels = jax.random.randint(k2, (B,), 0, CFG["num_labels"], dtype=jnp.int32)

    fwd = jax.jit(forward)
    logits, loss = fwd(params, input_ids, token_type_ids, attention_mask, labels)
    jax.block_until_ready((logits, loss))
    assert logits.shape == (B, CFG["num_labels"]) and loss.shape == ()
    print("KERNEL_OK")
</pallas_src>

<mosaic_0001>
module attributes {stable_mosaic.version = 11 : i64} {
  func.func @_ln_kernel(%arg0: i32, %arg1: memref<256x128xf32, #tpu.memory_space<vmem>>, %arg2: memref<1x128xf32, #tpu.memory_space<vmem>>, %arg3: memref<1x128xf32, #tpu.memory_space<vmem>>, %arg4: memref<256x128xbf16, #tpu.memory_space<vmem>>) attributes {dimension_semantics = [#tpu.dimension_semantics<parallel>], iteration_bounds = array<i64: 2>, scalar_prefetch = 0 : i64, scratch_operands = 0 : i64, tpu.core_type = #tpu.core_type<tc>, window_params = [{transform_indices = @transform_0, window_bounds = array<i64: 256, 128>}, {pipeline_mode = #tpu.pipeline_mode<synchronous>, transform_indices = @transform_1, window_bounds = array<i64: 1, 128>}, {pipeline_mode = #tpu.pipeline_mode<synchronous>, transform_indices = @transform_2, window_bounds = array<i64: 1, 128>}, {transform_indices = @transform_3, window_bounds = array<i64: 256, 128>}]} {
    %c0 = arith.constant 0 : index
    %c0_0 = arith.constant 0 : index
    %0 = vector.load %arg1[%c0, %c0_0] : memref<256x128xf32, #tpu.memory_space<vmem>>, vector<256x128xf32>
    %cst = arith.constant dense<0.000000e+00> : vector<256xf32>
    %1 = vector.multi_reduction <add>, %0, %cst [1] : vector<256x128xf32> to vector<256xf32>
    %2 = vector.shape_cast %1 : vector<256xf32> to vector<256x1xf32>
    %cst_1 = arith.constant 1.280000e+02 : f32
    %3 = vector.broadcast %cst_1 : f32 to vector<256x1xf32>
    %4 = arith.divf %2, %3 : vector<256x1xf32>
    %5 = vector.broadcast %4 : vector<256x1xf32> to vector<256x128xf32>
    %6 = arith.subf %0, %5 : vector<256x128xf32>
    %7 = arith.mulf %6, %6 : vector<256x128xf32>
    %cst_2 = arith.constant dense<0.000000e+00> : vector<256xf32>
    %8 = vector.multi_reduction <add>, %7, %cst_2 [1] : vector<256x128xf32> to vector<256xf32>
    %9 = vector.shape_cast %8 : vector<256xf32> to vector<256x1xf32>
    %cst_3 = arith.constant 1.280000e+02 : f32
    %10 = vector.broadcast %cst_3 : f32 to vector<256x1xf32>
    %11 = arith.divf %9, %10 : vector<256x1xf32>
    %cst_4 = arith.constant 9.99999996E-13 : f32
    %12 = vector.broadcast %cst_4 : f32 to vector<256x1xf32>
    %13 = arith.addf %11, %12 : vector<256x1xf32>
    %14 = math.rsqrt %13 : vector<256x1xf32>
    %15 = vector.broadcast %4 : vector<256x1xf32> to vector<256x128xf32>
    %16 = arith.subf %0, %15 : vector<256x128xf32>
    %17 = vector.broadcast %14 : vector<256x1xf32> to vector<256x128xf32>
    %18 = arith.mulf %16, %17 : vector<256x128xf32>
    %c0_5 = arith.constant 0 : index
    %c0_6 = arith.constant 0 : index
    %19 = vector.load %arg2[%c0_5, %c0_6] : memref<1x128xf32, #tpu.memory_space<vmem>>, vector<1x128xf32>
    %20 = vector.broadcast %19 : vector<1x128xf32> to vector<256x128xf32>
    %21 = arith.mulf %18, %20 : vector<256x128xf32>
    %c0_7 = arith.constant 0 : index
    %c0_8 = arith.constant 0 : index
    %22 = vector.load %arg3[%c0_7, %c0_8] : memref<1x128xf32, #tpu.memory_space<vmem>>, vector<1x128xf32>
    %23 = vector.broadcast %22 : vector<1x128xf32> to vector<256x128xf32>
    %24 = arith.addf %21, %23 : vector<256x128xf32>
    %25 = arith.truncf %24 : vector<256x128xf32> to vector<256x128xbf16>
    %c0_9 = arith.constant 0 : index
    %c0_10 = arith.constant 0 : index
    %26 = vector.load %arg4[%c0_9, %c0_10] : memref<256x128xbf16, #tpu.memory_space<vmem>>, vector<256x128xbf16>
    tpu.vector_store %arg4[%c0_9, %c0_10], %25 {strides = array<i32>} : memref<256x128xbf16, #tpu.memory_space<vmem>>, vector<256x128xbf16>,
    return
  }
  func.func @transform_0(%arg0: i32) -> (i32, i32) {
    %c0_i32 = arith.constant 0 : i32
    %c0_i32_0 = arith.constant 0 : i32
    return %arg0, %c0_i32 : i32, i32
  }
  func.func @transform_1(%arg0: i32) -> (i32, i32) {
    %c0_i32 = arith.constant 0 : i32
    %c0_i32_0 = arith.constant 0 : i32
    %c0_i32_1 = arith.constant 0 : i32
    return %c0_i32, %c0_i32_0 : i32, i32
  }
  func.func @transform_2(%arg0: i32) -> (i32, i32) {
    %c0_i32 = arith.constant 0 : i32
    %c0_i32_0 = arith.constant 0 : i32
    %c0_i32_1 = arith.constant 0 : i32
    return %c0_i32, %c0_i32_0 : i32, i32
  }
  func.func @transform_3(%arg0: i32) -> (i32, i32) {
    %c0_i32 = arith.constant 0 : i32
    %c0_i32_0 = arith.constant 0 : i32
    return %arg0, %c0_i32 : i32, i32
  }
}

module attributes {stable_mosaic.version = 11 : i64} {
  func.func @_linear_kernel(%arg0: i32, %arg1: memref<256x128xbf16, #tpu.memory_space<vmem>>, %arg2: memref<128x384xbf16, #tpu.memory_space<vmem>>, %arg3: memref<1x384xf32, #tpu.memory_space<vmem>>, %arg4: memref<256x384xbf16, #tpu.memory_space<vmem>>) attributes {dimension_semantics = [#tpu.dimension_semantics<parallel>], iteration_bounds = array<i64: 2>, scalar_prefetch = 0 : i64, scratch_operands = 0 : i64, tpu.core_type = #tpu.core_type<tc>, window_params = [{transform_indices = @transform_0, window_bounds = array<i64: 256, 128>}, {pipeline_mode = #tpu.pipeline_mode<synchronous>, transform_indices = @transform_1, window_bounds = array<i64: 128, 384>}, {pipeline_mode = #tpu.pipeline_mode<synchronous>, transform_indices = @transform_2, window_bounds = array<i64: 1, 384>}, {transform_indices = @transform_3, window_bounds = array<i64: 256, 384>}]} {
    %c0 = arith.constant 0 : index
    %c0_0 = arith.constant 0 : index
    %0 = vector.load %arg1[%c0, %c0_0] : memref<256x128xbf16, #tpu.memory_space<vmem>>, vector<256x128xbf16>
    %c0_1 = arith.constant 0 : index
    %c0_2 = arith.constant 0 : index
    %1 = vector.load %arg2[%c0_1, %c0_2] : memref<128x384xbf16, #tpu.memory_space<vmem>>, vector<128x384xbf16>
    %cst = arith.constant dense<0.000000e+00> : vector<256x384xf32>
    %2 = tpu.matmul %0, %1, %cst {dimension_numbers = #tpu.dot_dimension_numbers<[1], [0], [0], [1], [0, 0, 1, 1], [], []>} : vector<256x128xbf16>, vector<128x384xbf16>, vector<256x384xf32> -> vector<256x384xf32>
    %c0_3 = arith.constant 0 : index
    %c0_4 = arith.constant 0 : index
    %3 = vector.load %arg3[%c0_3, %c0_4] : memref<1x384xf32, #tpu.memory_space<vmem>>, vector<1x384xf32>
    %4 = vector.broadcast %3 : vector<1x384xf32> to vector<256x384xf32>
    %5 = arith.addf %2, %4 : vector<256x384xf32>
    %6 = arith.truncf %5 : vector<256x384xf32> to vector<256x384xbf16>
    %c0_5 = arith.constant 0 : index
    %c0_6 = arith.constant 0 : index
    %7 = vector.load %arg4[%c0_5, %c0_6] : memref<256x384xbf16, #tpu.memory_space<vmem>>, vector<256x384xbf16>
    tpu.vector_store %arg4[%c0_5, %c0_6], %6 {strides = array<i32>} : memref<256x384xbf16, #tpu.memory_space<vmem>>, vector<256x384xbf16>,
    return
  }
  func.func @transform_0(%arg0: i32) -> (i32, i32) {
    %c0_i32 = arith.constant 0 : i32
    %c0_i32_0 = arith.constant 0 : i32
    return %arg0, %c0_i32 : i32, i32
  }
  func.func @transform_1(%arg0: i32) -> (i32, i32) {
    %c0_i32 = arith.constant 0 : i32
    %c0_i32_0 = arith.constant 0 : i32
    %c0_i32_1 = arith.constant 0 : i32
    return %c0_i32, %c0_i32_0 : i32, i32
  }
  func.func @transform_2(%arg0: i32) -> (i32, i32) {
    %c0_i32 = arith.constant 0 : i32
    %c0_i32_0 = arith.constant 0 : i32
    %c0_i32_1 = arith.constant 0 : i32
    return %c0_i32, %c0_i32_0 : i32, i32
  }
  func.func @transform_3(%arg0: i32) -> (i32, i32) {
    %c0_i32 = arith.constant 0 : i32
    %c0_i32_0 = arith.constant 0 : i32
    return %arg0, %c0_i32 : i32, i32
  }
}

module attributes {stable_mosaic.version = 11 : i64} {
  func.func @_attn_kernel(%arg0: i32, %arg1: memref<1x64x384xbf16, #tpu.memory_space<vmem>>, %arg2: memref<1x1x64xf32, #tpu.memory_space<vmem>>, %arg3: memref<1x4x64x32xbf16, #tpu.memory_space<vmem>>) attributes {dimension_semantics = [#tpu.dimension_semantics<parallel>], iteration_bounds = array<i64: 8>, scalar_prefetch = 0 : i64, scratch_operands = 0 : i64, tpu.core_type = #tpu.core_type<tc>, window_params = [{transform_indices = @transform_0, window_bounds = array<i64: 1, 64, 384>}, {transform_indices = @transform_1, window_bounds = array<i64: 1, 1, 64>}, {transform_indices = @transform_2, window_bounds = array<i64: 1, 4, 64, 32>}]} {
    %c0 = arith.constant 0 : index
    %c0_0 = arith.constant 0 : index
    %c0_1 = arith.constant 0 : index
    %0 = vector.load %arg1[%c0, %c0_0, %c0_1] : memref<1x64x384xbf16, #tpu.memory_space<vmem>>, vector<1x64x384xbf16>
    %1 = vector.shape_cast %0 : vector<1x64x384xbf16> to vector<64x384xbf16>
    %c0_2 = arith.constant 0 : index
    %c0_3 = arith.constant 0 : index
    %c0_4 = arith.constant 0 : index
    %2 = vector.load %arg2[%c0_2, %c0_3, %c0_4] : memref<1x1x64xf32, #tpu.memory_space<vmem>>, vector<1x1x64xf32>
    %3 = vector.shape_cast %2 : vector<1x1x64xf32> to vector<1x64xf32>
    %4 = vector.extract_strided_slice %1 {offsets = [0, 0], sizes = [64, 32], strides = [1, 1]} : vector<64x384xbf16> to vector<64x32xbf16>
    %5 = vector.extract_strided_slice %1 {offsets = [0, 128], sizes = [64, 32], strides = [1, 1]} : vector<64x384xbf16> to vector<64x32xbf16>
    %6 = vector.extract_strided_slice %1 {offsets = [0, 256], sizes = [64, 32], strides = [1, 1]} : vector<64x384xbf16> to vector<64x32xbf16>
    %cst = arith.constant dense<0.000000e+00> : vector<64x64xf32>
    %7 = tpu.matmul %4, %5, %cst {dimension_numbers = #tpu.dot_dimension_numbers<[1], [1], [0], [0], [0, 0, 1, 0], [], []>} : vector<64x32xbf16>, vector<64x32xbf16>, vector<64x64xf32> -> vector<64x64xf32>
    %8 = vector.broadcast %3 : vector<1x64xf32> to vector<64x64xf32>
    %9 = arith.addf %7, %8 : vector<64x64xf32>
    %cst_5 = arith.constant dense<0xFF800000> : vector<64xf32>
    %10 = vector.multi_reduction <maximumf>, %9, %cst_5 [1] : vector<64x64xf32> to vector<64xf32>
    %11 = vector.shape_cast %10 : vector<64xf32> to vector<64x1xf32>
    %12 = vector.broadcast %11 : vector<64x1xf32> to vector<64x64xf32>
    %13 = arith.subf %9, %12 : vector<64x64xf32>
    %14 = math.exp %13 : vector<64x64xf32>
    %cst_6 = arith.constant dense<0.000000e+00> : vector<64xf32>
    %15 = vector.multi_reduction <add>, %14, %cst_6 [1] : vector<64x64xf32> to vector<64xf32>
    %16 = vector.shape_cast %15 : vector<64xf32> to vector<64x1xf32>
    %17 = tpu.reciprocal %16 {approx = true} : vector<64x1xf32> -> vector<64x1xf32>
    %18 = vector.broadcast %17 : vector<64x1xf32> to vector<64x64xf32>
    %19 = arith.mulf %14, %18 : vector<64x64xf32>
    %20 = arith.truncf %19 : vector<64x64xf32> to vector<64x64xbf16>
    %cst_7 = arith.constant dense<0.000000e+00> : vector<64x32xf32>
    %21 = tpu.matmul %20, %6, %cst_7 {dimension_numbers = #tpu.dot_dimension_numbers<[1], [0], [0], [1], [0, 0, 1, 1], [], []>} : vector<64x64xbf16>, vector<64x32xbf16>, vector<64x32xf32> -> vector<64x32xf32>
    %22 = arith.truncf %21 : vector<64x32xf32> to vector<64x32xbf16>
    %c0_8 = arith.constant 0 : index
    %c0_9 = arith.constant 0 : index
    %c0_10 = arith.constant 0 : index
    %c0_11 = arith.constant 0 : index
    %23 = vector.load %arg3[%c0_8, %c0_9, %c0_10, %c0_11] : memref<1x4x64x32xbf16, #tpu.memory_space<vmem>>, vector<1x1x64x32xbf16>
    %24 = vector.shape_cast %23 : vector<1x1x64x32xbf16> to vector<64x32xbf16>
    %25 = vector.shape_cast %22 : vector<64x32xbf16> to vector<1x1x64x32xbf16>
    tpu.vector_store %arg3[%c0_8, %c0_9, %c0_10, %c0_11], %25 {strides = array<i32>} : memref<1x4x64x32xbf16, #tpu.memory_space<vmem>>, vector<1x1x64x32xbf16>,
    %26 = vector.extract_strided_slice %1 {offsets = [0, 32], sizes = [64, 32], strides = [1, 1]} : vector<64x384xbf16> to vector<64x32xbf16>
    %27 = vector.extract_strided_slice %1 {offsets = [0, 160], sizes = [64, 32], strides = [1, 1]} : vector<64x384xbf16> to vector<64x32xbf16>
    %28 = vector.extract_strided_slice %1 {offsets = [0, 288], sizes = [64, 32], strides = [1, 1]} : vector<64x384xbf16> to vector<64x32xbf16>
    %cst_12 = arith.constant dense<0.000000e+00> : vector<64x64xf32>
    %29 = tpu.matmul %26, %27, %cst_12 {dimension_numbers = #tpu.dot_dimension_numbers<[1], [1], [0], [0], [0, 0, 1, 0], [], []>} : vector<64x32xbf16>, vector<64x32xbf16>, vector<64x64xf32> -> vector<64x64xf32>
    %30 = vector.broadcast %3 : vector<1x64xf32> to vector<64x64xf32>
    %31 = arith.addf %29, %30 : vector<64x64xf32>
    %cst_13 = arith.constant dense<0xFF800000> : vector<64xf32>
    %32 = vector.multi_reduction <maximumf>, %31, %cst_13 [1] : vector<64x64xf32> to vector<64xf32>
    %33 = vector.shape_cast %32 : vector<64xf32> to vector<64x1xf32>
    %34 = vector.broadcast %33 : vector<64x1xf32> to vector<64x64xf32>
    %35 = arith.subf %31, %34 : vector<64x64xf32>
    %36 = math.exp %35 : vector<64x64xf32>
    %cst_14 = arith.constant dense<0.000000e+00> : vector<64xf32>
    %37 = vector.multi_reduction <add>, %36, %cst_14 [1] : vector<64x64xf32> to vector<64xf32>
    %38 = vector.shape_cast %37 : vector<64xf32> to vector<64x1xf32>
    %39 = tpu.reciprocal %38 {approx = true} : vector<64x1xf32> -> vector<64x1xf32>
    %40 = vector.broadcast %39 : vector<64x1xf32> to vector<64x64xf32>
    %41 = arith.mulf %36, %40 : vector<64x64xf32>
    %42 = arith.truncf %41 : vector<64x64xf32> to vector<64x64xbf16>
    %cst_15 = arith.constant dense<0.000000e+00> : vector<64x32xf32>
    %43 = tpu.matmul %42, %28, %cst_15 {dimension_numbers = #tpu.dot_dimension_numbers<[1], [0], [0], [1], [0, 0, 1, 1], [], []>} : vector<64x64xbf16>, vector<64x32xbf16>, vector<64x32xf32> -> vector<64x32xf32>
    %44 = arith.truncf %43 : vector<64x32xf32> to vector<64x32xbf16>
    %c0_16 = arith.constant 0 : index
    %c1 = arith.constant 1 : index
    %c0_17 = arith.constant 0 : index
    %c0_18 = arith.constant 0 : index
    %45 = vector.load %arg3[%c0_16, %c1, %c0_17, %c0_18] : memref<1x4x64x32xbf16, #tpu.memory_space<vmem>>, vector<1x1x64x32xbf16>
    %46 = vector.shape_cast %45 : vector<1x1x64x32xbf16> to vector<64x32xbf16>
    %47 = vector.shape_cast %44 : vector<64x32xbf16> to vector<1x1x64x32xbf16>
    tpu.vector_store %arg3[%c0_16, %c1, %c0_17, %c0_18], %47 {strides = array<i32>} : memref<1x4x64x32xbf16, #tpu.memory_space<vmem>>, vector<1x1x64x32xbf16>,
    %48 = vector.extract_strided_slice %1 {offsets = [0, 64], sizes = [64, 32], strides = [1, 1]} : vector<64x384xbf16> to vector<64x32xbf16>
    %49 = vector.extract_strided_slice %1 {offsets = [0, 192], sizes = [64, 32], strides = [1, 1]} : vector<64x384xbf16> to vector<64x32xbf16>
    %50 = vector.extract_strided_slice %1 {offsets = [0, 320], sizes = [64, 32], strides = [1, 1]} : vector<64x384xbf16> to vector<64x32xbf16>
    %cst_19 = arith.constant dense<0.000000e+00> : vector<64x64xf32>
    %51 = tpu.matmul %48, %49, %cst_19 {dimension_numbers = #tpu.dot_dimension_numbers<[1], [1], [0], [0], [0, 0, 1, 0], [], []>} : vector<64x32xbf16>, vector<64x32xbf16>, vector<64x64xf32> -> vector<64x64xf32>
    %52 = vector.broadcast %3 : vector<1x64xf32> to vector<64x64xf32>
    %53 = arith.addf %51, %52 : vector<64x64xf32>
    %cst_20 = arith.constant dense<0xFF800000> : vector<64xf32>
    %54 = vector.multi_reduction <maximumf>, %53, %cst_20 [1] : vector<64x64xf32> to vector<64xf32>
    %55 = vector.shape_cast %54 : vector<64xf32> to vector<64x1xf32>
    %56 = vector.broadcast %55 : vector<64x1xf32> to vector<64x64xf32>
    %57 = arith.subf %53, %56 : vector<64x64xf32>
    %58 = math.exp %57 : vector<64x64xf32>
    %cst_21 = arith.constant dense<0.000000e+00> : vector<64xf32>
    %59 = vector.multi_reduction <add>, %58, %cst_21 [1] : vector<64x64xf32> to vector<64xf32>
    %60 = vector.shape_cast %59 : vector<64xf32> to vector<64x1xf32>
    %61 = tpu.reciprocal %60 {approx = true} : vector<64x1xf32> -> vector<64x1xf32>
    %62 = vector.broadcast %61 : vector<64x1xf32> to vector<64x64xf32>
    %63 = arith.mulf %58, %62 : vector<64x64xf32>
    %64 = arith.truncf %63 : vector<64x64xf32> to vector<64x64xbf16>
    %cst_22 = arith.constant dense<0.000000e+00> : vector<64x32xf32>
    %65 = tpu.matmul %64, %50, %cst_22 {dimension_numbers = #tpu.dot_dimension_numbers<[1], [0], [0], [1], [0, 0, 1, 1], [], []>} : vector<64x64xbf16>, vector<64x32xbf16>, vector<64x32xf32> -> vector<64x32xf32>
    %66 = arith.truncf %65 : vector<64x32xf32> to vector<64x32xbf16>
    %c0_23 = arith.constant 0 : index
    %c2 = arith.constant 2 : index
    %c0_24 = arith.constant 0 : index
    %c0_25 = arith.constant 0 : index
    %67 = vector.load %arg3[%c0_23, %c2, %c0_24, %c0_25] : memref<1x4x64x32xbf16, #tpu.memory_space<vmem>>, vector<1x1x64x32xbf16>
    %68 = vector.shape_cast %67 : vector<1x1x64x32xbf16> to vector<64x32xbf16>
    %69 = vector.shape_cast %66 : vector<64x32xbf16> to vector<1x1x64x32xbf16>
    tpu.vector_store %arg3[%c0_23, %c2, %c0_24, %c0_25], %69 {strides = array<i32>} : memref<1x4x64x32xbf16, #tpu.memory_space<vmem>>, vector<1x1x64x32xbf16>,
    %70 = vector.extract_strided_slice %1 {offsets = [0, 96], sizes = [64, 32], strides = [1, 1]} : vector<64x384xbf16> to vector<64x32xbf16>
    %71 = vector.extract_strided_slice %1 {offsets = [0, 224], sizes = [64, 32], strides = [1, 1]} : vector<64x384xbf16> to vector<64x32xbf16>
    %72 = vector.extract_strided_slice %1 {offsets = [0, 352], sizes = [64, 32], strides = [1, 1]} : vector<64x384xbf16> to vector<64x32xbf16>
    %cst_26 = arith.constant dense<0.000000e+00> : vector<64x64xf32>
    %73 = tpu.matmul %70, %71, %cst_26 {dimension_numbers = #tpu.dot_dimension_numbers<[1], [1], [0], [0], [0, 0, 1, 0], [], []>} : vector<64x32xbf16>, vector<64x32xbf16>, vector<64x64xf32> -> vector<64x64xf32>
    %74 = vector.broadcast %3 : vector<1x64xf32> to vector<64x64xf32>
    %75 = arith.addf %73, %74 : vector<64x64xf32>
    %cst_27 = arith.constant dense<0xFF800000> : vector<64xf32>
    %76 = vector.multi_reduction <maximumf>, %75, %cst_27 [1] : vector<64x64xf32> to vector<64xf32>
    %77 = vector.shape_cast %76 : vector<64xf32> to vector<64x1xf32>
    %78 = vector.broadcast %77 : vector<64x1xf32> to vector<64x64xf32>
    %79 = arith.subf %75, %78 : vector<64x64xf32>
    %80 = math.exp %79 : vector<64x64xf32>
    %cst_28 = arith.constant dense<0.000000e+00> : vector<64xf32>
    %81 = vector.multi_reduction <add>, %80, %cst_28 [1] : vector<64x64xf32> to vector<64xf32>
    %82 = vector.shape_cast %81 : vector<64xf32> to vector<64x1xf32>
    %83 = tpu.reciprocal %82 {approx = true} : vector<64x1xf32> -> vector<64x1xf32>
    %84 = vector.broadcast %83 : vector<64x1xf32> to vector<64x64xf32>
    %85 = arith.mulf %80, %84 : vector<64x64xf32>
    %86 = arith.truncf %85 : vector<64x64xf32> to vector<64x64xbf16>
    %cst_29 = arith.constant dense<0.000000e+00> : vector<64x32xf32>
    %87 = tpu.matmul %86, %72, %cst_29 {dimension_numbers = #tpu.dot_dimension_numbers<[1], [0], [0], [1], [0, 0, 1, 1], [], []>} : vector<64x64xbf16>, vector<64x32xbf16>, vector<64x32xf32> -> vector<64x32xf32>
    %88 = arith.truncf %87 : vector<64x32xf32> to vector<64x32xbf16>
    %c0_30 = arith.constant 0 : index
    %c3 = arith.constant 3 : index
    %c0_31 = arith.constant 0 : index
    %c0_32 = arith.constant 0 : index
    %89 = vector.load %arg3[%c0_30, %c3, %c0_31, %c0_32] : memref<1x4x64x32xbf16, #tpu.memory_space<vmem>>, vector<1x1x64x32xbf16>
    %90 = vector.shape_cast %89 : vector<1x1x64x32xbf16> to vector<64x32xbf16>
    %91 = vector.shape_cast %88 : vector<64x32xbf16> to vector<1x1x64x32xbf16>
    tpu.vector_store %arg3[%c0_30, %c3, %c0_31, %c0_32], %91 {strides = array<i32>} : memref<1x4x64x32xbf16, #tpu.memory_space<vmem>>, vector<1x1x64x32xbf16>,
    return
  }
  func.func @transform_0(%arg0: i32) -> (i32, i32, i32) {
    %c0_i32 = arith.constant 0 : i32
    %c0_i32_0 = arith.constant 0 : i32
    %c0_i32_1 = arith.constant 0 : i32
    return %arg0, %c0_i32, %c0_i32_0 : i32, i32, i32
  }
  func.func @transform_1(%arg0: i32) -> (i32, i32, i32) {
    %c0_i32 = arith.constant 0 : i32
    %c0_i32_0 = arith.constant 0 : i32
    %c0_i32_1 = arith.constant 0 : i32
    return %arg0, %c0_i32, %c0_i32_0 : i32, i32, i32
  }
  func.func @transform_2(%arg0: i32) -> (i32, i32, i32, i32) {
    %c0_i32 = arith.constant 0 : i32
    %c0_i32_0 = arith.constant 0 : i32
    %c0_i32_1 = arith.constant 0 : i32
    %c0_i32_2 = arith.constant 0 : i32
    return %arg0, %c0_i32, %c0_i32_0, %c0_i32_1 : i32, i32, i32, i32
  }
}

module attributes {stable_mosaic.version = 11 : i64} {
  func.func @_linear_res_ln_kernel(%arg0: i32, %arg1: memref<256x128xbf16, #tpu.memory_space<vmem>>, %arg2: memref<128x128xbf16, #tpu.memory_space<vmem>>, %arg3: memref<1x128xf32, #tpu.memory_space<vmem>>, %arg4: memref<256x128xbf16, #tpu.memory_space<vmem>>, %arg5: memref<1x128xf32, #tpu.memory_space<vmem>>, %arg6: memref<1x128xf32, #tpu.memory_space<vmem>>, %arg7: memref<256x128xbf16, #tpu.memory_space<vmem>>) attributes {dimension_semantics = [#tpu.dimension_semantics<parallel>], iteration_bounds = array<i64: 2>, scalar_prefetch = 0 : i64, scratch_operands = 0 : i64, tpu.core_type = #tpu.core_type<tc>, window_params = [{transform_indices = @transform_0, window_bounds = array<i64: 256, 128>}, {pipeline_mode = #tpu.pipeline_mode<synchronous>, transform_indices = @transform_1, window_bounds = array<i64: 128, 128>}, {pipeline_mode = #tpu.pipeline_mode<synchronous>, transform_indices = @transform_2, window_bounds = array<i64: 1, 128>}, {transform_indices = @transform_3, window_bounds = array<i64: 256, 128>}, {pipeline_mode = #tpu.pipeline_mode<synchronous>, transform_indices = @transform_4, window_bounds = array<i64: 1, 128>}, {pipeline_mode = #tpu.pipeline_mode<synchronous>, transform_indices = @transform_5, window_bounds = array<i64: 1, 128>}, {transform_indices = @transform_6, window_bounds = array<i64: 256, 128>}]} {
    %c0 = arith.constant 0 : index
    %c0_0 = arith.constant 0 : index
    %0 = vector.load %arg1[%c0, %c0_0] : memref<256x128xbf16, #tpu.memory_space<vmem>>, vector<256x128xbf16>
    %c0_1 = arith.constant 0 : index
    %c0_2 = arith.constant 0 : index
    %1 = vector.load %arg2[%c0_1, %c0_2] : memref<128x128xbf16, #tpu.memory_space<vmem>>, vector<128x128xbf16>
    %cst = arith.constant dense<0.000000e+00> : vector<256x128xf32>
    %2 = tpu.matmul %0, %1, %cst {dimension_numbers = #tpu.dot_dimension_numbers<[1], [0], [0], [1], [0, 0, 1, 1], [], []>} : vector<256x128xbf16>, vector<128x128xbf16>, vector<256x128xf32> -> vector<256x128xf32>
    %c0_3 = arith.constant 0 : index
    %c0_4 = arith.constant 0 : index
    %3 = vector.load %arg3[%c0_3, %c0_4] : memref<1x128xf32, #tpu.memory_space<vmem>>, vector<1x128xf32>
    %4 = vector.broadcast %3 : vector<1x128xf32> to vector<256x128xf32>
    %5 = arith.addf %2, %4 : vector<256x128xf32>
    %c0_5 = arith.constant 0 : index
    %c0_6 = arith.constant 0 : index
    %6 = vector.load %arg4[%c0_5, %c0_6] : memref<256x128xbf16, #tpu.memory_space<vmem>>, vector<256x128xbf16>
    %7 = arith.extf %6 : vector<256x128xbf16> to vector<256x128xf32>
    %8 = arith.addf %5, %7 : vector<256x128xf32>
    %cst_7 = arith.constant dense<0.000000e+00> : vector<256xf32>
    %9 = vector.multi_reduction <add>, %8, %cst_7 [1] : vector<256x128xf32> to vector<256xf32>
    %10 = vector.shape_cast %9 : vector<256xf32> to vector<256x1xf32>
    %cst_8 = arith.constant 1.280000e+02 : f32
    %11 = vector.broadcast %cst_8 : f32 to vector<256x1xf32>
    %12 = arith.divf %10, %11 : vector<256x1xf32>
    %13 = vector.broadcast %12 : vector<256x1xf32> to vector<256x128xf32>
    %14 = arith.subf %8, %13 : vector<256x128xf32>
    %15 = arith.mulf %14, %14 : vector<256x128xf32>
    %cst_9 = arith.constant dense<0.000000e+00> : vector<256xf32>
    %16 = vector.multi_reduction <add>, %15, %cst_9 [1] : vector<256x128xf32> to vector<256xf32>
    %17 = vector.shape_cast %16 : vector<256xf32> to vector<256x1xf32>
    %cst_10 = arith.constant 1.280000e+02 : f32
    %18 = vector.broadcast %cst_10 : f32 to vector<256x1xf32>
    %19 = arith.divf %17, %18 : vector<256x1xf32>
    %cst_11 = arith.constant 9.99999996E-13 : f32
    %20 = vector.broadcast %cst_11 : f32 to vector<256x1xf32>
    %21 = arith.addf %19, %20 : vector<256x1xf32>
    %22 = math.rsqrt %21 : vector<256x1xf32>
    %23 = vector.broadcast %12 : vector<256x1xf32> to vector<256x128xf32>
    %24 = arith.subf %8, %23 : vector<256x128xf32>
    %25 = vector.broadcast %22 : vector<256x1xf32> to vector<256x128xf32>
    %26 = arith.mulf %24, %25 : vector<256x128xf32>
    %c0_12 = arith.constant 0 : index
    %c0_13 = arith.constant 0 : index
    %27 = vector.load %arg5[%c0_12, %c0_13] : memref<1x128xf32, #tpu.memory_space<vmem>>, vector<1x128xf32>
    %28 = vector.broadcast %27 : vector<1x128xf32> to vector<256x128xf32>
    %29 = arith.mulf %26, %28 : vector<256x128xf32>
    %c0_14 = arith.constant 0 : index
    %c0_15 = arith.constant 0 : index
    %30 = vector.load %arg6[%c0_14, %c0_15] : memref<1x128xf32, #tpu.memory_space<vmem>>, vector<1x128xf32>
    %31 = vector.broadcast %30 : vector<1x128xf32> to vector<256x128xf32>
    %32 = arith.addf %29, %31 : vector<256x128xf32>
    %33 = arith.truncf %32 : vector<256x128xf32> to vector<256x128xbf16>
    %c0_16 = arith.constant 0 : index
    %c0_17 = arith.constant 0 : index
    %34 = vector.load %arg7[%c0_16, %c0_17] : memref<256x128xbf16, #tpu.memory_space<vmem>>, vector<256x128xbf16>
    tpu.vector_store %arg7[%c0_16, %c0_17], %33 {strides = array<i32>} : memref<256x128xbf16, #tpu.memory_space<vmem>>, vector<256x128xbf16>,
    return
  }
  func.func @transform_0(%arg0: i32) -> (i32, i32) {
    %c0_i32 = arith.constant 0 : i32
    %c0_i32_0 = arith.constant 0 : i32
    return %arg0, %c0_i32 : i32, i32
  }
  func.func @transform_1(%arg0: i32) -> (i32, i32) {
    %c0_i32 = arith.constant 0 : i32
    %c0_i32_0 = arith.constant 0 : i32
    %c0_i32_1 = arith.constant 0 : i32
    return %c0_i32, %c0_i32_0 : i32, i32
  }
  func.func @transform_2(%arg0: i32) -> (i32, i32) {
    %c0_i32 = arith.constant 0 : i32
    %c0_i32_0 = arith.constant 0 : i32
    %c0_i32_1 = arith.constant 0 : i32
    return %c0_i32, %c0_i32_0 : i32, i32
  }
  func.func @transform_3(%arg0: i32) -> (i32, i32) {
    %c0_i32 = arith.constant 0 : i32
    %c0_i32_0 = arith.constant 0 : i32
    return %arg0, %c0_i32 : i32, i32
  }
  func.func @transform_4(%arg0: i32) -> (i32, i32) {
    %c0_i32 = arith.constant 0 : i32
    %c0_i32_0 = arith.constant 0 : i32
    %c0_i32_1 = arith.constant 0 : i32
    return %c0_i32, %c0_i32_0 : i32, i32
  }
  func.func @transform_5(%arg0: i32) -> (i32, i32) {
    %c0_i32 = arith.constant 0 : i32
    %c0_i32_0 = arith.constant 0 : i32
    %c0_i32_1 = arith.constant 0 : i32
    return %c0_i32, %c0_i32_0 : i32, i32
  }
  func.func @transform_6(%arg0: i32) -> (i32, i32) {
    %c0_i32 = arith.constant 0 : i32
    %c0_i32_0 = arith.constant 0 : i32
    return %arg0, %c0_i32 : i32, i32
  }
}

module attributes {stable_mosaic.version = 11 : i64} {
  func.func @_linear_kernel(%arg0: i32, %arg1: memref<256x128xbf16, #tpu.memory_space<vmem>>, %arg2: memref<128x256xbf16, #tpu.memory_space<vmem>>, %arg3: memref<1x256xf32, #tpu.memory_space<vmem>>, %arg4: memref<256x256xbf16, #tpu.memory_space<vmem>>) attributes {dimension_semantics = [#tpu.dimension_semantics<parallel>], iteration_bounds = array<i64: 2>, scalar_prefetch = 0 : i64, scratch_operands = 0 : i64, tpu.core_type = #tpu.core_type<tc>, window_params = [{transform_indices = @transform_0, window_bounds = array<i64: 256, 128>}, {pipeline_mode = #tpu.pipeline_mode<synchronous>, transform_indices = @transform_1, window_bounds = array<i64: 128, 256>}, {pipeline_mode = #tpu.pipeline_mode<synchronous>, transform_indices = @transform_2, window_bounds = array<i64: 1, 256>}, {transform_indices = @transform_3, window_bounds = array<i64: 256, 256>}]} {
    %c0 = arith.constant 0 : index
    %c0_0 = arith.constant 0 : index
    %0 = vector.load %arg1[%c0, %c0_0] : memref<256x128xbf16, #tpu.memory_space<vmem>>, vector<256x128xbf16>
    %c0_1 = arith.constant 0 : index
    %c0_2 = arith.constant 0 : index
    %1 = vector.load %arg2[%c0_1, %c0_2] : memref<128x256xbf16, #tpu.memory_space<vmem>>, vector<128x256xbf16>
    %cst = arith.constant dense<0.000000e+00> : vector<256x256xf32>
    %2 = tpu.matmul %0, %1, %cst {dimension_numbers = #tpu.dot_dimension_numbers<[1], [0], [0], [1], [0, 0, 1, 1], [], []>} : vector<256x128xbf16>, vector<128x256xbf16>, vector<256x256xf32> -> vector<256x256xf32>
    %c0_3 = arith.constant 0 : index
    %c0_4 = arith.constant 0 : index
    %3 = vector.load %arg3[%c0_3, %c0_4] : memref<1x256xf32, #tpu.memory_space<vmem>>, vector<1x256xf32>
    %4 = vector.broadcast %3 : vector<1x256xf32> to vector<256x256xf32>
    %5 = arith.addf %2, %4 : vector<256x256xf32>
    %cst_5 = arith.constant 5.000000e-01 : f32
    %6 = vector.broadcast %cst_5 : f32 to vector<256x256xf32>
    %7 = arith.mulf %6, %5 : vector<256x256xf32>
    %cst_6 = arith.constant 0.707106769 : f32
    %8 = vector.broadcast %cst_6 : f32 to vector<256x256xf32>
    %9 = arith.mulf %5, %8 : vector<256x256xf32>
    %10 = math.absf %9 : vector<256x256xf32>
    %cst_7 = arith.constant 0.327591091 : f32
    %11 = vector.broadcast %cst_7 : f32 to vector<256x256xf32>
    %12 = arith.mulf %11, %10 : vector<256x256xf32>
    %cst_8 = arith.constant 1.000000e+00 : f32
    %13 = vector.broadcast %cst_8 : f32 to vector<256x256xf32>
    %14 = arith.addf %13, %12 : vector<256x256xf32>
    %cst_9 = arith.constant 1.000000e+00 : f32
    %15 = vector.broadcast %cst_9 : f32 to vector<256x256xf32>
    %16 = arith.divf %15, %14 : vector<256x256xf32>
    %cst_10 = arith.constant 1.06140542 : f32
    %17 = vector.broadcast %cst_10 : f32 to vector<256x256xf32>
    %18 = arith.mulf %17, %16 : vector<256x256xf32>
    %cst_11 = arith.constant -1.45315206 : f32
    %19 = vector.broadcast %cst_11 : f32 to vector<256x256xf32>
    %20 = arith.addf %18, %19 : vector<256x256xf32>
    %21 = arith.mulf %20, %16 : vector<256x256xf32>
    %cst_12 = arith.constant 1.42141378 : f32
    %22 = vector.broadcast %cst_12 : f32 to vector<256x256xf32>
    %23 = arith.addf %21, %22 : vector<256x256xf32>
    %24 = arith.mulf %23, %16 : vector<256x256xf32>
    %cst_13 = arith.constant -0.284496725 : f32
    %25 = vector.broadcast %cst_13 : f32 to vector<256x256xf32>
    %26 = arith.addf %24, %25 : vector<256x256xf32>
    %27 = arith.mulf %26, %16 : vector<256x256xf32>
    %cst_14 = arith.constant 0.254829586 : f32
    %28 = vector.broadcast %cst_14 : f32 to vector<256x256xf32>
    %29 = arith.addf %27, %28 : vector<256x256xf32>
    %30 = arith.mulf %29, %16 : vector<256x256xf32>
    %cst_15 = arith.constant 0.000000e+00 : f32
    %31 = vector.broadcast %cst_15 : f32 to vector<256x256xf32>
    %32 = arith.subf %31, %10 : vector<256x256xf32>
    %33 = arith.mulf %32, %10 : vector<256x256xf32>
    %34 = math.exp %33 : vector<256x256xf32>
    %35 = arith.mulf %30, %34 : vector<256x256xf32>
    %cst_16 = arith.constant 1.000000e+00 : f32
    %36 = vector.broadcast %cst_16 : f32 to vector<256x256xf32>
    %37 = arith.subf %36, %35 : vector<256x256xf32>
    %cst_17 = arith.constant 0.000000e+00 : f32
    %38 = vector.broadcast %cst_17 : f32 to vector<256x256xf32>
    %39 = arith.cmpf oge, %9, %38 : vector<256x256xf32>
    %cst_18 = arith.constant 0.000000e+00 : f32
    %40 = vector.broadcast %cst_18 : f32 to vector<256x256xf32>
    %41 = arith.subf %40, %37 : vector<256x256xf32>
    %42 = arith.select %39, %37, %41 : vector<256x256xi1>, vector<256x256xf32>
    %cst_19 = arith.constant 1.000000e+00 : f32
    %43 = vector.broadcast %cst_19 : f32 to vector<256x256xf32>
    %44 = arith.addf %43, %42 : vector<256x256xf32>
    %45 = arith.mulf %7, %44 : vector<256x256xf32>
    %46 = arith.truncf %45 : vector<256x256xf32> to vector<256x256xbf16>
    %c0_20 = arith.constant 0 : index
    %c0_21 = arith.constant 0 : index
    %47 = vector.load %arg4[%c0_20, %c0_21] : memref<256x256xbf16, #tpu.memory_space<vmem>>, vector<256x256xbf16>
    tpu.vector_store %arg4[%c0_20, %c0_21], %46 {strides = array<i32>} : memref<256x256xbf16, #tpu.memory_space<vmem>>, vector<256x256xbf16>,
    return
  }
  func.func @transform_0(%arg0: i32) -> (i32, i32) {
    %c0_i32 = arith.constant 0 : i32
    %c0_i32_0 = arith.constant 0 : i32
    return %arg0, %c0_i32 : i32, i32
  }
  func.func @transform_1(%arg0: i32) -> (i32, i32) {
    %c0_i32 = arith.constant 0 : i32
    %c0_i32_0 = arith.constant 0 : i32
    %c0_i32_1 = arith.constant 0 : i32
    return %c0_i32, %c0_i32_0 : i32, i32
  }
  func.func @transform_2(%arg0: i32) -> (i32, i32) {
    %c0_i32 = arith.constant 0 : i32
    %c0_i32_0 = arith.constant 0 : i32
    %c0_i32_1 = arith.constant 0 : i32
    return %c0_i32, %c0_i32_0 : i32, i32
  }
  func.func @transform_3(%arg0: i32) -> (i32, i32) {
    %c0_i32 = arith.constant 0 : i32
    %c0_i32_0 = arith.constant 0 : i32
    return %arg0, %c0_i32 : i32, i32
  }
}

module attributes {stable_mosaic.version = 11 : i64} {
  func.func @_linear_res_ln_kernel(%arg0: i32, %arg1: memref<256x256xbf16, #tpu.memory_space<vmem>>, %arg2: memref<256x128xbf16, #tpu.memory_space<vmem>>, %arg3: memref<1x128xf32, #tpu.memory_space<vmem>>, %arg4: memref<256x128xbf16, #tpu.memory_space<vmem>>, %arg5: memref<1x128xf32, #tpu.memory_space<vmem>>, %arg6: memref<1x128xf32, #tpu.memory_space<vmem>>, %arg7: memref<256x128xbf16, #tpu.memory_space<vmem>>) attributes {dimension_semantics = [#tpu.dimension_semantics<parallel>], iteration_bounds = array<i64: 2>, scalar_prefetch = 0 : i64, scratch_operands = 0 : i64, tpu.core_type = #tpu.core_type<tc>, window_params = [{transform_indices = @transform_0, window_bounds = array<i64: 256, 256>}, {pipeline_mode = #tpu.pipeline_mode<synchronous>, transform_indices = @transform_1, window_bounds = array<i64: 256, 128>}, {pipeline_mode = #tpu.pipeline_mode<synchronous>, transform_indices = @transform_2, window_bounds = array<i64: 1, 128>}, {transform_indices = @transform_3, window_bounds = array<i64: 256, 128>}, {pipeline_mode = #tpu.pipeline_mode<synchronous>, transform_indices = @transform_4, window_bounds = array<i64: 1, 128>}, {pipeline_mode = #tpu.pipeline_mode<synchronous>, transform_indices = @transform_5, window_bounds = array<i64: 1, 128>}, {transform_indices = @transform_6, window_bounds = array<i64: 256, 128>}]} {
    %c0 = arith.constant 0 : index
    %c0_0 = arith.constant 0 : index
    %0 = vector.load %arg1[%c0, %c0_0] : memref<256x256xbf16, #tpu.memory_space<vmem>>, vector<256x256xbf16>
    %c0_1 = arith.constant 0 : index
    %c0_2 = arith.constant 0 : index
    %1 = vector.load %arg2[%c0_1, %c0_2] : memref<256x128xbf16, #tpu.memory_space<vmem>>, vector<256x128xbf16>
    %cst = arith.constant dense<0.000000e+00> : vector<256x128xf32>
    %2 = tpu.matmul %0, %1, %cst {dimension_numbers = #tpu.dot_dimension_numbers<[1], [0], [0], [1], [0, 0, 1, 1], [], []>} : vector<256x256xbf16>, vector<256x128xbf16>, vector<256x128xf32> -> vector<256x128xf32>
    %c0_3 = arith.constant 0 : index
    %c0_4 = arith.constant 0 : index
    %3 = vector.load %arg3[%c0_3, %c0_4] : memref<1x128xf32, #tpu.memory_space<vmem>>, vector<1x128xf32>
    %4 = vector.broadcast %3 : vector<1x128xf32> to vector<256x128xf32>
    %5 = arith.addf %2, %4 : vector<256x128xf32>
    %c0_5 = arith.constant 0 : index
    %c0_6 = arith.constant 0 : index
    %6 = vector.load %arg4[%c0_5, %c0_6] : memref<256x128xbf16, #tpu.memory_space<vmem>>, vector<256x128xbf16>
    %7 = arith.extf %6 : vector<256x128xbf16> to vector<256x128xf32>
    %8 = arith.addf %5, %7 : vector<256x128xf32>
    %cst_7 = arith.constant dense<0.000000e+00> : vector<256xf32>
    %9 = vector.multi_reduction <add>, %8, %cst_7 [1] : vector<256x128xf32> to vector<256xf32>
    %10 = vector.shape_cast %9 : vector<256xf32> to vector<256x1xf32>
    %cst_8 = arith.constant 1.280000e+02 : f32
    %11 = vector.broadcast %cst_8 : f32 to vector<256x1xf32>
    %12 = arith.divf %10, %11 : vector<256x1xf32>
    %13 = vector.broadcast %12 : vector<256x1xf32> to vector<256x128xf32>
    %14 = arith.subf %8, %13 : vector<256x128xf32>
    %15 = arith.mulf %14, %14 : vector<256x128xf32>
    %cst_9 = arith.constant dense<0.000000e+00> : vector<256xf32>
    %16 = vector.multi_reduction <add>, %15, %cst_9 [1] : vector<256x128xf32> to vector<256xf32>
    %17 = vector.shape_cast %16 : vector<256xf32> to vector<256x1xf32>
    %cst_10 = arith.constant 1.280000e+02 : f32
    %18 = vector.broadcast %cst_10 : f32 to vector<256x1xf32>
    %19 = arith.divf %17, %18 : vector<256x1xf32>
    %cst_11 = arith.constant 9.99999996E-13 : f32
    %20 = vector.broadcast %cst_11 : f32 to vector<256x1xf32>
    %21 = arith.addf %19, %20 : vector<256x1xf32>
    %22 = math.rsqrt %21 : vector<256x1xf32>
    %23 = vector.broadcast %12 : vector<256x1xf32> to vector<256x128xf32>
    %24 = arith.subf %8, %23 : vector<256x128xf32>
    %25 = vector.broadcast %22 : vector<256x1xf32> to vector<256x128xf32>
    %26 = arith.mulf %24, %25 : vector<256x128xf32>
    %c0_12 = arith.constant 0 : index
    %c0_13 = arith.constant 0 : index
    %27 = vector.load %arg5[%c0_12, %c0_13] : memref<1x128xf32, #tpu.memory_space<vmem>>, vector<1x128xf32>
    %28 = vector.broadcast %27 : vector<1x128xf32> to vector<256x128xf32>
    %29 = arith.mulf %26, %28 : vector<256x128xf32>
    %c0_14 = arith.constant 0 : index
    %c0_15 = arith.constant 0 : index
    %30 = vector.load %arg6[%c0_14, %c0_15] : memref<1x128xf32, #tpu.memory_space<vmem>>, vector<1x128xf32>
    %31 = vector.broadcast %30 : vector<1x128xf32> to vector<256x128xf32>
    %32 = arith.addf %29, %31 : vector<256x128xf32>
    %33 = arith.truncf %32 : vector<256x128xf32> to vector<256x128xbf16>
    %c0_16 = arith.constant 0 : index
    %c0_17 = arith.constant 0 : index
    %34 = vector.load %arg7[%c0_16, %c0_17] : memref<256x128xbf16, #tpu.memory_space<vmem>>, vector<256x128xbf16>
    tpu.vector_store %arg7[%c0_16, %c0_17], %33 {strides = array<i32>} : memref<256x128xbf16, #tpu.memory_space<vmem>>, vector<256x128xbf16>,
    return
  }
  func.func @transform_0(%arg0: i32) -> (i32, i32) {
    %c0_i32 = arith.constant 0 : i32
    %c0_i32_0 = arith.constant 0 : i32
    return %arg0, %c0_i32 : i32, i32
  }
  func.func @transform_1(%arg0: i32) -> (i32, i32) {
    %c0_i32 = arith.constant 0 : i32
    %c0_i32_0 = arith.constant 0 : i32
    %c0_i32_1 = arith.constant 0 : i32
    return %c0_i32, %c0_i32_0 : i32, i32
  }
  func.func @transform_2(%arg0: i32) -> (i32, i32) {
    %c0_i32 = arith.constant 0 : i32
    %c0_i32_0 = arith.constant 0 : i32
    %c0_i32_1 = arith.constant 0 : i32
    return %c0_i32, %c0_i32_0 : i32, i32
  }
  func.func @transform_3(%arg0: i32) -> (i32, i32) {
    %c0_i32 = arith.constant 0 : i32
    %c0_i32_0 = arith.constant 0 : i32
    return %arg0, %c0_i32 : i32, i32
  }
  func.func @transform_4(%arg0: i32) -> (i32, i32) {
    %c0_i32 = arith.constant 0 : i32
    %c0_i32_0 = arith.constant 0 : i32
    %c0_i32_1 = arith.constant 0 : i32
    return %c0_i32, %c0_i32_0 : i32, i32
  }
  func.func @transform_5(%arg0: i32) -> (i32, i32) {
    %c0_i32 = arith.constant 0 : i32
    %c0_i32_0 = arith.constant 0 : i32
    %c0_i32_1 = arith.constant 0 : i32
    return %c0_i32, %c0_i32_0 : i32, i32
  }
  func.func @transform_6(%arg0: i32) -> (i32, i32) {
    %c0_i32 = arith.constant 0 : i32
    %c0_i32_0 = arith.constant 0 : i32
    return %arg0, %c0_i32 : i32, i32
  }
}

module attributes {stable_mosaic.version = 11 : i64} {
  func.func @_linear_kernel(%arg0: i32, %arg1: memref<8x128xbf16, #tpu.memory_space<vmem>>, %arg2: memref<128x128xbf16, #tpu.memory_space<vmem>>, %arg3: memref<1x128xf32, #tpu.memory_space<vmem>>, %arg4: memref<8x128xf32, #tpu.memory_space<vmem>>) attributes {dimension_semantics = [#tpu.dimension_semantics<parallel>], iteration_bounds = array<i64: 1>, scalar_prefetch = 0 : i64, scratch_operands = 0 : i64, tpu.core_type = #tpu.core_type<tc>, window_params = [{transform_indices = @transform_0, window_bounds = array<i64: 8, 128>}, {pipeline_mode = #tpu.pipeline_mode<synchronous>, transform_indices = @transform_1, window_bounds = array<i64: 128, 128>}, {pipeline_mode = #tpu.pipeline_mode<synchronous>, transform_indices = @transform_2, window_bounds = array<i64: 1, 128>}, {transform_indices = @transform_3, window_bounds = array<i64: 8, 128>}]} {
    %c0 = arith.constant 0 : index
    %c0_0 = arith.constant 0 : index
    %0 = vector.load %arg1[%c0, %c0_0] : memref<8x128xbf16, #tpu.memory_space<vmem>>, vector<8x128xbf16>
    %c0_1 = arith.constant 0 : index
    %c0_2 = arith.constant 0 : index
    %1 = vector.load %arg2[%c0_1, %c0_2] : memref<128x128xbf16, #tpu.memory_space<vmem>>, vector<128x128xbf16>
    %cst = arith.constant dense<0.000000e+00> : vector<8x128xf32>
    %2 = tpu.matmul %0, %1, %cst {dimension_numbers = #tpu.dot_dimension_numbers<[1], [0], [0], [1], [0, 0, 1, 1], [], []>} : vector<8x128xbf16>, vector<128x128xbf16>, vector<8x128xf32> -> vector<8x128xf32>
    %c0_3 = arith.constant 0 : index
    %c0_4 = arith.constant 0 : index
    %3 = vector.load %arg3[%c0_3, %c0_4] : memref<1x128xf32, #tpu.memory_space<vmem>>, vector<1x128xf32>
    %4 = vector.broadcast %3 : vector<1x128xf32> to vector<8x128xf32>
    %5 = arith.addf %2, %4 : vector<8x128xf32>
    %6 = math.tanh %5 : vector<8x128xf32>
    %c0_5 = arith.constant 0 : index
    %c0_6 = arith.constant 0 : index
    %7 = vector.load %arg4[%c0_5, %c0_6] : memref<8x128xf32, #tpu.memory_space<vmem>>, vector<8x128xf32>
    tpu.vector_store %arg4[%c0_5, %c0_6], %6 {strides = array<i32>} : memref<8x128xf32, #tpu.memory_space<vmem>>, vector<8x128xf32>,
    return
  }
  func.func @transform_0(%arg0: i32) -> (i32, i32) {
    %c0_i32 = arith.constant 0 : i32
    %c0_i32_0 = arith.constant 0 : i32
    return %arg0, %c0_i32 : i32, i32
  }
  func.func @transform_1(%arg0: i32) -> (i32, i32) {
    %c0_i32 = arith.constant 0 : i32
    %c0_i32_0 = arith.constant 0 : i32
    %c0_i32_1 = arith.constant 0 : i32
    return %c0_i32, %c0_i32_0 : i32, i32
  }
  func.func @transform_2(%arg0: i32) -> (i32, i32) {
    %c0_i32 = arith.constant 0 : i32
    %c0_i32_0 = arith.constant 0 : i32
    %c0_i32_1 = arith.constant 0 : i32
    return %c0_i32, %c0_i32_0 : i32, i32
  }
  func.func @transform_3(%arg0: i32) -> (i32, i32) {
    %c0_i32 = arith.constant 0 : i32
    %c0_i32_0 = arith.constant 0 : i32
    return %arg0, %c0_i32 : i32, i32
  }
}

module attributes {stable_mosaic.version = 11 : i64} {
  func.func @_cls_ce_kernel(%arg0: i32, %arg1: memref<8x128xf32, #tpu.memory_space<vmem>>, %arg2: memref<128x2xf32, #tpu.memory_space<vmem>>, %arg3: memref<1x2xf32, #tpu.memory_space<vmem>>, %arg4: memref<8x1xi32, #tpu.memory_space<vmem>>, %arg5: memref<8x2xf32, #tpu.memory_space<vmem>>, %arg6: memref<1x1xf32, #tpu.memory_space<vmem>>) attributes {dimension_semantics = [#tpu.dimension_semantics<arbitrary>], iteration_bounds = array<i64: 1>, scalar_prefetch = 0 : i64, scratch_operands = 0 : i64, tpu.core_type = #tpu.core_type<tc>, window_params = [{pipeline_mode = #tpu.pipeline_mode<synchronous>, transform_indices = @transform_0, window_bounds = array<i64: 8, 128>}, {pipeline_mode = #tpu.pipeline_mode<synchronous>, transform_indices = @transform_1, window_bounds = array<i64: 128, 2>}, {pipeline_mode = #tpu.pipeline_mode<synchronous>, transform_indices = @transform_2, window_bounds = array<i64: 1, 2>}, {pipeline_mode = #tpu.pipeline_mode<synchronous>, transform_indices = @transform_3, window_bounds = array<i64: 8, 1>}, {pipeline_mode = #tpu.pipeline_mode<synchronous>, transform_indices = @transform_4, window_bounds = array<i64: 8, 2>}, {pipeline_mode = #tpu.pipeline_mode<synchronous>, transform_indices = @transform_5, window_bounds = array<i64: 1, 1>}]} {
    %c0 = arith.constant 0 : index
    %c0_0 = arith.constant 0 : index
    %0 = vector.load %arg1[%c0, %c0_0] : memref<8x128xf32, #tpu.memory_space<vmem>>, vector<8x128xf32>
    %c0_1 = arith.constant 0 : index
    %c0_2 = arith.constant 0 : index
    %1 = vector.load %arg2[%c0_1, %c0_2] : memref<128x2xf32, #tpu.memory_space<vmem>>, vector<128x2xf32>
    %cst = arith.constant dense<0.000000e+00> : vector<8x2xf32>
    %2 = tpu.matmul %0, %1, %cst {dimension_numbers = #tpu.dot_dimension_numbers<[1], [0], [0], [1], [0, 0, 1, 1], [], []>} : vector<8x128xf32>, vector<128x2xf32>, vector<8x2xf32> -> vector<8x2xf32>
    %c0_3 = arith.constant 0 : index
    %c0_4 = arith.constant 0 : index
    %3 = vector.load %arg3[%c0_3, %c0_4] : memref<1x2xf32, #tpu.memory_space<vmem>>, vector<1x2xf32>
    %4 = vector.broadcast %3 : vector<1x2xf32> to vector<8x2xf32>
    %5 = arith.addf %2, %4 : vector<8x2xf32>
    %c0_5 = arith.constant 0 : index
    %c0_6 = arith.constant 0 : index
    %6 = vector.load %arg5[%c0_5, %c0_6] : memref<8x2xf32, #tpu.memory_space<vmem>>, vector<8x2xf32>
    tpu.vector_store %arg5[%c0_5, %c0_6], %5 {strides = array<i32>} : memref<8x2xf32, #tpu.memory_space<vmem>>, vector<8x2xf32>,
    %cst_7 = arith.constant dense<0xFF800000> : vector<8xf32>
    %7 = vector.multi_reduction <maximumf>, %5, %cst_7 [1] : vector<8x2xf32> to vector<8xf32>
    %8 = vector.shape_cast %7 : vector<8xf32> to vector<8x1xf32>
    %9 = vector.broadcast %8 : vector<8x1xf32> to vector<8x2xf32>
    %10 = arith.subf %5, %9 : vector<8x2xf32>
    %11 = math.exp %10 : vector<8x2xf32>
    %cst_8 = arith.constant dense<0.000000e+00> : vector<8xf32>
    %12 = vector.multi_reduction <add>, %11, %cst_8 [1] : vector<8x2xf32> to vector<8xf32>
    %13 = vector.shape_cast %12 : vector<8xf32> to vector<8x1xf32>
    %14 = math.log %13 : vector<8x1xf32>
    %15 = arith.addf %8, %14 : vector<8x1xf32>
    %16 = tpu.iota {dimensions = array<i32: 1>} : vector<8x2xi32>
    %c0_9 = arith.constant 0 : index
    %c0_10 = arith.constant 0 : index
    %17 = vector.load %arg4[%c0_9, %c0_10] : memref<8x1xi32, #tpu.memory_space<vmem>>, vector<8x1xi32>
    %18 = vector.broadcast %17 : vector<8x1xi32> to vector<8x2xi32>
    %19 = arith.cmpi eq, %16, %18 : vector<8x2xi32>
    %20 = arith.extui %19 : vector<8x2xi1> to vector<8x2xi32>
    %21 = arith.sitofp %20 : vector<8x2xi32> to vector<8x2xf32>
    %22 = arith.mulf %5, %21 : vector<8x2xf32>
    %cst_11 = arith.constant dense<0.000000e+00> : vector<8xf32>
    %23 = vector.multi_reduction <add>, %22, %cst_11 [1] : vector<8x2xf32> to vector<8xf32>
    %24 = vector.shape_cast %23 : vector<8xf32> to vector<8x1xf32>
    %25 = arith.subf %15, %24 : vector<8x1xf32>
    %cst_12 = arith.constant dense<0.000000e+00> : vector<1xf32>
    %26 = vector.multi_reduction <add>, %25, %cst_12 [0] : vector<8x1xf32> to vector<1xf32>
    %27 = vector.shape_cast %26 : vector<1xf32> to vector<1x1xf32>
    %cst_13 = arith.constant 8.000000e+00 : f32
    %28 = vector.broadcast %cst_13 : f32 to vector<1x1xf32>
    %29 = arith.divf %27, %28 : vector<1x1xf32>
    %c0_14 = arith.constant 0 : index
    %c0_15 = arith.constant 0 : index
    %30 = vector.load %arg6[%c0_14, %c0_15] : memref<1x1xf32, #tpu.memory_space<vmem>>, vector<1x1xf32>
    tpu.vector_store %arg6[%c0_14, %c0_15], %29 {strides = array<i32>} : memref<1x1xf32, #tpu.memory_space<vmem>>, vector<1x1xf32>,
    return
  }
  func.func @transform_0(%arg0: i32) -> (i32, i32) {
    %c0_i32 = arith.constant 0 : i32
    %c0_i32_0 = arith.constant 0 : i32
    %c0_i32_1 = arith.constant 0 : i32
    return %c0_i32, %c0_i32_0 : i32, i32
  }
  func.func @transform_1(%arg0: i32) -> (i32, i32) {
    %c0_i32 = arith.constant 0 : i32
    %c0_i32_0 = arith.constant 0 : i32
    %c0_i32_1 = arith.constant 0 : i32
    return %c0_i32, %c0_i32_0 : i32, i32
  }
  func.func @transform_2(%arg0: i32) -> (i32, i32) {
    %c0_i32 = arith.constant 0 : i32
    %c0_i32_0 = arith.constant 0 : i32
    %c0_i32_1 = arith.constant 0 : i32
    return %c0_i32, %c0_i32_0 : i32, i32
  }
  func.func @transform_3(%arg0: i32) -> (i32, i32) {
    %c0_i32 = arith.constant 0 : i32
    %c0_i32_0 = arith.constant 0 : i32
    %c0_i32_1 = arith.constant 0 : i32
    return %c0_i32, %c0_i32_0 : i32, i32
  }
  func.func @transform_4(%arg0: i32) -> (i32, i32) {
    %c0_i32 = arith.constant 0 : i32
    %c0_i32_0 = arith.constant 0 : i32
    %c0_i32_1 = arith.constant 0 : i32
    return %c0_i32, %c0_i32_0 : i32, i32
  }
  func.func @transform_5(%arg0: i32) -> (i32, i32) {
    %c0_i32 = arith.constant 0 : i32
    %c0_i32_0 = arith.constant 0 : i32
    %c0_i32_1 = arith.constant 0 : i32
    return %c0_i32, %c0_i32_0 : i32, i32
  }
}

</mosaic_0001>

<bundles_post_ra>
// kernel: forward.13
= control target key start
LH: loop header
LB: loop body
LE: loop exit
PB: predicated region body
PF: predicated region fallthrough
CT: control target
= control target key end

     0   :  { %s1257_s12 = smov 0   ;;  %s2188_s0 = inlined_call_operand.vmem [shape: f32[512,128], index: 0, kind: input, shape index: {}]   ;;  %s2189_s1 = inlined_call_operand.vmem [shape: f32[1,128], index: 1, kind: input, shape index: {}]   ;;  %s2190_s2 = inlined_call_operand.vmem [shape: f32[1,128], index: 2, kind: input, shape index: {}]   ;;  %s2191_s3 = inlined_call_operand.vmem [shape: bf16[512,128], index: 3, kind: output, shape index: {}]  }
   0x1 LB: > { %s1045_s13 = sadd.s32 4294967295, %s1234_s12   ;;  %p1049_p0 = scmp.ge.s32.totalorder %s1234_s12, 1  ;;  %s1234_s12 = sphi %s1257_s12, %s13_s12  }
   0x2   : > { %p138_p1 = scmp.lt.s32.totalorder %s1234_s12, 3 }
   0x4   : > { %p139_p2 = pnand %p1049_p0, %p138_p1 }
   0x5   : > { %s1050_s14 = sshll.u32 (!%p139_p2), %s1045_s13, 5 }
   0x6   : > { %142 = sbr.rel (%p139_p2) target bundleno = 390 (0x186), region = 32  ;;  %p163_p3 = scmp.lt.s32.totalorder (!%p139_p2), %s1050_s14, 63 }
   0xb   : > { %s2221_s14 = smov (!%p163_p3, %s1050_s14), 63  ;;  %v1236_v32 = vmov 128.0  }
   0xc   : > { %s1051_s15 = sshll.u32 %s2221_s14, 3  ;;  %1162 = vrcp.f32 %v1236_v32  ;;  %s1053_s23 = sshll.u32 %s2221_s14, 2 }
   0xd   : > { %s1271_s18 = scalar_lea.vmem %s2188_s0, %s1051_s15  ;;  %s1719_s26 = scalar_lea.vmem %s2191_s3, %s1053_s23 }
   0xe   : > { %v1274_v0 = vld [vmem:[%s1271_s18 + $0x20] sm:$0xff]  ;;  %v1277_v1 = vld [vmem:[%s1271_s18 + $0x10] sm:$0xff]  ;;  %v1286_v3 = vld [vmem:[%s1271_s18 + $0x28] sm:$0xff] }
   0xf   : > { %v1280_v2 = vld [vmem:[%s1271_s18] sm:$0xff]  ;;  %214 = vadd.xlane.f32.xlu2 %v1274_v0  ;;  %210 = vadd.xlane.f32.xlu1 %v1277_v1  ;;  %v1289_v4 = vld [vmem:[%s1271_s18 + $0x18] sm:$0xff]  ;;  %v1292_v5 = vld [vmem:[%s1271_s18 + $0x8] sm:$0xff] }
  0x10   : > { %206 = vadd.xlane.f32.xlu0 %v1280_v2  ;;  %v1298_v6 = vld [vmem:[%s1271_s18 + $0x40] sm:$0xff]  ;;  %v1301_v7 = vld [vmem:[%s1271_s18 + $0x38] sm:$0xff]  ;;  %v1304_v8 = vld [vmem:[%s1271_s18 + $0x30] sm:$0xff] }
  0x11   : > { %v1310_v9 = vld [vmem:[%s1271_s18 + $0x58] sm:$0xff]  ;;  %v1313_v10 = vld [vmem:[%s1271_s18 + $0x50] sm:$0xff]  ;;  %v1316_v11 = vld [vmem:[%s1271_s18 + $0x48] sm:$0xff] }
  0x12   : > { %v1322_v12 = vld [vmem:[%s1271_s18 + $0x70] sm:$0xff]  ;;  %v1325_v13 = vld [vmem:[%s1271_s18 + $0x68] sm:$0xff]  ;;  %v1328_v14 = vld [vmem:[%s1271_s18 + $0x60] sm:$0xff]  ;;  %v1163_v33 = vpop.eup %1162 }
  0x13   : > { %v1334_v15 = vld [vmem:[%s1271_s18 + $0x88] sm:$0xff]  ;;  %v1337_v16 = vld [vmem:[%s1271_s18 + $0x80] sm:$0xff]  ;;  %v1340_v17 = vld [vmem:[%s1271_s18 + $0x78] sm:$0xff]  ;;  %v271_v34 = vmul.f32 128.0, %v1163_v33  ;;  %vm275_vm0 = vweird.f32 %v1163_v33 }
  0x14   : > { %v1346_v18 = vld [vmem:[%s1271_s18 + $0xa0] sm:$0xff]  ;;  %v1349_v19 = vld [vmem:[%s1271_s18 + $0x98] sm:$0xff]  ;;  %v1352_v20 = vld [vmem:[%s1271_s18 + $0x90] sm:$0xff] }
  0x15   : > { %v1358_v21 = vld [vmem:[%s1271_s18 + $0xb8] sm:$0xff]  ;;  %v1361_v22 = vld [vmem:[%s1271_s18 + $0xb0] sm:$0xff]  ;;  %v1364_v23 = vld [vmem:[%s1271_s18 + $0xa8] sm:$0xff]  ;;  %v272_v35 = vsub.f32 1.0, %v271_v34 }
  0x16   : > { %v1370_v24 = vld [vmem:[%s1271_s18 + $0xd0] sm:$0xff]  ;;  %v1373_v25 = vld [vmem:[%s1271_s18 + $0xc8] sm:$0xff]  ;;  %v1376_v26 = vld [vmem:[%s1271_s18 + $0xc0] sm:$0xff] }
  0x17   : > { %216 = vadd.xlane.f32.xlu2 %v1286_v3  ;;  %212 = vadd.xlane.f32.xlu1 %v1289_v4  ;;  %v1382_v27 = vld [vmem:[%s1271_s18 + $0xe8] sm:$0xff]  ;;  %v1385_v28 = vld [vmem:[%s1271_s18 + $0xe0] sm:$0xff]  ;;  %v1388_v29 = vld [vmem:[%s1271_s18 + $0xd8] sm:$0xff]  ;;  %v273_v36 = vmul.f32 %v1163_v33, %v272_v35 }
  0x18   : > { %208 = vadd.xlane.f32.xlu0 %v1292_v5  ;;  %v1394_v30 = vld [vmem:[%s1271_s18 + $0xf8] sm:$0xff]  ;;  %v1397_v31 = vld [vmem:[%s1271_s18 + $0xf0] sm:$0xff] }
  0x19   : > { %v274_v37 = vadd.f32 %v1163_v33, %v273_v36 }
  0x1b   : > { %v1401_v38 = vsel %vm275_vm0, %v1163_v33, %v274_v37 }
  0x1f   : > { %222 = vadd.xlane.f32.xlu2 %v1298_v6  ;;  %220 = vadd.xlane.f32.xlu1 %v1301_v7 }
  0x20   : > { %218 = vadd.xlane.f32.xlu0 %v1304_v8 }
  0x27   : > { %228 = vadd.xlane.f32.xlu2 %v1310_v9  ;;  %226 = vadd.xlane.f32.xlu1 %v1313_v10 }
  0x28   : > { %224 = vadd.xlane.f32.xlu0 %v1316_v11 }
  0x2f   : > { %234 = vadd.xlane.f32.xlu2 %v1322_v12  ;;  %232 = vadd.xlane.f32.xlu1 %v1325_v13 }
  0x30   : > { %230 = vadd.xlane.f32.xlu0 %v1328_v14 }
  0x37   : > { %240 = vadd.xlane.f32.xlu2 %v1334_v15  ;;  %238 = vadd.xlane.f32.xlu1 %v1337_v16 }
  0x38   : > { %236 = vadd.xlane.f32.xlu0 %v1340_v17 }
  0x3f   : > { %246 = vadd.xlane.f32.xlu2 %v1346_v18  ;;  %244 = vadd.xlane.f32.xlu1 %v1349_v19 }
  0x40   : > { %242 = vadd.xlane.f32.xlu0 %v1352_v20 }
  0x47   : > { %252 = vadd.xlane.f32.xlu2 %v1358_v21  ;;  %250 = vadd.xlane.f32.xlu1 %v1361_v22 }
  0x48   : > { %248 = vadd.xlane.f32.xlu0 %v1364_v23 }
  0x4f   : > { %258 = vadd.xlane.f32.xlu2 %v1370_v24  ;;  %256 = vadd.xlane.f32.xlu1 %v1373_v25 }
  0x50   : > { %254 = vadd.xlane.f32.xlu0 %v1376_v26 }
  0x57   : > { %264 = vadd.xlane.f32.xlu2 %v1382_v27  ;;  %262 = vadd.xlane.f32.xlu1 %v1385_v28 }
  0x58   : > { %260 = vadd.xlane.f32.xlu0 %v1388_v29 }
  0x5f   : > { %268 = vadd.xlane.f32.xlu1 %v1394_v30 }
  0x60   : > { %266 = vadd.xlane.f32.xlu0 %v1397_v31 }
  0x82   : > { %v215_v39 = vpop.xlane.xlu2 %214  ;;  %v211_v40 = vpop.xlane.xlu1 %210 }
  0x83   : > { %v279_v41 = vmul.f32 %v1401_v38, %v211_v40  ;;  %v207_v42 = vpop.xlane.xlu0 %206  ;;  %v281_v56 = vmul.f32 %v1401_v38, %v215_v39 }
  0x84   : > { %v277_v43 = vmul.f32 %v1401_v38, %v207_v42 }
  0x85   : > { %v1406_v44 = vsub.f32 %v1277_v1, %v279_v41  ;;  %v1435_v61 = vsub.f32 %v1274_v0, %v281_v56 }
  0x86   : > { %v1409_v45 = vsub.f32 %v1280_v2, %v277_v43 }
  0x87   : > { %v343_v46 = vmul.f32 %v1406_v44, %v1406_v44  ;;  %v345_v32 = vmul.f32 %v1435_v61, %v1435_v61 }
  0x88   : > { %v341_v47 = vmul.f32 %v1409_v45, %v1409_v45 }
  0x89   : > { %377 = vadd.xlane.f32.xlu1 %v343_v46 }
  0x8a   : > { %373 = vadd.xlane.f32.xlu2 %v341_v47  ;;  %v217_v48 = vpop.xlane.xlu2 %216  ;;  %v213_v49 = vpop.xlane.xlu1 %212 }
  0x8b   : > { %v282_v50 = vmul.f32 %v1401_v38, %v217_v48  ;;  %v280_v51 = vmul.f32 %v1401_v38, %v213_v49  ;;  %v209_v52 = vpop.xlane.xlu0 %208 }
  0x8c   : > { %v278_v53 = vmul.f32 %v1401_v38, %v209_v52 }
  0x8d   : > { %v1419_v54 = vsub.f32 %v1286_v3, %v282_v50  ;;  %v1422_v55 = vsub.f32 %v1289_v4, %v280_v51 }
  0x8e   : > { %v1426_v57 = vsub.f32 %v1292_v5, %v278_v53 }
  0x8f   : > { %v346_v58 = vmul.f32 %v1419_v54, %v1419_v54  ;;  %v344_v59 = vmul.f32 %v1422_v55, %v1422_v55 }
  0x90   : > { %v342_v60 = vmul.f32 %v1426_v57, %v1426_v57 }
  0x91   : > { %383 = vadd.xlane.f32.xlu1 %v346_v58 }
  0x92   : > { %379 = vadd.xlane.f32.xlu2 %v344_v59  ;;  %375 = vadd.xlane.f32.xlu0 %v342_v60  ;;  %v223_v62 = vpop.xlane.xlu2 %222  ;;  %v221_v63 = vpop.xlane.xlu1 %220 }
  0x93   : > { %v285_v1 = vmul.f32 %v1401_v38, %v223_v62  ;;  %v219_v2 = vpop.xlane.xlu0 %218  ;;  %v284_v0 = vmul.f32 %v1401_v38, %v221_v63 }
  0x94   : > { %v283_v3 = vmul.f32 %v1401_v38, %v219_v2 }
  0x95   : > { %v1440_v4 = vsub.f32 %v1298_v6, %v285_v1  ;;  %v1453_v6 = vsub.f32 %v1301_v7, %v284_v0 }
  0x96   : > { %v1443_v5 = vsub.f32 %v1304_v8, %v283_v3 }
  0x97   : > { %v349_v33 = vmul.f32 %v1440_v4, %v1440_v4  ;;  %v348_v42 = vmul.f32 %v1453_v6, %v1453_v6 }
  0x98   : > { %v347_v34 = vmul.f32 %v1443_v5, %v1443_v5 }
  0x99   : > { %389 = vadd.xlane.f32.xlu1 %v349_v33 }
  0x9a   : > { %381 = vadd.xlane.f32.xlu0 %v345_v32  ;;  %385 = vadd.xlane.f32.xlu2 %v347_v34  ;;  %v229_v35 = vpop.xlane.xlu2 %228  ;;  %v227_v8 = vpop.xlane.xlu1 %226 }
  0x9b   : > { %v288_v36 = vmul.f32 %v1401_v38, %v229_v35  ;;  %v225_v37 = vpop.xlane.xlu0 %224  ;;  %v287_v43 = vmul.f32 %v1401_v38, %v227_v8 }
  0x9c   : > { %v286_v39 = vmul.f32 %v1401_v38, %v225_v37 }
  0x9d   : > { %v1458_v40 = vsub.f32 %v1310_v9, %v288_v36  ;;  %v1471_v9 = vsub.f32 %v1313_v10, %v287_v43 }
  0x9e   : > { %v1461_v41 = vsub.f32 %v1316_v11, %v286_v39 }
  0x9f   : > { %v352_v7 = vmul.f32 %v1458_v40, %v1458_v40  ;;  %v351_v53 = vmul.f32 %v1471_v9, %v1471_v9 }
  0xa0   : > { %v350_v46 = vmul.f32 %v1461_v41, %v1461_v41 }
  0xa1   : > { %395 = vadd.xlane.f32.xlu1 %v352_v7 }
  0xa2   : > { %387 = vadd.xlane.f32.xlu0 %v348_v42  ;;  %391 = vadd.xlane.f32.xlu2 %v350_v46  ;;  %v235_v47 = vpop.xlane.xlu2 %234  ;;  %v233_v11 = vpop.xlane.xlu1 %232 }
  0xa3   : > { %v291_v48 = vmul.f32 %v1401_v38, %v235_v47  ;;  %v231_v49 = vpop.xlane.xlu0 %230  ;;  %v290_v56 = vmul.f32 %v1401_v38, %v233_v11 }
  0xa4   : > { %v289_v50 = vmul.f32 %v1401_v38, %v231_v49 }
  0xa5   : > { %v1476_v51 = vsub.f32 %v1322_v12, %v291_v48  ;;  %v1489_v12 = vsub.f32 %v1325_v13, %v290_v56 }
  0xa6   : > { %v1479_v52 = vsub.f32 %v1328_v14, %v289_v50 }
  0xa7   : > { %v355_v10 = vmul.f32 %v1476_v51, %v1476_v51  ;;  %v354_v3 = vmul.f32 %v1489_v12, %v1489_v12 }
  0xa8   : > { %v353_v58 = vmul.f32 %v1479_v52, %v1479_v52 }
  0xa9   : > { %401 = vadd.xlane.f32.xlu1 %v355_v10 }
  0xaa   : > { %393 = vadd.xlane.f32.xlu0 %v351_v53  ;;  %397 = vadd.xlane.f32.xlu2 %v353_v58  ;;  %v241_v59 = vpop.xlane.xlu2 %240  ;;  %v239_v14 = vpop.xlane.xlu1 %238 }
  0xab   : > { %v294_v60 = vmul.f32 %v1401_v38, %v241_v59  ;;  %v237_v62 = vpop.xlane.xlu0 %236  ;;  %v293_v32 = vmul.f32 %v1401_v38, %v239_v14 }
  0xac   : > { %v292_v63 = vmul.f32 %v1401_v38, %v237_v62 }
  0xad   : > { %v1494_v1 = vsub.f32 %v1334_v15, %v294_v60  ;;  %v1507_v15 = vsub.f32 %v1337_v16, %v293_v32 }
  0xae   : > { %v1497_v2 = vsub.f32 %v1340_v17, %v292_v63 }
  0xaf   : > { %v358_v13 = vmul.f32 %v1494_v1, %v1494_v1  ;;  %v357_v39 = vmul.f32 %v1507_v15, %v1507_v15 }
  0xb0   : > { %v356_v0 = vmul.f32 %v1497_v2, %v1497_v2 }
  0xb1   : > { %407 = vadd.xlane.f32.xlu1 %v358_v13 }
  0xb2   : > { %399 = vadd.xlane.f32.xlu0 %v354_v3  ;;  %403 = vadd.xlane.f32.xlu2 %v356_v0  ;;  %v247_v33 = vpop.xlane.xlu2 %246  ;;  %v245_v17 = vpop.xlane.xlu1 %244 }
  0xb3   : > { %v297_v34 = vmul.f32 %v1401_v38, %v247_v33  ;;  %v243_v35 = vpop.xlane.xlu0 %242  ;;  %v296_v42 = vmul.f32 %v1401_v38, %v245_v17 }
  0xb4   : > { %v295_v8 = vmul.f32 %v1401_v38, %v243_v35 }
  0xb5   : > { %v1512_v36 = vsub.f32 %v1346_v18, %v297_v34  ;;  %v1525_v18 = vsub.f32 %v1349_v19, %v296_v42 }
  0xb6   : > { %v1515_v37 = vsub.f32 %v1352_v20, %v295_v8 }
  0xb7   : > { %v361_v16 = vmul.f32 %v1512_v36, %v1512_v36  ;;  %v360_v50 = vmul.f32 %v1525_v18, %v1525_v18 }
  0xb8   : > { %v359_v43 = vmul.f32 %v1515_v37, %v1515_v37 }
  0xb9   : > { %413 = vadd.xlane.f32.xlu1 %v361_v16 }
  0xba   : > { %405 = vadd.xlane.f32.xlu0 %v357_v39  ;;  %409 = vadd.xlane.f32.xlu2 %v359_v43  ;;  %v253_v7 = vpop.xlane.xlu2 %252  ;;  %v251_v20 = vpop.xlane.xlu1 %250 }
  0xbb   : > { %v300_v46 = vmul.f32 %v1401_v38, %v253_v7  ;;  %v249_v47 = vpop.xlane.xlu0 %248  ;;  %v299_v53 = vmul.f32 %v1401_v38, %v251_v20 }
  0xbc   : > { %v298_v11 = vmul.f32 %v1401_v38, %v249_v47 }
  0xbd   : > { %v1530_v48 = vsub.f32 %v1358_v21, %v300_v46  ;;  %v1543_v21 = vsub.f32 %v1361_v22, %v299_v53 }
  0xbe   : > { %v1533_v49 = vsub.f32 %v1364_v23, %v298_v11 }
  0xbf   : > { %v364_v19 = vmul.f32 %v1530_v48, %v1530_v48  ;;  %v363_v63 = vmul.f32 %v1543_v21, %v1543_v21 }
  0xc0   : > { %v362_v56 = vmul.f32 %v1533_v49, %v1533_v49 }
  0xc1   : > { %419 = vadd.xlane.f32.xlu1 %v364_v19 }
  0xc2   : > { %411 = vadd.xlane.f32.xlu0 %v360_v50  ;;  %415 = vadd.xlane.f32.xlu2 %v362_v56  ;;  %v259_v10 = vpop.xlane.xlu2 %258  ;;  %v257_v23 = vpop.xlane.xlu1 %256 }
  0xc3   : > { %v303_v58 = vmul.f32 %v1401_v38, %v259_v10  ;;  %v255_v59 = vpop.xlane.xlu0 %254  ;;  %v302_v3 = vmul.f32 %v1401_v38, %v257_v23 }
  0xc4   : > { %v301_v14 = vmul.f32 %v1401_v38, %v255_v59 }
  0xc5   : > { %v1548_v60 = vsub.f32 %v1370_v24, %v303_v58  ;;  %v1561_v24 = vsub.f32 %v1373_v25, %v302_v3 }
  0xc6   : > { %v1551_v62 = vsub.f32 %v1376_v26, %v301_v14 }
  0xc7   : > { %v367_v22 = vmul.f32 %v1548_v60, %v1548_v60  ;;  %v366_v8 = vmul.f32 %v1561_v24, %v1561_v24 }
  0xc8   : > { %v365_v32 = vmul.f32 %v1551_v62, %v1551_v62 }
  0xc9   : > { %425 = vadd.xlane.f32.xlu1 %v367_v22 }
  0xca   : > { %417 = vadd.xlane.f32.xlu0 %v363_v63  ;;  %421 = vadd.xlane.f32.xlu2 %v365_v32  ;;  %v265_v13 = vpop.xlane.xlu2 %264  ;;  %v263_v26 = vpop.xlane.xlu1 %262 }
  0xcb   : > { %v306_v0 = vmul.f32 %v1401_v38, %v265_v13  ;;  %v261_v33 = vpop.xlane.xlu0 %260  ;;  %v305_v39 = vmul.f32 %v1401_v38, %v263_v26 }
  0xcc   : > { %v304_v17 = vmul.f32 %v1401_v38, %v261_v33 }
  0xcd   : > { %v1566_v34 = vsub.f32 %v1382_v27, %v306_v0  ;;  %v1579_v27 = vsub.f32 %v1385_v28, %v305_v39 }
  0xce   : > { %v1569_v35 = vsub.f32 %v1388_v29, %v304_v17 }
  0xcf   : > { %v370_v25 = vmul.f32 %v1566_v34, %v1566_v34  ;;  %v369_v20 = vmul.f32 %v1579_v27, %v1579_v27 }
  0xd0   : > { %v368_v42 = vmul.f32 %v1569_v35, %v1569_v35 }
  0xd1   : > { %431 = vadd.xlane.f32.xlu1 %v370_v25 }
  0xd2   : > { %423 = vadd.xlane.f32.xlu0 %v366_v8  ;;  %427 = vadd.xlane.f32.xlu2 %v368_v42  ;;  %v269_v29 = vpop.xlane.xlu1 %268 }
  0xd3   : > { %v267_v16 = vpop.xlane.xlu0 %266  ;;  %v308_v46 = vmul.f32 %v1401_v38, %v269_v29 }
  0xd4   : > { %v307_v43 = vmul.f32 %v1401_v38, %v267_v16 }
  0xd5   : > { %v1591_v28 = vsub.f32 %v1394_v30, %v308_v46 }
  0xd6   : > { %v1583_v7 = vsub.f32 %v1397_v31, %v307_v43 }
  0xd7   : > { %v372_v11 = vmul.f32 %v1591_v28, %v1591_v28 }
  0xd8   : > { %v371_v47 = vmul.f32 %v1583_v7, %v1583_v7 }
  0xda   : > { %429 = vadd.xlane.f32.xlu0 %v369_v20  ;;  %433 = vadd.xlane.f32.xlu2 %v371_v47 }
  0xe2   : > { %435 = vadd.xlane.f32.xlu0 %v372_v11 }
  0xfc   : > { %v378_v50 = vpop.xlane.xlu1 %377 }
  0xfd   : > { %v439_v31 = vmul.f32 %v378_v50, %v1401_v38  ;;  %v374_v53 = vpop.xlane.xlu2 %373 }
  0xfe   : > { %v437_v19 = vmul.f32 %v374_v53, %v1401_v38 }
  0xff   : > { %v471_v56 = vadd.f32 1e-12, %v439_v31 }
 0x100   : > { %v469_v10 = vadd.f32 1e-12, %v437_v19 }
 0x101   : > { %1164 = vrsqrt.f32 %v471_v56  ;;  %vm527_vm1 = vweird.f32 %v471_v56 }
 0x102   : > { %1166 = vrsqrt.f32 %v469_v10  ;;  %vm507_vm4 = vweird.f32 %v469_v10 }
 0x104   : > { %v384_v23 = vpop.xlane.xlu1 %383 }
 0x105   : > { %v442_v58 = vmul.f32 %v384_v23, %v1401_v38  ;;  %v380_v59 = vpop.xlane.xlu2 %379  ;;  %v376_v30 = vpop.xlane.xlu0 %375 }
 0x106   : > { %v440_v14 = vmul.f32 %v380_v59, %v1401_v38  ;;  %v438_v63 = vmul.f32 %v376_v30, %v1401_v38 }
 0x107   : > { %v1165_v3 = vpop.eup %1164  ;;  %v1600_v22 = vadd.f32 1e-12, %v442_v58 }
 0x108   : > { %v1167_v32 = vpop.eup %1166  ;;  %v522_v13 = vmul.f32 %v1165_v3, %v471_v56  ;;  %v1602_v26 = vadd.f32 1e-12, %v440_v14  ;;  %v1604_v0 = vadd.f32 1e-12, %v438_v63  ;;  %vm528_vm2 = vweird.f32 %v1165_v3 }
 0x109   : > { %v502_v33 = vmul.f32 %v1167_v32, %v469_v10  ;;  %1168 = vrsqrt.f32 %v1600_v22  ;;  %vm508_vm3 = vweird.f32 %v1167_v32  ;;  %vm1621_vm5 = vmor %vm527_vm1, %vm528_vm2  ;;  %vm557_vm7 = vweird.f32 %v1600_v22 }
 0x10a   : > { %v523_v17 = vmul.f32 %v1165_v3, %v522_v13  ;;  %1170 = vrsqrt.f32 %v1602_v26  ;;  %vm509_vm6 = vmor %vm507_vm4, %vm508_vm3  ;;  %vm537_vm9 = vweird.f32 %v1602_v26  ;;  %vm517_vm11 = vweird.f32 %v1604_v0 }
 0x10b   : > { %v503_v8 = vmul.f32 %v1167_v32, %v502_v33  ;;  %1172 = vrsqrt.f32 %v1604_v0 }
 0x10c   : > { %v524_v39 = vmul.f32 0.5, %v523_v17  ;;  %v390_v25 = vpop.xlane.xlu1 %389 }
 0x10d   : > { %v504_v42 = vmul.f32 0.5, %v503_v8  ;;  %v445_v16 = vmul.f32 %v390_v25, %v1401_v38  ;;  %v386_v29 = vpop.xlane.xlu2 %385  ;;  %v382_v46 = vpop.xlane.xlu0 %381 }
 0x10e   : > { %v525_v43 = vsub.f32 1.5, %v524_v39  ;;  %v443_v20 = vmul.f32 %v386_v29, %v1401_v38  ;;  %v441_v14 = vmul.f32 %v382_v46, %v1401_v38 }
 0x10f   : > { %v1611_v47 = vpop.eup %1168  ;;  %v505_v11 = vsub.f32 1.5, %v504_v42  ;;  %v1613_v50 = vadd.f32 1e-12, %v445_v16 }
 0x110   : > { %v1171_v31 = vpop.eup %1170  ;;  %v526_v53 = vmul.f32 %v1165_v3, %v525_v43  ;;  %v552_v19 = vmul.f32 %v1611_v47, %v1600_v22  ;;  %v1617_v23 = vadd.f32 1e-12, %v443_v20  ;;  %vm558_vm8 = vweird.f32 %v1611_v47 }
 0x111   : > { %v1619_v58 = vpop.eup %1172  ;;  %v506_v59 = vmul.f32 %v1167_v32, %v505_v11  ;;  %v532_v30 = vmul.f32 %v1171_v31, %v1602_v26  ;;  %1174 = vrsqrt.f32 %v1613_v50  ;;  %vm538_vm10 = vweird.f32 %v1171_v31  ;;  %vm1665_vm13 = vmor %vm557_vm7, %vm558_vm8 }
 0x112   : > { %v530_v10 = vsel %vm1621_vm5, %v1165_v3, %v526_v53  ;;  %v553_v63 = vmul.f32 %v1611_v47, %v552_v19  ;;  %v512_v13 = vmul.f32 %v1619_v58, %v1604_v0  ;;  %1176 = vrsqrt.f32 %v1617_v23  ;;  %v1639_v3 = vld [vmem:[%s2189_s1] ss:$0 sm:$0xff]  ;;  %vm539_vm15 = vmor %vm537_vm9, %vm538_vm10 }
 0x113   : > { %v510_v33 = vsel %vm509_vm6, %v1167_v32, %v506_v59  ;;  %v533_v17 = vmul.f32 %v1171_v31, %v532_v30  ;;  %v823_v42 = vmul.f32 %v530_v10, %v1406_v44  ;;  %v1643_v32 = vadd.f32 1e-12, %v441_v14  ;;  %v1658_v59 = vld [vmem:[%s2190_s2] ss:$0 sm:$0xff] }
 0x114   : > { %v554_v8 = vmul.f32 0.5, %v553_v63  ;;  %v513_v39 = vmul.f32 %v1619_v58, %v512_v13  ;;  %v396_v25 = vpop.xlane.xlu1 %395  ;;  %v821_v29 = vmul.f32 %v510_v33, %v1409_v45  ;;  %vm518_vm12 = vweird.f32 %v1619_v58 }
 0x115   : > { %v534_v16 = vmul.f32 0.5, %v533_v17  ;;  %v448_v46 = vmul.f32 %v396_v25, %v1401_v38  ;;  %v392_v11 = vpop.xlane.xlu2 %391  ;;  %1178 = vrsqrt.f32 %v1643_v32  ;;  %v388_v56 = vpop.xlane.xlu0 %387  ;;  %v859_v30 = vmul.f32 %v1639_v3, %v823_v42  ;;  %vm519_vm1 = vmor %vm517_vm11, %vm518_vm12 }
 0x116   : > { %v555_v43 = vsub.f32 1.5, %v554_v8  ;;  %v514_v20 = vmul.f32 0.5, %v513_v39  ;;  %vm587_vm14 = vweird.f32 %v1613_v50  ;;  %v857_v33 = vmul.f32 %v1639_v3, %v821_v29 }
 0x117   : > { %v1647_v53 = vpop.eup %1174  ;;  %v535_v19 = vsub.f32 1.5, %v534_v16  ;;  %v1670_v63 = vadd.f32 1e-12, %v448_v46  ;;  %vm567_vm0 = vweird.f32 %v1617_v23  ;;  %v446_v42 = vmul.f32 %v392_v11, %v1401_v38 }
 0x118   : > { %v515_v44 = vsub.f32 1.5, %v514_v20  ;;  %v582_v45 = vmul.f32 %v1647_v53, %v1613_v50  ;;  %v1672_v13 = vpop.eup %1176  ;;  %v556_v17 = vmul.f32 %v1611_v47, %v555_v43  ;;  %v444_v26 = vmul.f32 %v388_v56, %v1401_v38 }
 0x119   : > { %v536_v10 = vmul.f32 %v1171_v31, %v535_v19  ;;  %v562_v25 = vmul.f32 %v1672_v13, %v1617_v23  ;;  %1180 = vrsqrt.f32 %v1670_v63  ;;  %v895_v0 = vadd.f32 %v1658_v59, %v859_v30 }
 0x11a   : > { %v516_v22 = vmul.f32 %v1619_v58, %v515_v44  ;;  %v583_v8 = vmul.f32 %v1647_v53, %v582_v45  ;;  %vm588_vm2 = vweird.f32 %v1647_v53  ;;  %v893_v45 = vadd.f32 %v1658_v59, %v857_v33 }
 0x11b   : > { %v540_v39 = vsel %vm539_vm15, %v1171_v31, %v536_v10  ;;  %v1693_v20 = vpop.eup %1178  ;;  %v563_v11 = vmul.f32 %v1672_v13, %v562_v25  ;;  %v1708_v30 = vadd.f32 1e-12, %v446_v42  ;;  %v1713_v14 = vadd.f32 1e-12, %v444_v26  ;;  %vm1726_vm3 = vmor %vm587_vm14, %vm588_vm2 }
 0x11c   : > { %v824_v16 = vmul.f32 %v540_v39, %v1422_v55  ;;  %v520_v29 = vsel %vm519_vm1, %v1619_v58, %v516_v22  ;;  %v584_v43 = vmul.f32 0.5, %v583_v8  ;;  %v402_v31 = vpop.xlane.xlu1 %401  ;;  %v560_v55 = vsel %vm1665_vm13, %v1611_v47, %v556_v17 }
 0x11d   : > { %v822_v46 = vmul.f32 %v520_v29, %v1426_v57  ;;  %v542_v44 = vmul.f32 %v1693_v20, %v1643_v32  ;;  %v564_v57 = vmul.f32 0.5, %v563_v11  ;;  %v398_v17 = vpop.xlane.xlu2 %397  ;;  %v826_v8 = vmul.f32 %v560_v55, %v1419_v54 }
 0x11e   : > { %v860_v58 = vmul.f32 %v1639_v3, %v824_v16  ;;  %v585_v19 = vsub.f32 1.5, %v584_v43  ;;  %1182 = vrsqrt.f32 %v1708_v30  ;;  %vm568_vm4 = vweird.f32 %v1672_v13  ;;  %v394_v16 = vpop.xlane.xlu0 %393 }
 0x11f   : > { %v858_v56 = vmul.f32 %v1639_v3, %v822_v46  ;;  %v543_v47 = vmul.f32 %v1693_v20, %v542_v44  ;;  %v565_v25 = vsub.f32 1.5, %v564_v57  ;;  %v1731_v54 = vpop.eup %1180  ;;  %1184 = vrsqrt.f32 %v1713_v14  ;;  %vm1748_vm6 = vmor %vm567_vm0, %vm568_vm4 }
 0x120   : > { %v896_v10 = vadd.f32 %v1658_v59, %v860_v58  ;;  %v586_v22 = vmul.f32 %v1647_v53, %v585_v19  ;;  %v612_v43 = vmul.f32 %v1731_v54, %v1670_v63  ;;  %vm548_vm5 = vweird.f32 %v1693_v20 }
 0x121   : > { %v894_v33 = vadd.f32 %v1658_v59, %v858_v56  ;;  %v544_v26 = vmul.f32 0.5, %v543_v47  ;;  %v566_v50 = vmul.f32 %v1672_v13, %v565_v25  ;;  %v862_v55 = vmul.f32 %v1639_v3, %v826_v8 }
 0x122   : > { %v1064_v42 = vpack.c.bf16 %v896_v10, %v895_v0  ;;  %v590_v46 = vsel %vm1726_vm3, %v1647_v53, %v586_v22  ;;  %v451_v0 = vmul.f32 %v402_v31, %v1401_v38  ;;  %v613_v19 = vmul.f32 %v1731_v54, %v612_v43 }
 0x123   : > { %v1059_v29 = vpack.c.bf16 %v894_v33, %v893_v45  ;;  %v545_v11 = vsub.f32 1.5, %v544_v26  ;;  %v449_v44 = vmul.f32 %v398_v17, %v1401_v38  ;;  %v570_v53 = vsel %vm1748_vm6, %v1672_v13, %v566_v50 }
 0x124   : > { %1136 = vst [vmem:[%s1719_s26 + $0x8] sm:$0xff] %v1064_v42   ;;  %v408_v45 = vpop.xlane.xlu1 %407  ;;  %vm547_vm7 = vweird.f32 %v1643_v32  ;;  %v1759_v56 = vadd.f32 1e-12, %v451_v0  ;;  %v1183_v23 = vpop.eup %1182  ;;  %v829_v57 = vmul.f32 %v590_v46, %v1440_v4  ;;  %vm617_vm9 = vweird.f32 %v1670_v63 }
 0x125   : > { %1060 = vst [vmem:[%s1719_s26] sm:$0xff] %v1059_v29   ;;  %v546_v31 = vmul.f32 %v1693_v20, %v545_v11  ;;  %vm549_vm8 = vmor %vm547_vm7, %vm548_vm5  ;;  %v1763_v10 = vadd.f32 1e-12, %v449_v44  ;;  %v447_v22 = vmul.f32 %v394_v16, %v1401_v38  ;;  %v1185_v47 = vpop.eup %1184  ;;  %v614_v13 = vmul.f32 0.5, %v613_v19 }
 0x126   : > { %v592_v8 = vmul.f32 %v1183_v23, %v1708_v30  ;;  %v454_v32 = vmul.f32 %v408_v45, %v1401_v38  ;;  %v898_v33 = vadd.f32 %v1658_v59, %v862_v55  ;;  %v827_v39 = vmul.f32 %v570_v53, %v1443_v5  ;;  %v400_v46 = vpop.xlane.xlu0 %399 }
 0x127   : > { %v550_v17 = vsel %vm549_vm8, %v1693_v20, %v546_v31  ;;  %v572_v25 = vmul.f32 %v1185_v47, %v1713_v14  ;;  %vm618_vm10 = vweird.f32 %v1731_v54  ;;  %vm597_vm11 = vweird.f32 %v1708_v30  ;;  %v404_v20 = vpop.xlane.xlu2 %403 }
 0x128   : > { %v825_v4 = vmul.f32 %v550_v17, %v1435_v61  ;;  %v593_v42 = vmul.f32 %v1183_v23, %v592_v8  ;;  %1186 = vrsqrt.f32 %v1759_v56  ;;  %v865_v26 = vmul.f32 %v1639_v3, %v829_v57  ;;  %vm1796_vm15 = vmor %vm617_vm9, %vm618_vm10 }
 0x129   : > { %v573_v29 = vmul.f32 %v1185_v47, %v572_v25  ;;  %1188 = vrsqrt.f32 %v1763_v10  ;;  %v615_v5 = vsub.f32 1.5, %v614_v13  ;;  %v1779_v61 = vadd.f32 1e-12, %v447_v22 }
 0x12a   : > { %v861_v16 = vmul.f32 %v1639_v3, %v825_v4  ;;  %v594_v50 = vmul.f32 0.5, %v593_v42  ;;  %v1781_v43 = vadd.f32 1e-12, %v454_v32  ;;  %v863_v11 = vmul.f32 %v1639_v3, %v827_v39 }
 0x12b   : > { %v574_v55 = vmul.f32 0.5, %v573_v29  ;;  %v452_v58 = vmul.f32 %v404_v20, %v1401_v38  ;;  %vm598_vm12 = vweird.f32 %v1183_v23  ;;  %vm577_vm13 = vweird.f32 %v1713_v14 }
 0x12c   : > { %v897_v0 = vadd.f32 %v1658_v59, %v861_v16  ;;  %v595_v19 = vsub.f32 1.5, %v594_v50  ;;  %1190 = vrsqrt.f32 %v1779_v61  ;;  %vm578_vm14 = vweird.f32 %v1185_v47  ;;  %vm599_vm0 = vmor %vm597_vm11, %vm598_vm12  ;;  %v414_v42 = vpop.xlane.xlu1 %413 }
 0x12d   : > { %v575_v45 = vsub.f32 1.5, %v574_v55  ;;  %1192 = vrsqrt.f32 %v1781_v43  ;;  %v616_v31 = vmul.f32 %v1731_v54, %v615_v5  ;;  %v1800_v17 = vadd.f32 1e-12, %v452_v58  ;;  %vm579_vm1 = vmor %vm577_vm13, %vm578_vm14 }
 0x12e   : > { %v1069_v44 = vpack.c.bf16 %v898_v33, %v897_v0  ;;  %v1789_v53 = vpop.eup %1186  ;;  %v596_v22 = vmul.f32 %v1183_v23, %v595_v19  ;;  %v450_v13 = vmul.f32 %v400_v46, %v1401_v38  ;;  %v901_v32 = vadd.f32 %v1658_v59, %v865_v26  ;;  %v1839_v58 = vpop.xlane.xlu0 %405 }
 0x12f   : > { %v1803_v8 = vpop.eup %1188  ;;  %v899_v33 = vadd.f32 %v1658_v59, %v863_v11  ;;  %v576_v63 = vmul.f32 %v1185_v47, %v575_v45  ;;  %v642_v39 = vmul.f32 %v1789_v53, %v1759_v56  ;;  %vm647_vm2 = vweird.f32 %v1759_v56  ;;  %v410_v55 = vpop.xlane.xlu2 %409 }
 0x130   : > { %1137 = vst [vmem:[%s1719_s26 + $0x10] sm:$0xff] %v1069_v44   ;;  %v600_v4 = vsel %vm599_vm0, %v1183_v23, %v596_v22  ;;  %v622_v25 = vmul.f32 %v1803_v8, %v1763_v10  ;;  %vm627_vm3 = vweird.f32 %v1763_v10  ;;  %1194 = vrsqrt.f32 %v1800_v17 }
 0x131   : > { %v830_v30 = vmul.f32 %v600_v4, %v1461_v41  ;;  %v580_v20 = vsel %vm579_vm1, %v1185_v47, %v576_v63  ;;  %v643_v26 = vmul.f32 %v1789_v53, %v642_v39  ;;  %v620_v14 = vsel %vm1796_vm15, %v1731_v54, %v616_v31 }
 0x132   : > { %v1191_v23 = vpop.eup %1190  ;;  %v828_v16 = vmul.f32 %v580_v20, %v1453_v6  ;;  %v623_v29 = vmul.f32 %v1803_v8, %v622_v25  ;;  %v1828_v5 = vadd.f32 1e-12, %v450_v13  ;;  %v457_v11 = vmul.f32 %v414_v42, %v1401_v38 }
 0x133   : > { %v1830_v50 = vpop.eup %1192  ;;  %v866_v41 = vmul.f32 %v1639_v3, %v830_v30  ;;  %v644_v47 = vmul.f32 0.5, %v643_v26  ;;  %v602_v46 = vmul.f32 %v1191_v23, %v1779_v61  ;;  %vm648_vm4 = vweird.f32 %v1789_v53 }
 0x134   : > { %v864_v0 = vmul.f32 %v1639_v3, %v828_v16  ;;  %v624_v54 = vmul.f32 0.5, %v623_v29  ;;  %v672_v6 = vmul.f32 %v1830_v50, %v1781_v43  ;;  %1196 = vrsqrt.f32 %v1828_v5  ;;  %vm1851_vm5 = vmor %vm647_vm2, %vm648_vm4 }
 0x135   : > { %v902_v19 = vadd.f32 %v1658_v59, %v866_v41  ;;  %v645_v44 = vsub.f32 1.5, %v644_v47  ;;  %v603_v45 = vmul.f32 %v1191_v23, %v602_v46  ;;  %v832_v31 = vmul.f32 %v620_v14, %v1458_v40 }
 0x136   : > { %v900_v57 = vadd.f32 %v1658_v59, %v864_v0  ;;  %v625_v22 = vsub.f32 1.5, %v624_v54  ;;  %v673_v13 = vmul.f32 %v1830_v50, %v672_v6  ;;  %v1195_v63 = vpop.eup %1194  ;;  %v1855_v40 = vadd.f32 1e-12, %v457_v11  ;;  %v420_v0 = vpop.xlane.xlu1 %419 }
 0x137   : > { %v1079_v39 = vpack.c.bf16 %v902_v19, %v901_v32  ;;  %v646_v4 = vmul.f32 %v1789_v53, %v645_v44  ;;  %v604_v42 = vmul.f32 0.5, %v603_v45  ;;  %vm628_vm6 = vweird.f32 %v1803_v8  ;;  %v416_v45 = vpop.xlane.xlu2 %415 }
 0x138   : > { %v1074_v30 = vpack.c.bf16 %v900_v57, %v899_v33  ;;  %v674_v20 = vmul.f32 0.5, %v673_v13  ;;  %v652_v26 = vmul.f32 %v1195_v63, %v1800_v17  ;;  %v626_v32 = vmul.f32 %v1803_v8, %v625_v22  ;;  %vm1872_vm9 = vmor %vm627_vm3, %vm628_vm6 }
 0x139   : > { %1139 = vst [vmem:[%s1719_s26 + $0x20] sm:$0xff] %v1079_v39   ;;  %v605_v14 = vsub.f32 1.5, %v604_v42  ;;  %vm608_vm7 = vweird.f32 %v1191_v23  ;;  %1198 = vrsqrt.f32 %v1855_v40  ;;  %v650_v56 = vsel %vm1851_vm5, %v1789_v53, %v646_v4 }
 0x13a   : > { %1138 = vst [vmem:[%s1719_s26 + $0x18] sm:$0xff] %v1074_v30   ;;  %vm607_vm8 = vweird.f32 %v1779_v61  ;;  %v653_v33 = vmul.f32 %v1195_v63, %v652_v26  ;;  %v1867_v16 = vpop.eup %1196  ;;  %v868_v29 = vmul.f32 %v1639_v3, %v832_v31  ;;  %v675_v46 = vsub.f32 1.5, %v674_v20  ;;  %v412_v31 = vpop.xlane.xlu0 %411 }
 0x13b   : > { %v606_v47 = vmul.f32 %v1191_v23, %v605_v14  ;;  %v455_v11 = vmul.f32 %v410_v55, %v1401_v38  ;;  %vm609_vm10 = vmor %vm607_vm8, %vm608_vm7  ;;  %vm677_vm11 = vweird.f32 %v1781_v43  ;;  %vm678_vm12 = vweird.f32 %v1830_v50 }
 0x13c   : > { %v654_v61 = vmul.f32 0.5, %v653_v33  ;;  %v632_v53 = vmul.f32 %v1867_v16, %v1828_v5  ;;  %v835_v10 = vmul.f32 %v650_v56, %v1476_v51  ;;  %v630_v54 = vsel %vm1872_vm9, %v1803_v8, %v626_v32  ;;  %vm1901_vm15 = vmor %vm677_vm11, %vm678_vm12 }
 0x13d   : > { %v610_v6 = vsel %vm609_vm10, %v1191_v23, %v606_v47  ;;  %v1885_v19 = vadd.f32 1e-12, %v455_v11  ;;  %vm657_vm13 = vweird.f32 %v1800_v17  ;;  %vm658_vm14 = vweird.f32 %v1195_v63 }
 0x13e   : > { %v831_v55 = vmul.f32 %v610_v6, %v1471_v9  ;;  %v655_v44 = vsub.f32 1.5, %v654_v61  ;;  %v904_v22 = vadd.f32 %v1658_v59, %v868_v29  ;;  %v676_v51 = vmul.f32 %v1830_v50, %v675_v46  ;;  %vm659_vm0 = vmor %vm657_vm13, %vm658_vm14  ;;  %v426_v61 = vpop.xlane.xlu1 %425 }
 0x13f   : > { %v1889_v57 = vpop.eup %1198  ;;  %v633_v13 = vmul.f32 %v1867_v16, %v632_v53  ;;  %1200 = vrsqrt.f32 %v1885_v19  ;;  %v833_v8 = vmul.f32 %v630_v54, %v1479_v52  ;;  %v871_v25 = vmul.f32 %v1639_v3, %v835_v10 }
 0x140   : > { %v867_v9 = vmul.f32 %v1639_v3, %v831_v55  ;;  %v656_v39 = vmul.f32 %v1195_v63, %v655_v44  ;;  %v702_v4 = vmul.f32 %v1889_v57, %v1855_v40  ;;  %vm638_vm1 = vweird.f32 %v1867_v16 }
 0x141   : > { %v634_v52 = vmul.f32 0.5, %v633_v13  ;;  %v453_v42 = vmul.f32 %v1839_v58, %v1401_v38  ;;  %v460_v26 = vmul.f32 %v420_v0, %v1401_v38  ;;  %v680_v32 = vsel %vm1901_vm15, %v1830_v50, %v676_v51 }
 0x142   : > { %v903_v43 = vadd.f32 %v1658_v59, %v867_v9  ;;  %v660_v30 = vsel %vm659_vm0, %v1195_v63, %v656_v39  ;;  %v703_v20 = vmul.f32 %v1889_v57, %v702_v4  ;;  %v458_v63 = vmul.f32 %v416_v45, %v1401_v38  ;;  %v422_v45 = vpop.xlane.xlu2 %421 }
 0x143   : > { %v836_v17 = vmul.f32 %v660_v30, %v1497_v2  ;;  %v635_v14 = vsub.f32 1.5, %v634_v52  ;;  %v1920_v56 = vadd.f32 1e-12, %v453_v42  ;;  %v1922_v58 = vadd.f32 1e-12, %v460_v26 }
 0x144   : > { %v1084_v33 = vpack.c.bf16 %v904_v22, %v903_v43  ;;  %v704_v29 = vmul.f32 0.5, %v703_v20  ;;  %vm637_vm2 = vweird.f32 %v1828_v5  ;;  %v907_v2 = vadd.f32 %v1658_v59, %v871_v25  ;;  %v418_v22 = vpop.xlane.xlu0 %417 }
 0x145   : > { %v1925_v41 = vpop.eup %1200  ;;  %v872_v47 = vmul.f32 %v1639_v3, %v836_v17  ;;  %v636_v46 = vmul.f32 %v1867_v16, %v635_v14  ;;  %1202 = vrsqrt.f32 %v1920_v56  ;;  %v869_v50 = vmul.f32 %v1639_v3, %v833_v8  ;;  %vm639_vm3 = vmor %vm637_vm2, %vm638_vm1 }
 0x146   : > { %1140 = vst [vmem:[%s1719_s26 + $0x28] sm:$0xff] %v1084_v33   ;;  %v682_v11 = vmul.f32 %v1925_v41, %v1885_v19  ;;  %1204 = vrsqrt.f32 %v1922_v58  ;;  %v838_v53 = vmul.f32 %v680_v32, %v1494_v1  ;;  %v1942_v10 = vadd.f32 1e-12, %v458_v63 }
 0x147   : > { %v908_v5 = vadd.f32 %v1658_v59, %v872_v47  ;;  %v640_v0 = vsel %vm639_vm3, %v1867_v16, %v636_v46  ;;  %v705_v6 = vsub.f32 1.5, %v704_v29  ;;  %v456_v44 = vmul.f32 %v412_v31, %v1401_v38  ;;  %v432_v46 = vpop.xlane.xlu1 %431 }
 0x148   : > { %v834_v54 = vmul.f32 %v640_v0, %v1489_v12  ;;  %v683_v55 = vmul.f32 %v1925_v41, %v682_v11  ;;  %vm707_vm4 = vweird.f32 %v1855_v40  ;;  %1206 = vrsqrt.f32 %v1942_v10 }
 0x149   : > { %v1094_v51 = vpack.c.bf16 %v908_v5, %v907_v2  ;;  %v463_v1 = vmul.f32 %v426_v61, %v1401_v38  ;;  %vm708_vm5 = vweird.f32 %v1889_v57  ;;  %v1952_v13 = vadd.f32 1e-12, %v456_v44 }
 0x14a   : > { %v870_v16 = vmul.f32 %v1639_v3, %v834_v54  ;;  %v684_v12 = vmul.f32 0.5, %v683_v55  ;;  %v905_v9 = vadd.f32 %v1658_v59, %v869_v50  ;;  %v874_v31 = vmul.f32 %v1639_v3, %v838_v53  ;;  %vm1966_vm6 = vmor %vm707_vm4, %vm708_vm5  ;;  %v428_v5 = vpop.xlane.xlu2 %427 }
 0x14b   : > { %v1203_v8 = vpop.eup %1202  ;;  %1142 = vst [vmem:[%s1719_s26 + $0x38] sm:$0xff] %v1094_v51   ;;  %v1957_v23 = vadd.f32 1e-12, %v463_v1  ;;  %v706_v25 = vmul.f32 %v1889_v57, %v705_v6  ;;  %1208 = vrsqrt.f32 %v1952_v13  ;;  %v461_v20 = vmul.f32 %v422_v45, %v1401_v38 }
 0x14c   : > { %v1959_v39 = vpop.eup %1204  ;;  %v906_v4 = vadd.f32 %v1658_v59, %v870_v16  ;;  %v685_v52 = vsub.f32 1.5, %v684_v12  ;;  %v662_v42 = vmul.f32 %v1203_v8, %v1920_v56  ;;  %v459_v26 = vmul.f32 %v418_v22, %v1401_v38  ;;  %v1997_v0 = vpop.xlane.xlu0 %423 }
 0x14d   : > { %v732_v30 = vmul.f32 %v1959_v39, %v1922_v58  ;;  %vm687_vm7 = vweird.f32 %v1885_v19  ;;  %vm688_vm8 = vweird.f32 %v1925_v41  ;;  %1210 = vrsqrt.f32 %v1957_v23 }
 0x14e   : > { %v1089_v32 = vpack.c.bf16 %v906_v4, %v905_v9  ;;  %v663_v17 = vmul.f32 %v1203_v8, %v662_v42  ;;  %v1975_v14 = vpop.eup %1206  ;;  %v710_v33 = vsel %vm1966_vm6, %v1889_v57, %v706_v25  ;;  %v686_v29 = vmul.f32 %v1925_v41, %v685_v52  ;;  %vm2004_vm11 = vmor %vm687_vm7, %vm688_vm8 }
 0x14f   : > { %v733_v40 = vmul.f32 %v1959_v39, %v732_v30  ;;  %v712_v47 = vmul.f32 %v1975_v14, %v1942_v10  ;;  %v1989_v2 = vadd.f32 %v1658_v59, %v874_v31  ;;  %v1991_v11 = vadd.f32 1e-12, %v461_v20 }
 0x150   : > { %1141 = vst [vmem:[%s1719_s26 + $0x30] sm:$0xff] %v1089_v32   ;;  %v664_v63 = vmul.f32 0.5, %v663_v17  ;;  %v1993_v61 = vadd.f32 1e-12, %v459_v26  ;;  %vm667_vm9 = vweird.f32 %v1920_v56  ;;  %vm668_vm10 = vweird.f32 %v1203_v8 }
 0x151   : > { %v734_v50 = vmul.f32 0.5, %v733_v40  ;;  %v713_v57 = vmul.f32 %v1975_v14, %v712_v47  ;;  %v1209_v54 = vpop.eup %1208  ;;  %v841_v6 = vmul.f32 %v710_v33, %v1512_v36  ;;  %vm717_vm12 = vweird.f32 %v1942_v10  ;;  %vm669_vm13 = vmor %vm667_vm9, %vm668_vm10 }
 0x152   : > { %v665_v53 = vsub.f32 1.5, %v664_v63  ;;  %1212 = vrsqrt.f32 %v1991_v11  ;;  %v466_v44 = vmul.f32 %v432_v46, %v1401_v38  ;;  %v690_v45 = vsel %vm2004_vm11, %v1925_v41, %v686_v29 }
 0x153   : > { %v714_v36 = vmul.f32 0.5, %v713_v57  ;;  %v692_v51 = vmul.f32 %v1209_v54, %v1952_v13  ;;  %v2015_v1 = vpop.eup %1210  ;;  %v735_v19 = vsub.f32 1.5, %v734_v50  ;;  %vm718_vm14 = vweird.f32 %v1975_v14 }
 0x154   : > { %v666_v22 = vmul.f32 %v1203_v8, %v665_v53  ;;  %1214 = vrsqrt.f32 %v1993_v61  ;;  %v464_v16 = vmul.f32 %v428_v5, %v1401_v38  ;;  %v762_v31 = vmul.f32 %v2015_v1, %v1957_v23  ;;  %vm719_vm1 = vmor %vm717_vm12, %vm718_vm14  ;;  %v430_v50 = vpop.xlane.xlu0 %429 }
 0x155   : > { %v715_v9 = vsub.f32 1.5, %v714_v36  ;;  %v693_v41 = vmul.f32 %v1209_v54, %v692_v51  ;;  %vm737_vm15 = vweird.f32 %v1922_v58  ;;  %vm738_vm0 = vweird.f32 %v1959_v39 }
 0x156   : > { %v670_v12 = vsel %vm669_vm13, %v1203_v8, %v666_v22  ;;  %v2028_v56 = vadd.f32 1e-12, %v466_v44  ;;  %v839_v25 = vmul.f32 %v690_v45, %v1515_v37  ;;  %v763_v8 = vmul.f32 %v2015_v1, %v762_v31  ;;  %vm2051_vm3 = vmor %vm737_vm15, %vm738_vm0  ;;  %v434_v22 = vpop.xlane.xlu2 %433 }
 0x157   : > { %v837_v4 = vmul.f32 %v670_v12, %v1507_v15  ;;  %v716_v52 = vmul.f32 %v1975_v14, %v715_v9  ;;  %v694_v42 = vmul.f32 0.5, %v693_v41  ;;  %v877_v30 = vmul.f32 %v1639_v3, %v841_v6 }
 0x158   : > { %v2033_v43 = vpop.eup %1212  ;;  %vm698_vm2 = vweird.f32 %v1209_v54  ;;  %1216 = vrsqrt.f32 %v2028_v56  ;;  %v736_v15 = vmul.f32 %v1959_v39, %v735_v19  ;;  %v2044_v32 = vadd.f32 1e-12, %v464_v16 }
 0x159   : > { %v873_v20 = vmul.f32 %v1639_v3, %v837_v4  ;;  %v720_v37 = vsel %vm719_vm1, %v1975_v14, %v716_v52  ;;  %v695_v26 = vsub.f32 1.5, %v694_v42  ;;  %v764_v29 = vmul.f32 0.5, %v763_v8 }
 0x15a   : > { %v1215_v17 = vpop.eup %1214  ;;  %v842_v33 = vmul.f32 %v720_v37, %v1533_v49  ;;  %v742_v14 = vmul.f32 %v2033_v43, %v1991_v11  ;;  %v875_v63 = vmul.f32 %v1639_v3, %v839_v25  ;;  %vm697_vm4 = vweird.f32 %v1952_v13 }
 0x15b   : > { %v909_v40 = vadd.f32 %v1658_v59, %v873_v20  ;;  %v696_v47 = vmul.f32 %v1209_v54, %v695_v26  ;;  %v722_v46 = vmul.f32 %v1215_v17, %v1993_v61  ;;  %v913_v58 = vadd.f32 %v1658_v59, %v877_v30  ;;  %vm699_vm5 = vmor %vm697_vm4, %vm698_vm2 }
 0x15c   : > { %v878_v57 = vmul.f32 %v1639_v3, %v842_v33  ;;  %v740_v49 = vsel %vm2051_vm3, %v1959_v39, %v736_v15  ;;  %1218 = vrsqrt.f32 %v2044_v32  ;;  %v743_v45 = vmul.f32 %v2033_v43, %v742_v14  ;;  %v436_v37 = vpop.xlane.xlu0 %435 }
 0x15d   : > { %v1099_v53 = vpack.c.bf16 %v1989_v2, %v909_v40  ;;  %v700_v5 = vsel %vm699_vm5, %v1209_v54, %v696_v47  ;;  %v723_v6 = vmul.f32 %v1215_v17, %v722_v46  ;;  %v765_v2 = vsub.f32 1.5, %v764_v29 }
 0x15e   : > { %v2069_v13 = vpop.eup %1216  ;;  %v914_v55 = vadd.f32 %v1658_v59, %v878_v57  ;;  %v840_v44 = vmul.f32 %v700_v5, %v1525_v18  ;;  %v911_v36 = vadd.f32 %v1658_v59, %v875_v63  ;;  %vm767_vm6 = vweird.f32 %v1957_v23 }
 0x15f   : > { %1143 = vst [vmem:[%s1719_s26 + $0x40] sm:$0xff] %v1099_v53   ;;  %v724_v39 = vmul.f32 0.5, %v723_v6  ;;  %v792_v54 = vmul.f32 %v2069_v13, %v2028_v56  ;;  %v844_v51 = vmul.f32 %v740_v49, %v1530_v48  ;;  %vm768_vm7 = vweird.f32 %v2015_v1 }
 0x160   : > { %v1109_v19 = vpack.c.bf16 %v914_v55, %v913_v58  ;;  %v876_v16 = vmul.f32 %v1639_v3, %v840_v44  ;;  %vm728_vm8 = vweird.f32 %v1215_v17  ;;  %v462_v12 = vmul.f32 %v1997_v0, %v1401_v38  ;;  %vm2091_vm10 = vmor %vm767_vm6, %vm768_vm7 }
 0x161   : > { %v725_v18 = vsub.f32 1.5, %v724_v39  ;;  %v467_v9 = vmul.f32 %v434_v22, %v1401_v38  ;;  %v766_v31 = vmul.f32 %v2015_v1, %v765_v2  ;;  %v744_v4 = vmul.f32 0.5, %v743_v45 }
 0x162   : > { %1145 = vst [vmem:[%s1719_s26 + $0x50] sm:$0xff] %v1109_v19   ;;  %v912_v41 = vadd.f32 %v1658_v59, %v876_v16  ;;  %vm727_vm9 = vweird.f32 %v1993_v61  ;;  %v1219_v48 = vpop.eup %1218  ;;  %v793_v0 = vmul.f32 %v2069_v13, %v792_v54  ;;  %v2096_v42 = vadd.f32 1e-12, %v462_v12 }
 0x163   : > { %v726_v52 = vmul.f32 %v1215_v17, %v725_v18  ;;  %v2098_v8 = vadd.f32 1e-12, %v467_v9  ;;  %vm729_vm11 = vmor %vm727_vm9, %vm728_vm8  ;;  %v772_v20 = vmul.f32 %v1219_v48, %v2044_v32  ;;  %v465_v61 = vmul.f32 %v430_v50, %v1401_v38 }
 0x164   : > { %v1104_v30 = vpack.c.bf16 %v912_v41, %v911_v36  ;;  %v880_v23 = vmul.f32 %v1639_v3, %v844_v51  ;;  %v770_v26 = vsel %vm2091_vm10, %v2015_v1, %v766_v31  ;;  %1220 = vrsqrt.f32 %v2096_v42 }
 0x165   : > { %v730_v15 = vsel %vm729_vm11, %v1215_v17, %v726_v52  ;;  %v773_v10 = vmul.f32 %v1219_v48, %v772_v20  ;;  %v745_v33 = vsub.f32 1.5, %v744_v4  ;;  %v794_v29 = vmul.f32 0.5, %v793_v0 }
 0x166   : > { %1144 = vst [vmem:[%s1719_s26 + $0x48] sm:$0xff] %v1104_v30   ;;  %v843_v40 = vmul.f32 %v730_v15, %v1543_v21  ;;  %1222 = vrsqrt.f32 %v2098_v8  ;;  %v2112_v47 = vadd.f32 1e-12, %v465_v61  ;;  %v468_v17 = vmul.f32 %v436_v37, %v1401_v38 }
 0x167   : > { %v774_v63 = vmul.f32 0.5, %v773_v10  ;;  %v916_v46 = vadd.f32 %v1658_v59, %v880_v23  ;;  %v847_v1 = vmul.f32 %v770_v26, %v1548_v60  ;;  %vm777_vm12 = vweird.f32 %v2044_v32 }
 0x168   : > { %v879_v14 = vmul.f32 %v1639_v3, %v843_v40  ;;  %vm778_vm13 = vweird.f32 %v1219_v48  ;;  %1224 = vrsqrt.f32 %v2112_v47  ;;  %v746_v58 = vmul.f32 %v2033_v43, %v745_v33 }
 0x169   : > { %v775_v50 = vsub.f32 1.5, %v774_v63  ;;  %vm747_vm14 = vweird.f32 %v1991_v11  ;;  %vm748_vm15 = vweird.f32 %v2033_v43  ;;  %v2123_v38 = vadd.f32 1e-12, %v468_v17  ;;  %vm779_vm1 = vmor %vm777_vm12, %vm778_vm13 }
 0x16a   : > { %v915_v21 = vadd.f32 %v1658_v59, %v879_v14  ;;  %v1221_v53 = vpop.eup %1220  ;;  %v795_v60 = vsub.f32 1.5, %v794_v29  ;;  %vm797_vm0 = vweird.f32 %v2028_v56  ;;  %v883_v11 = vmul.f32 %v1639_v3, %v847_v1  ;;  %vm2131_vm2 = vmor %vm747_vm14, %vm748_vm15 }
 0x16b   : > { %v776_v49 = vmul.f32 %v1219_v48, %v775_v50  ;;  %v752_v6 = vmul.f32 %v1221_v53, %v2096_v42  ;;  %1226 = vrsqrt.f32 %v2123_v38  ;;  %vm798_vm3 = vweird.f32 %v2069_v13 }
 0x16c   : > { %v1114_v57 = vpack.c.bf16 %v916_v46, %v915_v21  ;;  %v1223_v5 = vpop.eup %1222  ;;  %v750_v32 = vsel %vm2131_vm2, %v2033_v43, %v746_v58  ;;  %v796_v39 = vmul.f32 %v2069_v13, %v795_v60  ;;  %vm2145_vm4 = vmor %vm797_vm0, %vm798_vm3  ;;  %v919_v43 = vadd.f32 %v1658_v59, %v883_v11 }
 0x16d   : > { %v780_v44 = vsel %vm779_vm1, %v1219_v48, %v776_v49  ;;  %v802_v2 = vmul.f32 %v1223_v5, %v2098_v8  ;;  %v753_v22 = vmul.f32 %v1221_v53, %v752_v6  ;;  %vm807_vm5 = vweird.f32 %v2098_v8 }
 0x16e   : > { %1146 = vst [vmem:[%s1719_s26 + $0x58] sm:$0xff] %v1114_v57   ;;  %v848_v45 = vmul.f32 %v780_v44, %v1569_v35  ;;  %v1225_v36 = vpop.eup %1224  ;;  %v845_v35 = vmul.f32 %v750_v32, %v1551_v62  ;;  %vm758_vm6 = vweird.f32 %v1221_v53  ;;  %v800_v4 = vsel %vm2145_vm4, %v2069_v13, %v796_v39 }
 0x16f   : > { %v803_v54 = vmul.f32 %v1223_v5, %v802_v2  ;;  %v754_v16 = vmul.f32 0.5, %v753_v22  ;;  %v782_v18 = vmul.f32 %v1225_v36, %v2112_v47  ;;  %vm808_vm7 = vweird.f32 %v1223_v5 }
 0x170   : > { %v884_v19 = vmul.f32 %v1639_v3, %v848_v45  ;;  %vm757_vm8 = vweird.f32 %v2096_v42  ;;  %v881_v30 = vmul.f32 %v1639_v3, %v845_v35  ;;  %v850_v23 = vmul.f32 %v800_v4, %v1566_v34  ;;  %vm809_vm10 = vmor %vm807_vm5, %vm808_vm7 }
 0x171   : > { %v804_v12 = vmul.f32 0.5, %v803_v54  ;;  %v1227_v9 = vpop.eup %1226  ;;  %v755_v56 = vsub.f32 1.5, %v754_v16  ;;  %v783_v31 = vmul.f32 %v1225_v36, %v782_v18  ;;  %vm759_vm9 = vmor %vm757_vm8, %vm758_vm6  ;;  %vm788_vm11 = vweird.f32 %v1225_v36 }
 0x172   : > { %v920_v41 = vadd.f32 %v1658_v59, %v884_v19  ;;  %v812_v25 = vmul.f32 %v1227_v9, %v2123_v38  ;;  %vm787_vm12 = vweird.f32 %v2112_v47  ;;  %vm818_vm14 = vweird.f32 %v1227_v9 }
 0x173   : > { %v805_v48 = vsub.f32 1.5, %v804_v12  ;;  %v756_v62 = vmul.f32 %v1221_v53, %v755_v56  ;;  %v784_v0 = vmul.f32 0.5, %v783_v31  ;;  %vm789_vm13 = vmor %vm787_vm12, %vm788_vm11  ;;  %v917_v34 = vadd.f32 %v1658_v59, %v881_v30 }
 0x174   : > { %v1124_v52 = vpack.c.bf16 %v920_v41, %v919_v43  ;;  %v813_v61 = vmul.f32 %v1227_v9, %v812_v25  ;;  %v886_v8 = vmul.f32 %v1639_v3, %v850_v23  ;;  %vm817_vm15 = vweird.f32 %v2123_v38 }
 0x175   : > { %v806_v20 = vmul.f32 %v1223_v5, %v805_v48  ;;  %v760_v15 = vsel %vm759_vm9, %v1221_v53, %v756_v62  ;;  %v785_v13 = vsub.f32 1.5, %v784_v0  ;;  %vm819_vm0 = vmor %vm817_vm15, %vm818_vm14 }
 0x176   : > { %1148 = vst [vmem:[%s1719_s26 + $0x68] sm:$0xff] %v1124_v52   ;;  %v846_v37 = vmul.f32 %v760_v15, %v1561_v24  ;;  %v814_v40 = vmul.f32 0.5, %v813_v61 }
 0x177   : > { %v810_v26 = vsel %vm809_vm10, %v1223_v5, %v806_v20  ;;  %v786_v42 = vmul.f32 %v1225_v36, %v785_v13 }
 0x178   : > { %v882_v10 = vmul.f32 %v1639_v3, %v846_v37  ;;  %v815_v33 = vsub.f32 1.5, %v814_v40  ;;  %v851_v29 = vmul.f32 %v810_v26, %v1583_v7  ;;  %v922_v7 = vadd.f32 %v1658_v59, %v886_v8 }
 0x179   : > { %v790_v14 = vsel %vm789_vm13, %v1225_v36, %v786_v42 }
 0x17a   : > { %v918_v24 = vadd.f32 %v1658_v59, %v882_v10  ;;  %v849_v63 = vmul.f32 %v790_v14, %v1579_v27  ;;  %v816_v17 = vmul.f32 %v1227_v9, %v815_v33  ;;  %v887_v21 = vmul.f32 %v1639_v3, %v851_v29 }
 0x17c   : > { %v1119_v47 = vpack.c.bf16 %v918_v24, %v917_v34  ;;  %v885_v46 = vmul.f32 %v1639_v3, %v849_v63  ;;  %v820_v1 = vsel %vm819_vm0, %v1227_v9, %v816_v17  ;;  %v923_v38 = vadd.f32 %v1658_v59, %v887_v21 }
 0x17d   : > { %v852_v50 = vmul.f32 %v820_v1, %v1591_v28 }
 0x17e   : > { %1147 = vst [vmem:[%s1719_s26 + $0x60] sm:$0xff] %v1119_v47   ;;  %v921_v58 = vadd.f32 %v1658_v59, %v885_v46 }
 0x17f   : > { %v888_v27 = vmul.f32 %v1639_v3, %v852_v50 }
 0x180   : > { %v1129_v53 = vpack.c.bf16 %v922_v7, %v921_v58 }
 0x181   : > { %v924_v57 = vadd.f32 %v1658_v59, %v888_v27 }
 0x182   : > { %1149 = vst [vmem:[%s1719_s26 + $0x70] sm:$0xff] %v1129_v53  }
 0x183   : > { %v1134_v60 = vpack.c.bf16 %v924_v57, %v923_v38 }
 0x185   : > { %1150 = vst [vmem:[%s1719_s26 + $0x78] sm:$0xff] %v1134_v60  }
 0x186 PF: > { %s13_s12 = sadd.s32 1, %s1234_s12  }
 0x187   : > { %p10_p4 = scmp.ge.s32.totalorder %s13_s12, 4  }
 0x189   :  { %12 = sbr.rel (!%p10_p4) target bundleno = 1 (0x1), region = 62 }

// kernel: forward.14
= control target key start
LH: loop header
LB: loop body
LE: loop exit
PB: predicated region body
PF: predicated region fallthrough
CT: control target
= control target key end

     0   :  { %s1197_s12 = smov 0   ;;  %s1637_s0 = inlined_call_operand.vmem [shape: bf16[512,128], index: 0, kind: input, shape index: {}]   ;;  %s1638_s1 = inlined_call_operand.vmem [shape: bf16[128,384], index: 1, kind: input, shape index: {}]   ;;  %s1639_s2 = inlined_call_operand.vmem [shape: f32[1,384], index: 2, kind: input, shape index: {}]   ;;  %s1640_s3 = inlined_call_operand.vmem [shape: bf16[512,384], index: 3, kind: output, shape index: {}]  }
   0x1 LB: > { %s925_s13 = sadd.s32 4294967295, %s1175_s12   ;;  %p929_p0 = scmp.ge.s32.totalorder %s1175_s12, 1  ;;  %s1175_s12 = sphi %s1197_s12, %s13_s12  }
   0x2   : > { %p138_p1 = scmp.lt.s32.totalorder %s1175_s12, 3 }
   0x4   : > { %p139_p2 = pnand %p929_p0, %p138_p1 }
   0x5   : > { %s930_s5 = sshll.u32 (!%p139_p2), %s925_s13, 5 }
   0x6   : > { %142 = sbr.rel (%p139_p2) target bundleno = 368 (0x170), region = 32  ;;  %p164_p3 = scmp.lt.s32.totalorder (!%p139_p2), %s930_s5, 63 }
   0xb   : > { %v1084_v0 = vld [vmem:[%s1638_s1 + $0xa8] sm:$0xf]  ;;  %v1134_v1 = vld [vmem:[%s1638_s1 + $0xb0] sm:$0xf0]  ;;  %v1133_v2 = vld [vmem:[%s1638_s1 + $0xac] sm:$0xf] }
   0xc   : > { %v1085_v3 = vor.u32 %v1134_v1, %v1084_v0  ;;  %v1086_v4 = vld [vmem:[%s1638_s1 + $0xb4] sm:$0xf0]  ;;  %v1092_v5 = vld [vmem:[%s1638_s1 + $0xb0] sm:$0xf]  ;;  %v1135_v6 = vld [vmem:[%s1638_s1 + $0xb8] sm:$0xf0] }
   0xd   : > { %v1223_v7 = vor.u32 %v1133_v2, %v1086_v4  ;;  %v1225_v8 = vor.u32 %v1135_v6, %v1092_v5  ;;  %v1072_v9 = vld [vmem:[%s1638_s1 + $0x90] sm:$0xf]  ;;  %v1131_v10 = vld [vmem:[%s1638_s1 + $0x98] sm:$0xf0]  ;;  %v1130_v11 = vld [vmem:[%s1638_s1 + $0x94] sm:$0xf] }
   0xe   : > { %472 = vmatpush.bf16.msra.mxu0 %v1085_v3  ;;  %1136 = vmatpush.bf16.msra.mxu3 %v1085_v3  ;;  %v1073_v12 = vor.u32 %v1131_v10, %v1072_v9  ;;  %v1074_v13 = vld [vmem:[%s1638_s1 + $0x9c] sm:$0xf0]  ;;  %v1080_v14 = vld [vmem:[%s1638_s1 + $0x98] sm:$0xf]  ;;  %v1132_v15 = vld [vmem:[%s1638_s1 + $0xa0] sm:$0xf0] }
   0xf   : > { %561 = vmatpush.bf16.msra.mxu1 %v1223_v7  ;;  %650 = vmatpush.bf16.msra.mxu2 %v1225_v8  ;;  %v1247_v16 = vor.u32 %v1130_v11, %v1074_v13  ;;  %v1249_v17 = vor.u32 %v1132_v15, %v1080_v14  ;;  %v1060_v18 = vld [vmem:[%s1638_s1 + $0x78] sm:$0xf]  ;;  %v1128_v19 = vld [vmem:[%s1638_s1 + $0x80] sm:$0xf0]  ;;  %v1127_v20 = vld [vmem:[%s1638_s1 + $0x7c] sm:$0xf] }
  0x10   : > { %v1062_v21 = vld [vmem:[%s1638_s1 + $0x84] sm:$0xf0]  ;;  %v1068_v22 = vld [vmem:[%s1638_s1 + $0x80] sm:$0xf]  ;;  %v1129_v23 = vld [vmem:[%s1638_s1 + $0x88] sm:$0xf0]  ;;  %v1061_v24 = vor.u32 %v1128_v19, %v1060_v18 }
  0x11   : > { %v1271_v25 = vor.u32 %v1127_v20, %v1062_v21  ;;  %v1273_v26 = vor.u32 %v1129_v23, %v1068_v22  ;;  %v1048_v27 = vld [vmem:[%s1638_s1 + $0x60] sm:$0xf]  ;;  %v1125_v28 = vld [vmem:[%s1638_s1 + $0x68] sm:$0xf0]  ;;  %v1124_v29 = vld [vmem:[%s1638_s1 + $0x64] sm:$0xf] }
  0x12   : > { %473 = vmatpush.bf16.msra.mxu0 %v1073_v12  ;;  %1137 = vmatpush.bf16.msra.mxu3 %v1073_v12  ;;  %v1050_v30 = vld [vmem:[%s1638_s1 + $0x6c] sm:$0xf0]  ;;  %v1056_v31 = vld [vmem:[%s1638_s1 + $0x68] sm:$0xf]  ;;  %v1126_v32 = vld [vmem:[%s1638_s1 + $0x70] sm:$0xf0]  ;;  %v1049_v33 = vor.u32 %v1125_v28, %v1048_v27 }
  0x13   : > { %562 = vmatpush.bf16.msra.mxu1 %v1247_v16  ;;  %651 = vmatpush.bf16.msra.mxu2 %v1249_v17  ;;  %v1295_v34 = vor.u32 %v1124_v29, %v1050_v30  ;;  %v1297_v35 = vor.u32 %v1126_v32, %v1056_v31  ;;  %v1036_v36 = vld [vmem:[%s1638_s1 + $0x48] sm:$0xf]  ;;  %v1122_v37 = vld [vmem:[%s1638_s1 + $0x50] sm:$0xf0]  ;;  %v1121_v38 = vld [vmem:[%s1638_s1 + $0x4c] sm:$0xf] }
  0x14   : > { %v1038_v39 = vld [vmem:[%s1638_s1 + $0x54] sm:$0xf0]  ;;  %v1044_v40 = vld [vmem:[%s1638_s1 + $0x50] sm:$0xf]  ;;  %v1123_v41 = vld [vmem:[%s1638_s1 + $0x58] sm:$0xf0]  ;;  %v1037_v42 = vor.u32 %v1122_v37, %v1036_v36 }
  0x15   : > { %v1024_v43 = vld [vmem:[%s1638_s1 + $0x30] sm:$0xf]  ;;  %v1119_v44 = vld [vmem:[%s1638_s1 + $0x38] sm:$0xf0]  ;;  %v1041_v45 = vor.u32 %v1121_v38, %v1038_v39  ;;  %v1325_v46 = vor.u32 %v1123_v41, %v1044_v40  ;;  %v1118_v47 = vld [vmem:[%s1638_s1 + $0x34] sm:$0xf] }
  0x16   : > { %474 = vmatpush.bf16.msra.mxu0 %v1061_v24  ;;  %1138 = vmatpush.bf16.msra.mxu3 %v1061_v24  ;;  %v1026_v48 = vld [vmem:[%s1638_s1 + $0x3c] sm:$0xf0]  ;;  %v1032_v49 = vld [vmem:[%s1638_s1 + $0x38] sm:$0xf]  ;;  %v1120_v50 = vld [vmem:[%s1638_s1 + $0x40] sm:$0xf0]  ;;  %v1025_v51 = vor.u32 %v1119_v44, %v1024_v43 }
  0x17   : > { %563 = vmatpush.bf16.msra.mxu1 %v1271_v25  ;;  %652 = vmatpush.bf16.msra.mxu2 %v1273_v26  ;;  %v1012_v52 = vld [vmem:[%s1638_s1 + $0x18] sm:$0xf]  ;;  %v1029_v53 = vor.u32 %v1118_v47, %v1026_v48  ;;  %v1345_v54 = vor.u32 %v1120_v50, %v1032_v49  ;;  %v1116_v55 = vld [vmem:[%s1638_s1 + $0x20] sm:$0xf0]  ;;  %v1115_v56 = vld [vmem:[%s1638_s1 + $0x1c] sm:$0xf] }
  0x18   : > { %s1642_s5 = smov (!%p164_p3, %s930_s5), 63  ;;  %v1014_v57 = vld [vmem:[%s1638_s1 + $0x24] sm:$0xf0]  ;;  %v1020_v58 = vld [vmem:[%s1638_s1 + $0x20] sm:$0xf]  ;;  %v1013_v60 = vor.u32 %v1116_v55, %v1012_v52 }
  0x19   : > { %v1117_v59 = vld [vmem:[%s1638_s1 + $0x28] sm:$0xf0]  ;;  %v1000_v61 = vld [vmem:[%s1638_s1] sm:$0xf]  ;;  %v1017_v62 = vor.u32 %v1115_v56, %v1014_v57  ;;  %v1112_v1 = vld [vmem:[%s1638_s1 + $0x4] sm:$0xf] }
  0x1a   : > { %475 = vmatpush.bf16.msra.mxu0 %v1049_v33  ;;  %1139 = vmatpush.bf16.msra.mxu3 %v1049_v33  ;;  %v1021_v63 = vor.u32 %v1117_v59, %v1020_v58  ;;  %v1113_v0 = vld [vmem:[%s1638_s1 + $0x8] sm:$0xf0]  ;;  %s931_s29 = sshll.u32 %s1642_s5, 2  ;;  %v1002_v2 = vld [vmem:[%s1638_s1 + $0xc] sm:$0xf0]  ;;  %s1160_s16 = smul.u32 12, %s1642_s5 }
  0x1b   : > { %564 = vmatpush.bf16.msra.mxu1 %v1295_v34  ;;  %653 = vmatpush.bf16.msra.mxu2 %v1297_v35  ;;  %v1008_v3 = vld [vmem:[%s1638_s1 + $0x8] sm:$0xf]  ;;  %v1114_v4 = vld [vmem:[%s1638_s1 + $0x10] sm:$0xf0]  ;;  %v1001_v5 = vor.u32 %v1113_v0, %v1000_v61  ;;  %s1387_s13 = scalar_lea.vmem %s1637_s0, %s931_s29  ;;  %v1005_v6 = vor.u32 %v1112_v1, %v1002_v2  ;;  %v240_v20 = vld [vmem:[%s1639_s2] sm:$0x7] }
  0x1c   : > { %v1009_v9 = vor.u32 %v1114_v4, %v1008_v3  ;;  %v1096_v10 = vld [vmem:[%s1387_s13] sm:$0xff]  ;;  %v1097_v12 = vld [vmem:[%s1387_s13 + $0x8] sm:$0xff]  ;;  %v1405_v14 = vld [vmem:[%s1387_s13 + $0x70] sm:$0xff]  ;;  %v1430_v21 = vperm.slane %v240_v20, 0  ;;  %v1432_v22 = vperm.slane %v240_v20, 1  ;;  %s1441_s19 = scalar_lea.vmem %s1640_s3, %s1160_s16  ;;  %v1444_v29 = vperm.slane %v240_v20, 2 }
  0x1d   : > { %v1391_v11 = vld [vmem:[%s1387_s13 + $0x60] sm:$0xff]  ;;  %v1400_v13 = vld [vmem:[%s1387_s13 + $0x68] sm:$0xff]  ;;  %v1099_v15 = vld [vmem:[%s1387_s13 + $0x18] sm:$0xff] }
  0x1e   : > { %476 = vmatpush.bf16.msra.mxu0 %v1037_v42  ;;  %1140 = vmatpush.bf16.msra.mxu3 %v1037_v42  ;;  %v1102_v18 = vld [vmem:[%s1387_s13 + $0x30] sm:$0xff]  ;;  %v1103_v19 = vld [vmem:[%s1387_s13 + $0x38] sm:$0xff]  ;;  %v1104_v23 = vld [vmem:[%s1387_s13 + $0x40] sm:$0xff] }
  0x1f   : > { %565 = vmatpush.bf16.msra.mxu1 %v1041_v45  ;;  %654 = vmatpush.bf16.msra.mxu2 %v1325_v46  ;;  %v1105_v41 = vld [vmem:[%s1387_s13 + $0x48] sm:$0xff] }
  0x22   : > { %477 = vmatpush.bf16.msra.mxu0 %v1025_v51  ;;  %1141 = vmatpush.bf16.msra.mxu3 %v1025_v51 }
  0x23   : > { %566 = vmatpush.bf16.msra.mxu1 %v1029_v53  ;;  %655 = vmatpush.bf16.msra.mxu2 %v1345_v54 }
  0x26   : > { %478 = vmatpush.bf16.msra.mxu0 %v1013_v60  ;;  %1142 = vmatpush.bf16.msra.mxu3 %v1013_v60  ;;  %v1106_v60 = vld [vmem:[%s1387_s13 + $0x50] sm:$0xff] }
  0x27   : > { %567 = vmatpush.bf16.msra.mxu1 %v1017_v62  ;;  %656 = vmatpush.bf16.msra.mxu2 %v1021_v63 }
  0x2a   : > { %479 = vmatpush.bf16.msra.mxu0 %v1001_v5  ;;  %1143 = vmatpush.bf16.msra.mxu3 %v1001_v5 }
  0x2b   : > { %568 = vmatpush.bf16.msra.mxu1 %v1005_v6  ;;  %657 = vmatpush.bf16.msra.mxu2 %v1009_v9 }
  0x2d   : > { %480 = vmatmul.bf16.vlgmr.msra.gmra.mxu0 %v1096_v10  ;;  %540 = vmatmul.bf16.vlgmr.msra.gmra.mxu3 %v1391_v11 }
  0x2e   : > { %1144 = vmatpush.bf16.msrb.mxu3 %v1223_v7  ;;  %569 = vmatmul.bf16.vlgmr.msra.gmra.mxu1 %v1096_v10  ;;  %v1098_v7 = vld [vmem:[%s1387_s13 + $0x10] sm:$0xff] }
  0x2f   : > { %658 = vmatmul.bf16.vlgmr.msra.gmra.mxu2 %v1096_v10 }
  0x32   : > { %1145 = vmatpush.bf16.msrb.mxu3 %v1247_v16  ;;  %v1414_v16 = vld [vmem:[%s1387_s13 + $0x78] sm:$0xff] }
  0x36   : > { %1146 = vmatpush.bf16.msrb.mxu3 %v1271_v25 }
  0x3a   : > { %1147 = vmatpush.bf16.msrb.mxu3 %v1295_v34 }
  0x3d   : > { %485 = vmatmul.bf16.gmra.mxu0 %v1097_v12  ;;  %545 = vmatmul.bf16.gmra.mxu3 %v1400_v13 }
  0x3e   : > { %1148 = vmatpush.bf16.msrb.mxu3 %v1041_v45  ;;  %574 = vmatmul.bf16.gmra.mxu1 %v1097_v12 }
  0x3f   : > { %663 = vmatmul.bf16.gmra.mxu2 %v1097_v12 }
  0x42   : > { %1149 = vmatpush.bf16.msrb.mxu3 %v1029_v53 }
  0x46   : > { %1150 = vmatpush.bf16.msrb.mxu3 %v1017_v62 }
  0x4a   : > { %1151 = vmatpush.bf16.msrb.mxu3 %v1005_v6 }
  0x4d   : > { %490 = vmatmul.bf16.gmra.mxu0 %v1098_v7  ;;  %550 = vmatmul.bf16.gmra.mxu3 %v1405_v14 }
  0x4e   : > { %1152 = vmatpush.bf16.msra.mxu3 %v1225_v8  ;;  %579 = vmatmul.bf16.gmra.mxu1 %v1098_v7  ;;  %v1100_v8 = vld [vmem:[%s1387_s13 + $0x20] sm:$0xff] }
  0x4f   : > { %668 = vmatmul.bf16.gmra.mxu2 %v1098_v7 }
  0x52   : > { %1153 = vmatpush.bf16.msra.mxu3 %v1249_v17  ;;  %v1101_v17 = vld [vmem:[%s1387_s13 + $0x28] sm:$0xff] }
  0x56   : > { %1154 = vmatpush.bf16.msra.mxu3 %v1273_v26 }
  0x5a   : > { %1155 = vmatpush.bf16.msra.mxu3 %v1297_v35 }
  0x5d   : > { %495 = vmatmul.bf16.gmra.mxu0 %v1099_v15  ;;  %555 = vmatmul.bf16.gmra.mxu3 %v1414_v16 }
  0x5e   : > { %1156 = vmatpush.bf16.msra.mxu3 %v1325_v46  ;;  %584 = vmatmul.bf16.gmra.mxu1 %v1099_v15 }
  0x5f   : > { %673 = vmatmul.bf16.gmra.mxu2 %v1099_v15 }
  0x62   : > { %1157 = vmatpush.bf16.msra.mxu3 %v1345_v54 }
  0x66   : > { %1158 = vmatpush.bf16.msra.mxu3 %v1021_v63 }
  0x6a   : > { %1159 = vmatpush.bf16.msra.mxu3 %v1009_v9 }
  0x6d   : > { %500 = vmatmul.bf16.gmra.mxu0 %v1100_v8  ;;  %629 = vmatmul.bf16.vlgmr.msrb.gmra.mxu3 %v1391_v11 }
  0x6e   : > { %589 = vmatmul.bf16.gmra.mxu1 %v1100_v8 }
  0x6f   : > { %678 = vmatmul.bf16.gmra.mxu2 %v1100_v8  ;;  %v1107_v8 = vld [vmem:[%s1387_s13 + $0x58] sm:$0xff] }
  0x7d   : > { %505 = vmatmul.bf16.gmra.mxu0 %v1101_v17  ;;  %634 = vmatmul.bf16.gmra.mxu3 %v1400_v13 }
  0x7e   : > { %594 = vmatmul.bf16.gmra.mxu1 %v1101_v17 }
  0x7f   : > { %683 = vmatmul.bf16.gmra.mxu2 %v1101_v17 }
  0x8d   : > { %510 = vmatmul.bf16.gmra.mxu0 %v1102_v18  ;;  %639 = vmatmul.bf16.gmra.mxu3 %v1405_v14 }
  0x8e   : > { %599 = vmatmul.bf16.gmra.mxu1 %v1102_v18 }
  0x8f   : > { %688 = vmatmul.bf16.gmra.mxu2 %v1102_v18 }
  0x9d   : > { %515 = vmatmul.bf16.gmra.mxu0 %v1103_v19  ;;  %644 = vmatmul.bf16.gmra.mxu3 %v1414_v16 }
  0x9e   : > { %604 = vmatmul.bf16.gmra.mxu1 %v1103_v19 }
  0x9f   : > { %693 = vmatmul.bf16.gmra.mxu2 %v1103_v19 }
  0xaa   : > { %v481_v24 = vpop.f32.mrf.mxu0 }
  0xab   : > { %v482_v25 = vadd.f32 %v481_v24, %v1430_v21  ;;  %v570_v26 = vpop.f32.mrf.mxu1 }
  0xac   : > { %v571_v27 = vadd.f32 %v570_v26, %v1432_v22 }
  0xad   : > { %520 = vmatmul.bf16.gmra.mxu0 %v1104_v23  ;;  %718 = vmatmul.bf16.vlgmr.msra.gmra.mxu3 %v1391_v11 }
  0xae   : > { %v739_v28 = vpack.c.bf16 %v571_v27, %v482_v25  ;;  %609 = vmatmul.bf16.gmra.mxu1 %v1104_v23 }
  0xaf   : > { %698 = vmatmul.bf16.gmra.mxu2 %v1104_v23 }
  0xb0   : > { %803 = vst [vmem:[%s1441_s19] sm:$0xff] %v739_v28  ;;  %v1447_v30 = vpop.f32.mrf.mxu3 }
  0xb2   : > { %v659_v31 = vpop.f32.mrf.mxu2  ;;  %v483_v33 = vpop.f32.mrf.mxu0 }
  0xb3   : > { %v660_v32 = vadd.f32 %v659_v31, %v1444_v29  ;;  %v484_v34 = vadd.f32 %v483_v33, %v1430_v21  ;;  %v572_v35 = vpop.f32.mrf.mxu1 }
  0xb4   : > { %v573_v37 = vadd.f32 %v572_v35, %v1432_v22 }
  0xb5   : > { %v740_v36 = vpack.c.bf16 %v660_v32, %v660_v32 }
  0xb6   : > { %v741_v38 = vpack.c.bf16 %v573_v37, %v484_v34 }
  0xb7   : > { %804 = vst [vmem:[%s1441_s19 + $0x8] sm:$0xf] %v740_v36 }
  0xb8   : > { %805 = vst [vmem:[%s1441_s19 + $0xc] sm:$0xff] %v741_v38  ;;  %v1454_v39 = vpop.f32.mrf.mxu3 }
  0xba   : > { %v661_v40 = vpop.f32.mrf.mxu2  ;;  %v486_v43 = vpop.f32.mrf.mxu0 }
  0xbb   : > { %v662_v42 = vadd.f32 %v661_v40, %v1444_v29  ;;  %v487_v44 = vadd.f32 %v486_v43, %v1430_v21  ;;  %v575_v45 = vpop.f32.mrf.mxu1 }
  0xbc   : > { %v576_v47 = vadd.f32 %v575_v45, %v1432_v22 }
  0xbd   : > { %v742_v46 = vpack.c.bf16 %v662_v42, %v662_v42  ;;  %525 = vmatmul.bf16.gmra.mxu0 %v1105_v41  ;;  %723 = vmatmul.bf16.gmra.mxu3 %v1400_v13 }
  0xbe   : > { %v743_v48 = vpack.c.bf16 %v576_v47, %v487_v44  ;;  %614 = vmatmul.bf16.gmra.mxu1 %v1105_v41  ;;  %v542_v47 = vadd.f32 %v1447_v30, %v1430_v21 }
  0xbf   : > { %806 = vst [vmem:[%s1441_s19 + $0x14] sm:$0xf] %v742_v46  ;;  %703 = vmatmul.bf16.gmra.mxu2 %v1105_v41 }
  0xc0   : > { %807 = vst [vmem:[%s1441_s19 + $0x18] sm:$0xff] %v743_v48  ;;  %v1463_v49 = vpop.f32.mrf.mxu3 }
  0xc2   : > { %v664_v50 = vpop.f32.mrf.mxu2  ;;  %v488_v52 = vpop.f32.mrf.mxu0 }
  0xc3   : > { %v665_v51 = vadd.f32 %v664_v50, %v1444_v29  ;;  %v489_v53 = vadd.f32 %v488_v52, %v1430_v21  ;;  %v577_v54 = vpop.f32.mrf.mxu1 }
  0xc4   : > { %v578_v56 = vadd.f32 %v577_v54, %v1432_v22 }
  0xc5   : > { %v744_v55 = vpack.c.bf16 %v665_v51, %v665_v51 }
  0xc6   : > { %v745_v57 = vpack.c.bf16 %v578_v56, %v489_v53 }
  0xc7   : > { %808 = vst [vmem:[%s1441_s19 + $0x20] sm:$0xf] %v744_v55 }
  0xc8   : > { %809 = vst [vmem:[%s1441_s19 + $0x24] sm:$0xff] %v745_v57  ;;  %v1470_v58 = vpop.f32.mrf.mxu3 }
  0xca   : > { %v666_v59 = vpop.f32.mrf.mxu2  ;;  %v491_v62 = vpop.f32.mrf.mxu0 }
  0xcb   : > { %v667_v61 = vadd.f32 %v666_v59, %v1444_v29  ;;  %v492_v63 = vadd.f32 %v491_v62, %v1430_v21  ;;  %v580_v0 = vpop.f32.mrf.mxu1 }
  0xcc   : > { %v581_v2 = vadd.f32 %v580_v0, %v1432_v22 }
  0xcd   : > { %v746_v1 = vpack.c.bf16 %v667_v61, %v667_v61  ;;  %530 = vmatmul.bf16.gmra.mxu0 %v1106_v60  ;;  %728 = vmatmul.bf16.gmra.mxu3 %v1405_v14 }
  0xce   : > { %v747_v3 = vpack.c.bf16 %v581_v2, %v492_v63  ;;  %619 = vmatmul.bf16.gmra.mxu1 %v1106_v60 }
  0xcf   : > { %810 = vst [vmem:[%s1441_s19 + $0x2c] sm:$0xf] %v746_v1  ;;  %708 = vmatmul.bf16.gmra.mxu2 %v1106_v60  ;;  %v544_v60 = vadd.f32 %v1454_v39, %v1430_v21 }
  0xd0   : > { %811 = vst [vmem:[%s1441_s19 + $0x30] sm:$0xff] %v747_v3  ;;  %v1479_v4 = vpop.f32.mrf.mxu3 }
  0xd2   : > { %v669_v5 = vpop.f32.mrf.mxu2  ;;  %v493_v9 = vpop.f32.mrf.mxu0 }
  0xd3   : > { %v670_v6 = vadd.f32 %v669_v5, %v1444_v29  ;;  %v494_v10 = vadd.f32 %v493_v9, %v1430_v21  ;;  %v582_v11 = vpop.f32.mrf.mxu1 }
  0xd4   : > { %v583_v13 = vadd.f32 %v582_v11, %v1432_v22 }
  0xd5   : > { %v748_v12 = vpack.c.bf16 %v670_v6, %v670_v6 }
  0xd6   : > { %v749_v7 = vpack.c.bf16 %v583_v13, %v494_v10  ;;  %v547_v10 = vadd.f32 %v1463_v49, %v1430_v21 }
  0xd7   : > { %812 = vst [vmem:[%s1441_s19 + $0x38] sm:$0xf] %v748_v12 }
  0xd8   : > { %813 = vst [vmem:[%s1441_s19 + $0x3c] sm:$0xff] %v749_v7  ;;  %v1486_v14 = vpop.f32.mrf.mxu3 }
  0xda   : > { %v671_v15 = vpop.f32.mrf.mxu2  ;;  %v496_v18 = vpop.f32.mrf.mxu0 }
  0xdb   : > { %v672_v17 = vadd.f32 %v671_v15, %v1444_v29  ;;  %v497_v19 = vadd.f32 %v496_v18, %v1430_v21  ;;  %v585_v20 = vpop.f32.mrf.mxu1 }
  0xdc   : > { %v586_v24 = vadd.f32 %v585_v20, %v1432_v22 }
  0xdd   : > { %v750_v23 = vpack.c.bf16 %v672_v17, %v672_v17  ;;  %535 = vmatmul.bf16.gmra.mxu0 %v1107_v8  ;;  %733 = vmatmul.bf16.gmra.mxu3 %v1414_v16 }
  0xde   : > { %v751_v25 = vpack.c.bf16 %v586_v24, %v497_v19  ;;  %624 = vmatmul.bf16.gmra.mxu1 %v1107_v8 }
  0xdf   : > { %814 = vst [vmem:[%s1441_s19 + $0x44] sm:$0xf] %v750_v23  ;;  %713 = vmatmul.bf16.gmra.mxu2 %v1107_v8  ;;  %v549_v23 = vadd.f32 %v1470_v58, %v1430_v21 }
  0xe0   : > { %815 = vst [vmem:[%s1441_s19 + $0x48] sm:$0xff] %v751_v25  ;;  %v1495_v26 = vpop.f32.mrf.mxu3 }
  0xe2   : > { %v674_v27 = vpop.f32.mrf.mxu2  ;;  %v498_v31 = vpop.f32.mrf.mxu0 }
  0xe3   : > { %v675_v28 = vadd.f32 %v674_v27, %v1444_v29  ;;  %v499_v32 = vadd.f32 %v498_v31, %v1430_v21  ;;  %v587_v33 = vpop.f32.mrf.mxu1 }
  0xe4   : > { %v588_v16 = vadd.f32 %v587_v33, %v1432_v22 }
  0xe5   : > { %v752_v34 = vpack.c.bf16 %v675_v28, %v675_v28 }
  0xe6   : > { %v753_v35 = vpack.c.bf16 %v588_v16, %v499_v32 }
  0xe7   : > { %816 = vst [vmem:[%s1441_s19 + $0x50] sm:$0xf] %v752_v34 }
  0xe8   : > { %817 = vst [vmem:[%s1441_s19 + $0x54] sm:$0xff] %v753_v35  ;;  %v1502_v36 = vpop.f32.mrf.mxu3 }
  0xea   : > { %v676_v37 = vpop.f32.mrf.mxu2  ;;  %v501_v40 = vpop.f32.mrf.mxu0 }
  0xeb   : > { %v677_v38 = vadd.f32 %v676_v37, %v1444_v29  ;;  %v502_v41 = vadd.f32 %v501_v40, %v1430_v21  ;;  %v590_v42 = vpop.f32.mrf.mxu1  ;;  %v552_v37 = vadd.f32 %v1479_v4, %v1430_v21 }
  0xec   : > { %v591_v44 = vadd.f32 %v590_v42, %v1432_v22 }
  0xed   : > { %v754_v43 = vpack.c.bf16 %v677_v38, %v677_v38 }
  0xee   : > { %v755_v45 = vpack.c.bf16 %v591_v44, %v502_v41 }
  0xef   : > { %818 = vst [vmem:[%s1441_s19 + $0x5c] sm:$0xf] %v754_v43 }
  0xf0   : > { %819 = vst [vmem:[%s1441_s19 + $0x60] sm:$0xff] %v755_v45  ;;  %v630_v46 = vpop.f32.mrf.mxu3 }
  0xf1   : > { %v631_v48 = vadd.f32 %v630_v46, %v1432_v22 }
  0xf2   : > { %v679_v50 = vpop.f32.mrf.mxu2  ;;  %v503_v52 = vpop.f32.mrf.mxu0 }
  0xf3   : > { %v680_v51 = vadd.f32 %v679_v50, %v1444_v29  ;;  %v787_v53 = vpack.c.bf16 %v631_v48, %v542_v47  ;;  %v504_v54 = vadd.f32 %v503_v52, %v1430_v21  ;;  %v592_v55 = vpop.f32.mrf.mxu1  ;;  %v554_v50 = vadd.f32 %v1486_v14, %v1430_v21 }
  0xf4   : > { %v593_v57 = vadd.f32 %v592_v55, %v1432_v22 }
  0xf5   : > { %v756_v56 = vpack.c.bf16 %v680_v51, %v680_v51  ;;  %851 = vst [vmem:[%s1441_s19 + $0x120] sm:$0xff] %v787_v53 }
  0xf6   : > { %v757_v59 = vpack.c.bf16 %v593_v57, %v504_v54 }
  0xf7   : > { %820 = vst [vmem:[%s1441_s19 + $0x68] sm:$0xf] %v756_v56 }
  0xf8   : > { %821 = vst [vmem:[%s1441_s19 + $0x6c] sm:$0xff] %v757_v59  ;;  %v632_v30 = vpop.f32.mrf.mxu3 }
  0xf9   : > { %v633_v61 = vadd.f32 %v632_v30, %v1432_v22 }
  0xfa   : > { %v681_v62 = vpop.f32.mrf.mxu2  ;;  %v506_v0 = vpop.f32.mrf.mxu0 }
  0xfb   : > { %v682_v63 = vadd.f32 %v681_v62, %v1444_v29  ;;  %v789_v1 = vpack.c.bf16 %v633_v61, %v544_v60  ;;  %v507_v2 = vadd.f32 %v506_v0, %v1430_v21  ;;  %v595_v3 = vpop.f32.mrf.mxu1  ;;  %v557_v61 = vadd.f32 %v1495_v26, %v1430_v21 }
  0xfc   : > { %v596_v6 = vadd.f32 %v595_v3, %v1432_v22 }
  0xfd   : > { %v758_v5 = vpack.c.bf16 %v682_v63, %v682_v63  ;;  %853 = vst [vmem:[%s1441_s19 + $0x12c] sm:$0xff] %v789_v1 }
  0xfe   : > { %v759_v9 = vpack.c.bf16 %v596_v6, %v507_v2 }
  0xff   : > { %822 = vst [vmem:[%s1441_s19 + $0x74] sm:$0xf] %v758_v5 }
 0x100   : > { %823 = vst [vmem:[%s1441_s19 + $0x78] sm:$0xff] %v759_v9  ;;  %v635_v39 = vpop.f32.mrf.mxu3 }
 0x101   : > { %v636_v11 = vadd.f32 %v635_v39, %v1432_v22 }
 0x102   : > { %v684_v12 = vpop.f32.mrf.mxu2  ;;  %v508_v7 = vpop.f32.mrf.mxu0 }
 0x103   : > { %v685_v13 = vadd.f32 %v684_v12, %v1444_v29  ;;  %v791_v15 = vpack.c.bf16 %v636_v11, %v547_v10  ;;  %v509_v8 = vadd.f32 %v508_v7, %v1430_v21  ;;  %v597_v17 = vpop.f32.mrf.mxu1  ;;  %v559_v10 = vadd.f32 %v1502_v36, %v1430_v21 }
 0x104   : > { %v598_v19 = vadd.f32 %v597_v17, %v1432_v22 }
 0x105   : > { %v760_v18 = vpack.c.bf16 %v685_v13, %v685_v13  ;;  %855 = vst [vmem:[%s1441_s19 + $0x138] sm:$0xff] %v791_v15 }
 0x106   : > { %v761_v20 = vpack.c.bf16 %v598_v19, %v509_v8 }
 0x107   : > { %824 = vst [vmem:[%s1441_s19 + $0x80] sm:$0xf] %v760_v18 }
 0x108   : > { %825 = vst [vmem:[%s1441_s19 + $0x84] sm:$0xff] %v761_v20  ;;  %v637_v49 = vpop.f32.mrf.mxu3 }
 0x109   : > { %v638_v24 = vadd.f32 %v637_v49, %v1432_v22 }
 0x10a   : > { %v686_v25 = vpop.f32.mrf.mxu2  ;;  %v511_v28 = vpop.f32.mrf.mxu0 }
 0x10b   : > { %v687_v27 = vadd.f32 %v686_v25, %v1444_v29  ;;  %v793_v31 = vpack.c.bf16 %v638_v24, %v549_v23  ;;  %v512_v32 = vadd.f32 %v511_v28, %v1430_v21  ;;  %v600_v33 = vpop.f32.mrf.mxu1 }
 0x10c   : > { %v601_v16 = vadd.f32 %v600_v33, %v1432_v22 }
 0x10d   : > { %v762_v34 = vpack.c.bf16 %v687_v27, %v687_v27  ;;  %857 = vst [vmem:[%s1441_s19 + $0x144] sm:$0xff] %v793_v31 }
 0x10e   : > { %v763_v35 = vpack.c.bf16 %v601_v16, %v512_v32 }
 0x10f   : > { %826 = vst [vmem:[%s1441_s19 + $0x8c] sm:$0xf] %v762_v34 }
 0x110   : > { %827 = vst [vmem:[%s1441_s19 + $0x90] sm:$0xff] %v763_v35  ;;  %v640_v58 = vpop.f32.mrf.mxu3 }
 0x111   : > { %v641_v38 = vadd.f32 %v640_v58, %v1432_v22 }
 0x112   : > { %v689_v40 = vpop.f32.mrf.mxu2  ;;  %v513_v42 = vpop.f32.mrf.mxu0 }
 0x113   : > { %v690_v41 = vadd.f32 %v689_v40, %v1444_v29  ;;  %v795_v43 = vpack.c.bf16 %v641_v38, %v552_v37  ;;  %v514_v44 = vadd.f32 %v513_v42, %v1430_v21  ;;  %v602_v45 = vpop.f32.mrf.mxu1 }
 0x114   : > { %v603_v47 = vadd.f32 %v602_v45, %v1432_v22 }
 0x115   : > { %v764_v46 = vpack.c.bf16 %v690_v41, %v690_v41  ;;  %859 = vst [vmem:[%s1441_s19 + $0x150] sm:$0xff] %v795_v43 }
 0x116   : > { %v765_v48 = vpack.c.bf16 %v603_v47, %v514_v44 }
 0x117   : > { %828 = vst [vmem:[%s1441_s19 + $0x98] sm:$0xf] %v764_v46 }
 0x118   : > { %829 = vst [vmem:[%s1441_s19 + $0x9c] sm:$0xff] %v765_v48  ;;  %v642_v4 = vpop.f32.mrf.mxu3 }
 0x119   : > { %v643_v51 = vadd.f32 %v642_v4, %v1432_v22 }
 0x11a   : > { %v691_v52 = vpop.f32.mrf.mxu2  ;;  %v516_v54 = vpop.f32.mrf.mxu0 }
 0x11b   : > { %v692_v53 = vadd.f32 %v691_v52, %v1444_v29  ;;  %v797_v55 = vpack.c.bf16 %v643_v51, %v554_v50  ;;  %v517_v56 = vadd.f32 %v516_v54, %v1430_v21  ;;  %v605_v57 = vpop.f32.mrf.mxu1 }
 0x11c   : > { %v606_v30 = vadd.f32 %v605_v57, %v1432_v22 }
 0x11d   : > { %v766_v59 = vpack.c.bf16 %v692_v53, %v692_v53  ;;  %861 = vst [vmem:[%s1441_s19 + $0x15c] sm:$0xff] %v797_v55 }
 0x11e   : > { %v767_v60 = vpack.c.bf16 %v606_v30, %v517_v56 }
 0x11f   : > { %830 = vst [vmem:[%s1441_s19 + $0xa4] sm:$0xf] %v766_v59 }
 0x120   : > { %831 = vst [vmem:[%s1441_s19 + $0xa8] sm:$0xff] %v767_v60  ;;  %v645_v14 = vpop.f32.mrf.mxu3 }
 0x121   : > { %v646_v62 = vadd.f32 %v645_v14, %v1432_v22 }
 0x122   : > { %v694_v63 = vpop.f32.mrf.mxu2  ;;  %v518_v1 = vpop.f32.mrf.mxu0 }
 0x123   : > { %v695_v0 = vadd.f32 %v694_v63, %v1444_v29  ;;  %v799_v2 = vpack.c.bf16 %v646_v62, %v557_v61  ;;  %v519_v3 = vadd.f32 %v518_v1, %v1430_v21  ;;  %v607_v5 = vpop.f32.mrf.mxu1 }
 0x124   : > { %v608_v9 = vadd.f32 %v607_v5, %v1432_v22 }
 0x125   : > { %v768_v6 = vpack.c.bf16 %v695_v0, %v695_v0  ;;  %863 = vst [vmem:[%s1441_s19 + $0x168] sm:$0xff] %v799_v2 }
 0x126   : > { %v769_v39 = vpack.c.bf16 %v608_v9, %v519_v3 }
 0x127   : > { %832 = vst [vmem:[%s1441_s19 + $0xb0] sm:$0xf] %v768_v6 }
 0x128   : > { %833 = vst [vmem:[%s1441_s19 + $0xb4] sm:$0xff] %v769_v39  ;;  %v647_v26 = vpop.f32.mrf.mxu3 }
 0x129   : > { %v648_v11 = vadd.f32 %v647_v26, %v1432_v22 }
 0x12a   : > { %v696_v12 = vpop.f32.mrf.mxu2  ;;  %v521_v7 = vpop.f32.mrf.mxu0 }
 0x12b   : > { %v697_v13 = vadd.f32 %v696_v12, %v1444_v29  ;;  %v801_v15 = vpack.c.bf16 %v648_v11, %v559_v10  ;;  %v522_v8 = vadd.f32 %v521_v7, %v1430_v21  ;;  %v610_v17 = vpop.f32.mrf.mxu1 }
 0x12c   : > { %v611_v19 = vadd.f32 %v610_v17, %v1432_v22 }
 0x12d   : > { %v770_v18 = vpack.c.bf16 %v697_v13, %v697_v13  ;;  %865 = vst [vmem:[%s1441_s19 + $0x174] sm:$0xff] %v801_v15 }
 0x12e   : > { %v771_v20 = vpack.c.bf16 %v611_v19, %v522_v8 }
 0x12f   : > { %834 = vst [vmem:[%s1441_s19 + $0xbc] sm:$0xf] %v770_v18 }
 0x130   : > { %835 = vst [vmem:[%s1441_s19 + $0xc0] sm:$0xff] %v771_v20  ;;  %v719_v36 = vpop.f32.mrf.mxu3 }
 0x131   : > { %v720_v23 = vadd.f32 %v719_v36, %v1444_v29 }
 0x132   : > { %v699_v49 = vpop.f32.mrf.mxu2  ;;  %v523_v25 = vpop.f32.mrf.mxu0 }
 0x133   : > { %v700_v24 = vadd.f32 %v699_v49, %v1444_v29  ;;  %v788_v27 = vpack.c.bf16 %v720_v23, %v720_v23  ;;  %v524_v28 = vadd.f32 %v523_v25, %v1430_v21  ;;  %v612_v31 = vpop.f32.mrf.mxu1 }
 0x134   : > { %v613_v33 = vadd.f32 %v612_v31, %v1432_v22 }
 0x135   : > { %v772_v32 = vpack.c.bf16 %v700_v24, %v700_v24  ;;  %852 = vst [vmem:[%s1441_s19 + $0x128] sm:$0xf] %v788_v27 }
 0x136   : > { %v773_v34 = vpack.c.bf16 %v613_v33, %v524_v28 }
 0x137   : > { %836 = vst [vmem:[%s1441_s19 + $0xc8] sm:$0xf] %v772_v32 }
 0x138   : > { %837 = vst [vmem:[%s1441_s19 + $0xcc] sm:$0xff] %v773_v34  ;;  %v721_v16 = vpop.f32.mrf.mxu3 }
 0x139   : > { %v722_v58 = vadd.f32 %v721_v16, %v1444_v29 }
 0x13a   : > { %v701_v35 = vpop.f32.mrf.mxu2  ;;  %v526_v38 = vpop.f32.mrf.mxu0 }
 0x13b   : > { %v702_v37 = vadd.f32 %v701_v35, %v1444_v29  ;;  %v790_v40 = vpack.c.bf16 %v722_v58, %v722_v58  ;;  %v527_v41 = vadd.f32 %v526_v38, %v1430_v21  ;;  %v615_v42 = vpop.f32.mrf.mxu1 }
 0x13c   : > { %v616_v44 = vadd.f32 %v615_v42, %v1432_v22 }
 0x13d   : > { %v774_v43 = vpack.c.bf16 %v702_v37, %v702_v37  ;;  %854 = vst [vmem:[%s1441_s19 + $0x134] sm:$0xf] %v790_v40 }
 0x13e   : > { %v775_v45 = vpack.c.bf16 %v616_v44, %v527_v41 }
 0x13f   : > { %838 = vst [vmem:[%s1441_s19 + $0xd4] sm:$0xf] %v774_v43 }
 0x140   : > { %839 = vst [vmem:[%s1441_s19 + $0xd8] sm:$0xff] %v775_v45  ;;  %v724_v46 = vpop.f32.mrf.mxu3 }
 0x141   : > { %v725_v48 = vadd.f32 %v724_v46, %v1444_v29 }
 0x142   : > { %v704_v47 = vpop.f32.mrf.mxu2  ;;  %v528_v50 = vpop.f32.mrf.mxu0 }
 0x143   : > { %v705_v4 = vadd.f32 %v704_v47, %v1444_v29  ;;  %v792_v51 = vpack.c.bf16 %v725_v48, %v725_v48  ;;  %v529_v52 = vadd.f32 %v528_v50, %v1430_v21  ;;  %v617_v53 = vpop.f32.mrf.mxu1 }
 0x144   : > { %v618_v55 = vadd.f32 %v617_v53, %v1432_v22 }
 0x145   : > { %v776_v54 = vpack.c.bf16 %v705_v4, %v705_v4  ;;  %856 = vst [vmem:[%s1441_s19 + $0x140] sm:$0xf] %v792_v51 }
 0x146   : > { %v777_v56 = vpack.c.bf16 %v618_v55, %v529_v52 }
 0x147   : > { %840 = vst [vmem:[%s1441_s19 + $0xe0] sm:$0xf] %v776_v54 }
 0x148   : > { %841 = vst [vmem:[%s1441_s19 + $0xe4] sm:$0xff] %v777_v56  ;;  %v726_v57 = vpop.f32.mrf.mxu3 }
 0x149   : > { %v727_v30 = vadd.f32 %v726_v57, %v1444_v29 }
 0x14a   : > { %v706_v59 = vpop.f32.mrf.mxu2  ;;  %v531_v14 = vpop.f32.mrf.mxu0 }
 0x14b   : > { %v707_v60 = vadd.f32 %v706_v59, %v1444_v29  ;;  %v794_v61 = vpack.c.bf16 %v727_v30, %v727_v30  ;;  %v532_v62 = vadd.f32 %v531_v14, %v1430_v21  ;;  %v620_v63 = vpop.f32.mrf.mxu1 }
 0x14c   : > { %v621_v1 = vadd.f32 %v620_v63, %v1432_v22 }
 0x14d   : > { %v778_v0 = vpack.c.bf16 %v707_v60, %v707_v60  ;;  %858 = vst [vmem:[%s1441_s19 + $0x14c] sm:$0xf] %v794_v61 }
 0x14e   : > { %v779_v2 = vpack.c.bf16 %v621_v1, %v532_v62 }
 0x14f   : > { %842 = vst [vmem:[%s1441_s19 + $0xec] sm:$0xf] %v778_v0 }
 0x150   : > { %843 = vst [vmem:[%s1441_s19 + $0xf0] sm:$0xff] %v779_v2  ;;  %v729_v3 = vpop.f32.mrf.mxu3 }
 0x151   : > { %v730_v6 = vadd.f32 %v729_v3, %v1444_v29 }
 0x152   : > { %v709_v5 = vpop.f32.mrf.mxu2  ;;  %v533_v39 = vpop.f32.mrf.mxu0 }
 0x153   : > { %v710_v9 = vadd.f32 %v709_v5, %v1444_v29  ;;  %v796_v26 = vpack.c.bf16 %v730_v6, %v730_v6  ;;  %v534_v10 = vadd.f32 %v533_v39, %v1430_v21  ;;  %v622_v11 = vpop.f32.mrf.mxu1 }
 0x154   : > { %v623_v13 = vadd.f32 %v622_v11, %v1432_v22 }
 0x155   : > { %v780_v12 = vpack.c.bf16 %v710_v9, %v710_v9  ;;  %860 = vst [vmem:[%s1441_s19 + $0x158] sm:$0xf] %v796_v26 }
 0x156   : > { %v781_v7 = vpack.c.bf16 %v623_v13, %v534_v10 }
 0x157   : > { %844 = vst [vmem:[%s1441_s19 + $0xf8] sm:$0xf] %v780_v12 }
 0x158   : > { %845 = vst [vmem:[%s1441_s19 + $0xfc] sm:$0xff] %v781_v7  ;;  %v731_v15 = vpop.f32.mrf.mxu3 }
 0x159   : > { %v732_v17 = vadd.f32 %v731_v15, %v1444_v29 }
 0x15a   : > { %v711_v8 = vpop.f32.mrf.mxu2  ;;  %v536_v19 = vpop.f32.mrf.mxu0 }
 0x15b   : > { %v712_v18 = vadd.f32 %v711_v8, %v1444_v29  ;;  %v798_v20 = vpack.c.bf16 %v732_v17, %v732_v17  ;;  %v537_v36 = vadd.f32 %v536_v19, %v1430_v21  ;;  %v625_v49 = vpop.f32.mrf.mxu1 }
 0x15c   : > { %v626_v24 = vadd.f32 %v625_v49, %v1432_v22 }
 0x15d   : > { %v782_v23 = vpack.c.bf16 %v712_v18, %v712_v18  ;;  %862 = vst [vmem:[%s1441_s19 + $0x164] sm:$0xf] %v798_v20 }
 0x15e   : > { %v783_v25 = vpack.c.bf16 %v626_v24, %v537_v36 }
 0x15f   : > { %846 = vst [vmem:[%s1441_s19 + $0x104] sm:$0xf] %v782_v23 }
 0x160   : > { %847 = vst [vmem:[%s1441_s19 + $0x108] sm:$0xff] %v783_v25  ;;  %v734_v27 = vpop.f32.mrf.mxu3 }
 0x161   : > { %v735_v31 = vadd.f32 %v734_v27, %v1444_v29 }
 0x162   : > { %v714_v28 = vpop.f32.mrf.mxu2  ;;  %v538_v33 = vpop.f32.mrf.mxu0 }
 0x163   : > { %v715_v32 = vadd.f32 %v714_v28, %v1444_v29  ;;  %v800_v34 = vpack.c.bf16 %v735_v31, %v735_v31  ;;  %v539_v16 = vadd.f32 %v538_v33, %v1430_v21  ;;  %v627_v35 = vpop.f32.mrf.mxu1 }
 0x164   : > { %v628_v37 = vadd.f32 %v627_v35, %v1432_v22 }
 0x165   : > { %v784_v58 = vpack.c.bf16 %v715_v32, %v715_v32  ;;  %864 = vst [vmem:[%s1441_s19 + $0x170] sm:$0xf] %v800_v34 }
 0x166   : > { %v785_v38 = vpack.c.bf16 %v628_v37, %v539_v16 }
 0x167   : > { %848 = vst [vmem:[%s1441_s19 + $0x110] sm:$0xf] %v784_v58 }
 0x168   : > { %849 = vst [vmem:[%s1441_s19 + $0x114] sm:$0xff] %v785_v38  ;;  %v736_v40 = vpop.f32.mrf.mxu3 }
 0x169   : > { %v737_v42 = vadd.f32 %v736_v40, %v1444_v29 }
 0x16a   : > { %v716_v41 = vpop.f32.mrf.mxu2 }
 0x16b   : > { %v717_v43 = vadd.f32 %v716_v41, %v1444_v29  ;;  %v802_v44 = vpack.c.bf16 %v737_v42, %v737_v42 }
 0x16d   : > { %v786_v45 = vpack.c.bf16 %v717_v43, %v717_v43  ;;  %866 = vst [vmem:[%s1441_s19 + $0x17c] sm:$0xf] %v802_v44 }
 0x16f   : > { %850 = vst [vmem:[%s1441_s19 + $0x11c] sm:$0xf] %v786_v45 }
 0x170 PF: > { %s13_s12 = sadd.s32 1, %s1175_s12  }
 0x171   : > { %p10_p4 = scmp.ge.s32.totalorder %s13_s12, 4  }
 0x173   :  { %12 = sbr.rel (!%p10_p4) target bundleno = 1 (0x1), region = 62 }

// kernel: forward.15
= control target key start
LH: loop header
LB: loop body
LE: loop exit
PB: predicated region body
PF: predicated region fallthrough
CT: control target
= control target key end

     0   :  { %s1491_s9 = smov 0   ;;  %s2134_s0 = inlined_call_operand.vmem [shape: bf16[8,64,384], index: 0, kind: input, shape index: {}]   ;;  %s2135_s1 = inlined_call_operand.vmem [shape: f32[8,1,64], index: 1, kind: input, shape index: {}]   ;;  %s2136_s2 = inlined_call_operand.vmem [shape: bf16[8,4,64,32], index: 2, kind: output, shape index: {}]  }
   0x1 LB: > { %s1197_s10 = sadd.s32 4294967295, %s1471_s9   ;;  %p1201_p0 = scmp.ge.s32.totalorder %s1471_s9, 1  ;;  %s1471_s9 = sphi %s1491_s9, %s12_s9  }
   0x2   : > { %p120_p1 = scmp.lt.s32.totalorder %s1471_s9, 9 }
   0x4   : > { %p121_p2 = pnand %p1201_p0, %p120_p1 }
   0x5   : > { %p145_p3 = scmp.lt.s32.totalorder (!%p121_p2), %s1197_s10, 7  ;;  %s1473_s18 = smov (!%p121_p2), 96  }
   0x6   : > { %124 = sbr.rel (%p121_p2) target bundleno = 1199 (0x4af), region = 28  ;;  %s1474_s19 = smov (!%p121_p2), 64  }
   0x7   : > { %s1475_s20 = smov (!%p121_p2), 32  }
   0xb   : > { %s2138_s10 = smov (!%p145_p3, %s1197_s10), 7  ;;  %vm211_vm0 = vcmask 261120   ;;  %vm265_vm1 = vcmask 523264   ;;  %vm431_vm2 = vcmask 257024  }
   0xc   : > { %s1324_s11 = smul.u32 96, %s2138_s10  ;;  %s152_s14 = scalar_lea.vmem %s2135_s1, %s2138_s10 }
   0xd   : > { %v1583_v37 = vld [vmem:[%s152_s14] ss:$0 sm:$0xff]  ;;  %s1311_s23 = sshll.u32 %s2138_s10, 7 }
   0xe   : > { %s1509_s17 = scalar_lea.vmem %s2134_s0, %s1324_s11  ;;  %s1818_s26 = scalar_lea.vmem %s2136_s2, %s1311_s23 }
   0xf   : > { %v1321_v0 = vld [vmem:[%s1509_s17 + $0x4c] sm:$0xf]  ;;  %v1233_v1 = vld [vmem:[%s1509_s17 + $0x54] sm:$0xf0]  ;;  %v1318_v2 = vld [vmem:[%s1509_s17 + $0x34] sm:$0xf] }
  0x10   : > { %v1236_v3 = vor.u32 %v1321_v0, %v1233_v1  ;;  %v1229_v4 = vld [vmem:[%s1509_s17 + $0x3c] sm:$0xf0]  ;;  %v1315_v5 = vld [vmem:[%s1509_s17 + $0x1c] sm:$0xf]  ;;  %v1225_v6 = vld [vmem:[%s1509_s17 + $0x24] sm:$0xf0] }
  0x11   : > { %v1232_v7 = vor.u32 %v1318_v2, %v1229_v4  ;;  %v1228_v9 = vor.u32 %v1315_v5, %v1225_v6  ;;  %v1312_v10 = vld [vmem:[%s1509_s17 + $0x4] sm:$0xf]  ;;  %v1221_v11 = vld [vmem:[%s1509_s17 + $0xc] sm:$0xf0]  ;;  %v1207_v12 = vld [vmem:[%s1509_s17] sm:$0xf] }
  0x12   : > { %v234_v8 = vsel %vm211_vm0, %v1236_v3, 0  ;;  %454 = vrot.lane.b32.xlu2 %v1236_v3, %s1473_s18  ;;  %v1313_v13 = vld [vmem:[%s1509_s17 + $0x8] sm:$0xf0]  ;;  %v1526_v15 = vor.u32 %v1312_v10, %v1221_v11  ;;  %v1211_v17 = vld [vmem:[%s1509_s17 + $0x18] sm:$0xf] }
  0x13   : > { %240 = vmatpush.bf16.xpose.msra.mxu0 %v234_v8  ;;  %452 = vrot.lane.b32.xlu1 %v1232_v7, %s1473_s18  ;;  %v231_v14 = vsel %vm211_vm0, %v1232_v7, 0  ;;  %v1528_v16 = vor.u32 %v1313_v13, %v1207_v12  ;;  %v1316_v18 = vld [vmem:[%s1509_s17 + $0x20] sm:$0xf0]  ;;  %v228_v19 = vsel %vm211_vm0, %v1228_v9, 0  ;;  %v1215_v21 = vld [vmem:[%s1509_s17 + $0x30] sm:$0xf] }
  0x14   : > { %450 = vrot.lane.b32.xlu0 %v1228_v9, %s1473_s18  ;;  %v1538_v20 = vor.u32 %v1316_v18, %v1211_v17  ;;  %v1319_v22 = vld [vmem:[%s1509_s17 + $0x38] sm:$0xf0]  ;;  %v225_v24 = vsel %vm211_vm0, %v1526_v15, 0  ;;  %v1219_v25 = vld [vmem:[%s1509_s17 + $0x48] sm:$0xf] }
  0x15   : > { %v1542_v23 = vor.u32 %v1319_v22, %v1215_v21  ;;  %v1322_v26 = vld [vmem:[%s1509_s17 + $0x50] sm:$0xf0]  ;;  %v1255_v38 = vld [vmem:[%s1509_s17 + $0x50] sm:$0xf]  ;;  %v1323_v39 = vld [vmem:[%s1509_s17 + $0x58] sm:$0xf0] }
  0x16   : > { %v1556_v27 = vor.u32 %v1322_v26, %v1219_v25  ;;  %v1587_v40 = vor.u32 %v1323_v39, %v1255_v38  ;;  %v1251_v44 = vld [vmem:[%s1509_s17 + $0x38] sm:$0xf]  ;;  %v1320_v45 = vld [vmem:[%s1509_s17 + $0x40] sm:$0xf0]  ;;  %v1247_v48 = vld [vmem:[%s1509_s17 + $0x20] sm:$0xf] }
  0x17   : > { %v1597_v47 = vor.u32 %v1320_v45, %v1251_v44  ;;  %v1317_v49 = vld [vmem:[%s1509_s17 + $0x28] sm:$0xf0]  ;;  %v1243_v55 = vld [vmem:[%s1509_s17 + $0x8] sm:$0xf]  ;;  %v1314_v56 = vld [vmem:[%s1509_s17 + $0x10] sm:$0xf0] }
  0x18   : > { %398 = vmatpush.bf16.msra.mxu1 %v1587_v40  ;;  %v1603_v50 = vor.u32 %v1317_v49, %v1247_v48  ;;  %v1611_v57 = vor.u32 %v1314_v56, %v1243_v55 }
  0x1a   : > { %448 = vrot.lane.b32.xlu2 %v1526_v15, %s1473_s18 }
  0x1b   : > { %241 = vmatpush.bf16.xpose.msra.mxu0 %v231_v14  ;;  %685 = vrot.lane.b32.xlu1 %v1236_v3, %s1474_s19 }
  0x1c   : > { %440 = vrot.lane.b32.xlu0 %v1528_v16, %s1473_s18  ;;  %399 = vmatpush.bf16.msra.mxu1 %v1597_v47 }
  0x20   : > { %400 = vmatpush.bf16.msra.mxu1 %v1603_v50 }
  0x22   : > { %444 = vrot.lane.b32.xlu2 %v1542_v23, %s1473_s18 }
  0x23   : > { %242 = vmatpush.bf16.xpose.msra.mxu0 %v228_v19  ;;  %446 = vrot.lane.b32.xlu1 %v1556_v27, %s1473_s18 }
  0x24   : > { %442 = vrot.lane.b32.xlu0 %v1538_v20, %s1473_s18  ;;  %401 = vmatpush.bf16.msra.mxu1 %v1611_v57 }
  0x2a   : > { %916 = vrot.lane.b32.xlu2 %v1236_v3, %s1475_s20 }
  0x2b   : > { %243 = vmatpush.bf16.xpose.msra.mxu0 %v225_v24  ;;  %671 = vrot.lane.b32.xlu1 %v1528_v16, %s1474_s19 }
  0x2c   : > { %683 = vrot.lane.b32.xlu0 %v1232_v7, %s1474_s19 }
  0x32   : > { %1237 = vmatmul.msk.bf16.vlgmr.msra.gmra.mxu0 %vm211_vm0, %v1528_v16  ;;  %912 = vrot.lane.b32.xlu2 %v1228_v9, %s1475_s20 }
  0x34   : > { %914 = vrot.lane.b32.xlu0 %v1232_v7, %s1475_s20 }
  0x3c   : > { %681 = vrot.lane.b32.xlu0 %v1228_v9, %s1474_s19 }
  0x42   : > { %1238 = vmatmul.msk.bf16.gmra.mxu0 %vm211_vm0, %v1538_v20 }
  0x44   : > { %679 = vrot.lane.b32.xlu0 %v1526_v15, %s1474_s19 }
  0x52   : > { %1239 = vmatmul.msk.bf16.gmra.mxu0 %vm211_vm0, %v1542_v23 }
  0x62   : > { %1240 = vmatmul.msk.bf16.gmra.mxu0 %vm211_vm0, %v1556_v27 }
  0x6c   : > { %v455_v28 = vpop.permute.xlu2 %454 }
  0x6d   : > { %v478_v29 = vsel %vm211_vm0, %v455_v28, 0 }
  0x6e   : > { %484 = vmatpush.bf16.xpose.msra.mxu2 %v478_v29 }
  0x74   : > { %v449_v34 = vpop.permute.xlu2 %448 }
  0x75   : > { %v469_v35 = vsel %vm211_vm0, %v449_v34, 0 }
  0x7c   : > { %v445_v54 = vpop.permute.xlu2 %444 }
  0x84   : > { %v917_v63 = vpop.permute.xlu2 %916 }
  0x85   : > { %v453_v30 = vpop.permute.xlu1 %452  ;;  %v940_v2 = vsel %vm211_vm0, %v917_v63, 0 }
  0x86   : > { %v475_v31 = vsel %vm211_vm0, %v453_v30, 0  ;;  %v451_v32 = vpop.permute.xlu0 %450  ;;  %946 = vmatpush.bf16.xpose.msrb.mxu0 %v940_v2 }
  0x87   : > { %485 = vmatpush.bf16.xpose.msra.mxu2 %v475_v31  ;;  %v472_v33 = vsel %vm211_vm0, %v451_v32, 0 }
  0x8c   : > { %v913_v21 = vpop.permute.xlu2 %912 }
  0x8d   : > { %v686_v53 = vpop.permute.xlu1 %685  ;;  %v934_v24 = vsel %vm211_vm0, %v913_v21, 0 }
  0x8e   : > { %v441_v36 = vpop.permute.xlu0 %440  ;;  %v709_v59 = vsel %vm211_vm0, %v686_v53, 0 }
  0x8f   : > { %486 = vmatpush.bf16.xpose.msra.mxu2 %v472_v33  ;;  %715 = vmatpush.bf16.xpose.msrb.mxu1 %v709_v59 }
  0x95   : > { %v447_v14 = vpop.permute.xlu1 %446 }
  0x96   : > { %v443_v43 = vpop.permute.xlu0 %442 }
  0x97   : > { %487 = vmatpush.bf16.xpose.msra.mxu2 %v469_v35 }
  0x9d   : > { %v1652_v34 = vpop.permute.xlu1 %671 }
  0x9e   : > { %1261 = vmatmul.msk.bf16.vlgmr.msra.gmra.mxu2 %vm211_vm0, %v441_v36  ;;  %v684_v62 = vpop.permute.xlu0 %683 }
  0x9f   : > { %v706_v1 = vsel %vm211_vm0, %v684_v62, 0 }
  0xa0   : > { %716 = vmatpush.bf16.xpose.msrb.mxu1 %v706_v1 }
  0xa6   : > { %v915_v5 = vpop.permute.xlu0 %914 }
  0xa7   : > { %v937_v6 = vsel %vm211_vm0, %v915_v5, 0 }
  0xa8   : > { %947 = vmatpush.bf16.xpose.msrb.mxu0 %v937_v6 }
  0xae   : > { %1262 = vmatmul.msk.bf16.gmra.mxu2 %vm211_vm0, %v443_v43  ;;  %v682_v10 = vpop.permute.xlu0 %681 }
  0xaf   : > { %v245_v41 = vpop.f32.mrf.mxu0  ;;  %v703_v11 = vsel %vm211_vm0, %v682_v10, 0 }
  0xb0   : > { %v1590_v42 = vadd.f32 %v1583_v37, %v245_v41  ;;  %717 = vmatpush.bf16.xpose.msrb.mxu1 %v703_v11  ;;  %948 = vmatpush.bf16.xpose.msrb.mxu0 %v934_v24 }
  0xb2   : > { %v266_v46 = vsel %vm265_vm1, %v1590_v42, -inf }
  0xb3   : > { %267 = vmax.xlane.f32.xlu0 %v266_v46 }
  0xb6   : > { %v680_v17 = vpop.permute.xlu0 %679 }
  0xb7   : > { %v247_v51 = vpop.f32.mrf.mxu0  ;;  %v700_v18 = vsel %vm211_vm0, %v680_v17, 0 }
  0xb8   : > { %v1606_v52 = vadd.f32 %v1583_v37, %v247_v51  ;;  %718 = vmatpush.bf16.xpose.msrb.mxu1 %v700_v18 }
  0xba   : > { %v269_v58 = vsel %vm265_vm1, %v1606_v52, -inf }
  0xbb   : > { %270 = vmax.xlane.f32.xlu0 %v269_v58 }
  0xbe   : > { %1263 = vmatmul.msk.bf16.gmra.mxu2 %vm211_vm0, %v445_v54 }
  0xbf   : > { %v250_v60 = vpop.f32.mrf.mxu0 }
  0xc0   : > { %v1618_v61 = vadd.f32 %v1583_v37, %v250_v60 }
  0xc2   : > { %v272_v0 = vsel %vm265_vm1, %v1618_v61, -inf }
  0xc3   : > { %273 = vmax.xlane.f32.xlu1 %v272_v0 }
  0xc7   : > { %v252_v3 = vpop.f32.mrf.mxu0 }
  0xc8   : > { %v253_v4 = vadd.f32 %v1583_v37, %v252_v3 }
  0xca   : > { %v275_v7 = vsel %vm265_vm1, %v253_v4, -inf }
  0xcb   : > { %276 = vmax.xlane.f32.xlu1 %v275_v7 }
  0xce   : > { %1264 = vmatmul.msk.bf16.gmra.mxu2 %vm211_vm0, %v447_v14 }
  0xcf   : > { %v255_v8 = vpop.f32.mrf.mxu0  ;;  %910 = vrot.lane.b32.xlu0 %v1526_v15, %s1475_s20 }
  0xd0   : > { %v256_v9 = vadd.f32 %v1583_v37, %v255_v8 }
  0xd2   : > { %v278_v12 = vsel %vm265_vm1, %v256_v9, -inf }
  0xd3   : > { %279 = vmax.xlane.f32.xlu2 %v278_v12 }
  0xd7   : > { %v257_v13 = vpop.f32.mrf.mxu0 }
  0xd8   : > { %v258_v25 = vadd.f32 %v1583_v37, %v257_v13 }
  0xda   : > { %v281_v26 = vsel %vm265_vm1, %v258_v25, -inf }
  0xdf   : > { %v260_v19 = vpop.f32.mrf.mxu0 }
  0xe0   : > { %v1636_v15 = vadd.f32 %v1583_v37, %v260_v19 }
  0xe2   : > { %v284_v22 = vsel %vm265_vm1, %v1636_v15, -inf }
  0xe3   : > { %285 = vmax.xlane.f32.xlu1 %v284_v22 }
  0xe7   : > { %v262_v28 = vpop.f32.mrf.mxu0 }
  0xe8   : > { %v263_v29 = vadd.f32 %v1583_v37, %v262_v28 }
  0xea   : > { %v287_v30 = vsel %vm265_vm1, %v263_v29, -inf }
  0xeb   : > { %673 = vrot.lane.b32.xlu2 %v1538_v20, %s1474_s19 }
  0xf9   : > { %282 = vmax.xlane.f32.xlu0 %v281_v26 }
  0xfc   : > { %904 = vrot.lane.b32.xlu1 %v1538_v20, %s1475_s20 }
 0x101   : > { %288 = vmax.xlane.f32.xlu0 %v287_v30 }
 0x115   : > { %902 = vrot.lane.b32.xlu0 %v1528_v16, %s1475_s20 }
 0x121   : > { %v489_v59 = vpop.f32.mrf.mxu2 }
 0x126   : > { %v268_v31 = vpop.xlane.xlu0 %267 }
 0x127   : > { %v290_v32 = vsub.f32 %v1590_v42, %v268_v31 }
 0x129   : > { %v298_v33 = vmul.f32 1.442695, %v290_v32  ;;  %v491_v63 = vpop.f32.mrf.mxu2 }
 0x12a   : > { %v1710_v28 = vadd.f32 %v1583_v37, %v491_v63 }
 0x12b   : > { %1337 = vpow2.f32 %v298_v33 }
 0x12c   : > { %v512_v30 = vsel %vm265_vm1, %v1710_v28, -inf }
 0x12e   : > { %v271_v35 = vpop.xlane.xlu0 %270 }
 0x12f   : > { %v291_v36 = vsub.f32 %v1606_v52, %v271_v35 }
 0x131   : > { %v1655_v38 = vpop.eup %1337  ;;  %v300_v39 = vmul.f32 1.442695, %v291_v36  ;;  %v1679_v0 = vpop.f32.mrf.mxu2 }
 0x132   : > { %v314_v20 = vsel %vm265_vm1, %v1655_v38, 0.0 }
 0x133   : > { %1339 = vpow2.f32 %v300_v39  ;;  %315 = vadd.xlane.f32.xlu2 %v314_v20 }
 0x136   : > { %v274_v41 = vpop.xlane.xlu1 %273 }
 0x137   : > { %v292_v16 = vsub.f32 %v1618_v61, %v274_v41 }
 0x139   : > { %v1660_v43 = vpop.eup %1339  ;;  %v302_v42 = vmul.f32 1.442695, %v292_v16  ;;  %v496_v1 = vpop.f32.mrf.mxu2 }
 0x13a   : > { %v317_v44 = vsel %vm265_vm1, %v1660_v43, 0.0  ;;  %v1691_v11 = vadd.f32 %v1583_v37, %v496_v1 }
 0x13b   : > { %1341 = vpow2.f32 %v302_v42  ;;  %318 = vadd.xlane.f32.xlu1 %v317_v44 }
 0x13c   : > { %v518_v17 = vsel %vm265_vm1, %v1691_v11, -inf }
 0x13e   : > { %v277_v45 = vpop.xlane.xlu1 %276 }
 0x13f   : > { %v293_v46 = vsub.f32 %v253_v4, %v277_v45  ;;  %v1684_v4 = vadd.f32 %v1583_v37, %v489_v59 }
 0x141   : > { %v1664_v48 = vpop.eup %1341  ;;  %v304_v49 = vmul.f32 1.442695, %v293_v46  ;;  %v911_v51 = vpop.permute.xlu0 %910  ;;  %v509_v7 = vsel %vm265_vm1, %v1684_v4, -inf }
 0x142   : > { %v320_v52 = vsel %vm265_vm1, %v1664_v48, 0.0  ;;  %v931_v53 = vsel %vm211_vm0, %v911_v51, 0  ;;  %v499_v6 = vpop.f32.mrf.mxu2 }
 0x143   : > { %1343 = vpow2.f32 %v304_v49  ;;  %321 = vadd.xlane.f32.xlu1 %v320_v52  ;;  %949 = vmatpush.bf16.xpose.msrb.mxu0 %v931_v53  ;;  %v1719_v33 = vadd.f32 %v1583_v37, %v499_v6  ;;  %v1743_v53 = vadd.f32 %v1583_v37, %v1679_v0 }
 0x146   : > { %v280_v54 = vpop.xlane.xlu2 %279 }
 0x147   : > { %v294_v55 = vsub.f32 %v256_v9, %v280_v54 }
 0x149   : > { %v1669_v56 = vpop.eup %1343  ;;  %v306_v58 = vmul.f32 1.442695, %v294_v55  ;;  %v515_v55 = vsel %vm265_vm1, %v1743_v53, -inf }
 0x14a   : > { %v323_v60 = vsel %vm265_vm1, %v1669_v56, 0.0  ;;  %v501_v14 = vpop.f32.mrf.mxu2 }
 0x14b   : > { %1345 = vpow2.f32 %v306_v58  ;;  %906 = vrot.lane.b32.xlu2 %v1542_v23, %s1475_s20  ;;  %324 = vadd.xlane.f32.xlu1 %v323_v60  ;;  %v1749_v58 = vadd.f32 %v1583_v37, %v501_v14 }
 0x14e   : > { %v1723_v35 = vpop.permute.xlu2 %673 }
 0x151   : > { %v1675_v61 = vpop.eup %1345 }
 0x152   : > { %v326_v62 = vsel %vm265_vm1, %v1675_v61, 0.0  ;;  %v504_v21 = vpop.f32.mrf.mxu2 }
 0x153   : > { %327 = vadd.xlane.f32.xlu1 %v326_v62  ;;  %v1702_v22 = vadd.f32 %v1583_v37, %v504_v21 }
 0x156   : > { %v286_v26 = vpop.xlane.xlu1 %285 }
 0x15a   : > { %v506_v36 = vpop.f32.mrf.mxu2 }
 0x15b   : > { %v1732_v20 = vadd.f32 %v1583_v37, %v506_v36 }
 0x15d   : > { %v530_v41 = vsel %vm265_vm1, %v1732_v20, -inf }
 0x16c   : > { %677 = vrot.lane.b32.xlu1 %v1556_v27, %s1474_s19  ;;  %v283_v2 = vpop.xlane.xlu0 %282 }
 0x16d   : > { %v295_v3 = vsub.f32 %v258_v25, %v283_v2  ;;  %v527_v25 = vsel %vm265_vm1, %v1702_v22, -inf }
 0x16e   : > { %v905_v31 = vpop.permute.xlu1 %904 }
 0x16f   : > { %v308_v5 = vmul.f32 1.442695, %v295_v3 }
 0x171   : > { %1347 = vpow2.f32 %v308_v5 }
 0x174   : > { %510 = vmax.xlane.f32.xlu2 %v509_v7  ;;  %v289_v8 = vpop.xlane.xlu0 %288 }
 0x175   : > { %v297_v9 = vsub.f32 %v263_v29, %v289_v8  ;;  %v296_v29 = vsub.f32 %v1636_v15, %v286_v26 }
 0x177   : > { %v1688_v10 = vpop.eup %1347  ;;  %v312_v12 = vmul.f32 1.442695, %v297_v9  ;;  %v310_v32 = vmul.f32 1.442695, %v296_v29 }
 0x178   : > { %v329_v13 = vsel %vm265_vm1, %v1688_v10, 0.0 }
 0x179   : > { %330 = vadd.xlane.f32.xlu0 %v329_v13  ;;  %1349 = vpow2.f32 %v312_v12 }
 0x17a   : > { %1351 = vpow2.f32 %v310_v32 }
 0x17c   : > { %519 = vmax.xlane.f32.xlu2 %v518_v17 }
 0x17f   : > { %v1697_v18 = vpop.eup %1349 }
 0x180   : > { %v335_v19 = vsel %vm265_vm1, %v1697_v18, 0.0  ;;  %v1725_v15 = vpop.eup %1351 }
 0x184   : > { %336 = vadd.xlane.f32.xlu2 %v335_v19 }
 0x187   : > { %v903_v24 = vpop.permute.xlu0 %902 }
 0x188   : > { %1293 = vmatmul.msk.bf16.vlgmr.msrb.gmra.mxu0 %vm211_vm0, %v903_v24 }
 0x18c   : > { %528 = vmax.xlane.f32.xlu2 %v527_v25 }
 0x18d   : > { %675 = vrot.lane.b32.xlu0 %v1542_v23, %s1474_s19  ;;  %v521_v23 = vsel %vm265_vm1, %v1719_v33, -inf }
 0x195   : > { %908 = vrot.lane.b32.xlu0 %v1556_v27, %s1475_s20  ;;  %v332_v27 = vsel %vm265_vm1, %v1725_v15, 0.0 }
 0x196   : > { %513 = vmax.xlane.f32.xlu1 %v512_v30 }
 0x198   : > { %1294 = vmatmul.msk.bf16.gmra.mxu0 %vm211_vm0, %v905_v31 }
 0x19e   : > { %522 = vmax.xlane.f32.xlu1 %v521_v23 }
 0x1a4   : > { %605 = vrot.lane.b32.xlu2 %v1597_v47, %s1473_s18 }
 0x1a6   : > { %v316_v39 = vpop.xlane.xlu2 %315  ;;  %333 = vadd.xlane.f32.xlu1 %v332_v27 }
 0x1a7   : > { %1353 = vrcp.f32 %v316_v39 }
 0x1ac   : > { %838 = vrot.lane.b32.xlu2 %v1587_v40, %s1474_s19 }
 0x1ad   : > { %v1354_v44 = vpop.eup %1353 }
 0x1ae   : > { %v907_v16 = vpop.permute.xlu2 %906  ;;  %531 = vmax.xlane.f32.xlu1 %v530_v41  ;;  %v319_v42 = vpop.xlane.xlu1 %318  ;;  %v346_v49 = vmul.f32 %v1354_v44, %v1655_v38 }
 0x1af   : > { %1355 = vrcp.f32 %v319_v42  ;;  %1295 = vmatmul.msk.bf16.gmra.mxu0 %vm211_vm0, %v907_v16 }
 0x1b5   : > { %v1356_v45 = vpop.eup %1355 }
 0x1b6   : > { %v322_v46 = vpop.xlane.xlu1 %321  ;;  %v347_v51 = vmul.f32 %v1356_v45, %v1660_v43  ;;  %v524_v43 = vsel %vm265_vm1, %v1749_v58, -inf }
 0x1b7   : > { %1357 = vrcp.f32 %v322_v46 }
 0x1b8   : > { %v354_v52 = vpack.c.bf16 %v347_v51, %v346_v49 }
 0x1ba   : > { %1257 = vmatmul.msk.bf16.vlgmr.msra.gmra.mxu1 %vm265_vm1, %v354_v52 }
 0x1bd   : > { %v1358_v38 = vpop.eup %1357 }
 0x1be   : > { %v325_v54 = vpop.xlane.xlu1 %324  ;;  %v348_v60 = vmul.f32 %v1358_v38, %v1664_v48 }
 0x1bf   : > { %1359 = vrcp.f32 %v325_v54  ;;  %516 = vmax.xlane.f32.xlu0 %v515_v55 }
 0x1c5   : > { %v1360_v59 = vpop.eup %1359 }
 0x1c6   : > { %v349_v62 = vmul.f32 %v1360_v59, %v1669_v56  ;;  %v328_v1 = vpop.xlane.xlu1 %327 }
 0x1c7   : > { %525 = vmax.xlane.f32.xlu0 %v524_v43  ;;  %603 = vrot.lane.b32.xlu1 %v1603_v50, %s1473_s18  ;;  %1361 = vrcp.f32 %v328_v1 }
 0x1c8   : > { %v355_v63 = vpack.c.bf16 %v349_v62, %v348_v60 }
 0x1ca   : > { %1258 = vmatmul.msk.bf16.gmra.mxu1 %vm265_vm1, %v355_v63 }
 0x1cd   : > { %v1362_v3 = vpop.eup %1361 }
 0x1ce   : > { %v350_v8 = vmul.f32 %v1362_v3, %v1675_v61 }
 0x1db   : > { %607 = vrot.lane.b32.xlu0 %v1587_v40, %s1473_s18 }
 0x1de   : > { %v1772_v13 = vpop.permute.xlu1 %677 }
 0x1e3   : > { %601 = vrot.lane.b32.xlu0 %v1611_v57, %s1473_s18 }
 0x1e7   : > { %v511_v0 = vpop.xlane.xlu2 %510 }
 0x1e8   : > { %v533_v2 = vsub.f32 %v1684_v4, %v511_v0 }
 0x1ea   : > { %v541_v48 = vmul.f32 1.442695, %v533_v2 }
 0x1ec   : > { %1363 = vpow2.f32 %v541_v48  ;;  %v331_v56 = vpop.xlane.xlu0 %330 }
 0x1ed   : > { %1365 = vrcp.f32 %v331_v56 }
 0x1f2   : > { %v1763_v5 = vpop.eup %1363 }
 0x1f3   : > { %v1366_v6 = vpop.eup %1365  ;;  %v557_v7 = vsel %vm265_vm1, %v1763_v5, 0.0 }
 0x1f4   : > { %558 = vadd.xlane.f32.xlu2 %v557_v7  ;;  %v351_v9 = vmul.f32 %v1366_v6, %v1688_v10  ;;  %v1782_v10 = vpop.xlane.xlu2 %519 }
 0x1f6   : > { %v356_v12 = vpack.c.bf16 %v351_v9, %v350_v8 }
 0x1f8   : > { %1259 = vmatmul.msk.bf16.gmra.mxu1 %vm265_vm1, %v356_v12 }
 0x1fc   : > { %v337_v30 = vpop.xlane.xlu2 %336 }
 0x1fd   : > { %1367 = vrcp.f32 %v337_v30 }
 0x1ff   : > { %v1770_v4 = vpop.permute.xlu0 %675 }
 0x203   : > { %v1368_v39 = vpop.eup %1367 }
 0x204   : > { %v353_v45 = vmul.f32 %v1368_v39, %v1697_v18  ;;  %v529_v62 = vpop.xlane.xlu2 %528 }
 0x205   : > { %v951_v14 = vpop.f32.mrf.mxu0  ;;  %v539_v63 = vsub.f32 %v1702_v22, %v529_v62 }
 0x206   : > { %v1775_v17 = vadd.f32 %v1583_v37, %v951_v14 }
 0x207   : > { %v909_v19 = vpop.permute.xlu0 %908  ;;  %v553_v48 = vmul.f32 1.442695, %v539_v63 }
 0x208   : > { %1296 = vmatmul.msk.bf16.gmra.mxu0 %vm211_vm0, %v909_v19  ;;  %v971_v21 = vsel %vm265_vm1, %v1775_v17, -inf }
 0x209   : > { %v1780_v61 = vpop.xlane.xlu1 %513  ;;  %972 = vmax.xlane.f32.xlu1 %v971_v21 }
 0x20a   : > { %v534_v39 = vsub.f32 %v1710_v28, %v1780_v61 }
 0x20d   : > { %v953_v24 = vpop.f32.mrf.mxu0 }
 0x20e   : > { %v1785_v25 = vadd.f32 %v1583_v37, %v953_v24 }
 0x210   : > { %v974_v26 = vsel %vm265_vm1, %v1785_v25, -inf }
 0x211   : > { %v523_v29 = vpop.xlane.xlu1 %522  ;;  %975 = vmax.xlane.f32.xlu0 %v974_v26 }
 0x215   : > { %v956_v31 = vpop.f32.mrf.mxu0 }
 0x216   : > { %v1790_v32 = vadd.f32 %v1583_v37, %v956_v31 }
 0x218   : > { %v977_v23 = vsel %vm265_vm1, %v1790_v32, -inf }
 0x219   : > { %v334_v27 = vpop.xlane.xlu1 %333  ;;  %978 = vmax.xlane.f32.xlu0 %v977_v23 }
 0x21a   : > { %1369 = vrcp.f32 %v334_v27  ;;  %v536_v27 = vsub.f32 %v1691_v11, %v1782_v10 }
 0x21d   : > { %v958_v36 = vpop.f32.mrf.mxu0 }
 0x21e   : > { %v1795_v41 = vadd.f32 %v1583_v37, %v958_v36 }
 0x220   : > { %v1370_v16 = vpop.eup %1369  ;;  %v980_v42 = vsel %vm265_vm1, %v1795_v41, -inf }
 0x221   : > { %981 = vmax.xlane.f32.xlu1 %v980_v42  ;;  %v352_v44 = vmul.f32 %v1370_v16, %v1725_v15  ;;  %v537_v15 = vsub.f32 %v1719_v33, %v523_v29  ;;  %v532_v9 = vpop.xlane.xlu1 %531 }
 0x223   : > { %v357_v46 = vpack.c.bf16 %v353_v45, %v352_v44  ;;  %v549_v60 = vmul.f32 1.442695, %v537_v15  ;;  %v543_v44 = vmul.f32 1.442695, %v534_v39 }
 0x225   : > { %1260 = vmatmul.msk.bf16.gmra.mxu1 %vm265_vm1, %v357_v46 }
 0x22c   : > { %v961_v49 = vpop.f32.mrf.mxu0 }
 0x22d   : > { %v1803_v51 = vadd.f32 %v1583_v37, %v961_v49  ;;  %v540_v49 = vsub.f32 %v1732_v20, %v532_v9 }
 0x22f   : > { %v983_v52 = vsel %vm265_vm1, %v1803_v51, -inf }
 0x230   : > { %984 = vmax.xlane.f32.xlu0 %v983_v52 }
 0x232   : > { %v517_v54 = vpop.xlane.xlu0 %516 }
 0x233   : > { %v535_v55 = vsub.f32 %v1743_v53, %v517_v54  ;;  %v555_v54 = vmul.f32 1.442695, %v540_v49 }
 0x234   : > { %v963_v38 = vpop.f32.mrf.mxu0 }
 0x235   : > { %v545_v59 = vmul.f32 1.442695, %v535_v55  ;;  %v1811_v18 = vadd.f32 %v1583_v37, %v963_v38  ;;  %1277 = vmatmul.msk.bf16.vlgmr.msrb.gmra.mxu1 %vm211_vm0, %v1652_v34 }
 0x237   : > { %1371 = vpow2.f32 %v545_v59  ;;  %v403_v43 = vpop.f32.mrf.mxu1  ;;  %v986_v33 = vsel %vm265_vm1, %v1811_v18, -inf }
 0x238   : > { %v423_v53 = vpack.c.bf16 %v403_v43, %v403_v43  ;;  %987 = vmax.xlane.f32.xlu1 %v986_v33  ;;  %1373 = vpow2.f32 %v549_v60 }
 0x239   : > { %1375 = vpow2.f32 %v553_v48  ;;  %v604_v24 = vpop.permute.xlu1 %603 }
 0x23a   : > { %432 = vst.msk [vmem:[%s1818_s26] sm:$0xf] %vm431_vm2, %v423_v53  ;;  %v526_v3 = vpop.xlane.xlu0 %525 }
 0x23d   : > { %v1824_v34 = vpop.eup %1371 }
 0x23e   : > { %v563_v0 = vsel %vm265_vm1, %v1824_v34, 0.0  ;;  %v1831_v56 = vpop.eup %1373 }
 0x23f   : > { %v405_v1 = vpop.f32.mrf.mxu1  ;;  %564 = vadd.xlane.f32.xlu2 %v563_v0  ;;  %v569_v22 = vsel %vm265_vm1, %v1831_v56, 0.0  ;;  %v1839_v8 = vpop.eup %1375 }
 0x240   : > { %v424_v2 = vpack.c.bf16 %v405_v1, %v405_v1  ;;  %v575_v14 = vsel %vm265_vm1, %v1839_v8, 0.0 }
 0x242   : > { %433 = vst.msk [vmem:[%s1818_s26 + $0x4] sm:$0xf] %vm431_vm2, %v424_v2 }
 0x245   : > { %1278 = vmatmul.msk.bf16.gmra.mxu1 %vm211_vm0, %v1723_v35  ;;  %v606_v35 = vpop.permute.xlu2 %605 }
 0x247   : > { %v408_v6 = vpop.f32.mrf.mxu1  ;;  %570 = vadd.xlane.f32.xlu2 %v569_v22 }
 0x248   : > { %v425_v7 = vpack.c.bf16 %v408_v6, %v408_v6 }
 0x24a   : > { %434 = vst.msk [vmem:[%s1818_s26 + $0x8] sm:$0xf] %vm431_vm2, %v425_v7 }
 0x24d   : > { %v608_v12 = vpop.permute.xlu0 %607  ;;  %v839_v29 = vpop.permute.xlu2 %838 }
 0x24e   : > { %629 = vmatpush.bf16.msra.mxu3 %v608_v12 }
 0x24f   : > { %v410_v19 = vpop.f32.mrf.mxu1  ;;  %576 = vadd.xlane.f32.xlu2 %v575_v14 }
 0x250   : > { %v426_v21 = vpack.c.bf16 %v410_v19, %v410_v19 }
 0x252   : > { %435 = vst.msk [vmem:[%s1818_s26 + $0xc] sm:$0xf] %vm431_vm2, %v426_v21  ;;  %630 = vmatpush.bf16.msra.mxu3 %v606_v35 }
 0x255   : > { %1279 = vmatmul.msk.bf16.gmra.mxu1 %vm211_vm0, %v1770_v4  ;;  %v602_v26 = vpop.permute.xlu0 %601 }
 0x256   : > { %631 = vmatpush.bf16.msra.mxu3 %v604_v24 }
 0x25a   : > { %632 = vmatpush.bf16.msra.mxu3 %v602_v26 }
 0x25e   : > { %860 = vmatpush.bf16.msrb.mxu3 %v839_v29 }
 0x265   : > { %1280 = vmatmul.msk.bf16.gmra.mxu1 %vm211_vm0, %v1772_v13  ;;  %v547_v13 = vmul.f32 1.442695, %v536_v27 }
 0x267   : > { %836 = vrot.lane.b32.xlu2 %v1597_v47, %s1474_s19  ;;  %1377 = vpow2.f32 %v547_v13  ;;  %v1898_v63 = vpop.xlane.xlu2 %558 }
 0x268   : > { %1379 = vpow2.f32 %v543_v44 }
 0x26d   : > { %v1869_v10 = vpop.eup %1377 }
 0x26e   : > { %v566_v52 = vsel %vm265_vm1, %v1869_v10, 0.0  ;;  %v1880_v38 = vpop.eup %1379 }
 0x26f   : > { %834 = vrot.lane.b32.xlu2 %v1603_v50, %s1474_s19 }
 0x275   : > { %v413_v30 = vpop.f32.mrf.mxu1 }
 0x276   : > { %v427_v31 = vpack.c.bf16 %v413_v30, %v413_v30 }
 0x277   : > { %1065 = vrot.lane.b32.xlu2 %v1603_v50, %s1475_s20  ;;  %v538_v50 = vsub.f32 %v1749_v58, %v526_v3 }
 0x278   : > { %436 = vst.msk [vmem:[%s1818_s26 + $0x10] sm:$0xf] %vm431_vm2, %v427_v31 }
 0x279   : > { %v551_v45 = vmul.f32 1.442695, %v538_v50 }
 0x27b   : > { %1381 = vpow2.f32 %v551_v45 }
 0x27c   : > { %1383 = vpow2.f32 %v555_v54 }
 0x27d   : > { %v415_v4 = vpop.f32.mrf.mxu1 }
 0x27e   : > { %v428_v23 = vpack.c.bf16 %v415_v4, %v415_v4 }
 0x280   : > { %437 = vst.msk [vmem:[%s1818_s26 + $0x14] sm:$0xf] %vm431_vm2, %v428_v23 }
 0x281   : > { %v1882_v20 = vpop.eup %1381 }
 0x282   : > { %v572_v15 = vsel %vm265_vm1, %v1882_v20, 0.0  ;;  %v1888_v59 = vpop.eup %1383 }
 0x283   : > { %v578_v33 = vsel %vm265_vm1, %v1888_v59, 0.0 }
 0x284   : > { %v976_v11 = vpop.xlane.xlu0 %975 }
 0x285   : > { %v966_v36 = vpop.f32.mrf.mxu0  ;;  %v996_v61 = vsub.f32 %v1785_v25, %v976_v11  ;;  %v560_v25 = vsel %vm265_vm1, %v1880_v38, 0.0 }
 0x286   : > { %v1864_v16 = vadd.f32 %v1583_v37, %v966_v36 }
 0x287   : > { %v1005_v55 = vmul.f32 1.442695, %v996_v61 }
 0x288   : > { %v989_v42 = vsel %vm265_vm1, %v1864_v16, -inf }
 0x289   : > { %990 = vmax.xlane.f32.xlu0 %v989_v42  ;;  %1385 = vpow2.f32 %v1005_v55 }
 0x28c   : > { %v979_v50 = vpop.xlane.xlu0 %978 }
 0x28d   : > { %v968_v46 = vpop.f32.mrf.mxu0  ;;  %v997_v44 = vsub.f32 %v1790_v32, %v979_v50 }
 0x28e   : > { %v1873_v28 = vadd.f32 %v1583_v37, %v968_v46 }
 0x28f   : > { %v1890_v43 = vpop.eup %1385  ;;  %v1007_v49 = vmul.f32 1.442695, %v997_v44 }
 0x290   : > { %v992_v58 = vsel %vm265_vm1, %v1873_v28, -inf  ;;  %v1022_v53 = vsel %vm265_vm1, %v1890_v43, 0.0 }
 0x291   : > { %993 = vmax.xlane.f32.xlu1 %v992_v58  ;;  %567 = vadd.xlane.f32.xlu0 %v566_v52 }
 0x299   : > { %561 = vadd.xlane.f32.xlu1 %v560_v25  ;;  %573 = vadd.xlane.f32.xlu0 %v572_v15 }
 0x2a1   : > { %579 = vadd.xlane.f32.xlu0 %v578_v33  ;;  %1023 = vadd.xlane.f32.xlu1 %v1022_v53 }
 0x2a2   : > { %v418_v60 = vpop.f32.mrf.mxu1 }
 0x2a3   : > { %v429_v62 = vpack.c.bf16 %v418_v60, %v418_v60  ;;  %v985_v15 = vpop.xlane.xlu0 %984 }
 0x2a5   : > { %438 = vst.msk [vmem:[%s1818_s26 + $0x18] sm:$0xf] %vm431_vm2, %v429_v62 }
 0x2aa   : > { %v420_v0 = vpop.f32.mrf.mxu1 }
 0x2ab   : > { %v430_v1 = vpack.c.bf16 %v420_v0, %v420_v0 }
 0x2ad   : > { %439 = vst.msk [vmem:[%s1818_s26 + $0x1c] sm:$0xf] %vm431_vm2, %v430_v1 }
 0x2b2   : > { %v720_v2 = vpop.f32.mrf.mxu1  ;;  %v1902_v48 = vpop.xlane.xlu2 %564 }
 0x2b3   : > { %v1905_v3 = vadd.f32 %v1583_v37, %v720_v2 }
 0x2b5   : > { %v740_v22 = vsel %vm265_vm1, %v1905_v3, -inf }
 0x2b6   : > { %741 = vmax.xlane.f32.xlu0 %v740_v22 }
 0x2ba   : > { %v722_v6 = vpop.f32.mrf.mxu1  ;;  %v1909_v7 = vpop.xlane.xlu2 %570  ;;  %1067 = vrot.lane.b32.xlu1 %v1597_v47, %s1475_s20 }
 0x2bb   : > { %v1914_v9 = vadd.f32 %v1583_v37, %v722_v6 }
 0x2bd   : > { %v743_v12 = vsel %vm265_vm1, %v1914_v9, -inf }
 0x2be   : > { %744 = vmax.xlane.f32.xlu2 %v743_v12 }
 0x2c2   : > { %v725_v14 = vpop.f32.mrf.mxu1  ;;  %v1918_v19 = vpop.xlane.xlu2 %576 }
 0x2c3   : > { %v1933_v23 = vadd.f32 %v1583_v37, %v725_v14 }
 0x2c5   : > { %v746_v36 = vsel %vm265_vm1, %v1933_v23, -inf }
 0x2ca   : > { %v727_v21 = vpop.f32.mrf.mxu1  ;;  %1069 = vrot.lane.b32.xlu0 %v1587_v40, %s1475_s20  ;;  %v837_v35 = vpop.permute.xlu2 %836 }
 0x2cb   : > { %v1923_v24 = vadd.f32 %v1583_v37, %v727_v21  ;;  %861 = vmatpush.bf16.msrb.mxu3 %v837_v35  ;;  %v973_v40 = vpop.xlane.xlu1 %972 }
 0x2cc   : > { %v995_v27 = vsub.f32 %v1775_v17, %v973_v40 }
 0x2cd   : > { %v749_v47 = vsel %vm265_vm1, %v1923_v24, -inf }
 0x2ce   : > { %750 = vmax.xlane.f32.xlu2 %v749_v47  ;;  %v1003_v39 = vmul.f32 1.442695, %v995_v27 }
 0x2d0   : > { %1387 = vpow2.f32 %v1003_v39 }
 0x2d1   : > { %1389 = vpow2.f32 %v1007_v49 }
 0x2d2   : > { %v730_v26 = vpop.f32.mrf.mxu1  ;;  %v835_v29 = vpop.permute.xlu2 %834 }
 0x2d3   : > { %862 = vmatpush.bf16.msrb.mxu3 %v835_v29  ;;  %v1939_v42 = vadd.f32 %v1583_v37, %v730_v26  ;;  %v982_v61 = vpop.xlane.xlu1 %981 }
 0x2d4   : > { %v998_v32 = vsub.f32 %v1795_v41, %v982_v61 }
 0x2d5   : > { %v752_v17 = vsel %vm265_vm1, %v1939_v42, -inf }
 0x2d6   : > { %v1952_v52 = vpop.eup %1387  ;;  %v1009_v25 = vmul.f32 1.442695, %v998_v32 }
 0x2d7   : > { %v1019_v54 = vsel %vm265_vm1, %v1952_v52, 0.0  ;;  %v1959_v33 = vpop.eup %1389 }
 0x2d8   : > { %1391 = vpow2.f32 %v1009_v25  ;;  %v1025_v53 = vsel %vm265_vm1, %v1959_v33, 0.0 }
 0x2da   : > { %v732_v30 = vpop.f32.mrf.mxu1 }
 0x2db   : > { %v1928_v31 = vadd.f32 %v1583_v37, %v732_v30  ;;  %v1964_v60 = vpop.xlane.xlu1 %987 }
 0x2dd   : > { %v755_v4 = vsel %vm265_vm1, %v1928_v31, -inf }
 0x2de   : > { %756 = vmax.xlane.f32.xlu2 %v755_v4  ;;  %v1966_v62 = vpop.eup %1391 }
 0x2df   : > { %v1028_v1 = vsel %vm265_vm1, %v1966_v62, 0.0 }
 0x2e2   : > { %v735_v13 = vpop.f32.mrf.mxu1 }
 0x2e3   : > { %v1950_v58 = vadd.f32 %v1583_v37, %v735_v13 }
 0x2e4   : > { %747 = vmax.xlane.f32.xlu1 %v746_v36 }
 0x2e5   : > { %v758_v55 = vsel %vm265_vm1, %v1950_v58, -inf }
 0x2ea   : > { %v737_v45 = vpop.f32.mrf.mxu1 }
 0x2eb   : > { %v1943_v11 = vadd.f32 %v1583_v37, %v737_v45  ;;  %v999_v37 = vsub.f32 %v1803_v51, %v985_v15 }
 0x2ec   : > { %753 = vmax.xlane.f32.xlu1 %v752_v17 }
 0x2ed   : > { %v761_v46 = vsel %vm265_vm1, %v1943_v11, -inf  ;;  %v1011_v41 = vmul.f32 1.442695, %v999_v37 }
 0x2ee   : > { %762 = vmax.xlane.f32.xlu2 %v761_v46 }
 0x2ef   : > { %1393 = vpow2.f32 %v1011_v41 }
 0x2f0   : > { %1395 = vrcp.f32 %v1898_v63 }
 0x2f4   : > { %1020 = vadd.xlane.f32.xlu0 %v1019_v54  ;;  %759 = vmax.xlane.f32.xlu1 %v758_v55 }
 0x2f5   : > { %v1976_v51 = vpop.eup %1393 }
 0x2f6   : > { %v1031_v22 = vsel %vm265_vm1, %v1976_v51, 0.0  ;;  %v1396_v14 = vpop.eup %1395 }
 0x2f7   : > { %v589_v35 = vmul.f32 %v1396_v14, %v1763_v5  ;;  %v1066_v5 = vpop.permute.xlu2 %1065 }
 0x2fc   : > { %1026 = vadd.xlane.f32.xlu0 %v1025_v53  ;;  %v1968_v0 = vpop.xlane.xlu0 %990 }
 0x304   : > { %v1972_v2 = vpop.xlane.xlu1 %993  ;;  %1029 = vadd.xlane.f32.xlu0 %v1028_v1  ;;  %v568_v12 = vpop.xlane.xlu0 %567  ;;  %v1000_v1 = vsub.f32 %v1811_v18, %v1964_v60 }
 0x306   : > { %832 = vrot.lane.b32.xlu2 %v1611_v57, %s1474_s19 }
 0x30c   : > { %v562_v6 = vpop.xlane.xlu1 %561  ;;  %1032 = vadd.xlane.f32.xlu0 %v1031_v22  ;;  %v574_v29 = vpop.xlane.xlu0 %573 }
 0x30d   : > { %1397 = vrcp.f32 %v562_v6 }
 0x30e   : > { %1399 = vrcp.f32 %v568_v12 }
 0x30f   : > { %1401 = vrcp.f32 %v1902_v48 }
 0x310   : > { %1403 = vrcp.f32 %v574_v29 }
 0x311   : > { %1405 = vrcp.f32 %v1909_v7 }
 0x313   : > { %v1398_v21 = vpop.eup %1397 }
 0x314   : > { %v590_v47 = vmul.f32 %v1398_v21, %v1880_v38  ;;  %v1400_v63 = vpop.eup %1399  ;;  %v580_v4 = vpop.xlane.xlu0 %579 }
 0x315   : > { %v1402_v30 = vpop.eup %1401  ;;  %v592_v40 = vmul.f32 %v1400_v63, %v1869_v10 }
 0x316   : > { %v597_v26 = vpack.c.bf16 %v590_v47, %v589_v35  ;;  %v591_v27 = vmul.f32 %v1402_v30, %v1824_v34  ;;  %v1404_v48 = vpop.eup %1403 }
 0x317   : > { %v1406_v50 = vpop.eup %1405  ;;  %v594_v10 = vmul.f32 %v1404_v48, %v1882_v20 }
 0x318   : > { %1265 = vmatmul.msk.bf16.vlgmr.msra.gmra.mxu3 %vm265_vm1, %v597_v26  ;;  %v598_v13 = vpack.c.bf16 %v592_v40, %v591_v27  ;;  %v593_v46 = vmul.f32 %v1406_v50, %v1831_v56  ;;  %v1002_v27 = vsub.f32 %v1873_v28, %v1972_v2 }
 0x31a   : > { %v599_v7 = vpack.c.bf16 %v594_v10, %v593_v46 }
 0x328   : > { %1266 = vmatmul.msk.bf16.gmra.mxu3 %vm265_vm1, %v598_v13 }
 0x329   : > { %v742_v38 = vpop.xlane.xlu0 %741 }
 0x32a   : > { %v764_v36 = vsub.f32 %v1905_v3, %v742_v38  ;;  %v1997_v3 = vpop.xlane.xlu1 %1023  ;;  %v1017_v38 = vmul.f32 1.442695, %v1002_v27 }
 0x32c   : > { %v772_v39 = vmul.f32 1.442695, %v764_v36  ;;  %v1001_v36 = vsub.f32 %v1864_v16, %v1968_v0 }
 0x32e   : > { %1407 = vpow2.f32 %v772_v39  ;;  %v1015_v39 = vmul.f32 1.442695, %v1001_v36 }
 0x331   : > { %v745_v44 = vpop.xlane.xlu2 %744 }
 0x332   : > { %v765_v45 = vsub.f32 %v1914_v9, %v745_v44  ;;  %v1068_v61 = vpop.permute.xlu1 %1067 }
 0x334   : > { %v1992_v34 = vpop.eup %1407  ;;  %v774_v17 = vmul.f32 1.442695, %v765_v45 }
 0x335   : > { %v788_v49 = vsel %vm265_vm1, %v1992_v34, 0.0 }
 0x336   : > { %1409 = vpow2.f32 %v774_v17  ;;  %789 = vadd.xlane.f32.xlu1 %v788_v49 }
 0x337   : > { %1411 = vrcp.f32 %v580_v4 }
 0x338   : > { %1267 = vmatmul.msk.bf16.gmra.mxu3 %vm265_vm1, %v599_v7  ;;  %1413 = vrcp.f32 %v1918_v19 }
 0x33c   : > { %v2001_v9 = vpop.eup %1409  ;;  %v1070_v20 = vpop.permute.xlu0 %1069 }
 0x33d   : > { %1091 = vmatpush.bf16.msrb.mxu2 %v1070_v20  ;;  %v791_v56 = vsel %vm265_vm1, %v2001_v9, 0.0  ;;  %v1412_v32 = vpop.eup %1411 }
 0x33e   : > { %792 = vadd.xlane.f32.xlu1 %v791_v56  ;;  %v1414_v54 = vpop.eup %1413  ;;  %v596_v55 = vmul.f32 %v1412_v32, %v1888_v59  ;;  %v1013_v59 = vmul.f32 1.442695, %v1000_v1 }
 0x33f   : > { %v595_v25 = vmul.f32 %v1414_v54, %v1839_v8 }
 0x341   : > { %1092 = vmatpush.bf16.msrb.mxu2 %v1068_v61  ;;  %v600_v15 = vpack.c.bf16 %v596_v55, %v595_v25  ;;  %v751_v19 = vpop.xlane.xlu2 %750 }
 0x342   : > { %v767_v4 = vsub.f32 %v1923_v24, %v751_v19 }
 0x345   : > { %1093 = vmatpush.bf16.msrb.mxu2 %v1066_v5 }
 0x348   : > { %1268 = vmatmul.msk.bf16.gmra.mxu3 %vm265_vm1, %v600_v15 }
 0x351   : > { %v757_v41 = vpop.xlane.xlu2 %756 }
 0x352   : > { %v769_v12 = vsub.f32 %v1928_v31, %v757_v41 }
 0x354   : > { %v782_v18 = vmul.f32 1.442695, %v769_v12 }
 0x357   : > { %v748_v37 = vpop.xlane.xlu1 %747  ;;  %1063 = vrot.lane.b32.xlu1 %v1611_v57, %s1475_s20 }
 0x358   : > { %v766_v53 = vsub.f32 %v1933_v23, %v748_v37 }
 0x35a   : > { %v776_v22 = vmul.f32 1.442695, %v766_v53 }
 0x35c   : > { %1415 = vpow2.f32 %v776_v22 }
 0x35d   : > { %1417 = vpow2.f32 %v1013_v59 }
 0x35f   : > { %v754_v6 = vpop.xlane.xlu1 %753 }
 0x360   : > { %v768_v8 = vsub.f32 %v1939_v42, %v754_v6 }
 0x361   : > { %v763_v14 = vpop.xlane.xlu2 %762 }
 0x362   : > { %v2015_v21 = vpop.eup %1415  ;;  %v780_v35 = vmul.f32 1.442695, %v768_v8  ;;  %v771_v57 = vsub.f32 %v1943_v11, %v763_v14 }
 0x363   : > { %v794_v23 = vsel %vm265_vm1, %v2015_v21, 0.0  ;;  %v2020_v26 = vpop.eup %1417 }
 0x364   : > { %1419 = vpow2.f32 %v780_v35  ;;  %795 = vadd.xlane.f32.xlu2 %v794_v23  ;;  %v786_v60 = vmul.f32 1.442695, %v771_v57  ;;  %v1034_v29 = vsel %vm265_vm1, %v2020_v26, 0.0 }
 0x365   : > { %1421 = vpow2.f32 %v782_v18 }
 0x366   : > { %1423 = vpow2.f32 %v786_v60 }
 0x367   : > { %v760_v47 = vpop.xlane.xlu1 %759  ;;  %v1021_v25 = vpop.xlane.xlu0 %1020 }
 0x368   : > { %v770_v31 = vsub.f32 %v1950_v58, %v760_v47  ;;  %v778_v58 = vmul.f32 1.442695, %v767_v4 }
 0x369   : > { %v833_v45 = vpop.permute.xlu2 %832 }
 0x36a   : > { %v2022_v42 = vpop.eup %1419  ;;  %v784_v63 = vmul.f32 1.442695, %v770_v31  ;;  %863 = vmatpush.bf16.msrb.mxu3 %v833_v45 }
 0x36b   : > { %v800_v11 = vsel %vm265_vm1, %v2022_v42, 0.0  ;;  %v2029_v30 = vpop.eup %1421 }
 0x36c   : > { %1035 = vadd.xlane.f32.xlu2 %v1034_v29  ;;  %801 = vadd.xlane.f32.xlu0 %v800_v11  ;;  %v2032_v40 = vpop.eup %1423  ;;  %1425 = vpow2.f32 %v784_v63  ;;  %v803_v5 = vsel %vm265_vm1, %v2029_v30, 0.0 }
 0x36d   : > { %v809_v13 = vsel %vm265_vm1, %v2032_v40, 0.0  ;;  %1427 = vpow2.f32 %v778_v58 }
 0x36e   : > { %1429 = vpow2.f32 %v1017_v38 }
 0x36f   : > { %1431 = vpow2.f32 %v1015_v39  ;;  %v1027_v22 = vpop.xlane.xlu0 %1026 }
 0x372   : > { %v2042_v24 = vpop.eup %1425 }
 0x373   : > { %v806_v28 = vsel %vm265_vm1, %v2042_v24, 0.0  ;;  %v2046_v2 = vpop.eup %1427 }
 0x374   : > { %810 = vadd.xlane.f32.xlu2 %v809_v13  ;;  %804 = vadd.xlane.f32.xlu0 %v803_v5  ;;  %v2048_v48 = vpop.eup %1429  ;;  %v797_v50 = vsel %vm265_vm1, %v2046_v2, 0.0 }
 0x375   : > { %v1040_v16 = vsel %vm265_vm1, %v2048_v48, 0.0  ;;  %v2054_v0 = vpop.eup %1431 }
 0x376   : > { %v1037_v44 = vsel %vm265_vm1, %v2054_v0, 0.0 }
 0x377   : > { %v1030_v35 = vpop.xlane.xlu0 %1029 }
 0x37c   : > { %807 = vadd.xlane.f32.xlu0 %v806_v28 }
 0x381   : > { %798 = vadd.xlane.f32.xlu1 %v797_v50 }
 0x384   : > { %1041 = vadd.xlane.f32.xlu0 %v1040_v16 }
 0x389   : > { %1038 = vadd.xlane.f32.xlu1 %v1037_v44 }
 0x39b   : > { %v634_v10 = vpop.f32.mrf.mxu3 }
 0x39c   : > { %v654_v17 = vpack.c.bf16 %v634_v10, %v634_v10 }
 0x39e   : > { %1269 = vst.msk [vmem:[%s1818_s26 + $0x20] sm:$0xf] %vm431_vm2, %v654_v17 }
 0x3a3   : > { %v636_v46 = vpop.f32.mrf.mxu3 }
 0x3a4   : > { %v655_v49 = vpack.c.bf16 %v636_v46, %v636_v46 }
 0x3a6   : > { %1270 = vst.msk [vmem:[%s1818_s26 + $0x24] sm:$0xf] %vm431_vm2, %v655_v49 }
 0x3a9   : > { %v790_v7 = vpop.xlane.xlu1 %789 }
 0x3aa   : > { %1433 = vrcp.f32 %v790_v7 }
 0x3ab   : > { %v639_v20 = vpop.f32.mrf.mxu3 }
 0x3ac   : > { %v656_v56 = vpack.c.bf16 %v639_v20, %v639_v20 }
 0x3ae   : > { %1271 = vst.msk [vmem:[%s1818_s26 + $0x28] sm:$0xf] %vm431_vm2, %v656_v56 }
 0x3b0   : > { %v1434_v55 = vpop.eup %1433 }
 0x3b1   : > { %v793_v61 = vpop.xlane.xlu1 %792  ;;  %v820_v19 = vmul.f32 %v1434_v55, %v1992_v34 }
 0x3b2   : > { %1435 = vrcp.f32 %v793_v61 }
 0x3b3   : > { %v641_v32 = vpop.f32.mrf.mxu3  ;;  %1437 = vrcp.f32 %v1021_v25 }
 0x3b4   : > { %v657_v54 = vpack.c.bf16 %v641_v32, %v641_v32  ;;  %1439 = vrcp.f32 %v1997_v3 }
 0x3b5   : > { %1441 = vrcp.f32 %v1030_v35 }
 0x3b6   : > { %1272 = vst.msk [vmem:[%s1818_s26 + $0x2c] sm:$0xf] %vm431_vm2, %v657_v54  ;;  %1443 = vrcp.f32 %v1027_v22 }
 0x3b8   : > { %v1436_v15 = vpop.eup %1435 }
 0x3b9   : > { %v821_v37 = vmul.f32 %v1436_v15, %v2001_v9  ;;  %v1438_v6 = vpop.eup %1437 }
 0x3ba   : > { %v1440_v12 = vpop.eup %1439  ;;  %v1051_v34 = vmul.f32 %v1438_v6, %v1952_v52  ;;  %v1033_v52 = vpop.xlane.xlu0 %1032 }
 0x3bb   : > { %v644_v53 = vpop.f32.mrf.mxu3  ;;  %v828_v41 = vpack.c.bf16 %v821_v37, %v820_v19  ;;  %v1052_v9 = vmul.f32 %v1440_v12, %v1890_v43  ;;  %v1442_v60 = vpop.eup %1441  ;;  %1445 = vrcp.f32 %v1033_v52 }
 0x3bc   : > { %v658_v1 = vpack.c.bf16 %v644_v53, %v644_v53  ;;  %v1444_v31 = vpop.eup %1443  ;;  %v1054_v29 = vmul.f32 %v1442_v60, %v1966_v62 }
 0x3bd   : > { %1281 = vmatmul.msk.bf16.vlgmr.msrb.gmra.mxu3 %vm265_vm1, %v828_v41  ;;  %v1059_v23 = vpack.c.bf16 %v1052_v9, %v1051_v34  ;;  %v1053_v11 = vmul.f32 %v1444_v31, %v1959_v33 }
 0x3be   : > { %1273 = vst.msk [vmem:[%s1818_s26 + $0x30] sm:$0xf] %vm431_vm2, %v658_v1 }
 0x3bf   : > { %v1060_v63 = vpack.c.bf16 %v1054_v29, %v1053_v11 }
 0x3c1   : > { %v1446_v58 = vpop.eup %1445 }
 0x3c2   : > { %v1055_v36 = vmul.f32 %v1446_v58, %v1976_v51 }
 0x3c3   : > { %v646_v59 = vpop.f32.mrf.mxu3 }
 0x3c4   : > { %v659_v8 = vpack.c.bf16 %v646_v59, %v646_v59 }
 0x3c6   : > { %1274 = vst.msk [vmem:[%s1818_s26 + $0x34] sm:$0xf] %vm431_vm2, %v659_v8 }
 0x3c9   : > { %v1064_v14 = vpop.permute.xlu1 %1063 }
 0x3ca   : > { %1094 = vmatpush.bf16.msrb.mxu2 %v1064_v14 }
 0x3cb   : > { %v649_v57 = vpop.f32.mrf.mxu3 }
 0x3cc   : > { %v660_v18 = vpack.c.bf16 %v649_v57, %v649_v57 }
 0x3cd   : > { %1297 = vmatmul.msk.bf16.vlgmr.msrb.gmra.mxu2 %vm265_vm1, %v1059_v23 }
 0x3ce   : > { %1275 = vst.msk [vmem:[%s1818_s26 + $0x38] sm:$0xf] %vm431_vm2, %v660_v18 }
 0x3d3   : > { %v651_v3 = vpop.f32.mrf.mxu3 }
 0x3d4   : > { %v661_v47 = vpack.c.bf16 %v651_v3, %v651_v3 }
 0x3d6   : > { %1276 = vst.msk [vmem:[%s1818_s26 + $0x3c] sm:$0xf] %vm431_vm2, %v661_v47 }
 0x3d7   : > { %v796_v43 = vpop.xlane.xlu2 %795 }
 0x3dd   : > { %1298 = vmatmul.msk.bf16.gmra.mxu2 %vm265_vm1, %v1060_v63 }
 0x3df   : > { %v1036_v4 = vpop.xlane.xlu2 %1035  ;;  %v802_v27 = vpop.xlane.xlu0 %801 }
 0x3e0   : > { %1447 = vrcp.f32 %v1036_v4 }
 0x3e1   : > { %1449 = vrcp.f32 %v796_v43 }
 0x3e6   : > { %v1448_v13 = vpop.eup %1447 }
 0x3e7   : > { %v805_v5 = vpop.xlane.xlu0 %804  ;;  %v1056_v38 = vmul.f32 %v1448_v13, %v2020_v26  ;;  %v1450_v50 = vpop.eup %1449 }
 0x3e8   : > { %v822_v45 = vmul.f32 %v1450_v50, %v2015_v21  ;;  %v811_v32 = vpop.xlane.xlu2 %810 }
 0x3e9   : > { %v1061_v39 = vpack.c.bf16 %v1056_v38, %v1055_v36 }
 0x3ed   : > { %1299 = vmatmul.msk.bf16.gmra.mxu2 %vm265_vm1, %v1061_v39 }
 0x3ef   : > { %v808_v62 = vpop.xlane.xlu0 %807 }
 0x3f4   : > { %v799_v33 = vpop.xlane.xlu1 %798 }
 0x3f5   : > { %1451 = vrcp.f32 %v799_v33 }
 0x3f7   : > { %v1042_v28 = vpop.xlane.xlu0 %1041 }
 0x3f8   : > { %1453 = vrcp.f32 %v1042_v28 }
 0x3fb   : > { %v1452_v16 = vpop.eup %1451 }
 0x3fc   : > { %v1039_v44 = vpop.xlane.xlu1 %1038  ;;  %v823_v10 = vmul.f32 %v1452_v16, %v2046_v2 }
 0x3fd   : > { %1455 = vrcp.f32 %v1039_v44 }
 0x3fe   : > { %v829_v26 = vpack.c.bf16 %v823_v10, %v822_v45  ;;  %v1454_v51 = vpop.eup %1453  ;;  %1457 = vrcp.f32 %v805_v5 }
 0x3ff   : > { %1459 = vrcp.f32 %v802_v27  ;;  %v1058_v49 = vmul.f32 %v1454_v51, %v2048_v48 }
 0x400   : > { %1282 = vmatmul.msk.bf16.gmra.mxu3 %vm265_vm1, %v829_v26  ;;  %1461 = vrcp.f32 %v808_v62 }
 0x401   : > { %1463 = vrcp.f32 %v811_v32 }
 0x403   : > { %v1456_v17 = vpop.eup %1455 }
 0x404   : > { %v1057_v46 = vmul.f32 %v1456_v17, %v2054_v0  ;;  %v1458_v20 = vpop.eup %1457 }
 0x405   : > { %v1460_v56 = vpop.eup %1459  ;;  %v825_v21 = vmul.f32 %v1458_v20, %v2029_v30 }
 0x406   : > { %v1062_v7 = vpack.c.bf16 %v1058_v49, %v1057_v46  ;;  %v824_v2 = vmul.f32 %v1460_v56, %v2022_v42  ;;  %v1462_v0 = vpop.eup %1461 }
 0x407   : > { %v1464_v48 = vpop.eup %1463  ;;  %v826_v54 = vmul.f32 %v1462_v0, %v2042_v24 }
 0x408   : > { %1300 = vmatmul.msk.bf16.gmra.mxu2 %vm265_vm1, %v1062_v7  ;;  %v830_v61 = vpack.c.bf16 %v825_v21, %v824_v2  ;;  %v827_v55 = vmul.f32 %v1464_v48, %v2032_v40 }
 0x40a   : > { %v831_v25 = vpack.c.bf16 %v827_v55, %v826_v54 }
 0x410   : > { %1283 = vmatmul.msk.bf16.gmra.mxu3 %vm265_vm1, %v830_v61 }
 0x420   : > { %1284 = vmatmul.msk.bf16.gmra.mxu3 %vm265_vm1, %v831_v25 }
 0x440   : > { %v865_v42 = vpop.f32.mrf.mxu3 }
 0x441   : > { %v885_v30 = vpack.c.bf16 %v865_v42, %v865_v42 }
 0x443   : > { %1285 = vst.msk [vmem:[%s1818_s26 + $0x40] sm:$0xf] %vm431_vm2, %v885_v30 }
 0x448   : > { %v867_v15 = vpop.f32.mrf.mxu3 }
 0x449   : > { %v886_v19 = vpack.c.bf16 %v867_v15, %v867_v15 }
 0x44b   : > { %1286 = vst.msk [vmem:[%s1818_s26 + $0x44] sm:$0xf] %vm431_vm2, %v886_v19 }
 0x450   : > { %v1096_v37 = vpop.f32.mrf.mxu2 }
 0x451   : > { %v1116_v53 = vpack.c.bf16 %v1096_v37, %v1096_v37 }
 0x453   : > { %1301 = vst.msk [vmem:[%s1818_s26 + $0x60] sm:$0xf] %vm431_vm2, %v1116_v53 }
 0x458   : > { %v1098_v40 = vpop.f32.mrf.mxu2 }
 0x459   : > { %v1117_v24 = vpack.c.bf16 %v1098_v40, %v1098_v40 }
 0x45b   : > { %1302 = vst.msk [vmem:[%s1818_s26 + $0x64] sm:$0xf] %vm431_vm2, %v1117_v24 }
 0x460   : > { %v1101_v41 = vpop.f32.mrf.mxu2 }
 0x461   : > { %v1118_v1 = vpack.c.bf16 %v1101_v41, %v1101_v41 }
 0x463   : > { %1303 = vst.msk [vmem:[%s1818_s26 + $0x68] sm:$0xf] %vm431_vm2, %v1118_v1 }
 0x468   : > { %v1103_v22 = vpop.f32.mrf.mxu2 }
 0x469   : > { %v1119_v59 = vpack.c.bf16 %v1103_v22, %v1103_v22 }
 0x46b   : > { %1304 = vst.msk [vmem:[%s1818_s26 + $0x6c] sm:$0xf] %vm431_vm2, %v1119_v59 }
 0x470   : > { %v1106_v6 = vpop.f32.mrf.mxu2 }
 0x471   : > { %v1120_v8 = vpack.c.bf16 %v1106_v6, %v1106_v6 }
 0x473   : > { %1305 = vst.msk [vmem:[%s1818_s26 + $0x70] sm:$0xf] %vm431_vm2, %v1120_v8 }
 0x478   : > { %v1108_v12 = vpop.f32.mrf.mxu2 }
 0x479   : > { %v1121_v34 = vpack.c.bf16 %v1108_v12, %v1108_v12 }
 0x47b   : > { %1306 = vst.msk [vmem:[%s1818_s26 + $0x74] sm:$0xf] %vm431_vm2, %v1121_v34 }
 0x483   : > { %v870_v9 = vpop.f32.mrf.mxu3 }
 0x484   : > { %v887_v14 = vpack.c.bf16 %v870_v9, %v870_v9 }
 0x486   : > { %1287 = vst.msk [vmem:[%s1818_s26 + $0x48] sm:$0xf] %vm431_vm2, %v887_v14 }
 0x48b   : > { %v872_v35 = vpop.f32.mrf.mxu3  ;;  %v1111_v57 = vpop.f32.mrf.mxu2 }
 0x48c   : > { %v888_v23 = vpack.c.bf16 %v872_v35, %v872_v35  ;;  %v1122_v18 = vpack.c.bf16 %v1111_v57, %v1111_v57 }
 0x48e   : > { %1288 = vst.msk [vmem:[%s1818_s26 + $0x4c] sm:$0xf] %vm431_vm2, %v888_v23 }
 0x48f   : > { %1307 = vst.msk [vmem:[%s1818_s26 + $0x78] sm:$0xf] %vm431_vm2, %v1122_v18 }
 0x493   : > { %v875_v3 = vpop.f32.mrf.mxu3  ;;  %v1113_v60 = vpop.f32.mrf.mxu2 }
 0x494   : > { %v889_v47 = vpack.c.bf16 %v875_v3, %v875_v3  ;;  %v1123_v31 = vpack.c.bf16 %v1113_v60, %v1113_v60 }
 0x496   : > { %1289 = vst.msk [vmem:[%s1818_s26 + $0x50] sm:$0xf] %vm431_vm2, %v889_v47 }
 0x497   : > { %1308 = vst.msk [vmem:[%s1818_s26 + $0x7c] sm:$0xf] %vm431_vm2, %v1123_v31 }
 0x49b   : > { %v877_v52 = vpop.f32.mrf.mxu3 }
 0x49c   : > { %v890_v43 = vpack.c.bf16 %v877_v52, %v877_v52 }
 0x49e   : > { %1290 = vst.msk [vmem:[%s1818_s26 + $0x54] sm:$0xf] %vm431_vm2, %v890_v43 }
 0x4a3   : > { %v880_v29 = vpop.f32.mrf.mxu3 }
 0x4a4   : > { %v891_v11 = vpack.c.bf16 %v880_v29, %v880_v29 }
 0x4a6   : > { %1291 = vst.msk [vmem:[%s1818_s26 + $0x58] sm:$0xf] %vm431_vm2, %v891_v11 }
 0x4ab   : > { %v882_v63 = vpop.f32.mrf.mxu3 }
 0x4ac   : > { %v892_v4 = vpack.c.bf16 %v882_v63, %v882_v63 }
 0x4ae   : > { %1292 = vst.msk [vmem:[%s1818_s26 + $0x5c] sm:$0xf] %vm431_vm2, %v892_v4 }
 0x4af PF: > { %s12_s9 = sadd.s32 1, %s1471_s9  }
 0x4b0   : > { %p9_p4 = scmp.ge.s32.totalorder %s12_s9, 10  }
 0x4b2   :  { %11 = sbr.rel (!%p9_p4) target bundleno = 1 (0x1), region = 64 }

// kernel: forward.16
= control target key start
LH: loop header
LB: loop body
LE: loop exit
PB: predicated region body
PF: predicated region fallthrough
CT: control target
= control target key end

     0   :  { %s1962_s21 = smov 0   ;;  %s3026_s0 = inlined_call_operand.vmem [shape: bf16[512,128], index: 0, kind: input, shape index: {}]   ;;  %s3027_s1 = inlined_call_operand.vmem [shape: bf16[128,128], index: 1, kind: input, shape index: {}]   ;;  %s3028_s2 = inlined_call_operand.vmem [shape: f32[1,128], index: 2, kind: input, shape index: {}]   ;;  %s3029_s3 = inlined_call_operand.vmem [shape: bf16[512,128], index: 3, kind: input, shape index: {}]   ;;  %s3030_s4 = inlined_call_operand.vmem [shape: f32[1,128], index: 4, kind: input, shape index: {}]   ;;  %s3031_s5 = inlined_call_operand.vmem [shape: f32[1,128], index: 5, kind: input, shape index: {}]   ;;  %s3032_s6 = inlined_call_operand.vmem [shape: bf16[512,128], index: 6, kind: output, shape index: {}]  }
   0x1 LB: > { %s1509_s22 = sadd.s32 4294967295, %s1924_s21   ;;  %p1513_p0 = scmp.ge.s32.totalorder %s1924_s21, 1  ;;  %s1924_s21 = sphi %s1962_s21, %s16_s21  }
   0x2   : > { %p224_p1 = scmp.lt.s32.totalorder %s1924_s21, 3 }
   0x4   : > { %p225_p2 = pnand %p1513_p0, %p224_p1 }
   0x5   : > { %s1514_s7 = sshll.u32 (!%p225_p2), %s1509_s22, 5 }
   0x6   : > { %228 = sbr.rel (%p225_p2) target bundleno = 557 (0x22d), region = 44  ;;  %p260_p3 = scmp.lt.s32.totalorder (!%p225_p2), %s1514_s7, 63 }
   0xb   : > { %v1641_v0 = vld [vmem:[%s3027_s1 + $0x38] sm:$0xff]  ;;  %v1640_v1 = vld [vmem:[%s3027_s1 + $0x30] sm:$0xff]  ;;  %v1639_v2 = vld [vmem:[%s3027_s1 + $0x28] sm:$0xff]  ;;  %s3060_s7 = smov (!%p260_p3, %s1514_s7), 63 }
   0xc   : > { %473 = vmatpush.bf16.msra.mxu0 %v1641_v0  ;;  %1816 = vmatpush.bf16.msra.mxu1 %v1641_v0  ;;  %v1638_v3 = vld [vmem:[%s3027_s1 + $0x20] sm:$0xff]  ;;  %v1637_v4 = vld [vmem:[%s3027_s1 + $0x18] sm:$0xff]  ;;  %v1636_v5 = vld [vmem:[%s3027_s1 + $0x10] sm:$0xff]  ;;  %s1991_s14 = sshll.u32 %s3060_s7, 2 }
   0xd   : > { %1817 = vmatpush.bf16.msra.mxu2 %v1641_v0  ;;  %1818 = vmatpush.bf16.msra.mxu3 %v1641_v0  ;;  %v1635_v6 = vld [vmem:[%s3027_s1 + $0x8] sm:$0xff]  ;;  %v1634_v7 = vld [vmem:[%s3027_s1] sm:$0xff]  ;;  %s2000_s19 = scalar_lea.vmem %s3026_s0, %s1991_s14  ;;  %s2022_s23 = scalar_lea.vmem %s3029_s3, %s1991_s14 }
   0xe   : > { %v1618_v8 = vld [vmem:[%s2000_s19] sm:$0xff]  ;;  %v1619_v12 = vld [vmem:[%s2000_s19 + $0x8] sm:$0xff]  ;;  %v1620_v16 = vld [vmem:[%s2000_s19 + $0x10] sm:$0xff]  ;;  %s2529_s8 = scalar_lea.vmem %s3032_s6, %s1991_s14 }
   0xf   : > { %v1622_v9 = vld [vmem:[%s2000_s19 + $0x20] sm:$0xff]  ;;  %v1623_v13 = vld [vmem:[%s2000_s19 + $0x28] sm:$0xff]  ;;  %v1624_v17 = vld [vmem:[%s2000_s19 + $0x30] sm:$0xff] }
  0x10   : > { %474 = vmatpush.bf16.msra.mxu0 %v1640_v1  ;;  %1819 = vmatpush.bf16.msra.mxu1 %v1640_v1  ;;  %v1626_v10 = vld [vmem:[%s2000_s19 + $0x40] sm:$0xff]  ;;  %v1631_v14 = vld [vmem:[%s2000_s19 + $0x68] sm:$0xff]  ;;  %v1628_v18 = vld [vmem:[%s2000_s19 + $0x50] sm:$0xff] }
  0x11   : > { %1820 = vmatpush.bf16.msra.mxu2 %v1640_v1  ;;  %1821 = vmatpush.bf16.msra.mxu3 %v1640_v1  ;;  %v1630_v11 = vld [vmem:[%s2000_s19 + $0x60] sm:$0xff]  ;;  %v1627_v15 = vld [vmem:[%s2000_s19 + $0x48] sm:$0xff]  ;;  %v1632_v19 = vld [vmem:[%s2000_s19 + $0x70] sm:$0xff] }
  0x12   : > { %v1621_v20 = vld [vmem:[%s2000_s19 + $0x18] sm:$0xff]  ;;  %v1789_v24 = vld [vmem:[%s2022_s23 + $0x20] sm:$0xff]   ;;  %v1786_v57 = vld [vmem:[%s2022_s23 + $0x8] sm:$0xff]  }
  0x13   : > { %v1625_v21 = vld [vmem:[%s2000_s19 + $0x38] sm:$0xff]  ;;  %v1643_v25 = vld [vmem:[%s2022_s23] sm:$0xff]   ;;  %v1660_v27 = vunpack.c.l.bf16 %v1789_v24  ;;  %v1798_v61 = vld [vmem:[%s2022_s23 + $0x68] sm:$0xff]   ;;  %v1648_v63 = vunpack.c.l.bf16 %v1786_v57 }
  0x14   : > { %475 = vmatpush.bf16.msra.mxu0 %v1639_v2  ;;  %1822 = vmatpush.bf16.msra.mxu1 %v1639_v2  ;;  %v1629_v22 = vld [vmem:[%s2000_s19 + $0x58] sm:$0xff]  ;;  %v2029_v26 = vld [vmem:[%s3028_s2] ss:$0 sm:$0xff]  ;;  %v1644_v28 = vunpack.c.l.bf16 %v1643_v25  ;;  %v1645_v52 = vunpack.c.h.bf16 %v1643_v25  ;;  %v1696_v0 = vunpack.c.l.bf16 %v1798_v61 }
  0x15   : > { %1823 = vmatpush.bf16.msra.mxu2 %v1639_v2  ;;  %1824 = vmatpush.bf16.msra.mxu3 %v1639_v2  ;;  %v1633_v23 = vld [vmem:[%s2000_s19 + $0x78] sm:$0xff]  ;;  %v1793_v35 = vld [vmem:[%s2022_s23 + $0x40] sm:$0xff]  }
  0x16   : > { %v1797_v36 = vld [vmem:[%s2022_s23 + $0x60] sm:$0xff]   ;;  %v1676_v37 = vunpack.c.l.bf16 %v1793_v35  ;;  %v1677_v48 = vunpack.c.h.bf16 %v1793_v35 }
  0x17   : > { %v1692_v40 = vunpack.c.l.bf16 %v1797_v36  ;;  %v1693_v47 = vunpack.c.h.bf16 %v1797_v36 }
  0x18   : > { %476 = vmatpush.bf16.msra.mxu0 %v1638_v3  ;;  %1825 = vmatpush.bf16.msra.mxu1 %v1638_v3 }
  0x19   : > { %1826 = vmatpush.bf16.msra.mxu2 %v1638_v3  ;;  %1827 = vmatpush.bf16.msra.mxu3 %v1638_v3  ;;  %v1661_v3 = vunpack.c.h.bf16 %v1789_v24  ;;  %v1787_v24 = vld [vmem:[%s2022_s23 + $0x10] sm:$0xff]  }
  0x1c   : > { %477 = vmatpush.bf16.msra.mxu0 %v1637_v4  ;;  %1828 = vmatpush.bf16.msra.mxu1 %v1637_v4 }
  0x1d   : > { %1829 = vmatpush.bf16.msra.mxu2 %v1637_v4  ;;  %1830 = vmatpush.bf16.msra.mxu3 %v1637_v4 }
  0x20   : > { %478 = vmatpush.bf16.msra.mxu0 %v1636_v5  ;;  %1831 = vmatpush.bf16.msra.mxu1 %v1636_v5 }
  0x21   : > { %1832 = vmatpush.bf16.msra.mxu2 %v1636_v5  ;;  %1833 = vmatpush.bf16.msra.mxu3 %v1636_v5 }
  0x24   : > { %479 = vmatpush.bf16.msra.mxu0 %v1635_v6  ;;  %1834 = vmatpush.bf16.msra.mxu1 %v1635_v6 }
  0x25   : > { %1835 = vmatpush.bf16.msra.mxu2 %v1635_v6  ;;  %1836 = vmatpush.bf16.msra.mxu3 %v1635_v6 }
  0x28   : > { %480 = vmatpush.bf16.msra.mxu0 %v1634_v7  ;;  %1837 = vmatpush.bf16.msra.mxu1 %v1634_v7 }
  0x29   : > { %1838 = vmatpush.bf16.msra.mxu2 %v1634_v7  ;;  %1839 = vmatpush.bf16.msra.mxu3 %v1634_v7 }
  0x2b   : > { %481 = vmatmul.bf16.vlgmr.msra.gmra.mxu0 %v1618_v8  ;;  %501 = vmatmul.bf16.vlgmr.msra.gmra.mxu1 %v1622_v9  ;;  %v1790_v9 = vld [vmem:[%s2022_s23 + $0x28] sm:$0xff]  }
  0x2c   : > { %521 = vmatmul.bf16.vlgmr.msra.gmra.mxu2 %v1626_v10  ;;  %541 = vmatmul.bf16.vlgmr.msra.gmra.mxu3 %v1630_v11  ;;  %v1794_v11 = vld [vmem:[%s2022_s23 + $0x48] sm:$0xff]  }
  0x3b   : > { %486 = vmatmul.bf16.gmra.mxu0 %v1619_v12  ;;  %506 = vmatmul.bf16.gmra.mxu1 %v1623_v13 }
  0x3c   : > { %546 = vmatmul.bf16.gmra.mxu3 %v1631_v14  ;;  %526 = vmatmul.bf16.gmra.mxu2 %v1627_v15  ;;  %v1665_v15 = vunpack.c.h.bf16 %v1790_v9 }
  0x4b   : > { %491 = vmatmul.bf16.gmra.mxu0 %v1620_v16  ;;  %511 = vmatmul.bf16.gmra.mxu1 %v1624_v17  ;;  %v1664_v16 = vunpack.c.l.bf16 %v1790_v9 }
  0x4c   : > { %531 = vmatmul.bf16.gmra.mxu2 %v1628_v18  ;;  %551 = vmatmul.bf16.gmra.mxu3 %v1632_v19  ;;  %v1680_v18 = vunpack.c.l.bf16 %v1794_v11 }
  0x5b   : > { %496 = vmatmul.bf16.gmra.mxu0 %v1621_v20  ;;  %516 = vmatmul.bf16.gmra.mxu1 %v1625_v21 }
  0x5c   : > { %536 = vmatmul.bf16.gmra.mxu2 %v1629_v22  ;;  %556 = vmatmul.bf16.gmra.mxu3 %v1633_v23 }
  0xa8   : > { %v482_v29 = vpop.f32.mrf.mxu0  ;;  %v502_v30 = vpop.f32.mrf.mxu1 }
  0xa9   : > { %v483_v31 = vadd.f32 %v2029_v26, %v482_v29  ;;  %v503_v32 = vadd.f32 %v2029_v26, %v502_v30  ;;  %v1649_v30 = vunpack.c.h.bf16 %v1786_v57 }
  0xab   : > { %v2033_v33 = vadd.f32 %v1660_v27, %v503_v32  ;;  %v2035_v34 = vadd.f32 %v1644_v28, %v483_v31  ;;  %v1652_v28 = vunpack.c.l.bf16 %v1787_v24  ;;  %v1697_v32 = vunpack.c.h.bf16 %v1798_v61 }
  0xad   : > { %674 = vadd.xlane.f32.xlu2 %v2033_v33  ;;  %658 = vadd.xlane.f32.xlu0 %v2035_v34 }
  0xaf   : > { %v522_v38 = vpop.f32.mrf.mxu2  ;;  %v542_v39 = vpop.f32.mrf.mxu3 }
  0xb0   : > { %v523_v41 = vadd.f32 %v2029_v26, %v522_v38  ;;  %v543_v42 = vadd.f32 %v2029_v26, %v542_v39  ;;  %v484_v43 = vpop.f32.mrf.mxu0  ;;  %v504_v44 = vpop.f32.mrf.mxu1  ;;  %v1791_v39 = vld [vmem:[%s2022_s23 + $0x30] sm:$0xff]  }
  0xb1   : > { %v485_v49 = vadd.f32 %v2029_v26, %v484_v43  ;;  %v505_v1 = vadd.f32 %v2029_v26, %v504_v44 }
  0xb2   : > { %v2043_v45 = vadd.f32 %v1676_v37, %v523_v41  ;;  %v2045_v46 = vadd.f32 %v1692_v40, %v543_v42  ;;  %v1795_v37 = vld [vmem:[%s2022_s23 + $0x50] sm:$0xff]  }
  0xb3   : > { %v2057_v60 = vadd.f32 %v1645_v52, %v485_v49  ;;  %v2072_v12 = vadd.f32 %v1661_v3, %v505_v1  ;;  %v1684_v43 = vunpack.c.l.bf16 %v1795_v37  ;;  %v1681_v49 = vunpack.c.h.bf16 %v1794_v11 }
  0xb4   : > { %690 = vadd.xlane.f32.xlu1 %v2043_v45  ;;  %v1685_v1 = vunpack.c.h.bf16 %v1795_v37 }
  0xb5   : > { %706 = vadd.xlane.f32.xlu0 %v2045_v46 }
  0xb7   : > { %v524_v50 = vpop.f32.mrf.mxu2  ;;  %v544_v51 = vpop.f32.mrf.mxu3 }
  0xb8   : > { %v525_v53 = vadd.f32 %v2029_v26, %v524_v50  ;;  %v545_v54 = vadd.f32 %v2029_v26, %v544_v51  ;;  %v487_v55 = vpop.f32.mrf.mxu0  ;;  %v507_v56 = vpop.f32.mrf.mxu1 }
  0xb9   : > { %v488_v62 = vadd.f32 %v2029_v26, %v487_v55  ;;  %v508_v13 = vadd.f32 %v2029_v26, %v507_v56 }
  0xba   : > { %v2053_v58 = vadd.f32 %v1693_v47, %v545_v54  ;;  %v2055_v59 = vadd.f32 %v1677_v48, %v525_v53  ;;  %v1668_v47 = vunpack.c.l.bf16 %v1791_v39  ;;  %v1799_v53 = vld [vmem:[%s2022_s23 + $0x70] sm:$0xff]  }
  0xbb   : > { %v2066_v6 = vadd.f32 %v1648_v63, %v488_v62  ;;  %v2082_v21 = vadd.f32 %v1664_v16, %v508_v13  ;;  %v1700_v61 = vunpack.c.l.bf16 %v1799_v53  ;;  %v1653_v63 = vunpack.c.h.bf16 %v1787_v24 }
  0xbc   : > { %708 = vadd.xlane.f32.xlu1 %v2053_v58  ;;  %692 = vadd.xlane.f32.xlu2 %v2055_v59  ;;  %v1701_v13 = vunpack.c.h.bf16 %v1799_v53 }
  0xbd   : > { %660 = vadd.xlane.f32.xlu0 %v2057_v60 }
  0xbf   : > { %v547_v2 = vpop.f32.mrf.mxu3  ;;  %v527_v4 = vpop.f32.mrf.mxu2 }
  0xc0   : > { %v548_v5 = vadd.f32 %v2029_v26, %v547_v2  ;;  %v489_v7 = vpop.f32.mrf.mxu0  ;;  %v509_v8 = vpop.f32.mrf.mxu1  ;;  %v528_v17 = vadd.f32 %v2029_v26, %v527_v4 }
  0xc1   : > { %v510_v14 = vadd.f32 %v2029_v26, %v509_v8  ;;  %v490_v29 = vadd.f32 %v2029_v26, %v489_v7  ;;  %v1788_v7 = vld [vmem:[%s2022_s23 + $0x18] sm:$0xff]  }
  0xc2   : > { %v2069_v10 = vadd.f32 %v1696_v0, %v548_v5  ;;  %v2084_v22 = vadd.f32 %v1680_v18, %v528_v17  ;;  %v1669_v17 = vunpack.c.h.bf16 %v1791_v39 }
  0xc3   : > { %v2080_v20 = vadd.f32 %v1665_v15, %v510_v14  ;;  %v2096_v38 = vadd.f32 %v1649_v30, %v490_v29  ;;  %v1656_v15 = vunpack.c.l.bf16 %v1788_v7  ;;  %v1800_v29 = vld [vmem:[%s2022_s23 + $0x78] sm:$0xff]  }
  0xc4   : > { %710 = vadd.xlane.f32.xlu2 %v2069_v10  ;;  %662 = vadd.xlane.f32.xlu1 %v2066_v6 }
  0xc5   : > { %676 = vadd.xlane.f32.xlu0 %v2072_v12 }
  0xc7   : > { %v529_v19 = vpop.f32.mrf.mxu2  ;;  %v549_v25 = vpop.f32.mrf.mxu3 }
  0xc8   : > { %v492_v23 = vpop.f32.mrf.mxu0  ;;  %v550_v31 = vadd.f32 %v2029_v26, %v549_v25  ;;  %v512_v41 = vpop.f32.mrf.mxu1  ;;  %v530_v48 = vadd.f32 %v2029_v26, %v529_v19  ;;  %v1792_v25 = vld [vmem:[%s2022_s23 + $0x38] sm:$0xff]  }
  0xc9   : > { %v493_v27 = vadd.f32 %v2029_v26, %v492_v23  ;;  %v513_v44 = vadd.f32 %v2029_v26, %v512_v41  ;;  %v1704_v41 = vunpack.c.l.bf16 %v1800_v29 }
  0xca   : > { %v2099_v40 = vadd.f32 %v1697_v32, %v550_v31  ;;  %v2112_v54 = vadd.f32 %v1681_v49, %v530_v48 }
  0xcb   : > { %v2093_v35 = vadd.f32 %v1652_v28, %v493_v27  ;;  %v2109_v52 = vadd.f32 %v1668_v47, %v513_v44  ;;  %v1796_v27 = vld [vmem:[%s2022_s23 + $0x58] sm:$0xff]  }
  0xcc   : > { %680 = vadd.xlane.f32.xlu2 %v2080_v20  ;;  %678 = vadd.xlane.f32.xlu1 %v2082_v21  ;;  %v1688_v37 = vunpack.c.l.bf16 %v1796_v27  ;;  %v1689_v53 = vunpack.c.h.bf16 %v1796_v27 }
  0xcd   : > { %694 = vadd.xlane.f32.xlu0 %v2084_v22 }
  0xcf   : > { %v532_v36 = vpop.f32.mrf.mxu2  ;;  %v552_v50 = vpop.f32.mrf.mxu3 }
  0xd0   : > { %v533_v42 = vadd.f32 %v2029_v26, %v532_v36  ;;  %v494_v55 = vpop.f32.mrf.mxu0  ;;  %v553_v57 = vadd.f32 %v2029_v26, %v552_v50  ;;  %v514_v3 = vpop.f32.mrf.mxu1  ;;  %v1672_v36 = vunpack.c.l.bf16 %v1792_v25 }
  0xd1   : > { %v495_v62 = vadd.f32 %v2029_v26, %v494_v55  ;;  %v515_v16 = vadd.f32 %v2029_v26, %v514_v3 }
  0xd2   : > { %v2107_v51 = vadd.f32 %v1684_v43, %v533_v42  ;;  %v2120_v2 = vadd.f32 %v1700_v61, %v553_v57  ;;  %v1673_v61 = vunpack.c.h.bf16 %v1792_v25 }
  0xd3   : > { %v2122_v5 = vadd.f32 %v1653_v63, %v495_v62  ;;  %v2139_v28 = vadd.f32 %v1669_v17, %v515_v16 }
  0xd4   : > { %666 = vadd.xlane.f32.xlu2 %v2093_v35  ;;  %664 = vadd.xlane.f32.xlu1 %v2096_v38 }
  0xd5   : > { %712 = vadd.xlane.f32.xlu0 %v2099_v40 }
  0xd7   : > { %v534_v56 = vpop.f32.mrf.mxu2  ;;  %v554_v4 = vpop.f32.mrf.mxu3 }
  0xd8   : > { %v535_v0 = vadd.f32 %v2029_v26, %v534_v56  ;;  %v497_v9 = vpop.f32.mrf.mxu0  ;;  %v555_v11 = vadd.f32 %v2029_v26, %v554_v4  ;;  %v517_v24 = vpop.f32.mrf.mxu1  ;;  %v1657_v56 = vunpack.c.h.bf16 %v1788_v7  ;;  %v1705_v4 = vunpack.c.h.bf16 %v1800_v29 }
  0xd9   : > { %v498_v14 = vadd.f32 %v2029_v26, %v497_v9  ;;  %v518_v30 = vadd.f32 %v2029_v26, %v517_v24  ;;  %v1926_v9 = vmov 128.0  }
  0xda   : > { %v2125_v8 = vadd.f32 %v1685_v1, %v535_v0  ;;  %v2133_v19 = vadd.f32 %v1701_v13, %v555_v11  ;;  %1852 = vrcp.f32 %v1926_v9 }
  0xdb   : > { %v2135_v23 = vadd.f32 %v1656_v15, %v498_v14  ;;  %v2148_v42 = vadd.f32 %v1672_v36, %v518_v30 }
  0xdc   : > { %698 = vadd.xlane.f32.xlu2 %v2107_v51  ;;  %696 = vadd.xlane.f32.xlu1 %v2112_v54 }
  0xdd   : > { %682 = vadd.xlane.f32.xlu0 %v2109_v52 }
  0xdf   : > { %v537_v18 = vpop.f32.mrf.mxu2  ;;  %v557_v32 = vpop.f32.mrf.mxu3 }
  0xe0   : > { %v538_v31 = vadd.f32 %v2029_v26, %v537_v18  ;;  %v558_v39 = vadd.f32 %v2029_v26, %v557_v32  ;;  %v499_v48 = vpop.f32.mrf.mxu0  ;;  %v519_v49 = vpop.f32.mrf.mxu1 }
  0xe1   : > { %v500_v55 = vadd.f32 %v2029_v26, %v499_v48  ;;  %v520_v57 = vadd.f32 %v2029_v26, %v519_v49  ;;  %v1853_v11 = vpop.eup %1852 }
  0xe2   : > { %v2150_v43 = vadd.f32 %v1688_v37, %v538_v31  ;;  %v2152_v44 = vadd.f32 %v1704_v41, %v558_v39  ;;  %v723_v13 = vmul.f32 128.0, %v1853_v11  ;;  %vm727_vm0 = vweird.f32 %v1853_v11 }
  0xe3   : > { %v2162_v63 = vadd.f32 %v1657_v56, %v500_v55  ;;  %v2164_v1 = vadd.f32 %v1673_v61, %v520_v57 }
  0xe4   : > { %668 = vadd.xlane.f32.xlu2 %v2122_v5  ;;  %714 = vadd.xlane.f32.xlu1 %v2120_v2  ;;  %v724_v14 = vsub.f32 1.0, %v723_v13 }
  0xe5   : > { %700 = vadd.xlane.f32.xlu0 %v2125_v8 }
  0xe6   : > { %v725_v15 = vmul.f32 %v1853_v11, %v724_v14 }
  0xe7   : > { %v539_v47 = vpop.f32.mrf.mxu2  ;;  %v559_v0 = vpop.f32.mrf.mxu3 }
  0xe8   : > { %v540_v50 = vadd.f32 %v2029_v26, %v539_v47  ;;  %v560_v3 = vadd.f32 %v2029_v26, %v559_v0  ;;  %v726_v16 = vadd.f32 %v1853_v11, %v725_v15 }
  0xea   : > { %v2160_v62 = vadd.f32 %v1689_v53, %v540_v50  ;;  %v2170_v7 = vadd.f32 %v1705_v4, %v560_v3  ;;  %v2173_v17 = vsel %vm727_vm0, %v1853_v11, %v726_v16 }
  0xec   : > { %716 = vadd.xlane.f32.xlu2 %v2133_v19  ;;  %684 = vadd.xlane.f32.xlu1 %v2139_v28 }
  0xed   : > { %670 = vadd.xlane.f32.xlu0 %v2135_v23 }
  0xf4   : > { %686 = vadd.xlane.f32.xlu2 %v2148_v42  ;;  %702 = vadd.xlane.f32.xlu1 %v2150_v43 }
  0xf5   : > { %718 = vadd.xlane.f32.xlu0 %v2152_v44 }
  0xfc   : > { %704 = vadd.xlane.f32.xlu2 %v2160_v62  ;;  %672 = vadd.xlane.f32.xlu1 %v2162_v63 }
  0xfd   : > { %688 = vadd.xlane.f32.xlu0 %v2164_v1 }
 0x104   : > { %720 = vadd.xlane.f32.xlu1 %v2170_v7 }
 0x120   : > { %v675_v18 = vpop.xlane.xlu2 %674  ;;  %v659_v24 = vpop.xlane.xlu0 %658 }
 0x121   : > { %v737_v25 = vmul.f32 %v2173_v17, %v675_v18  ;;  %v729_v26 = vmul.f32 %v2173_v17, %v659_v24 }
 0x123   : > { %v2178_v27 = vsub.f32 %v2033_v33, %v737_v25  ;;  %v2181_v29 = vsub.f32 %v2035_v34, %v729_v26 }
 0x125   : > { %v801_v30 = vmul.f32 %v2178_v27, %v2178_v27  ;;  %v793_v31 = vmul.f32 %v2181_v29, %v2181_v29 }
 0x127   : > { %v691_v32 = vpop.xlane.xlu1 %690  ;;  %841 = vadd.xlane.f32.xlu1 %v801_v30  ;;  %825 = vadd.xlane.f32.xlu2 %v793_v31 }
 0x128   : > { %v745_v36 = vmul.f32 %v2173_v17, %v691_v32  ;;  %v707_v37 = vpop.xlane.xlu0 %706 }
 0x129   : > { %v753_v39 = vmul.f32 %v2173_v17, %v707_v37 }
 0x12a   : > { %v2190_v33 = vsub.f32 %v2043_v45, %v745_v36 }
 0x12b   : > { %v2193_v34 = vsub.f32 %v2045_v46, %v753_v39 }
 0x12c   : > { %v809_v41 = vmul.f32 %v2190_v33, %v2190_v33 }
 0x12d   : > { %v817_v47 = vmul.f32 %v2193_v34, %v2193_v34 }
 0x12e   : > { %857 = vadd.xlane.f32.xlu0 %v809_v41 }
 0x12f   : > { %v709_v48 = vpop.xlane.xlu1 %708  ;;  %v693_v49 = vpop.xlane.xlu2 %692  ;;  %873 = vadd.xlane.f32.xlu2 %v817_v47 }
 0x130   : > { %v746_v50 = vmul.f32 %v2173_v17, %v693_v49  ;;  %v661_v53 = vpop.xlane.xlu0 %660  ;;  %v754_v57 = vmul.f32 %v2173_v17, %v709_v48 }
 0x131   : > { %v730_v55 = vmul.f32 %v2173_v17, %v661_v53 }
 0x132   : > { %v2202_v45 = vsub.f32 %v2055_v59, %v746_v50  ;;  %v2214_v59 = vsub.f32 %v2053_v58, %v754_v57 }
 0x133   : > { %v2205_v46 = vsub.f32 %v2057_v60, %v730_v55 }
 0x134   : > { %v810_v56 = vmul.f32 %v2202_v45, %v2202_v45  ;;  %v818_v16 = vmul.f32 %v2214_v59, %v2214_v59 }
 0x135   : > { %v794_v61 = vmul.f32 %v2205_v46, %v2205_v46 }
 0x136   : > { %859 = vadd.xlane.f32.xlu1 %v810_v56 }
 0x137   : > { %v711_v0 = vpop.xlane.xlu2 %710  ;;  %v663_v3 = vpop.xlane.xlu1 %662  ;;  %827 = vadd.xlane.f32.xlu0 %v794_v61 }
 0x138   : > { %v731_v4 = vmul.f32 %v2173_v17, %v663_v3  ;;  %v677_v9 = vpop.xlane.xlu0 %676  ;;  %v755_v14 = vmul.f32 %v2173_v17, %v711_v0 }
 0x139   : > { %v738_v60 = vmul.f32 %v2173_v17, %v677_v9 }
 0x13a   : > { %v2218_v11 = vsub.f32 %v2066_v6, %v731_v4  ;;  %v2231_v6 = vsub.f32 %v2069_v10, %v755_v14 }
 0x13b   : > { %v2221_v13 = vsub.f32 %v2072_v12, %v738_v60 }
 0x13c   : > { %v795_v15 = vmul.f32 %v2218_v11, %v2218_v11  ;;  %v819_v36 = vmul.f32 %v2231_v6, %v2231_v6 }
 0x13d   : > { %v802_v58 = vmul.f32 %v2221_v13, %v2221_v13 }
 0x13e   : > { %829 = vadd.xlane.f32.xlu1 %v795_v15 }
 0x13f   : > { %v681_v18 = vpop.xlane.xlu2 %680  ;;  %v679_v24 = vpop.xlane.xlu1 %678  ;;  %875 = vadd.xlane.f32.xlu0 %v818_v16  ;;  %843 = vadd.xlane.f32.xlu2 %v802_v58 }
 0x140   : > { %v739_v12 = vmul.f32 %v2173_v17, %v679_v24  ;;  %v695_v25 = vpop.xlane.xlu0 %694  ;;  %v740_v32 = vmul.f32 %v2173_v17, %v681_v18 }
 0x141   : > { %v747_v26 = vmul.f32 %v2173_v17, %v695_v25 }
 0x142   : > { %v2236_v30 = vsub.f32 %v2082_v21, %v739_v12  ;;  %v2249_v21 = vsub.f32 %v2080_v20, %v740_v32 }
 0x143   : > { %v2239_v31 = vsub.f32 %v2084_v22, %v747_v26 }
 0x144   : > { %v803_v10 = vmul.f32 %v2236_v30, %v2236_v30  ;;  %v804_v49 = vmul.f32 %v2249_v21, %v2249_v21 }
 0x145   : > { %v811_v37 = vmul.f32 %v2239_v31, %v2239_v31 }
 0x146   : > { %877 = vadd.xlane.f32.xlu1 %v819_v36 }
 0x147   : > { %v667_v39 = vpop.xlane.xlu2 %666  ;;  %v665_v41 = vpop.xlane.xlu1 %664  ;;  %845 = vadd.xlane.f32.xlu0 %v803_v10  ;;  %861 = vadd.xlane.f32.xlu2 %v811_v37 }
 0x148   : > { %v732_v22 = vmul.f32 %v2173_v17, %v665_v41  ;;  %v713_v47 = vpop.xlane.xlu0 %712  ;;  %v733_v4 = vmul.f32 %v2173_v17, %v667_v39 }
 0x149   : > { %v756_v50 = vmul.f32 %v2173_v17, %v713_v47 }
 0x14a   : > { %v2253_v48 = vsub.f32 %v2096_v38, %v732_v22 }
 0x14b   : > { %v2263_v38 = vsub.f32 %v2099_v40, %v756_v50 }
 0x14c   : > { %v796_v53 = vmul.f32 %v2253_v48, %v2253_v48 }
 0x14d   : > { %v820_v40 = vmul.f32 %v2263_v38, %v2263_v38 }
 0x14e   : > { %847 = vadd.xlane.f32.xlu1 %v804_v49 }
 0x14f   : > { %v699_v55 = vpop.xlane.xlu2 %698  ;;  %v697_v56 = vpop.xlane.xlu1 %696  ;;  %831 = vadd.xlane.f32.xlu2 %v796_v53 }
 0x150   : > { %v749_v20 = vmul.f32 %v2173_v17, %v699_v55  ;;  %v748_v57 = vmul.f32 %v2173_v17, %v697_v56  ;;  %v683_v61 = vpop.xlane.xlu0 %682 }
 0x151   : > { %v741_v14 = vmul.f32 %v2173_v17, %v683_v61 }
 0x152   : > { %v2266_v0 = vsub.f32 %v2107_v51, %v749_v20  ;;  %v2269_v3 = vsub.f32 %v2112_v54, %v748_v57  ;;  %v2280_v54 = vsub.f32 %v2093_v35, %v733_v4 }
 0x153   : > { %v2284_v18 = vsub.f32 %v2109_v52, %v741_v14 }
 0x154   : > { %v813_v9 = vmul.f32 %v2266_v0, %v2266_v0  ;;  %v812_v60 = vmul.f32 %v2269_v3, %v2269_v3  ;;  %v797_v26 = vmul.f32 %v2280_v54, %v2280_v54 }
 0x155   : > { %v805_v32 = vmul.f32 %v2284_v18, %v2284_v18 }
 0x156   : > { %865 = vadd.xlane.f32.xlu1 %v813_v9  ;;  %863 = vadd.xlane.f32.xlu0 %v812_v60 }
 0x157   : > { %v669_v51 = vpop.xlane.xlu2 %668  ;;  %v715_v15 = vpop.xlane.xlu1 %714  ;;  %879 = vadd.xlane.f32.xlu2 %v820_v40 }
 0x158   : > { %v734_v16 = vmul.f32 %v2173_v17, %v669_v51  ;;  %v701_v58 = vpop.xlane.xlu0 %700  ;;  %v757_v12 = vmul.f32 %v2173_v17, %v715_v15 }
 0x159   : > { %v750_v35 = vmul.f32 %v2173_v17, %v701_v58 }
 0x15a   : > { %v2287_v24 = vsub.f32 %v2122_v5, %v734_v16  ;;  %v2298_v5 = vsub.f32 %v2120_v2, %v757_v12 }
 0x15b   : > { %v2301_v37 = vsub.f32 %v2125_v8, %v750_v35 }
 0x15c   : > { %v798_v25 = vmul.f32 %v2287_v24, %v2287_v24  ;;  %v821_v41 = vmul.f32 %v2298_v5, %v2298_v5 }
 0x15d   : > { %v814_v47 = vmul.f32 %v2301_v37, %v2301_v37 }
 0x15e   : > { %835 = vadd.xlane.f32.xlu1 %v798_v25  ;;  %833 = vadd.xlane.f32.xlu0 %v797_v26 }
 0x15f   : > { %v717_v52 = vpop.xlane.xlu2 %716  ;;  %v685_v36 = vpop.xlane.xlu1 %684  ;;  %849 = vadd.xlane.f32.xlu2 %v805_v32 }
 0x160   : > { %v671_v10 = vpop.xlane.xlu0 %670  ;;  %v742_v39 = vmul.f32 %v2173_v17, %v685_v36  ;;  %v758_v15 = vmul.f32 %v2173_v17, %v717_v52 }
 0x161   : > { %v735_v22 = vmul.f32 %v2173_v17, %v671_v10 }
 0x162   : > { %v2310_v2 = vsub.f32 %v2139_v28, %v742_v39 }
 0x163   : > { %v2314_v55 = vsub.f32 %v2135_v23, %v735_v22 }
 0x164   : > { %v806_v61 = vmul.f32 %v2310_v2, %v2310_v2 }
 0x165   : > { %v799_v28 = vmul.f32 %v2314_v55, %v2314_v55 }
 0x166   : > { %881 = vadd.xlane.f32.xlu0 %v821_v41 }
 0x167   : > { %v687_v49 = vpop.xlane.xlu2 %686  ;;  %v703_v50 = vpop.xlane.xlu1 %702  ;;  %867 = vadd.xlane.f32.xlu2 %v814_v47 }
 0x168   : > { %v743_v8 = vmul.f32 %v2173_v17, %v687_v49  ;;  %v719_v53 = vpop.xlane.xlu0 %718  ;;  %v751_v20 = vmul.f32 %v2173_v17, %v703_v50 }
 0x169   : > { %v759_v12 = vmul.f32 %v2173_v17, %v719_v53 }
 0x16a   : > { %v2317_v56 = vsub.f32 %v2148_v42, %v743_v8  ;;  %v2327_v23 = vsub.f32 %v2150_v43, %v751_v20 }
 0x16b   : > { %v2353_v26 = vsub.f32 %v2152_v44, %v759_v12 }
 0x16c   : > { %v807_v57 = vmul.f32 %v2317_v56, %v2317_v56  ;;  %v815_v43 = vmul.f32 %v2327_v23, %v2327_v23 }
 0x16d   : > { %v823_v10 = vmul.f32 %v2353_v26, %v2353_v26 }
 0x16e   : > { %853 = vadd.xlane.f32.xlu1 %v807_v57  ;;  %851 = vadd.xlane.f32.xlu0 %v806_v61 }
 0x16f   : > { %v705_v4 = vpop.xlane.xlu2 %704  ;;  %v673_v9 = vpop.xlane.xlu1 %672  ;;  %837 = vadd.xlane.f32.xlu2 %v799_v28 }
 0x170   : > { %v752_v42 = vmul.f32 %v2173_v17, %v705_v4  ;;  %v689_v60 = vpop.xlane.xlu0 %688  ;;  %v736_v16 = vmul.f32 %v2173_v17, %v673_v9 }
 0x171   : > { %v744_v14 = vmul.f32 %v2173_v17, %v689_v60 }
 0x172   : > { %v2332_v40 = vsub.f32 %v2160_v62, %v752_v42  ;;  %v2347_v62 = vsub.f32 %v2133_v19, %v758_v15 }
 0x173   : > { %v2335_v51 = vsub.f32 %v2164_v1, %v744_v14  ;;  %v2350_v1 = vsub.f32 %v2162_v63, %v736_v16 }
 0x174   : > { %v816_v58 = vmul.f32 %v2332_v40, %v2332_v40  ;;  %v822_v52 = vmul.f32 %v2347_v62, %v2347_v62 }
 0x175   : > { %v808_v25 = vmul.f32 %v2335_v51, %v2335_v51  ;;  %v800_v36 = vmul.f32 %v2350_v1, %v2350_v1 }
 0x176   : > { %871 = vadd.xlane.f32.xlu1 %v816_v58  ;;  %869 = vadd.xlane.f32.xlu0 %v815_v43 }
 0x177   : > { %855 = vadd.xlane.f32.xlu2 %v808_v25  ;;  %v721_v35 = vpop.xlane.xlu1 %720 }
 0x178   : > { %v760_v32 = vmul.f32 %v2173_v17, %v721_v35 }
 0x17a   : > { %v2363_v19 = vsub.f32 %v2170_v7, %v760_v32 }
 0x17c   : > { %v824_v44 = vmul.f32 %v2363_v19, %v2363_v19 }
 0x17e   : > { %883 = vadd.xlane.f32.xlu1 %v822_v52  ;;  %839 = vadd.xlane.f32.xlu0 %v800_v36 }
 0x17f   : > { %885 = vadd.xlane.f32.xlu2 %v823_v10 }
 0x186   : > { %887 = vadd.xlane.f32.xlu0 %v824_v44 }
 0x19a   : > { %v842_v63 = vpop.xlane.xlu1 %841  ;;  %v826_v39 = vpop.xlane.xlu2 %825 }
 0x19b   : > { %v897_v41 = vmul.f32 %v842_v63, %v2173_v17  ;;  %v889_v22 = vmul.f32 %v826_v39, %v2173_v17 }
 0x19d   : > { %v929_v47 = vadd.f32 1e-12, %v897_v41  ;;  %v921_v49 = vadd.f32 1e-12, %v889_v22 }
 0x19f   : > { %1854 = vrsqrt.f32 %v929_v47  ;;  %vm1039_vm3 = vweird.f32 %v929_v47  ;;  %vm959_vm5 = vweird.f32 %v921_v49 }
 0x1a0   : > { %1856 = vrsqrt.f32 %v921_v49 }
 0x1a1   : > { %v858_v50 = vpop.xlane.xlu0 %857 }
 0x1a2   : > { %v905_v8 = vmul.f32 %v858_v50, %v2173_v17  ;;  %v874_v53 = vpop.xlane.xlu2 %873 }
 0x1a3   : > { %v913_v7 = vmul.f32 %v874_v53, %v2173_v17 }
 0x1a4   : > { %v937_v20 = vadd.f32 1e-12, %v905_v8 }
 0x1a5   : > { %v2371_v57 = vpop.eup %1854  ;;  %v2373_v61 = vadd.f32 1e-12, %v913_v7 }
 0x1a6   : > { %v2375_v28 = vpop.eup %1856  ;;  %v1034_v4 = vmul.f32 %v2371_v57, %v929_v47  ;;  %1858 = vrsqrt.f32 %v937_v20  ;;  %vm1040_vm1 = vweird.f32 %v2371_v57  ;;  %vm1119_vm8 = vweird.f32 %v937_v20 }
 0x1a7   : > { %v954_v9 = vmul.f32 %v2375_v28, %v921_v49  ;;  %1860 = vrsqrt.f32 %v2373_v61  ;;  %vm960_vm2 = vweird.f32 %v2375_v28  ;;  %vm2402_vm4 = vmor %vm1039_vm3, %vm1040_vm1  ;;  %vm1199_vm10 = vweird.f32 %v2373_v61 }
 0x1a8   : > { %v1035_v42 = vmul.f32 %v2371_v57, %v1034_v4  ;;  %vm2413_vm7 = vmor %vm959_vm5, %vm960_vm2 }
 0x1a9   : > { %v955_v60 = vmul.f32 %v2375_v28, %v954_v9  ;;  %v860_v14 = vpop.xlane.xlu1 %859 }
 0x1aa   : > { %v1036_v15 = vmul.f32 0.5, %v1035_v42  ;;  %v906_v16 = vmul.f32 %v860_v14, %v2173_v17  ;;  %v828_v58 = vpop.xlane.xlu0 %827 }
 0x1ab   : > { %v956_v43 = vmul.f32 0.5, %v955_v60  ;;  %v890_v12 = vmul.f32 %v828_v58, %v2173_v17 }
 0x1ac   : > { %v1859_v25 = vpop.eup %1858  ;;  %v2384_v35 = vadd.f32 1e-12, %v906_v16  ;;  %v1037_v10 = vsub.f32 1.5, %v1036_v15 }
 0x1ad   : > { %v2386_v32 = vpop.eup %1860  ;;  %v1114_v52 = vmul.f32 %v1859_v25, %v937_v20  ;;  %v2388_v36 = vadd.f32 1e-12, %v890_v12  ;;  %v957_v44 = vsub.f32 1.5, %v956_v43  ;;  %vm1120_vm6 = vweird.f32 %v1859_v25 }
 0x1ae   : > { %v1194_v63 = vmul.f32 %v2386_v32, %v2373_v61  ;;  %1862 = vrsqrt.f32 %v2384_v35  ;;  %v1038_v8 = vmul.f32 %v2371_v57, %v1037_v10  ;;  %vm2428_vm9 = vmor %vm1119_vm8, %vm1120_vm6  ;;  %vm1200_vm11 = vweird.f32 %v2386_v32 }
 0x1af   : > { %v1115_v39 = vmul.f32 %v1859_v25, %v1114_v52  ;;  %1864 = vrsqrt.f32 %v2388_v36  ;;  %v958_v53 = vmul.f32 %v2375_v28, %v957_v44  ;;  %vm1129_vm12 = vweird.f32 %v2384_v35  ;;  %vm2475_vm0 = vmor %vm1199_vm10, %vm1200_vm11 }
 0x1b0   : > { %v1195_v41 = vmul.f32 %v2386_v32, %v1194_v63  ;;  %v1042_v10 = vsel %vm2402_vm4, %v2371_v57, %v1038_v8  ;;  %vm969_vm13 = vweird.f32 %v2388_v36 }
 0x1b1   : > { %v1116_v22 = vmul.f32 0.5, %v1115_v39  ;;  %v830_v50 = vpop.xlane.xlu1 %829  ;;  %v962_v44 = vsel %vm2413_vm7, %v2375_v28, %v958_v53  ;;  %v1281_v8 = vmul.f32 %v1042_v10, %v2178_v27 }
 0x1b2   : > { %v1196_v7 = vmul.f32 0.5, %v1195_v41  ;;  %v891_v4 = vmul.f32 %v830_v50, %v2173_v17  ;;  %v844_v9 = vpop.xlane.xlu2 %843  ;;  %v876_v42 = vpop.xlane.xlu0 %875  ;;  %v2445_v50 = vld [vmem:[%s3030_s4] ss:$0 sm:$0xff]  ;;  %v1273_v53 = vmul.f32 %v962_v44, %v2181_v29 }
 0x1b3   : > { %v1117_v60 = vsub.f32 1.5, %v1116_v22  ;;  %v898_v58 = vmul.f32 %v844_v9, %v2173_v17  ;;  %v914_v49 = vmul.f32 %v876_v42, %v2173_v17 }
 0x1b4   : > { %v2400_v14 = vpop.eup %1862  ;;  %v2406_v16 = vadd.f32 1e-12, %v891_v4  ;;  %v1197_v63 = vsub.f32 1.5, %v1196_v7  ;;  %v1309_v10 = vmul.f32 %v2445_v50, %v1273_v53 }
 0x1b5   : > { %v2409_v43 = vpop.eup %1864  ;;  %v1118_v47 = vmul.f32 %v1859_v25, %v1117_v60  ;;  %v1124_v52 = vmul.f32 %v2400_v14, %v2384_v35  ;;  %v2440_v22 = vadd.f32 1e-12, %v898_v58  ;;  %v2449_v4 = vadd.f32 1e-12, %v914_v49  ;;  %v2465_v49 = vld [vmem:[%s3031_s5] ss:$0 sm:$0xff] }
 0x1b6   : > { %v964_v39 = vmul.f32 %v2409_v43, %v2388_v36  ;;  %1866 = vrsqrt.f32 %v2406_v16  ;;  %vm1130_vm14 = vweird.f32 %v2400_v14  ;;  %vm970_vm15 = vweird.f32 %v2409_v43 }
 0x1b7   : > { %v1125_v20 = vmul.f32 %v2400_v14, %v1124_v52  ;;  %v1122_v57 = vsel %vm2428_vm9, %v1859_v25, %v1118_v47  ;;  %v1198_v25 = vmul.f32 %v2386_v32, %v1197_v63  ;;  %1868 = vrsqrt.f32 %v2440_v22  ;;  %vm1131_vm1 = vmor %vm1129_vm12, %vm1130_vm14 }
 0x1b8   : > { %v965_v28 = vmul.f32 %v2409_v43, %v964_v39  ;;  %v1289_v58 = vmul.f32 %v1122_v57, %v2190_v33  ;;  %1870 = vrsqrt.f32 %v2449_v4  ;;  %v2468_v33 = vmul.f32 %v2445_v50, %v1281_v8  ;;  %vm971_vm2 = vmor %vm969_vm13, %vm970_vm15 }
 0x1b9   : > { %v1126_v7 = vmul.f32 0.5, %v1125_v20  ;;  %v878_v9 = vpop.xlane.xlu1 %877  ;;  %v1202_v41 = vsel %vm2475_vm0, %v2386_v32, %v1198_v25  ;;  %vm979_vm3 = vweird.f32 %v2406_v16  ;;  %vm1049_vm4 = vweird.f32 %v2440_v22 }
 0x1ba   : > { %v966_v42 = vmul.f32 0.5, %v965_v28  ;;  %v862_v60 = vpop.xlane.xlu2 %861  ;;  %v846_v15 = vpop.xlane.xlu0 %845  ;;  %v915_v29 = vmul.f32 %v878_v9, %v2173_v17  ;;  %v1325_v28 = vmul.f32 %v2445_v50, %v1289_v58  ;;  %vm1209_vm9 = vweird.f32 %v2449_v4 }
 0x1bb   : > { %v1127_v12 = vsub.f32 1.5, %v1126_v7  ;;  %v907_v47 = vmul.f32 %v862_v60, %v2173_v17  ;;  %v899_v39 = vmul.f32 %v846_v15, %v2173_v17 }
 0x1bc   : > { %v967_v27 = vsub.f32 1.5, %v966_v42  ;;  %v2460_v52 = vpop.eup %1866  ;;  %v2489_v57 = vadd.f32 1e-12, %v915_v29  ;;  %v1345_v42 = vadd.f32 %v2465_v49, %v1309_v10  ;;  %v1361_v29 = vadd.f32 %v2465_v49, %v1325_v28 }
 0x1bd   : > { %v1128_v63 = vmul.f32 %v2400_v14, %v1127_v12  ;;  %v974_v61 = vmul.f32 %v2460_v52, %v2406_v16  ;;  %v2497_v32 = vadd.f32 1e-12, %v907_v47  ;;  %v2499_v35 = vadd.f32 1e-12, %v899_v39  ;;  %v2501_v53 = vpop.eup %1868 }
 0x1be   : > { %v968_v20 = vmul.f32 %v2409_v43, %v967_v27  ;;  %1872 = vrsqrt.f32 %v2489_v57  ;;  %v1044_v60 = vmul.f32 %v2501_v53, %v2440_v22  ;;  %vm980_vm5 = vweird.f32 %v2460_v52 }
 0x1bf   : > { %v1132_v8 = vsel %vm1131_vm1, %v2400_v14, %v1128_v63  ;;  %v975_v25 = vmul.f32 %v2460_v52, %v974_v61  ;;  %v2507_v14 = vpop.eup %1870  ;;  %1874 = vrsqrt.f32 %v2497_v32  ;;  %vm1050_vm6 = vweird.f32 %v2501_v53  ;;  %vm2554_vm8 = vmor %vm979_vm3, %vm980_vm5 }
 0x1c0   : > { %v1290_v7 = vmul.f32 %v1132_v8, %v2202_v45  ;;  %v972_v9 = vsel %vm971_vm2, %v2409_v43, %v968_v20  ;;  %v1297_v45 = vmul.f32 %v1202_v41, %v2193_v34  ;;  %v1204_v58 = vmul.f32 %v2507_v14, %v2449_v4  ;;  %vm1051_vm10 = vmor %vm1049_vm4, %vm1050_vm6 }
 0x1c1   : > { %v1274_v36 = vmul.f32 %v972_v9, %v2205_v46  ;;  %v976_v15 = vmul.f32 0.5, %v975_v25  ;;  %v848_v12 = vpop.xlane.xlu1 %847  ;;  %v1045_v47 = vmul.f32 %v2501_v53, %v1044_v60  ;;  %1876 = vrsqrt.f32 %v2499_v35 }
 0x1c2   : > { %v1326_v43 = vmul.f32 %v2445_v50, %v1290_v7  ;;  %v832_v27 = vpop.xlane.xlu2 %831  ;;  %v1205_v34 = vmul.f32 %v2507_v14, %v1204_v58  ;;  %v900_v41 = vmul.f32 %v848_v12, %v2173_v17  ;;  %vm1210_vm7 = vweird.f32 %v2507_v14 }
 0x1c3   : > { %v1310_v46 = vmul.f32 %v2445_v50, %v1274_v36  ;;  %v977_v44 = vsub.f32 1.5, %v976_v15  ;;  %v1046_v39 = vmul.f32 0.5, %v1045_v47  ;;  %v892_v8 = vmul.f32 %v832_v27, %v2173_v17  ;;  %vm1211_vm11 = vmor %vm1209_vm9, %vm1210_vm7 }
 0x1c4   : > { %v1362_v10 = vadd.f32 %v2465_v49, %v1326_v43  ;;  %v2534_v20 = vpop.eup %1872  ;;  %v1206_v28 = vmul.f32 0.5, %v1205_v34  ;;  %v2544_v43 = vadd.f32 1e-12, %v900_v41  ;;  %v1333_v58 = vmul.f32 %v2445_v50, %v1297_v45 }
 0x1c5   : > { %v1346_v63 = vadd.f32 %v2465_v49, %v1310_v46  ;;  %v1047_v9 = vsub.f32 1.5, %v1046_v39  ;;  %v1214_v25 = vmul.f32 %v2534_v20, %v2489_v57  ;;  %v978_v36 = vmul.f32 %v2460_v52, %v977_v44  ;;  %v2546_v15 = vpop.eup %1874 }
 0x1c6   : > { %v1749_v61 = vpack.c.bf16 %v1362_v10, %v1361_v29  ;;  %v1207_v60 = vsub.f32 1.5, %v1206_v28  ;;  %v1134_v45 = vmul.f32 %v2546_v15, %v2497_v32  ;;  %1878 = vrsqrt.f32 %v2544_v43 }
 0x1c7   : > { %v1709_v7 = vpack.c.bf16 %v1346_v63, %v1345_v42  ;;  %v1048_v12 = vmul.f32 %v2501_v53, %v1047_v9  ;;  %v1215_v27 = vmul.f32 %v2534_v20, %v1214_v25  ;;  %v2561_v46 = vpop.eup %1876  ;;  %v2571_v47 = vadd.f32 1e-12, %v892_v8 }
 0x1c8   : > { %1808 = vst [vmem:[%s2529_s8 + $0x40] sm:$0xff] %v1749_v61   ;;  %v1208_v16 = vmul.f32 %v2507_v14, %v1207_v60  ;;  %v1353_v4 = vadd.f32 %v2465_v49, %v2468_v33  ;;  %v1054_v22 = vmul.f32 %v2561_v46, %v2499_v35  ;;  %v982_v63 = vsel %vm2554_vm8, %v2460_v52, %v978_v36 }
 0x1c9   : > { %1710 = vst [vmem:[%s2529_s8] sm:$0xff] %v1709_v7   ;;  %v864_v29 = vpop.xlane.xlu0 %863  ;;  %v1052_v10 = vsel %vm1051_vm10, %v2501_v53, %v1048_v12  ;;  %v1216_v44 = vmul.f32 0.5, %v1215_v27  ;;  %v1135_v33 = vmul.f32 %v2546_v15, %v1134_v45  ;;  %v866_v61 = vpop.xlane.xlu1 %865  ;;  %v1369_v53 = vadd.f32 %v2465_v49, %v1333_v58 }
 0x1ca   : > { %v880_v34 = vpop.xlane.xlu2 %879  ;;  %v1282_v39 = vmul.f32 %v1052_v10, %v2221_v13  ;;  %v1212_v41 = vsel %vm1211_vm11, %v2507_v14, %v1208_v16  ;;  %v1055_v8 = vmul.f32 %v2561_v46, %v1054_v22  ;;  %vm1059_vm12 = vweird.f32 %v2499_v35 }
 0x1cb   : > { %v1298_v28 = vmul.f32 %v1212_v41, %v2214_v59  ;;  %v1217_v9 = vsub.f32 1.5, %v1216_v44  ;;  %v1136_v25 = vmul.f32 0.5, %v1135_v33  ;;  %1880 = vrsqrt.f32 %v2571_v47 }
 0x1cc   : > { %v1318_v7 = vmul.f32 %v2445_v50, %v1282_v39  ;;  %v1275_v13 = vmul.f32 %v982_v63, %v2218_v11  ;;  %vm1220_vm13 = vweird.f32 %v2534_v20  ;;  %v1056_v14 = vmul.f32 0.5, %v1055_v8  ;;  %v1879_v36 = vpop.eup %1878 }
 0x1cd   : > { %v1334_v52 = vmul.f32 %v2445_v50, %v1298_v28  ;;  %v1137_v60 = vsub.f32 1.5, %v1136_v25  ;;  %v909_v58 = vmul.f32 %v866_v61, %v2173_v17  ;;  %v908_v42 = vmul.f32 %v864_v29, %v2173_v17 }
 0x1ce   : > { %v1354_v59 = vadd.f32 %v2465_v49, %v1318_v7  ;;  %v1057_v27 = vsub.f32 1.5, %v1056_v14  ;;  %vm1060_vm14 = vweird.f32 %v2561_v46  ;;  %v1064_v11 = vmul.f32 %v1879_v36, %v2544_v43 }
 0x1cf   : > { %v1370_v12 = vadd.f32 %v2465_v49, %v1334_v52  ;;  %v1218_v10 = vmul.f32 %v2534_v20, %v1217_v9  ;;  %v1138_v44 = vmul.f32 %v2546_v15, %v1137_v60  ;;  %vm1140_vm15 = vweird.f32 %v2546_v15  ;;  %vm2613_vm1 = vmor %vm1059_vm12, %vm1060_vm14 }
 0x1d0   : > { %v1729_v45 = vpack.c.bf16 %v1354_v59, %v1353_v4  ;;  %v1058_v63 = vmul.f32 %v2561_v46, %v1057_v27  ;;  %v1065_v29 = vmul.f32 %v1879_v36, %v1064_v11  ;;  %v2605_v39 = vadd.f32 1e-12, %v909_v58 }
 0x1d1   : > { %v834_v16 = vpop.xlane.xlu0 %833  ;;  %v1769_v22 = vpack.c.bf16 %v1370_v12, %v1369_v53  ;;  %v2607_v41 = vpop.eup %1880  ;;  %vm1219_vm0 = vweird.f32 %v2489_v57  ;;  %v2617_v33 = vadd.f32 1e-12, %v908_v42  ;;  %v916_v61 = vmul.f32 %v880_v34, %v2173_v17 }
 0x1d2   : > { %1804 = vst [vmem:[%s2529_s8 + $0x20] sm:$0xff] %v1729_v45   ;;  %vm2623_vm2 = vmor %vm1219_vm0, %vm1220_vm13  ;;  %vm1139_vm3 = vweird.f32 %v2497_v32  ;;  %v1062_v57 = vsel %vm2613_vm1, %v2561_v46, %v1058_v63  ;;  %v1066_v35 = vmul.f32 0.5, %v1065_v29  ;;  %v984_v28 = vmul.f32 %v2607_v41, %v2571_v47  ;;  %v850_v8 = vpop.xlane.xlu2 %849  ;;  %v836_v32 = vpop.xlane.xlu1 %835 }
 0x1d3   : > { %1812 = vst [vmem:[%s2529_s8 + $0x60] sm:$0xff] %v1769_v22   ;;  %v1311_v34 = vmul.f32 %v2445_v50, %v1275_v13  ;;  %v1222_v7 = vsel %vm2623_vm2, %v2534_v20, %v1218_v10  ;;  %vm2639_vm4 = vmor %vm1139_vm3, %vm1140_vm15  ;;  %vm1070_vm5 = vweird.f32 %v1879_v36  ;;  %1882 = vrsqrt.f32 %v2605_v39 }
 0x1d4   : > { %v1142_v46 = vsel %vm2639_vm4, %v2546_v15, %v1138_v44  ;;  %v1283_v25 = vmul.f32 %v1062_v57, %v2236_v30  ;;  %v1067_v13 = vsub.f32 1.5, %v1066_v35  ;;  %v985_v52 = vmul.f32 %v2607_v41, %v984_v28 }
 0x1d5   : > { %vm1069_vm6 = vweird.f32 %v2544_v43  ;;  %vm989_vm7 = vweird.f32 %v2571_v47  ;;  %1884 = vrsqrt.f32 %v2617_v33  ;;  %v2652_v20 = vadd.f32 1e-12, %v916_v61 }
 0x1d6   : > { %v1299_v14 = vmul.f32 %v1222_v7, %v2231_v6  ;;  %v1068_v59 = vmul.f32 %v1879_v36, %v1067_v13  ;;  %v986_v60 = vmul.f32 0.5, %v985_v52  ;;  %v894_v58 = vmul.f32 %v836_v32, %v2173_v17  ;;  %vm1071_vm8 = vmor %vm1069_vm6, %vm1070_vm5 }
 0x1d7   : > { %v1291_v30 = vmul.f32 %v1142_v46, %v2239_v31  ;;  %vm990_vm9 = vweird.f32 %v2607_v41  ;;  %1886 = vrsqrt.f32 %v2652_v20  ;;  %v893_v43 = vmul.f32 %v834_v16, %v2173_v17 }
 0x1d8   : > { %v1319_v42 = vmul.f32 %v2445_v50, %v1283_v25  ;;  %v1072_v12 = vsel %vm1071_vm8, %v1879_v36, %v1068_v59  ;;  %v987_v27 = vsub.f32 1.5, %v986_v60  ;;  %v2662_v6 = vadd.f32 1e-12, %v894_v58  ;;  %vm991_vm10 = vmor %vm989_vm7, %vm990_vm9 }
 0x1d9   : > { %v882_v15 = vpop.xlane.xlu0 %881  ;;  %v2664_v11 = vpop.eup %1882  ;;  %v1284_v45 = vmul.f32 %v1072_v12, %v2249_v21  ;;  %v2667_v10 = vadd.f32 1e-12, %v893_v43  ;;  %v901_v31 = vmul.f32 %v850_v8, %v2173_v17  ;;  %v1335_v22 = vmul.f32 %v2445_v50, %v1299_v14 }
 0x1da   : > { %v917_v44 = vmul.f32 %v882_v15, %v2173_v17  ;;  %v988_v16 = vmul.f32 %v2607_v41, %v987_v27  ;;  %v1154_v36 = vmul.f32 %v2664_v11, %v2605_v39  ;;  %1888 = vrsqrt.f32 %v2662_v6  ;;  %v868_v28 = vpop.xlane.xlu2 %867 }
 0x1db   : > { %v2676_v63 = vpop.eup %1884  ;;  %v1347_v29 = vadd.f32 %v2465_v49, %v1311_v34  ;;  %v1327_v21 = vmul.f32 %v2445_v50, %v1291_v30  ;;  %v1320_v4 = vmul.f32 %v2445_v50, %v1284_v45  ;;  %1890 = vrsqrt.f32 %v2667_v10 }
 0x1dc   : > { %v1355_v61 = vadd.f32 %v2465_v49, %v1319_v42  ;;  %v992_v53 = vsel %vm991_vm10, %v2607_v41, %v988_v16  ;;  %v1155_v57 = vmul.f32 %v2664_v11, %v1154_v36  ;;  %v1144_v35 = vmul.f32 %v2676_v63, %v2617_v33 }
 0x1dd   : > { %v1887_v8 = vpop.eup %1886  ;;  %v1356_v34 = vadd.f32 %v2465_v49, %v1320_v4  ;;  %v1276_v7 = vmul.f32 %v992_v53, %v2253_v48  ;;  %v2693_v9 = vadd.f32 1e-12, %v901_v31  ;;  %v2695_v47 = vadd.f32 1e-12, %v917_v44 }
 0x1de   : > { %v2698_v32 = vadd.f32 %v2465_v49, %v1335_v22  ;;  %v1145_v41 = vmul.f32 %v2676_v63, %v1144_v35  ;;  %vm1149_vm11 = vweird.f32 %v2617_v33  ;;  %v1224_v46 = vmul.f32 %v1887_v8, %v2652_v20 }
 0x1df   : > { %v1734_v25 = vpack.c.bf16 %v1356_v34, %v1355_v61  ;;  %v1312_v13 = vmul.f32 %v2445_v50, %v1276_v7  ;;  %1892 = vrsqrt.f32 %v2693_v9  ;;  %v910_v48 = vmul.f32 %v868_v28, %v2173_v17 }
 0x1e0   : > { %v2706_v52 = vpop.eup %1888  ;;  %v2709_v14 = vadd.f32 %v2465_v49, %v1327_v21  ;;  %v1146_v59 = vmul.f32 0.5, %v1145_v41  ;;  %v1225_v60 = vmul.f32 %v1887_v8, %v1224_v46  ;;  %1894 = vrsqrt.f32 %v2695_v47 }
 0x1e1   : > { %v854_v58 = vpop.xlane.xlu1 %853  ;;  %v2712_v15 = vpop.eup %1890  ;;  %1805 = vst [vmem:[%s2529_s8 + $0x28] sm:$0xff] %v1734_v25   ;;  %v1348_v30 = vadd.f32 %v2465_v49, %v1312_v13  ;;  %v1156_v43 = vmul.f32 0.5, %v1155_v57  ;;  %vm1229_vm12 = vweird.f32 %v2652_v20  ;;  %v1004_v42 = vmul.f32 %v2706_v52, %v2662_v6 }
 0x1e2   : > { %v2719_v12 = vpop.xlane.xlu0 %851  ;;  %v1147_v27 = vsub.f32 1.5, %v1146_v59  ;;  %vm1150_vm13 = vweird.f32 %v2676_v63  ;;  %v1226_v45 = vmul.f32 0.5, %v1225_v60  ;;  %v994_v31 = vmul.f32 %v2712_v15, %v2667_v10  ;;  %v838_v20 = vpop.xlane.xlu2 %837 }
 0x1e3   : > { %v1714_v44 = vpack.c.bf16 %v1348_v30, %v1347_v29  ;;  %vm1160_vm14 = vweird.f32 %v2664_v11  ;;  %v1005_v22 = vmul.f32 %v2706_v52, %v1004_v42  ;;  %v2726_v16 = vadd.f32 1e-12, %v910_v48  ;;  %vm1151_vm1 = vmor %vm1149_vm11, %vm1150_vm13 }
 0x1e4   : > { %vm1159_vm15 = vweird.f32 %v2605_v39  ;;  %v1148_v36 = vmul.f32 %v2676_v63, %v1147_v27  ;;  %v1227_v21 = vsub.f32 1.5, %v1226_v45  ;;  %vm1230_vm0 = vweird.f32 %v1887_v8 }
 0x1e5   : > { %v995_v4 = vmul.f32 %v2712_v15, %v994_v31  ;;  %v2731_v61 = vpop.eup %1892  ;;  %1801 = vst [vmem:[%s2529_s8 + $0x8] sm:$0xff] %v1714_v44   ;;  %v1157_v53 = vsub.f32 1.5, %v1156_v43  ;;  %v1006_v29 = vmul.f32 0.5, %v1005_v22  ;;  %vm1009_vm2 = vweird.f32 %v2662_v6  ;;  %vm1231_vm3 = vmor %vm1229_vm12, %vm1230_vm0 }
 0x1e6   : > { %1896 = vrsqrt.f32 %v2726_v16  ;;  %v2740_v57 = vpop.eup %1894  ;;  %v1152_v35 = vsel %vm1151_vm1, %v2676_v63, %v1148_v36  ;;  %v1228_v28 = vmul.f32 %v1887_v8, %v1227_v21  ;;  %v1074_v7 = vmul.f32 %v2731_v61, %v2693_v9  ;;  %vm2777_vm9 = vmor %vm1159_vm15, %vm1160_vm14 }
 0x1e7   : > { %v996_v34 = vmul.f32 0.5, %v995_v4  ;;  %v1292_v41 = vmul.f32 %v1152_v35, %v2269_v3  ;;  %v1007_v33 = vsub.f32 1.5, %v1006_v29  ;;  %vm1010_vm4 = vweird.f32 %v2706_v52 }
 0x1e8   : > { %vm1000_vm5 = vweird.f32 %v2712_v15  ;;  %v1232_v46 = vsel %vm1231_vm3, %v1887_v8, %v1228_v28  ;;  %v1075_v63 = vmul.f32 %v2731_v61, %v1074_v7  ;;  %v1234_v13 = vmul.f32 %v2740_v57, %v2695_v47  ;;  %vm1011_vm7 = vmor %vm1009_vm2, %vm1010_vm4 }
 0x1e9   : > { %v997_v25 = vsub.f32 1.5, %v996_v34  ;;  %v1328_v48 = vmul.f32 %v2445_v50, %v1292_v41  ;;  %v1300_v3 = vmul.f32 %v1232_v46, %v2263_v38  ;;  %v1008_v59 = vmul.f32 %v2706_v52, %v1007_v33  ;;  %v872_v42 = vpop.xlane.xlu1 %871 }
 0x1ea   : > { %vm999_vm6 = vweird.f32 %v2667_v10  ;;  %v1158_v60 = vmul.f32 %v2664_v11, %v1157_v53  ;;  %v1076_v30 = vmul.f32 0.5, %v1075_v63  ;;  %v1235_v43 = vmul.f32 %v2740_v57, %v1234_v13  ;;  %v870_v31 = vpop.xlane.xlu0 %869  ;;  %v856_v13 = vpop.xlane.xlu2 %855 }
 0x1eb   : > { %v998_v8 = vmul.f32 %v2712_v15, %v997_v25  ;;  %v1364_v38 = vadd.f32 %v2465_v49, %v1328_v48  ;;  %v1336_v45 = vmul.f32 %v2445_v50, %v1300_v3  ;;  %v1012_v10 = vsel %vm1011_vm7, %v2706_v52, %v1008_v59  ;;  %vm1001_vm8 = vmor %vm999_vm6, %vm1000_vm5 }
 0x1ec   : > { %v2763_v27 = vpop.eup %1896  ;;  %v903_v6 = vmul.f32 %v854_v58, %v2173_v17  ;;  %v1278_v44 = vmul.f32 %v1012_v10, %v2287_v24  ;;  %v1077_v36 = vsub.f32 1.5, %v1076_v30  ;;  %v1236_v21 = vmul.f32 0.5, %v1235_v43 }
 0x1ed   : > { %v1002_v22 = vsel %vm1001_vm8, %v2712_v15, %v998_v8  ;;  %v1754_v52 = vpack.c.bf16 %v1364_v38, %v2709_v14  ;;  %v1372_v53 = vadd.f32 %v2465_v49, %v1336_v45  ;;  %v1164_v24 = vmul.f32 %v2763_v27, %v2726_v16 }
 0x1ee   : > { %v1277_v58 = vmul.f32 %v1002_v22, %v2280_v54  ;;  %v1162_v15 = vsel %vm2777_vm9, %v2664_v11, %v1158_v60  ;;  %v1314_v39 = vmul.f32 %v2445_v50, %v1278_v44  ;;  %v1078_v29 = vmul.f32 %v2731_v61, %v1077_v36 }
 0x1ef   : > { %vm1080_vm10 = vweird.f32 %v2731_v61  ;;  %1809 = vst [vmem:[%s2529_s8 + $0x48] sm:$0xff] %v1754_v52   ;;  %v1774_v14 = vpack.c.bf16 %v1372_v53, %v2698_v32  ;;  %v1165_v54 = vmul.f32 %v2763_v27, %v1164_v24  ;;  %v2796_v28 = vadd.f32 1e-12, %v903_v6 }
 0x1f0   : > { %v1313_v35 = vmul.f32 %v2445_v50, %v1277_v58  ;;  %v1350_v34 = vadd.f32 %v2465_v49, %v1314_v39  ;;  %vm1079_vm11 = vweird.f32 %v2693_v9  ;;  %v1237_v11 = vsub.f32 1.5, %v1236_v21 }
 0x1f1   : > { %v902_v7 = vmul.f32 %v2719_v12, %v2173_v17  ;;  %v1293_v41 = vmul.f32 %v1162_v15, %v2266_v0  ;;  %1813 = vst [vmem:[%s2529_s8 + $0x68] sm:$0xff] %v1774_v14   ;;  %vm2805_vm12 = vmor %vm1079_vm11, %vm1080_vm10  ;;  %v1166_v46 = vmul.f32 0.5, %v1165_v54  ;;  %1898 = vrsqrt.f32 %v2796_v28  ;;  %v884_v59 = vpop.xlane.xlu1 %883 }
 0x1f2   : > { %v1349_v33 = vadd.f32 %v2465_v49, %v1313_v35  ;;  %v1082_v9 = vsel %vm2805_vm12, %v2731_v61, %v1078_v29  ;;  %vm1169_vm13 = vweird.f32 %v2726_v16  ;;  %v895_v0 = vmul.f32 %v838_v20, %v2173_v17  ;;  %v840_v43 = vpop.xlane.xlu0 %839 }
 0x1f3   : > { %v2814_v12 = vadd.f32 1e-12, %v902_v7  ;;  %vm1240_vm14 = vweird.f32 %v2740_v57  ;;  %v1167_v63 = vsub.f32 1.5, %v1166_v46  ;;  %vm1170_vm15 = vweird.f32 %v2763_v27  ;;  %v886_v7 = vpop.xlane.xlu2 %885 }
 0x1f4   : > { %v1719_v25 = vpack.c.bf16 %v1350_v34, %v1349_v33  ;;  %v1238_v48 = vmul.f32 %v2740_v57, %v1237_v11  ;;  %v2821_v3 = vadd.f32 1e-12, %v895_v0  ;;  %v912_v61 = vmul.f32 %v872_v42, %v2173_v17  ;;  %vm1171_vm1 = vmor %vm1169_vm13, %vm1170_vm15 }
 0x1f5   : > { %1900 = vrsqrt.f32 %v2814_v12  ;;  %v1329_v60 = vmul.f32 %v2445_v50, %v1293_v41  ;;  %v1285_v20 = vmul.f32 %v1082_v9, %v2284_v18  ;;  %v1168_v8 = vmul.f32 %v2763_v27, %v1167_v63 }
 0x1f6   : > { %1802 = vst [vmem:[%s2529_s8 + $0x10] sm:$0xff] %v1719_v25   ;;  %v911_v30 = vmul.f32 %v870_v31, %v2173_v17  ;;  %vm1239_vm0 = vweird.f32 %v2695_v47  ;;  %1902 = vrsqrt.f32 %v2821_v3  ;;  %v2833_v38 = vadd.f32 1e-12, %v912_v61 }
 0x1f7   : > { %v904_v42 = vmul.f32 %v856_v13, %v2173_v17  ;;  %v2836_v45 = vpop.eup %1898  ;;  %vm2840_vm2 = vmor %vm1239_vm0, %vm1240_vm14  ;;  %v1172_v10 = vsel %vm1171_vm1, %v2763_v27, %v1168_v8  ;;  %v918_v16 = vmul.f32 %v884_v59, %v2173_v17  ;;  %v1365_v22 = vadd.f32 %v2465_v49, %v1329_v60 }
 0x1f8   : > { %v2845_v47 = vadd.f32 1e-12, %v911_v30  ;;  %v1242_v6 = vsel %vm2840_vm2, %v2740_v57, %v1238_v48  ;;  %v1294_v31 = vmul.f32 %v1172_v10, %v2301_v37  ;;  %v1094_v44 = vmul.f32 %v2836_v45, %v2796_v28 }
 0x1f9   : > { %1904 = vrsqrt.f32 %v2833_v38  ;;  %v1321_v36 = vmul.f32 %v2445_v50, %v1285_v20  ;;  %v2858_v27 = vadd.f32 1e-12, %v904_v42  ;;  %v2864_v37 = vadd.f32 1e-12, %v918_v16 }
 0x1fa   : > { %1906 = vrsqrt.f32 %v2845_v47  ;;  %v1330_v4 = vmul.f32 %v2445_v50, %v1294_v31  ;;  %v1095_v57 = vmul.f32 %v2836_v45, %v1094_v44  ;;  %v896_v52 = vmul.f32 %v840_v43, %v2173_v17  ;;  %v888_v9 = vpop.xlane.xlu0 %887 }
 0x1fb   : > { %v2860_v21 = vpop.eup %1900  ;;  %v2868_v53 = vmul.f32 %v1242_v6, %v2298_v5  ;;  %vm1099_vm3 = vweird.f32 %v2796_v28  ;;  %1908 = vrsqrt.f32 %v2858_v27  ;;  %vm1089_vm4 = vweird.f32 %v2814_v12 }
 0x1fc   : > { %v1084_v58 = vmul.f32 %v2860_v21, %v2814_v12  ;;  %v2874_v24 = vpop.eup %1902  ;;  %v1366_v15 = vadd.f32 %v2465_v49, %v1330_v4  ;;  %v1096_v39 = vmul.f32 0.5, %v1095_v57  ;;  %1910 = vrsqrt.f32 %v2864_v37 }
 0x1fd   : > { %v2880_v29 = vadd.f32 %v2465_v49, %v1321_v36  ;;  %v1014_v14 = vmul.f32 %v2874_v24, %v2821_v3  ;;  %v2885_v35 = vadd.f32 1e-12, %v896_v52  ;;  %vm1100_vm5 = vweird.f32 %v2836_v45 }
 0x1fe   : > { %v1085_v5 = vmul.f32 %v2860_v21, %v1084_v58  ;;  %v1759_v34 = vpack.c.bf16 %v1366_v15, %v1365_v22  ;;  %v1097_v11 = vsub.f32 1.5, %v1096_v39  ;;  %vm1019_vm6 = vweird.f32 %v2821_v3  ;;  %vm2911_vm11 = vmor %vm1099_vm3, %vm1100_vm5 }
 0x1ff   : > { %v2887_v54 = vpop.eup %1904  ;;  %vm1090_vm7 = vweird.f32 %v2860_v21  ;;  %v1015_v32 = vmul.f32 %v2874_v24, %v1014_v14  ;;  %vm1189_vm8 = vweird.f32 %v2833_v38  ;;  %vm1020_vm9 = vweird.f32 %v2874_v24 }
 0x200   : > { %v2891_v41 = vpop.eup %1906  ;;  %v1086_v33 = vmul.f32 0.5, %v1085_v5  ;;  %v1184_v46 = vmul.f32 %v2887_v54, %v2833_v38  ;;  %1810 = vst [vmem:[%s2529_s8 + $0x50] sm:$0xff] %v1759_v34   ;;  %v1098_v0 = vmul.f32 %v2836_v45, %v1097_v11  ;;  %vm1179_vm10 = vweird.f32 %v2845_v47  ;;  %vm1091_vm14 = vmor %vm1089_vm4, %vm1090_vm7 }
 0x201   : > { %v1174_v25 = vmul.f32 %v2891_v41, %v2845_v47  ;;  %1912 = vrsqrt.f32 %v2885_v35  ;;  %v2905_v63 = vpop.eup %1908  ;;  %v1016_v61 = vmul.f32 0.5, %v1015_v32  ;;  %v919_v60 = vmul.f32 %v886_v7, %v2173_v17  ;;  %vm2947_vm1 = vmor %vm1019_vm6, %vm1020_vm9 }
 0x202   : > { %v1087_v48 = vsub.f32 1.5, %v1086_v33  ;;  %v1185_v59 = vmul.f32 %v2887_v54, %v1184_v46  ;;  %v2917_v20 = vpop.eup %1910  ;;  %v1102_v8 = vsel %vm2911_vm11, %v2836_v45, %v1098_v0  ;;  %v1104_v28 = vmul.f32 %v2905_v63, %v2858_v27 }
 0x203   : > { %v1175_v30 = vmul.f32 %v2891_v41, %v1174_v25  ;;  %v920_v43 = vmul.f32 %v888_v9, %v2173_v17  ;;  %v1017_v18 = vsub.f32 1.5, %v1016_v61  ;;  %vm1190_vm12 = vweird.f32 %v2887_v54 }
 0x204   : > { %v1088_v42 = vmul.f32 %v2860_v21, %v1087_v48  ;;  %v1186_v10 = vmul.f32 0.5, %v1185_v59  ;;  %vm1109_vm13 = vweird.f32 %v2858_v27  ;;  %vm1180_vm15 = vweird.f32 %v2891_v41  ;;  %vm1191_vm4 = vmor %vm1189_vm8, %vm1190_vm12 }
 0x205   : > { %v1176_v45 = vmul.f32 0.5, %v1175_v30  ;;  %v1105_v16 = vmul.f32 %v2905_v63, %v1104_v28  ;;  %v1244_v17 = vmul.f32 %v2917_v20, %v2864_v37  ;;  %v1287_v6 = vmul.f32 %v1102_v8, %v2317_v56  ;;  %vm1181_vm6 = vmor %vm1179_vm10, %vm1180_vm15 }
 0x206   : > { %v1092_v31 = vsel %vm1091_vm14, %v2860_v21, %v1088_v42  ;;  %v1018_v44 = vmul.f32 %v2874_v24, %v1017_v18  ;;  %v1187_v22 = vsub.f32 1.5, %v1186_v10  ;;  %vm1249_vm0 = vweird.f32 %v2864_v37 }
 0x207   : > { %v1913_v36 = vpop.eup %1912  ;;  %v1286_v12 = vmul.f32 %v1092_v31, %v2310_v2  ;;  %v1177_v4 = vsub.f32 1.5, %v1176_v45  ;;  %v1106_v57 = vmul.f32 0.5, %v1105_v16  ;;  %v1245_v52 = vmul.f32 %v2917_v20, %v1244_v17 }
 0x208   : > { %v1188_v21 = vmul.f32 %v2887_v54, %v1187_v22  ;;  %vm1110_vm2 = vweird.f32 %v2905_v63  ;;  %v1024_v58 = vmul.f32 %v1913_v36, %v2885_v35  ;;  %vm1029_vm3 = vweird.f32 %v2885_v35 }
 0x209   : > { %v1322_v2 = vmul.f32 %v2445_v50, %v1286_v12  ;;  %v1178_v3 = vmul.f32 %v2891_v41, %v1177_v4  ;;  %v1107_v15 = vsub.f32 1.5, %v1106_v57  ;;  %vm1250_vm5 = vweird.f32 %v2917_v20  ;;  %vm1111_vm7 = vmor %vm1109_vm13, %vm1110_vm2 }
 0x20a   : > { %v1323_v39 = vmul.f32 %v2445_v50, %v1287_v6  ;;  %v1192_v5 = vsel %vm1191_vm4, %v2887_v54, %v1188_v21  ;;  %v1246_v14 = vmul.f32 0.5, %v1245_v52  ;;  %v1025_v34 = vmul.f32 %v1913_v36, %v1024_v58  ;;  %vm1251_vm9 = vmor %vm1249_vm0, %vm1250_vm5 }
 0x20b   : > { %v1358_v11 = vadd.f32 %v2465_v49, %v1322_v2  ;;  %v1022_v38 = vsel %vm2947_vm1, %v2874_v24, %v1018_v44  ;;  %v1296_v7 = vmul.f32 %v1192_v5, %v2332_v40  ;;  %v1182_v33 = vsel %vm1181_vm6, %v2891_v41, %v1178_v3 }
 0x20c   : > { %v1295_v54 = vmul.f32 %v1182_v33, %v2327_v23  ;;  %v1108_v32 = vmul.f32 %v2905_v63, %v1107_v15  ;;  %v1247_v46 = vsub.f32 1.5, %v1246_v14  ;;  %v1026_v47 = vmul.f32 0.5, %v1025_v34 }
 0x20d   : > { %v1739_v9 = vpack.c.bf16 %v1358_v11, %v2880_v29  ;;  %v1332_v0 = vmul.f32 %v2445_v50, %v1296_v7  ;;  %vm1030_vm8 = vweird.f32 %v1913_v36  ;;  %v951_v24 = vadd.f32 1e-12, %v919_v60 }
 0x20e   : > { %v1331_v40 = vmul.f32 %v2445_v50, %v1295_v54  ;;  %v1112_v41 = vsel %vm1111_vm7, %v2905_v63, %v1108_v32  ;;  %v1248_v23 = vmul.f32 %v2917_v20, %v1247_v46  ;;  %v1027_v25 = vsub.f32 1.5, %v1026_v47  ;;  %vm1031_vm10 = vmor %vm1029_vm3, %vm1030_vm8 }
 0x20f   : > { %1806 = vst [vmem:[%s2529_s8 + $0x30] sm:$0xff] %v1739_v9   ;;  %v1279_v13 = vmul.f32 %v1022_v38, %v2314_v55  ;;  %v1368_v29 = vadd.f32 %v2465_v49, %v1332_v0  ;;  %v1288_v48 = vmul.f32 %v1112_v41, %v2335_v51  ;;  %1914 = vrsqrt.f32 %v951_v24 }
 0x210   : > { %v1367_v27 = vadd.f32 %v2465_v49, %v1331_v40  ;;  %v1252_v63 = vsel %vm1251_vm9, %v2917_v20, %v1248_v23  ;;  %v1028_v61 = vmul.f32 %v1913_v36, %v1027_v25  ;;  %v952_v59 = vadd.f32 1e-12, %v920_v43 }
 0x211   : > { %v1337_v55 = vmul.f32 %v2445_v50, %v2868_v53  ;;  %v1324_v60 = vmul.f32 %v2445_v50, %v1288_v48  ;;  %v1302_v51 = vmul.f32 %v1252_v63, %v2347_v62  ;;  %v1359_v37 = vadd.f32 %v2465_v49, %v1323_v39 }
 0x212   : > { %v1764_v8 = vpack.c.bf16 %v1368_v29, %v1367_v27  ;;  %v1032_v30 = vsel %vm1031_vm10, %v1913_v36, %v1028_v61  ;;  %1916 = vrsqrt.f32 %v952_v59  ;;  %v1315_v20 = vmul.f32 %v2445_v50, %v1279_v13 }
 0x213   : > { %v1360_v28 = vadd.f32 %v2465_v49, %v1324_v60  ;;  %v1338_v53 = vmul.f32 %v2445_v50, %v1302_v51  ;;  %v1280_v43 = vmul.f32 %v1032_v30, %v2350_v1  ;;  %v1373_v35 = vadd.f32 %v2465_v49, %v1337_v55 }
 0x214   : > { %1811 = vst [vmem:[%s2529_s8 + $0x58] sm:$0xff] %v1764_v8   ;;  %v1351_v16 = vadd.f32 %v2465_v49, %v1315_v20  ;;  %vm1259_vm12 = vweird.f32 %v951_v24  ;;  %vm1269_vm15 = vweird.f32 %v952_v59 }
 0x215   : > { %v1915_v62 = vpop.eup %1914  ;;  %v1744_v42 = vpack.c.bf16 %v1360_v28, %v1359_v37  ;;  %v1374_v18 = vadd.f32 %v2465_v49, %v1338_v53  ;;  %v1316_v10 = vmul.f32 %v2445_v50, %v1280_v43 }
 0x216   : > { %v1254_v45 = vmul.f32 %v1915_v62, %v951_v24  ;;  %vm1260_vm11 = vweird.f32 %v1915_v62 }
 0x217   : > { %1807 = vst [vmem:[%s2529_s8 + $0x38] sm:$0xff] %v1744_v42   ;;  %v1779_v17 = vpack.c.bf16 %v1374_v18, %v1373_v35  ;;  %v1352_v6 = vadd.f32 %v2465_v49, %v1316_v10  ;;  %vm1261_vm13 = vmor %vm1259_vm12, %vm1260_vm11 }
 0x218   : > { %v1917_v31 = vpop.eup %1916  ;;  %v1255_v44 = vmul.f32 %v1915_v62, %v1254_v45 }
 0x219   : > { %1814 = vst [vmem:[%s2529_s8 + $0x70] sm:$0xff] %v1779_v17   ;;  %v1724_v1 = vpack.c.bf16 %v1352_v6, %v1351_v16  ;;  %v1264_v22 = vmul.f32 %v1917_v31, %v952_v59  ;;  %vm1270_vm14 = vweird.f32 %v1917_v31 }
 0x21a   : > { %v1256_v36 = vmul.f32 0.5, %v1255_v44  ;;  %vm1271_vm0 = vmor %vm1269_vm15, %vm1270_vm14 }
 0x21b   : > { %1803 = vst [vmem:[%s2529_s8 + $0x18] sm:$0xff] %v1724_v1   ;;  %v1265_v12 = vmul.f32 %v1917_v31, %v1264_v22 }
 0x21c   : > { %v1257_v4 = vsub.f32 1.5, %v1256_v36 }
 0x21d   : > { %v1266_v57 = vmul.f32 0.5, %v1265_v12 }
 0x21e   : > { %v1258_v52 = vmul.f32 %v1915_v62, %v1257_v4 }
 0x21f   : > { %v1267_v56 = vsub.f32 1.5, %v1266_v57 }
 0x220   : > { %v1262_v21 = vsel %vm1261_vm13, %v1915_v62, %v1258_v52 }
 0x221   : > { %v1303_v58 = vmul.f32 %v1262_v21, %v2353_v26  ;;  %v1268_v2 = vmul.f32 %v1917_v31, %v1267_v56 }
 0x223   : > { %v1272_v3 = vsel %vm1271_vm0, %v1917_v31, %v1268_v2  ;;  %v1339_v15 = vmul.f32 %v2445_v50, %v1303_v58 }
 0x224   : > { %v1304_v39 = vmul.f32 %v1272_v3, %v2363_v19 }
 0x225   : > { %v1375_v14 = vadd.f32 %v2465_v49, %v1339_v15 }
 0x226   : > { %v1340_v5 = vmul.f32 %v2445_v50, %v1304_v39 }
 0x228   : > { %v1376_v34 = vadd.f32 %v2465_v49, %v1340_v5 }
 0x22a   : > { %v1784_v11 = vpack.c.bf16 %v1376_v34, %v1375_v14 }
 0x22c   : > { %1815 = vst [vmem:[%s2529_s8 + $0x78] sm:$0xff] %v1784_v11  }
 0x22d PF: > { %s16_s21 = sadd.s32 1, %s1924_s21  }
 0x22e   : > { %p13_p4 = scmp.ge.s32.totalorder %s16_s21, 4  }
 0x230   :  { %15 = sbr.rel (!%p13_p4) target bundleno = 1 (0x1), region = 77 }

// kernel: forward.24
= control target key start
LH: loop header
LB: loop body
LE: loop exit
PB: predicated region body
PF: predicated region fallthrough
CT: control target
= control target key end

     0   :  { %s198_s1 = inlined_call_operand.vmem [shape: bf16[128,128], index: 1, kind: input, shape index: {}]   ;;  %s199_s2 = inlined_call_operand.vmem [shape: f32[1,128], index: 2, kind: input, shape index: {}]   ;;  %s200_s0 = inlined_call_operand.vmem [shape: bf16[8,128], index: 0, kind: input, shape index: {}]   ;;  %s201_s3 = inlined_call_operand.vmem [shape: f32[8,128], index: 3, kind: output, shape index: {}]  }
   0x1   :  { %v141_v0 = vld [vmem:[%s198_s1 + $0x38] sm:$0xff]  ;;  %v140_v1 = vld [vmem:[%s198_s1 + $0x30] sm:$0xff]  ;;  %v139_v2 = vld [vmem:[%s198_s1 + $0x28] sm:$0xff] }
   0x2   :  { %83 = vmatpush.bf16.msra.mxu0 %v141_v0  ;;  %v138_v3 = vld [vmem:[%s198_s1 + $0x20] sm:$0xff]  ;;  %v137_v4 = vld [vmem:[%s198_s1 + $0x18] sm:$0xff]  ;;  %v136_v5 = vld [vmem:[%s198_s1 + $0x10] sm:$0xff] }
   0x3   :  { %v135_v6 = vld [vmem:[%s198_s1 + $0x8] sm:$0xff]  ;;  %v134_v7 = vld [vmem:[%s198_s1] sm:$0xff] }
   0x4   :  { %v14_v8 = vld [vmem:[%s200_s0] sm:$0xf] }
   0x5   :  { %v142_v9 = vld [vmem:[%s199_s2] ss:$0 sm:$0xff] }
   0x6   :  { %84 = vmatpush.bf16.msra.mxu0 %v140_v1 }
   0xa   :  { %85 = vmatpush.bf16.msra.mxu0 %v139_v2 }
   0xe   :  { %86 = vmatpush.bf16.msra.mxu0 %v138_v3 }
  0x12   :  { %87 = vmatpush.bf16.msra.mxu0 %v137_v4 }
  0x16   :  { %88 = vmatpush.bf16.msra.mxu0 %v136_v5 }
  0x1a   :  { %89 = vmatpush.bf16.msra.mxu0 %v135_v6 }
  0x1e   :  { %90 = vmatpush.bf16.msra.mxu0 %v134_v7 }
  0x21   :  { %91 = vmatmul.bf16.vlgmr.msra.gmra.mxu0 %v14_v8 }
  0x9e   :  { %v92_v10 = vpop.f32.mrf.mxu0 }
  0x9f   :  { %v93_v11 = vadd.f32 %v142_v9, %v92_v10 }
  0xa1   :  { %143 = vtanh.f32 %v93_v11 }
  0xa6   :  { %v94_v12 = vpop.f32.mrf.mxu0 }
  0xa7   :  { %v144_v13 = vpop.eup %143 }
  0xa8   :  { %97 = vst [vmem:[%s201_s3] sm:$0xff] %v144_v13 }

// kernel: forward.18
= control target key start
LH: loop header
LB: loop body
LE: loop exit
PB: predicated region body
PF: predicated region fallthrough
CT: control target
= control target key end

     0   :  { %s2296_s21 = smov 0   ;;  %s3210_s0 = inlined_call_operand.vmem [shape: bf16[512,256], index: 0, kind: input, shape index: {}]   ;;  %s3211_s1 = inlined_call_operand.vmem [shape: bf16[256,128], index: 1, kind: input, shape index: {}]   ;;  %s3212_s2 = inlined_call_operand.vmem [shape: f32[1,128], index: 2, kind: input, shape index: {}]   ;;  %s3213_s3 = inlined_call_operand.vmem [shape: bf16[512,128], index: 3, kind: input, shape index: {}]   ;;  %s3214_s4 = inlined_call_operand.vmem [shape: f32[1,128], index: 4, kind: input, shape index: {}]   ;;  %s3215_s5 = inlined_call_operand.vmem [shape: f32[1,128], index: 5, kind: input, shape index: {}]   ;;  %s3216_s6 = inlined_call_operand.vmem [shape: bf16[512,128], index: 6, kind: output, shape index: {}]  }
   0x1 LB: > { %s1729_s22 = sadd.s32 4294967295, %s2258_s21   ;;  %p1733_p0 = scmp.ge.s32.totalorder %s2258_s21, 1  ;;  %s2258_s21 = sphi %s2296_s21, %s16_s21  }
   0x2   : > { %p225_p1 = scmp.lt.s32.totalorder %s2258_s21, 3 }
   0x4   : > { %p226_p2 = pnand %p1733_p0, %p225_p1 }
   0x5   : > { %s1734_s11 = sshll.u32 (!%p226_p2), %s1729_s22, 5 }
   0x6   : > { %229 = sbr.rel (%p226_p2) target bundleno = 579 (0x243), region = 44  ;;  %p262_p3 = scmp.lt.s32.totalorder (!%p226_p2), %s1734_s11, 63 }
   0xb   : > { %v1975_v0 = vld [vmem:[%s3211_s1 + $0x38] sm:$0xff]  ;;  %v1974_v2 = vld [vmem:[%s3211_s1 + $0x30] sm:$0xff]  ;;  %v1973_v4 = vld [vmem:[%s3211_s1 + $0x28] sm:$0xff]  ;;  %s3234_s11 = smov (!%p262_p3, %s1734_s11), 63 }
   0xc   : > { %v1983_v1 = vld [vmem:[%s3211_s1 + $0x78] sm:$0xff]  ;;  %604 = vmatpush.bf16.msra.mxu0 %v1975_v0  ;;  %2158 = vmatpush.bf16.msra.mxu2 %v1975_v0  ;;  %v1982_v3 = vld [vmem:[%s3211_s1 + $0x70] sm:$0xff]  ;;  %v1981_v5 = vld [vmem:[%s3211_s1 + $0x68] sm:$0xff]  ;;  %s1935_s25 = sshll.u32 %s3234_s11, 3  ;;  %s1738_s14 = sshll.u32 %s3234_s11, 2 }
   0xd   : > { %693 = vmatpush.bf16.msra.mxu1 %v1983_v1  ;;  %2166 = vmatpush.bf16.msra.mxu3 %v1983_v1  ;;  %v1972_v6 = vld [vmem:[%s3211_s1 + $0x20] sm:$0xff]  ;;  %v1971_v8 = vld [vmem:[%s3211_s1 + $0x18] sm:$0xff]  ;;  %v1970_v10 = vld [vmem:[%s3211_s1 + $0x10] sm:$0xff]  ;;  %s2349_s30 = scalar_lea.vmem %s3210_s0, %s1935_s25  ;;  %s2430_s17 = scalar_lea.vmem %s3213_s3, %s1738_s14 }
   0xe   : > { %v1980_v7 = vld [vmem:[%s3211_s1 + $0x60] sm:$0xff]  ;;  %v1979_v9 = vld [vmem:[%s3211_s1 + $0x58] sm:$0xff]  ;;  %v1978_v11 = vld [vmem:[%s3211_s1 + $0x50] sm:$0xff]  ;;  %s2844_s27 = scalar_lea.vmem %s3216_s6, %s1738_s14 }
   0xf   : > { %v1969_v12 = vld [vmem:[%s3211_s1 + $0x8] sm:$0xff]  ;;  %v1968_v14 = vld [vmem:[%s3211_s1] sm:$0xff]  ;;  %v1751_v28 = vld [vmem:[%s2349_s30 + $0x10] sm:$0xf] }
  0x10   : > { %605 = vmatpush.bf16.msra.mxu0 %v1974_v2  ;;  %2159 = vmatpush.bf16.msra.mxu2 %v1974_v2  ;;  %v1977_v13 = vld [vmem:[%s3211_s1 + $0x48] sm:$0xff]  ;;  %v1976_v15 = vld [vmem:[%s3211_s1 + $0x40] sm:$0xff]  ;;  %v1939_v29 = vld [vmem:[%s2349_s30 + $0x14] sm:$0xf0] }
  0x11   : > { %694 = vmatpush.bf16.msra.mxu1 %v1982_v3  ;;  %2167 = vmatpush.bf16.msra.mxu3 %v1982_v3  ;;  %v1743_v16 = vld [vmem:[%s2349_s30] sm:$0xf]  ;;  %v1937_v17 = vld [vmem:[%s2349_s30 + $0x4] sm:$0xf0]  ;;  %v1936_v20 = vld [vmem:[%s2349_s30 + $0x4] sm:$0xf]  ;;  %v1752_v36 = vor.u32 %v1939_v29, %v1751_v28 }
  0x12   : > { %v1807_v18 = vld [vmem:[%s2349_s30 + $0x80] sm:$0xf]  ;;  %v1953_v19 = vld [vmem:[%s2349_s30 + $0x84] sm:$0xf0]  ;;  %v1745_v21 = vld [vmem:[%s2349_s30 + $0x8] sm:$0xf0]  ;;  %v1744_v24 = vor.u32 %v1937_v17, %v1743_v16 }
  0x13   : > { %v1952_v22 = vld [vmem:[%s2349_s30 + $0x84] sm:$0xf]  ;;  %v1809_v23 = vld [vmem:[%s2349_s30 + $0x88] sm:$0xf0]  ;;  %v1808_v25 = vor.u32 %v1953_v19, %v1807_v18  ;;  %v1748_v26 = vor.u32 %v1936_v20, %v1745_v21  ;;  %v1815_v30 = vld [vmem:[%s2349_s30 + $0x90] sm:$0xf] }
  0x14   : > { %606 = vmatpush.bf16.msra.mxu0 %v1973_v4  ;;  %2160 = vmatpush.bf16.msra.mxu2 %v1973_v4  ;;  %v1812_v27 = vor.u32 %v1952_v22, %v1809_v23  ;;  %v1955_v31 = vld [vmem:[%s2349_s30 + $0x94] sm:$0xf0]  ;;  %v1938_v32 = vld [vmem:[%s2349_s30 + $0x14] sm:$0xf]  ;;  %v1753_v33 = vld [vmem:[%s2349_s30 + $0x18] sm:$0xf0] }
  0x15   : > { %695 = vmatpush.bf16.msra.mxu1 %v1981_v5  ;;  %2168 = vmatpush.bf16.msra.mxu3 %v1981_v5  ;;  %v1954_v34 = vld [vmem:[%s2349_s30 + $0x94] sm:$0xf]  ;;  %v1817_v35 = vld [vmem:[%s2349_s30 + $0x98] sm:$0xf0]  ;;  %v1816_v37 = vor.u32 %v1955_v31, %v1815_v30  ;;  %v1756_v38 = vor.u32 %v1938_v32, %v1753_v33  ;;  %v1759_v40 = vld [vmem:[%s2349_s30 + $0x20] sm:$0xf] }
  0x16   : > { %v1820_v39 = vor.u32 %v1954_v34, %v1817_v35  ;;  %v1941_v41 = vld [vmem:[%s2349_s30 + $0x24] sm:$0xf0]  ;;  %v1823_v42 = vld [vmem:[%s2349_s30 + $0xa0] sm:$0xf]  ;;  %v1940_v44 = vld [vmem:[%s2349_s30 + $0x24] sm:$0xf] }
  0x17   : > { %v1957_v43 = vld [vmem:[%s2349_s30 + $0xa4] sm:$0xf0]  ;;  %v1761_v45 = vld [vmem:[%s2349_s30 + $0x28] sm:$0xf0]  ;;  %v1956_v46 = vld [vmem:[%s2349_s30 + $0xa4] sm:$0xf]  ;;  %v1760_v48 = vor.u32 %v1941_v41, %v1759_v40 }
  0x18   : > { %607 = vmatpush.bf16.msra.mxu0 %v1972_v6  ;;  %2161 = vmatpush.bf16.msra.mxu2 %v1972_v6  ;;  %v1825_v47 = vld [vmem:[%s2349_s30 + $0xa8] sm:$0xf0]  ;;  %v1824_v49 = vor.u32 %v1957_v43, %v1823_v42  ;;  %v1764_v50 = vor.u32 %v1940_v44, %v1761_v45  ;;  %v1767_v52 = vld [vmem:[%s2349_s30 + $0x30] sm:$0xf]  ;;  %v1943_v53 = vld [vmem:[%s2349_s30 + $0x34] sm:$0xf0] }
  0x19   : > { %696 = vmatpush.bf16.msra.mxu1 %v1980_v7  ;;  %2169 = vmatpush.bf16.msra.mxu3 %v1980_v7  ;;  %v1828_v51 = vor.u32 %v1956_v46, %v1825_v47  ;;  %v1831_v54 = vld [vmem:[%s2349_s30 + $0xb0] sm:$0xf]  ;;  %v1959_v55 = vld [vmem:[%s2349_s30 + $0xb4] sm:$0xf0]  ;;  %v1942_v56 = vld [vmem:[%s2349_s30 + $0x34] sm:$0xf]  ;;  %v1768_v60 = vor.u32 %v1943_v53, %v1767_v52 }
  0x1a   : > { %v1769_v57 = vld [vmem:[%s2349_s30 + $0x38] sm:$0xf0]  ;;  %v1958_v58 = vld [vmem:[%s2349_s30 + $0xb4] sm:$0xf]  ;;  %v1832_v61 = vor.u32 %v1959_v55, %v1831_v54  ;;  %v1775_v0 = vld [vmem:[%s2349_s30 + $0x40] sm:$0xf] }
  0x1b   : > { %v1833_v59 = vld [vmem:[%s2349_s30 + $0xb8] sm:$0xf0]  ;;  %v1772_v62 = vor.u32 %v1942_v56, %v1769_v57  ;;  %v1945_v1 = vld [vmem:[%s2349_s30 + $0x44] sm:$0xf0]  ;;  %v1839_v2 = vld [vmem:[%s2349_s30 + $0xc0] sm:$0xf] }
  0x1c   : > { %608 = vmatpush.bf16.msra.mxu0 %v1971_v8  ;;  %2162 = vmatpush.bf16.msra.mxu2 %v1971_v8  ;;  %v1836_v63 = vor.u32 %v1958_v58, %v1833_v59  ;;  %v1961_v3 = vld [vmem:[%s2349_s30 + $0xc4] sm:$0xf0]  ;;  %v1944_v4 = vld [vmem:[%s2349_s30 + $0x44] sm:$0xf]  ;;  %v1777_v5 = vld [vmem:[%s2349_s30 + $0x48] sm:$0xf0]  ;;  %v1776_v8 = vor.u32 %v1945_v1, %v1775_v0 }
  0x1d   : > { %697 = vmatpush.bf16.msra.mxu1 %v1979_v9  ;;  %2170 = vmatpush.bf16.msra.mxu3 %v1979_v9  ;;  %v1960_v6 = vld [vmem:[%s2349_s30 + $0xc4] sm:$0xf]  ;;  %v1841_v7 = vld [vmem:[%s2349_s30 + $0xc8] sm:$0xf0]  ;;  %v1840_v9 = vor.u32 %v1961_v3, %v1839_v2  ;;  %v1946_v16 = vld [vmem:[%s2349_s30 + $0x54] sm:$0xf] }
  0x1e   : > { %v1785_v17 = vld [vmem:[%s2349_s30 + $0x58] sm:$0xf0]  ;;  %v1962_v18 = vld [vmem:[%s2349_s30 + $0xd4] sm:$0xf]  ;;  %v1948_v28 = vld [vmem:[%s2349_s30 + $0x64] sm:$0xf] }
  0x1f   : > { %v1849_v19 = vld [vmem:[%s2349_s30 + $0xd8] sm:$0xf0]  ;;  %v1788_v22 = vor.u32 %v1946_v16, %v1785_v17  ;;  %v1793_v29 = vld [vmem:[%s2349_s30 + $0x68] sm:$0xf0]  ;;  %v1964_v30 = vld [vmem:[%s2349_s30 + $0xe4] sm:$0xf] }
  0x20   : > { %609 = vmatpush.bf16.msra.mxu0 %v1970_v10  ;;  %2163 = vmatpush.bf16.msra.mxu2 %v1970_v10  ;;  %v1780_v10 = vor.u32 %v1944_v4, %v1777_v5  ;;  %v1852_v23 = vor.u32 %v1962_v18, %v1849_v19  ;;  %v1857_v31 = vld [vmem:[%s2349_s30 + $0xe8] sm:$0xf0]  ;;  %v1796_v34 = vor.u32 %v1948_v28, %v1793_v29  ;;  %v1950_v40 = vld [vmem:[%s2349_s30 + $0x74] sm:$0xf]  ;;  %v1801_v41 = vld [vmem:[%s2349_s30 + $0x78] sm:$0xf0] }
  0x21   : > { %698 = vmatpush.bf16.msra.mxu1 %v1978_v11  ;;  %2171 = vmatpush.bf16.msra.mxu3 %v1978_v11  ;;  %v1844_v11 = vor.u32 %v1960_v6, %v1841_v7  ;;  %v1860_v35 = vor.u32 %v1964_v30, %v1857_v31  ;;  %v1966_v42 = vld [vmem:[%s2349_s30 + $0xf4] sm:$0xf]  ;;  %v1865_v43 = vld [vmem:[%s2349_s30 + $0xf8] sm:$0xf0]  ;;  %v1804_v46 = vor.u32 %v1950_v40, %v1801_v41  ;;  %v2135_v55 = vld [vmem:[%s2430_s17 + $0x40] sm:$0xff]  }
  0x22   : > { %v1868_v47 = vor.u32 %v1966_v42, %v1865_v43  ;;  %v2128_v6 = vld [vmem:[%s2430_s17 + $0x8] sm:$0xff]  }
  0x23   : > { %v2136_v17 = vld [vmem:[%s2430_s17 + $0x48] sm:$0xff]  }
  0x24   : > { %610 = vmatpush.bf16.msra.mxu0 %v1969_v12  ;;  %2164 = vmatpush.bf16.msra.mxu2 %v1969_v12  ;;  %v1783_v12 = vld [vmem:[%s2349_s30 + $0x50] sm:$0xf]  ;;  %v2023_v40 = vunpack.c.h.bf16 %v2136_v17 }
  0x25   : > { %699 = vmatpush.bf16.msra.mxu1 %v1977_v13  ;;  %2172 = vmatpush.bf16.msra.mxu3 %v1977_v13  ;;  %v1947_v13 = vld [vmem:[%s2349_s30 + $0x54] sm:$0xf0] }
  0x26   : > { %v1784_v20 = vor.u32 %v1947_v13, %v1783_v12 }
  0x28   : > { %611 = vmatpush.bf16.msra.mxu0 %v1968_v14  ;;  %2165 = vmatpush.bf16.msra.mxu2 %v1968_v14  ;;  %v1847_v14 = vld [vmem:[%s2349_s30 + $0xd0] sm:$0xf] }
  0x29   : > { %700 = vmatpush.bf16.msra.mxu1 %v1976_v15  ;;  %2173 = vmatpush.bf16.msra.mxu3 %v1976_v15  ;;  %v1963_v15 = vld [vmem:[%s2349_s30 + $0xd4] sm:$0xf0] }
  0x2a   : > { %v1848_v21 = vor.u32 %v1963_v15, %v1847_v14  ;;  %v1990_v14 = vunpack.c.l.bf16 %v2128_v6 }
  0x2b   : > { %612 = vmatmul.bf16.vlgmr.msra.gmra.mxu0 %v1744_v24  ;;  %652 = vmatmul.bf16.vlgmr.msra.gmra.mxu2 %v1808_v25  ;;  %v1791_v24 = vld [vmem:[%s2349_s30 + $0x60] sm:$0xf]  ;;  %v1949_v25 = vld [vmem:[%s2349_s30 + $0x64] sm:$0xf0] }
  0x2c   : > { %701 = vmatmul.bf16.vlgmr.msra.gmra.mxu1 %v1748_v26  ;;  %741 = vmatmul.bf16.vlgmr.msra.gmra.mxu3 %v1812_v27  ;;  %v1855_v26 = vld [vmem:[%s2349_s30 + $0xe0] sm:$0xf]  ;;  %v1965_v27 = vld [vmem:[%s2349_s30 + $0xe4] sm:$0xf0]  ;;  %v1792_v32 = vor.u32 %v1949_v25, %v1791_v24 }
  0x2d   : > { %v1856_v33 = vor.u32 %v1965_v27, %v1855_v26  ;;  %v1991_v27 = vunpack.c.h.bf16 %v2128_v6  ;;  %v2138_v6 = vld [vmem:[%s2430_s17 + $0x58] sm:$0xff]  }
  0x3b   : > { %617 = vmatmul.bf16.gmra.mxu0 %v1752_v36  ;;  %657 = vmatmul.bf16.gmra.mxu2 %v1816_v37  ;;  %v1799_v36 = vld [vmem:[%s2349_s30 + $0x70] sm:$0xf]  ;;  %v1951_v37 = vld [vmem:[%s2349_s30 + $0x74] sm:$0xf0] }
  0x3c   : > { %706 = vmatmul.bf16.gmra.mxu1 %v1756_v38  ;;  %746 = vmatmul.bf16.gmra.mxu3 %v1820_v39  ;;  %v1863_v38 = vld [vmem:[%s2349_s30 + $0xf0] sm:$0xf]  ;;  %v1967_v39 = vld [vmem:[%s2349_s30 + $0xf4] sm:$0xf0]  ;;  %v1800_v44 = vor.u32 %v1951_v37, %v1799_v36 }
  0x3d   : > { %v1864_v45 = vor.u32 %v1967_v39, %v1863_v38 }
  0x4b   : > { %622 = vmatmul.bf16.gmra.mxu0 %v1760_v48  ;;  %662 = vmatmul.bf16.gmra.mxu2 %v1824_v49  ;;  %v2435_v48 = vld [vmem:[%s3212_s2] ss:$0 sm:$0xff] }
  0x4c   : > { %711 = vmatmul.bf16.gmra.mxu1 %v1764_v50  ;;  %751 = vmatmul.bf16.gmra.mxu3 %v1828_v51  ;;  %v1985_v49 = vld [vmem:[%s2430_s17] sm:$0xff]  }
  0x4d   : > { %v1986_v53 = vunpack.c.l.bf16 %v1985_v49  ;;  %v1987_v1 = vunpack.c.h.bf16 %v1985_v49 }
  0x5b   : > { %627 = vmatmul.bf16.gmra.mxu0 %v1768_v60  ;;  %667 = vmatmul.bf16.gmra.mxu2 %v1832_v61  ;;  %v2018_v60 = vunpack.c.l.bf16 %v2135_v55 }
  0x5c   : > { %716 = vmatmul.bf16.gmra.mxu1 %v1772_v62  ;;  %756 = vmatmul.bf16.gmra.mxu3 %v1836_v63 }
  0x6b   : > { %632 = vmatmul.bf16.gmra.mxu0 %v1776_v8  ;;  %672 = vmatmul.bf16.gmra.mxu2 %v1840_v9  ;;  %v2019_v9 = vunpack.c.h.bf16 %v2135_v55 }
  0x6c   : > { %721 = vmatmul.bf16.gmra.mxu1 %v1780_v10  ;;  %761 = vmatmul.bf16.gmra.mxu3 %v1844_v11 }
  0x7b   : > { %637 = vmatmul.bf16.gmra.mxu0 %v1784_v20  ;;  %677 = vmatmul.bf16.gmra.mxu2 %v1848_v21 }
  0x7c   : > { %726 = vmatmul.bf16.gmra.mxu1 %v1788_v22  ;;  %766 = vmatmul.bf16.gmra.mxu3 %v1852_v23  ;;  %v2022_v22 = vunpack.c.l.bf16 %v2136_v17 }
  0x8b   : > { %642 = vmatmul.bf16.gmra.mxu0 %v1792_v32  ;;  %682 = vmatmul.bf16.gmra.mxu2 %v1856_v33  ;;  %v2129_v32 = vld [vmem:[%s2430_s17 + $0x10] sm:$0xff]  }
  0x8c   : > { %731 = vmatmul.bf16.gmra.mxu1 %v1796_v34  ;;  %771 = vmatmul.bf16.gmra.mxu3 %v1860_v35  ;;  %v1994_v39 = vunpack.c.l.bf16 %v2129_v32 }
  0x9b   : > { %647 = vmatmul.bf16.gmra.mxu0 %v1800_v44  ;;  %687 = vmatmul.bf16.gmra.mxu2 %v1864_v45  ;;  %v2137_v45 = vld [vmem:[%s2430_s17 + $0x50] sm:$0xff]  }
  0x9c   : > { %736 = vmatmul.bf16.gmra.mxu1 %v1804_v46  ;;  %776 = vmatmul.bf16.gmra.mxu3 %v1868_v47 }
  0xa8   : > { %v613_v50 = vpop.f32.mrf.mxu0 }
  0xa9   : > { %v614_v51 = vadd.f32 %v2435_v48, %v613_v50  ;;  %v702_v52 = vpop.f32.mrf.mxu1 }
  0xab   : > { %v703_v54 = vadd.f32 %v702_v52, %v614_v51  ;;  %v2026_v52 = vunpack.c.l.bf16 %v2137_v45 }
  0xad   : > { %v2440_v56 = vadd.f32 %v1986_v53, %v703_v54 }
  0xae   : > { %v653_v57 = vpop.f32.mrf.mxu2 }
  0xaf   : > { %v654_v58 = vadd.f32 %v2435_v48, %v653_v57  ;;  %v742_v59 = vpop.f32.mrf.mxu3  ;;  %878 = vadd.xlane.f32.xlu0 %v2440_v56 }
  0xb0   : > { %v615_v61 = vpop.f32.mrf.mxu0 }
  0xb1   : > { %v743_v62 = vadd.f32 %v742_v59, %v654_v58  ;;  %v616_v63 = vadd.f32 %v2435_v48, %v615_v61  ;;  %v704_v0 = vpop.f32.mrf.mxu1  ;;  %v2027_v59 = vunpack.c.h.bf16 %v2137_v45 }
  0xb3   : > { %v705_v2 = vadd.f32 %v704_v0, %v616_v63  ;;  %v2445_v3 = vadd.f32 %v2018_v60, %v743_v62 }
  0xb5   : > { %910 = vadd.xlane.f32.xlu1 %v2445_v3  ;;  %v2448_v4 = vadd.f32 %v1987_v1, %v705_v2  ;;  %v1995_v1 = vunpack.c.h.bf16 %v2129_v32  ;;  %v2130_v2 = vld [vmem:[%s2430_s17 + $0x18] sm:$0xff]  }
  0xb6   : > { %v655_v5 = vpop.f32.mrf.mxu2 }
  0xb7   : > { %v656_v7 = vadd.f32 %v2435_v48, %v655_v5  ;;  %v744_v8 = vpop.f32.mrf.mxu3  ;;  %880 = vadd.xlane.f32.xlu0 %v2448_v4 }
  0xb8   : > { %v618_v10 = vpop.f32.mrf.mxu0 }
  0xb9   : > { %v745_v11 = vadd.f32 %v744_v8, %v656_v7  ;;  %v619_v12 = vadd.f32 %v2435_v48, %v618_v10  ;;  %v707_v13 = vpop.f32.mrf.mxu1 }
  0xbb   : > { %v708_v15 = vadd.f32 %v707_v13, %v619_v12  ;;  %v2454_v16 = vadd.f32 %v2019_v9, %v745_v11  ;;  %v1998_v9 = vunpack.c.l.bf16 %v2130_v2  ;;  %v2030_v13 = vunpack.c.l.bf16 %v2138_v6 }
  0xbd   : > { %912 = vadd.xlane.f32.xlu2 %v2454_v16  ;;  %v2458_v18 = vadd.f32 %v1990_v14, %v708_v15 }
  0xbe   : > { %v658_v19 = vpop.f32.mrf.mxu2 }
  0xbf   : > { %v659_v20 = vadd.f32 %v2435_v48, %v658_v19  ;;  %v747_v21 = vpop.f32.mrf.mxu3  ;;  %882 = vadd.xlane.f32.xlu1 %v2458_v18 }
  0xc0   : > { %v620_v23 = vpop.f32.mrf.mxu0 }
  0xc1   : > { %v748_v24 = vadd.f32 %v747_v21, %v659_v20  ;;  %v621_v25 = vadd.f32 %v2435_v48, %v620_v23  ;;  %v709_v26 = vpop.f32.mrf.mxu1 }
  0xc3   : > { %v710_v28 = vadd.f32 %v709_v26, %v621_v25  ;;  %v2463_v29 = vadd.f32 %v2022_v22, %v748_v24  ;;  %v2031_v26 = vunpack.c.h.bf16 %v2138_v6 }
  0xc5   : > { %914 = vadd.xlane.f32.xlu0 %v2463_v29  ;;  %v2466_v30 = vadd.f32 %v1991_v27, %v710_v28  ;;  %v1999_v27 = vunpack.c.h.bf16 %v2130_v2 }
  0xc6   : > { %v660_v31 = vpop.f32.mrf.mxu2 }
  0xc7   : > { %v661_v33 = vadd.f32 %v2435_v48, %v660_v31  ;;  %v749_v34 = vpop.f32.mrf.mxu3  ;;  %884 = vadd.xlane.f32.xlu1 %v2466_v30 }
  0xc8   : > { %v623_v35 = vpop.f32.mrf.mxu0 }
  0xc9   : > { %v750_v36 = vadd.f32 %v749_v34, %v661_v33  ;;  %v624_v37 = vadd.f32 %v2435_v48, %v623_v35  ;;  %v712_v38 = vpop.f32.mrf.mxu1  ;;  %v2131_v34 = vld [vmem:[%s2430_s17 + $0x20] sm:$0xff]  }
  0xcb   : > { %v713_v41 = vadd.f32 %v712_v38, %v624_v37  ;;  %v2474_v43 = vadd.f32 %v2023_v40, %v750_v36  ;;  %v2139_v37 = vld [vmem:[%s2430_s17 + $0x60] sm:$0xff]  }
  0xcc   : > { %v2034_v45 = vunpack.c.l.bf16 %v2139_v37 }
  0xcd   : > { %v2472_v42 = vadd.f32 %v1994_v39, %v713_v41  ;;  %v2002_v39 = vunpack.c.l.bf16 %v2131_v34 }
  0xce   : > { %v663_v44 = vpop.f32.mrf.mxu2 }
  0xcf   : > { %v664_v46 = vadd.f32 %v2435_v48, %v663_v44  ;;  %v752_v47 = vpop.f32.mrf.mxu3  ;;  %886 = vadd.xlane.f32.xlu2 %v2472_v42  ;;  %916 = vadd.xlane.f32.xlu1 %v2474_v43 }
  0xd0   : > { %v625_v49 = vpop.f32.mrf.mxu0 }
  0xd1   : > { %v753_v50 = vadd.f32 %v752_v47, %v664_v46  ;;  %v714_v51 = vpop.f32.mrf.mxu1  ;;  %v626_v53 = vadd.f32 %v2435_v48, %v625_v49 }
  0xd3   : > { %v2481_v54 = vadd.f32 %v2026_v52, %v753_v50  ;;  %v715_v61 = vadd.f32 %v714_v51, %v626_v53 }
  0xd5   : > { %v2491_v8 = vadd.f32 %v1995_v1, %v715_v61  ;;  %v2132_v1 = vld [vmem:[%s2430_s17 + $0x28] sm:$0xff]  }
  0xd6   : > { %v665_v55 = vpop.f32.mrf.mxu2 }
  0xd7   : > { %v666_v57 = vadd.f32 %v2435_v48, %v665_v55  ;;  %v754_v58 = vpop.f32.mrf.mxu3  ;;  %918 = vadd.xlane.f32.xlu2 %v2481_v54 }
  0xd8   : > { %v628_v60 = vpop.f32.mrf.mxu0 }
  0xd9   : > { %v755_v62 = vadd.f32 %v754_v58, %v666_v57  ;;  %v629_v63 = vadd.f32 %v2435_v48, %v628_v60  ;;  %v717_v0 = vpop.f32.mrf.mxu1  ;;  %v2003_v60 = vunpack.c.h.bf16 %v2131_v34  ;;  %v2260_v34 = vmov 128.0  }
  0xda   : > { %2186 = vrcp.f32 %v2260_v34 }
  0xdb   : > { %v2487_v5 = vadd.f32 %v2027_v59, %v755_v62  ;;  %v718_v7 = vadd.f32 %v717_v0, %v629_v63  ;;  %v2035_v59 = vunpack.c.h.bf16 %v2139_v37 }
  0xdd   : > { %920 = vadd.xlane.f32.xlu0 %v2487_v5  ;;  %v2495_v19 = vadd.f32 %v1998_v9, %v718_v7  ;;  %v2140_v7 = vld [vmem:[%s2430_s17 + $0x68] sm:$0xff]  }
  0xde   : > { %v668_v10 = vpop.f32.mrf.mxu2 }
  0xdf   : > { %v669_v11 = vadd.f32 %v2435_v48, %v668_v10  ;;  %v757_v12 = vpop.f32.mrf.mxu3  ;;  %888 = vadd.xlane.f32.xlu2 %v2491_v8  ;;  %v2006_v10 = vunpack.c.l.bf16 %v2132_v1 }
  0xe0   : > { %v630_v14 = vpop.f32.mrf.mxu0 }
  0xe1   : > { %v758_v15 = vadd.f32 %v757_v12, %v669_v11  ;;  %v719_v17 = vpop.f32.mrf.mxu1  ;;  %v631_v20 = vadd.f32 %v2435_v48, %v630_v14  ;;  %v2038_v14 = vunpack.c.l.bf16 %v2140_v7 }
  0xe3   : > { %v2498_v21 = vadd.f32 %v2030_v13, %v758_v15  ;;  %v720_v23 = vadd.f32 %v719_v17, %v631_v20 }
  0xe5   : > { %922 = vadd.xlane.f32.xlu1 %v2498_v21  ;;  %890 = vadd.xlane.f32.xlu0 %v2495_v19  ;;  %v2507_v36 = vadd.f32 %v1999_v27, %v720_v23 }
  0xe6   : > { %v670_v22 = vpop.f32.mrf.mxu2 }
  0xe7   : > { %v671_v24 = vadd.f32 %v2435_v48, %v670_v22  ;;  %v759_v25 = vpop.f32.mrf.mxu3 }
  0xe8   : > { %v633_v28 = vpop.f32.mrf.mxu0 }
  0xe9   : > { %v760_v31 = vadd.f32 %v759_v25, %v671_v24  ;;  %v634_v32 = vadd.f32 %v2435_v48, %v633_v28  ;;  %v722_v33 = vpop.f32.mrf.mxu1 }
  0xeb   : > { %v2505_v35 = vadd.f32 %v2031_v26, %v760_v31  ;;  %v723_v38 = vadd.f32 %v722_v33, %v634_v32  ;;  %v2007_v31 = vunpack.c.h.bf16 %v2132_v1  ;;  %v2039_v32 = vunpack.c.h.bf16 %v2140_v7 }
  0xed   : > { %924 = vadd.xlane.f32.xlu2 %v2505_v35  ;;  %892 = vadd.xlane.f32.xlu1 %v2507_v36  ;;  %v2513_v50 = vadd.f32 %v2002_v39, %v723_v38 }
  0xee   : > { %v673_v40 = vpop.f32.mrf.mxu2 }
  0xef   : > { %v674_v41 = vadd.f32 %v2435_v48, %v673_v40  ;;  %v762_v44 = vpop.f32.mrf.mxu3  ;;  %v2133_v40 = vld [vmem:[%s2430_s17 + $0x30] sm:$0xff]  }
  0xf0   : > { %v635_v46 = vpop.f32.mrf.mxu0 }
  0xf1   : > { %v763_v47 = vadd.f32 %v762_v44, %v674_v41  ;;  %v724_v49 = vpop.f32.mrf.mxu1  ;;  %v636_v51 = vadd.f32 %v2435_v48, %v635_v46 }
  0xf3   : > { %v2516_v52 = vadd.f32 %v2034_v45, %v763_v47  ;;  %v725_v55 = vadd.f32 %v724_v49, %v636_v51  ;;  %v2141_v45 = vld [vmem:[%s2430_s17 + $0x70] sm:$0xff]   ;;  %v2010_v47 = vunpack.c.l.bf16 %v2133_v40  ;;  %v2187_v49 = vpop.eup %2186 }
  0xf4   : > { %vm947_vm0 = vweird.f32 %v2187_v49 }
  0xf5   : > { %894 = vadd.xlane.f32.xlu2 %v2513_v50  ;;  %926 = vadd.xlane.f32.xlu0 %v2516_v52  ;;  %v2525_v6 = vadd.f32 %v2003_v60, %v725_v55 }
  0xf6   : > { %v675_v53 = vpop.f32.mrf.mxu2 }
  0xf7   : > { %v676_v57 = vadd.f32 %v2435_v48, %v675_v53  ;;  %v764_v58 = vpop.f32.mrf.mxu3 }
  0xf8   : > { %v638_v61 = vpop.f32.mrf.mxu0 }
  0xf9   : > { %v765_v62 = vadd.f32 %v764_v58, %v676_v57  ;;  %v639_v63 = vadd.f32 %v2435_v48, %v638_v61  ;;  %v727_v0 = vpop.f32.mrf.mxu1  ;;  %v2042_v57 = vunpack.c.l.bf16 %v2141_v45  ;;  %v943_v61 = vmul.f32 128.0, %v2187_v49 }
  0xfb   : > { %v2523_v2 = vadd.f32 %v2035_v59, %v765_v62  ;;  %v728_v9 = vadd.f32 %v727_v0, %v639_v63  ;;  %v944_v1 = vsub.f32 1.0, %v943_v61 }
  0xfd   : > { %928 = vadd.xlane.f32.xlu1 %v2523_v2  ;;  %896 = vadd.xlane.f32.xlu0 %v2525_v6  ;;  %v2531_v22 = vadd.f32 %v2006_v10, %v728_v9 }
  0xfe   : > { %v678_v11 = vpop.f32.mrf.mxu2 }
  0xff   : > { %v679_v12 = vadd.f32 %v2435_v48, %v678_v11  ;;  %v767_v13 = vpop.f32.mrf.mxu3 }
 0x100   : > { %v640_v15 = vpop.f32.mrf.mxu0 }
 0x101   : > { %v768_v17 = vadd.f32 %v767_v13, %v679_v12  ;;  %v729_v20 = vpop.f32.mrf.mxu1  ;;  %v641_v23 = vadd.f32 %v2435_v48, %v640_v15  ;;  %v2043_v12 = vunpack.c.h.bf16 %v2141_v45  ;;  %v2011_v13 = vunpack.c.h.bf16 %v2133_v40 }
 0x103   : > { %v2534_v24 = vadd.f32 %v2038_v14, %v768_v17  ;;  %v730_v26 = vadd.f32 %v729_v20, %v641_v23  ;;  %v945_v20 = vmul.f32 %v2187_v49, %v944_v1  ;;  %v2134_v23 = vld [vmem:[%s2430_s17 + $0x38] sm:$0xff]  }
 0x105   : > { %930 = vadd.xlane.f32.xlu2 %v2534_v24  ;;  %898 = vadd.xlane.f32.xlu1 %v2531_v22  ;;  %v2541_v41 = vadd.f32 %v2007_v31, %v730_v26 }
 0x106   : > { %v680_v25 = vpop.f32.mrf.mxu2 }
 0x107   : > { %v681_v27 = vadd.f32 %v2435_v48, %v680_v25  ;;  %v769_v28 = vpop.f32.mrf.mxu3 }
 0x108   : > { %v643_v33 = vpop.f32.mrf.mxu0 }
 0x109   : > { %v770_v37 = vadd.f32 %v769_v28, %v681_v27  ;;  %v644_v38 = vadd.f32 %v2435_v48, %v643_v33  ;;  %v732_v39 = vpop.f32.mrf.mxu1  ;;  %v2142_v28 = vld [vmem:[%s2430_s17 + $0x78] sm:$0xff]   ;;  %v2014_v33 = vunpack.c.l.bf16 %v2134_v23 }
 0x10b   : > { %v2543_v44 = vadd.f32 %v2039_v32, %v770_v37  ;;  %v733_v46 = vadd.f32 %v732_v39, %v644_v38  ;;  %v946_v32 = vadd.f32 %v2187_v49, %v945_v20  ;;  %v2046_v39 = vunpack.c.l.bf16 %v2142_v28 }
 0x10d   : > { %900 = vadd.xlane.f32.xlu2 %v2541_v41  ;;  %932 = vadd.xlane.f32.xlu0 %v2543_v44  ;;  %v2549_v60 = vadd.f32 %v2010_v47, %v733_v46  ;;  %v2567_v46 = vsel %vm947_vm0, %v2187_v49, %v946_v32  ;;  %v2047_v49 = vunpack.c.h.bf16 %v2142_v28 }
 0x10e   : > { %v683_v51 = vpop.f32.mrf.mxu2 }
 0x10f   : > { %v684_v53 = vadd.f32 %v2435_v48, %v683_v51  ;;  %v772_v55 = vpop.f32.mrf.mxu3 }
 0x110   : > { %v645_v58 = vpop.f32.mrf.mxu0 }
 0x111   : > { %v773_v59 = vadd.f32 %v772_v55, %v684_v53  ;;  %v734_v62 = vpop.f32.mrf.mxu1  ;;  %v646_v63 = vadd.f32 %v2435_v48, %v645_v58 }
 0x113   : > { %v2552_v0 = vadd.f32 %v2042_v57, %v773_v59  ;;  %v735_v9 = vadd.f32 %v734_v62, %v646_v63  ;;  %v2015_v63 = vunpack.c.h.bf16 %v2134_v23 }
 0x115   : > { %934 = vadd.xlane.f32.xlu1 %v2552_v0  ;;  %902 = vadd.xlane.f32.xlu0 %v2549_v60  ;;  %v2561_v26 = vadd.f32 %v2011_v13, %v735_v9 }
 0x116   : > { %v685_v7 = vpop.f32.mrf.mxu2 }
 0x117   : > { %v686_v10 = vadd.f32 %v2435_v48, %v685_v7  ;;  %v774_v11 = vpop.f32.mrf.mxu3 }
 0x118   : > { %v648_v14 = vpop.f32.mrf.mxu0 }
 0x119   : > { %v775_v15 = vadd.f32 %v774_v11, %v686_v10  ;;  %v649_v17 = vadd.f32 %v2435_v48, %v648_v14  ;;  %v737_v27 = vpop.f32.mrf.mxu1 }
 0x11b   : > { %v2559_v25 = vadd.f32 %v2043_v12, %v775_v15  ;;  %v738_v31 = vadd.f32 %v737_v27, %v649_v17 }
 0x11d   : > { %936 = vadd.xlane.f32.xlu2 %v2559_v25  ;;  %904 = vadd.xlane.f32.xlu1 %v2561_v26  ;;  %v2569_v47 = vadd.f32 %v2014_v33, %v738_v31 }
 0x11e   : > { %v688_v34 = vpop.f32.mrf.mxu2 }
 0x11f   : > { %v689_v37 = vadd.f32 %v2435_v48, %v688_v34  ;;  %v777_v38 = vpop.f32.mrf.mxu3 }
 0x120   : > { %v650_v40 = vpop.f32.mrf.mxu0 }
 0x121   : > { %v778_v45 = vadd.f32 %v777_v38, %v689_v37  ;;  %v651_v53 = vadd.f32 %v2435_v48, %v650_v40  ;;  %v739_v58 = vpop.f32.mrf.mxu1 }
 0x122   : > { %v879_v51 = vpop.xlane.xlu0 %878 }
 0x123   : > { %v2572_v55 = vadd.f32 %v2046_v39, %v778_v45  ;;  %v949_v57 = vmul.f32 %v2567_v46, %v879_v51  ;;  %v740_v61 = vadd.f32 %v739_v58, %v651_v53 }
 0x125   : > { %906 = vadd.xlane.f32.xlu2 %v2569_v47  ;;  %938 = vadd.xlane.f32.xlu0 %v2572_v55  ;;  %v2579_v1 = vsub.f32 %v2440_v56, %v949_v57  ;;  %v2584_v13 = vadd.f32 %v2015_v63, %v740_v61 }
 0x126   : > { %v690_v59 = vpop.f32.mrf.mxu2 }
 0x127   : > { %v691_v62 = vadd.f32 %v2435_v48, %v690_v59  ;;  %v779_v7 = vpop.f32.mrf.mxu3  ;;  %v1013_v14 = vmul.f32 %v2579_v1, %v2579_v1 }
 0x128   : > { %v911_v9 = vpop.xlane.xlu1 %910 }
 0x129   : > { %v780_v10 = vadd.f32 %v779_v7, %v691_v62  ;;  %v965_v11 = vmul.f32 %v2567_v46, %v911_v9 }
 0x12a   : > { %v881_v56 = vpop.xlane.xlu0 %880 }
 0x12b   : > { %v2582_v12 = vadd.f32 %v2047_v49, %v780_v10  ;;  %v2591_v48 = vsub.f32 %v2445_v3, %v965_v11  ;;  %v950_v23 = vmul.f32 %v2567_v46, %v881_v56 }
 0x12d   : > { %940 = vadd.xlane.f32.xlu1 %v2582_v12  ;;  %908 = vadd.xlane.f32.xlu0 %v2584_v13  ;;  %v1029_v28 = vmul.f32 %v2591_v48, %v2591_v48  ;;  %v2604_v32 = vsub.f32 %v2448_v4, %v950_v23 }
 0x12e   : > { %1045 = vadd.xlane.f32.xlu2 %v1013_v14 }
 0x12f   : > { %v1014_v39 = vmul.f32 %v2604_v32, %v2604_v32 }
 0x130   : > { %v913_v15 = vpop.xlane.xlu2 %912 }
 0x131   : > { %v966_v17 = vmul.f32 %v2567_v46, %v913_v15 }
 0x132   : > { %v883_v20 = vpop.xlane.xlu1 %882 }
 0x133   : > { %v2596_v27 = vsub.f32 %v2454_v16, %v966_v17  ;;  %v951_v31 = vmul.f32 %v2567_v46, %v883_v20 }
 0x135   : > { %1077 = vadd.xlane.f32.xlu0 %v1029_v28  ;;  %v1030_v3 = vmul.f32 %v2596_v27, %v2596_v27  ;;  %v2607_v34 = vsub.f32 %v2458_v18, %v951_v31 }
 0x137   : > { %1079 = vadd.xlane.f32.xlu1 %v1030_v3  ;;  %v1015_v4 = vmul.f32 %v2607_v34, %v2607_v34 }
 0x138   : > { %v915_v33 = vpop.xlane.xlu0 %914 }
 0x139   : > { %v967_v16 = vmul.f32 %v2567_v46, %v915_v33 }
 0x13a   : > { %v885_v37 = vpop.xlane.xlu1 %884 }
 0x13b   : > { %v2611_v38 = vsub.f32 %v2463_v29, %v967_v16  ;;  %v952_v40 = vmul.f32 %v2567_v46, %v885_v37 }
 0x13d   : > { %1047 = vadd.xlane.f32.xlu0 %v1014_v39  ;;  %v1031_v45 = vmul.f32 %v2611_v38, %v2611_v38  ;;  %v2621_v18 = vsub.f32 %v2466_v30, %v952_v40 }
 0x13f   : > { %1049 = vadd.xlane.f32.xlu1 %v1015_v4  ;;  %1081 = vadd.xlane.f32.xlu2 %v1031_v45  ;;  %v1016_v58 = vmul.f32 %v2621_v18, %v2621_v18 }
 0x142   : > { %v887_v51 = vpop.xlane.xlu2 %886  ;;  %v917_v29 = vpop.xlane.xlu1 %916 }
 0x143   : > { %v968_v53 = vmul.f32 %v2567_v46, %v917_v29  ;;  %v953_v59 = vmul.f32 %v2567_v46, %v887_v51 }
 0x145   : > { %v2625_v57 = vsub.f32 %v2474_v43, %v968_v53  ;;  %v2633_v30 = vsub.f32 %v2472_v42, %v953_v59 }
 0x147   : > { %1051 = vadd.xlane.f32.xlu2 %v1016_v58  ;;  %v1032_v61 = vmul.f32 %v2625_v57, %v2625_v57  ;;  %v1017_v7 = vmul.f32 %v2633_v30, %v2633_v30 }
 0x149   : > { %1083 = vadd.xlane.f32.xlu0 %v1032_v61 }
 0x14a   : > { %v919_v62 = vpop.xlane.xlu2 %918 }
 0x14b   : > { %v969_v49 = vmul.f32 %v2567_v46, %v919_v62 }
 0x14d   : > { %v2637_v63 = vsub.f32 %v2481_v54, %v969_v49 }
 0x14f   : > { %v1033_v43 = vmul.f32 %v2637_v63, %v2637_v63 }
 0x150   : > { %v921_v9 = vpop.xlane.xlu0 %920 }
 0x151   : > { %v970_v10 = vmul.f32 %v2567_v46, %v921_v9  ;;  %1085 = vadd.xlane.f32.xlu1 %v1033_v43  ;;  %1053 = vadd.xlane.f32.xlu0 %v1017_v7 }
 0x152   : > { %v889_v11 = vpop.xlane.xlu2 %888 }
 0x153   : > { %v2645_v42 = vsub.f32 %v2487_v5, %v970_v10  ;;  %v954_v14 = vmul.f32 %v2567_v46, %v889_v11 }
 0x155   : > { %v2649_v54 = vsub.f32 %v2491_v8, %v954_v14  ;;  %v1034_v56 = vmul.f32 %v2645_v42, %v2645_v42 }
 0x157   : > { %1087 = vadd.xlane.f32.xlu2 %v1034_v56  ;;  %v1018_v15 = vmul.f32 %v2649_v54, %v2649_v54 }
 0x158   : > { %v923_v17 = vpop.xlane.xlu1 %922  ;;  %v891_v20 = vpop.xlane.xlu0 %890 }
 0x159   : > { %v971_v23 = vmul.f32 %v2567_v46, %v923_v17  ;;  %v955_v28 = vmul.f32 %v2567_v46, %v891_v20  ;;  %1055 = vadd.xlane.f32.xlu1 %v1018_v15 }
 0x15b   : > { %v2658_v5 = vsub.f32 %v2498_v21, %v971_v23  ;;  %v2661_v8 = vsub.f32 %v2495_v19, %v955_v28 }
 0x15d   : > { %v1035_v31 = vmul.f32 %v2658_v5, %v2658_v5  ;;  %v1019_v3 = vmul.f32 %v2661_v8, %v2661_v8 }
 0x15f   : > { %1089 = vadd.xlane.f32.xlu0 %v1035_v31  ;;  %1057 = vadd.xlane.f32.xlu2 %v1019_v3 }
 0x160   : > { %v925_v33 = vpop.xlane.xlu2 %924  ;;  %v893_v16 = vpop.xlane.xlu1 %892 }
 0x161   : > { %v972_v37 = vmul.f32 %v2567_v46, %v925_v33  ;;  %v956_v39 = vmul.f32 %v2567_v46, %v893_v16 }
 0x163   : > { %v2670_v21 = vsub.f32 %v2505_v35, %v972_v37  ;;  %v2673_v19 = vsub.f32 %v2507_v36, %v956_v39 }
 0x165   : > { %v1036_v40 = vmul.f32 %v2670_v21, %v2670_v21  ;;  %v1020_v4 = vmul.f32 %v2673_v19, %v2673_v19 }
 0x167   : > { %1091 = vadd.xlane.f32.xlu1 %v1036_v40  ;;  %1059 = vadd.xlane.f32.xlu0 %v1020_v4 }
 0x168   : > { %v895_v45 = vpop.xlane.xlu2 %894  ;;  %v927_v51 = vpop.xlane.xlu0 %926 }
 0x169   : > { %v957_v29 = vmul.f32 %v2567_v46, %v895_v45  ;;  %v973_v53 = vmul.f32 %v2567_v46, %v927_v51 }
 0x16b   : > { %v2682_v35 = vsub.f32 %v2513_v50, %v957_v29  ;;  %v2685_v36 = vsub.f32 %v2516_v52, %v973_v53 }
 0x16d   : > { %v1021_v58 = vmul.f32 %v2682_v35, %v2682_v35  ;;  %v1037_v59 = vmul.f32 %v2685_v36, %v2685_v36 }
 0x16f   : > { %1061 = vadd.xlane.f32.xlu1 %v1021_v58  ;;  %1093 = vadd.xlane.f32.xlu2 %v1037_v59 }
 0x170   : > { %v929_v61 = vpop.xlane.xlu1 %928  ;;  %v897_v62 = vpop.xlane.xlu0 %896 }
 0x171   : > { %v974_v49 = vmul.f32 %v2567_v46, %v929_v61  ;;  %v958_v43 = vmul.f32 %v2567_v46, %v897_v62 }
 0x173   : > { %v2694_v50 = vsub.f32 %v2523_v2, %v974_v49  ;;  %v2697_v52 = vsub.f32 %v2525_v6, %v958_v43 }
 0x175   : > { %v1038_v7 = vmul.f32 %v2694_v50, %v2694_v50  ;;  %v1022_v9 = vmul.f32 %v2697_v52, %v2697_v52 }
 0x177   : > { %1095 = vadd.xlane.f32.xlu0 %v1038_v7  ;;  %1063 = vadd.xlane.f32.xlu2 %v1022_v9 }
 0x178   : > { %v931_v10 = vpop.xlane.xlu2 %930  ;;  %v899_v11 = vpop.xlane.xlu1 %898 }
 0x179   : > { %v975_v14 = vmul.f32 %v2567_v46, %v931_v10  ;;  %v959_v56 = vmul.f32 %v2567_v46, %v899_v11 }
 0x17b   : > { %v2706_v2 = vsub.f32 %v2534_v24, %v975_v14  ;;  %v2709_v6 = vsub.f32 %v2531_v22, %v959_v56 }
 0x17d   : > { %v1039_v15 = vmul.f32 %v2706_v2, %v2706_v2  ;;  %v1023_v17 = vmul.f32 %v2709_v6, %v2709_v6 }
 0x17f   : > { %1097 = vadd.xlane.f32.xlu1 %v1039_v15  ;;  %1065 = vadd.xlane.f32.xlu0 %v1023_v17 }
 0x180   : > { %v901_v20 = vpop.xlane.xlu2 %900  ;;  %v933_v23 = vpop.xlane.xlu0 %932 }
 0x181   : > { %v960_v28 = vmul.f32 %v2567_v46, %v901_v20  ;;  %v976_v31 = vmul.f32 %v2567_v46, %v933_v23 }
 0x183   : > { %v2718_v24 = vsub.f32 %v2541_v41, %v960_v28  ;;  %v2721_v22 = vsub.f32 %v2543_v44, %v976_v31 }
 0x185   : > { %v1024_v3 = vmul.f32 %v2718_v24, %v2718_v24  ;;  %v1040_v33 = vmul.f32 %v2721_v22, %v2721_v22 }
 0x187   : > { %1067 = vadd.xlane.f32.xlu1 %v1024_v3  ;;  %1099 = vadd.xlane.f32.xlu2 %v1040_v33 }
 0x188   : > { %v935_v16 = vpop.xlane.xlu1 %934  ;;  %v903_v37 = vpop.xlane.xlu0 %902 }
 0x189   : > { %v977_v39 = vmul.f32 %v2567_v46, %v935_v16  ;;  %v961_v40 = vmul.f32 %v2567_v46, %v903_v37 }
 0x18b   : > { %v2730_v41 = vsub.f32 %v2552_v0, %v977_v39  ;;  %v2733_v44 = vsub.f32 %v2549_v60, %v961_v40 }
 0x18d   : > { %v1041_v4 = vmul.f32 %v2730_v41, %v2730_v41  ;;  %v1025_v45 = vmul.f32 %v2733_v44, %v2733_v44 }
 0x18f   : > { %1101 = vadd.xlane.f32.xlu0 %v1041_v4  ;;  %1069 = vadd.xlane.f32.xlu2 %v1025_v45 }
 0x190   : > { %v937_v51 = vpop.xlane.xlu2 %936  ;;  %v905_v29 = vpop.xlane.xlu1 %904 }
 0x191   : > { %v962_v53 = vmul.f32 %v2567_v46, %v905_v29  ;;  %v978_v49 = vmul.f32 %v2567_v46, %v937_v51 }
 0x193   : > { %v2741_v58 = vsub.f32 %v2561_v26, %v962_v53  ;;  %v2753_v9 = vsub.f32 %v2559_v25, %v978_v49 }
 0x195   : > { %v1026_v0 = vmul.f32 %v2741_v58, %v2741_v58  ;;  %v1042_v20 = vmul.f32 %v2753_v9, %v2753_v9 }
 0x197   : > { %1071 = vadd.xlane.f32.xlu0 %v1026_v0 }
 0x198   : > { %v907_v60 = vpop.xlane.xlu2 %906  ;;  %v939_v59 = vpop.xlane.xlu0 %938 }
 0x199   : > { %v963_v61 = vmul.f32 %v2567_v46, %v907_v60  ;;  %v979_v28 = vmul.f32 %v2567_v46, %v939_v59 }
 0x19b   : > { %v2747_v62 = vsub.f32 %v2569_v47, %v963_v61  ;;  %v2773_v31 = vsub.f32 %v2572_v55, %v979_v28 }
 0x19d   : > { %v1027_v43 = vmul.f32 %v2747_v62, %v2747_v62  ;;  %v1043_v4 = vmul.f32 %v2773_v31, %v2773_v31 }
 0x19f   : > { %1073 = vadd.xlane.f32.xlu1 %v1027_v43 }
 0x1a0   : > { %v941_v7 = vpop.xlane.xlu1 %940  ;;  %v909_v26 = vpop.xlane.xlu0 %908 }
 0x1a1   : > { %v980_v10 = vmul.f32 %v2567_v46, %v941_v7  ;;  %v1046_v11 = vpop.xlane.xlu2 %1045  ;;  %v964_v14 = vmul.f32 %v2567_v46, %v909_v26 }
 0x1a2   : > { %v1109_v56 = vmul.f32 %v1046_v11, %v2567_v46 }
 0x1a3   : > { %v2759_v47 = vsub.f32 %v2582_v12, %v980_v10  ;;  %v2762_v15 = vsub.f32 %v2584_v13, %v964_v14 }
 0x1a4   : > { %v1141_v17 = vadd.f32 1e-12, %v1109_v56 }
 0x1a5   : > { %v1044_v25 = vmul.f32 %v2759_v47, %v2759_v47  ;;  %v1028_v23 = vmul.f32 %v2762_v15, %v2762_v15 }
 0x1a6   : > { %2188 = vrsqrt.f32 %v1141_v17  ;;  %vm1179_vm2 = vweird.f32 %v1141_v17 }
 0x1a7   : > { %1103 = vadd.xlane.f32.xlu1 %v1042_v20  ;;  %1107 = vadd.xlane.f32.xlu0 %v1044_v25 }
 0x1a8   : > { %1075 = vadd.xlane.f32.xlu2 %v1028_v23  ;;  %v1078_v12 = vpop.xlane.xlu0 %1077 }
 0x1a9   : > { %v1125_v13 = vmul.f32 %v1078_v12, %v2567_v46 }
 0x1aa   : > { %v1080_v3 = vpop.xlane.xlu1 %1079 }
 0x1ab   : > { %v1157_v33 = vadd.f32 1e-12, %v1125_v13  ;;  %v1126_v16 = vmul.f32 %v1080_v3, %v2567_v46 }
 0x1ac   : > { %v2189_v37 = vpop.eup %2188 }
 0x1ad   : > { %v1174_v39 = vmul.f32 %v2189_v37, %v1141_v17  ;;  %2190 = vrsqrt.f32 %v1157_v33  ;;  %v1158_v40 = vadd.f32 1e-12, %v1126_v16  ;;  %vm1180_vm1 = vweird.f32 %v2189_v37 }
 0x1ae   : > { %vm2790_vm4 = vmor %vm1179_vm2, %vm1180_vm1  ;;  %vm1339_vm5 = vweird.f32 %v1157_v33 }
 0x1af   : > { %v1175_v45 = vmul.f32 %v2189_v37, %v1174_v39  ;;  %2192 = vrsqrt.f32 %v1158_v40  ;;  %vm1349_vm8 = vweird.f32 %v1158_v40 }
 0x1b0   : > { %1105 = vadd.xlane.f32.xlu2 %v1043_v4  ;;  %v1048_v51 = vpop.xlane.xlu0 %1047 }
 0x1b1   : > { %v1176_v29 = vmul.f32 0.5, %v1175_v45  ;;  %v1110_v53 = vmul.f32 %v1048_v51, %v2567_v46 }
 0x1b2   : > { %v1050_v55 = vpop.xlane.xlu1 %1049  ;;  %v1082_v0 = vpop.xlane.xlu2 %1081 }
 0x1b3   : > { %v2191_v60 = vpop.eup %2190  ;;  %v2779_v59 = vadd.f32 1e-12, %v1110_v53  ;;  %v1111_v61 = vmul.f32 %v1050_v55, %v2567_v46  ;;  %v1127_v49 = vmul.f32 %v1082_v0, %v2567_v46  ;;  %v1177_v43 = vsub.f32 1.5, %v1176_v29 }
 0x1b4   : > { %v1334_v7 = vmul.f32 %v2191_v60, %v1157_v33  ;;  %vm1340_vm3 = vweird.f32 %v2191_v60 }
 0x1b5   : > { %2194 = vrsqrt.f32 %v2779_v59  ;;  %v2784_v26 = vadd.f32 1e-12, %v1111_v61  ;;  %v2193_v10 = vpop.eup %2192  ;;  %v2786_v14 = vadd.f32 1e-12, %v1127_v49  ;;  %v1178_v20 = vmul.f32 %v2189_v37, %v1177_v43  ;;  %vm1341_vm6 = vmor %vm1339_vm5, %vm1340_vm3 }
 0x1b6   : > { %v1335_v11 = vmul.f32 %v2191_v60, %v1334_v7  ;;  %v1344_v56 = vmul.f32 %v2193_v10, %v1158_v40  ;;  %vm1350_vm7 = vweird.f32 %v2193_v10  ;;  %vm1189_vm11 = vweird.f32 %v2779_v59 }
 0x1b7   : > { %2196 = vrsqrt.f32 %v2784_v26  ;;  %v1182_v4 = vsel %vm2790_vm4, %v2189_v37, %v1178_v20  ;;  %vm1351_vm9 = vmor %vm1349_vm8, %vm1350_vm7  ;;  %vm1199_vm15 = vweird.f32 %v2784_v26  ;;  %vm1359_vm1 = vweird.f32 %v2786_v14 }
 0x1b8   : > { %v1336_v25 = vmul.f32 0.5, %v1335_v11  ;;  %2198 = vrsqrt.f32 %v2786_v14  ;;  %v1345_v23 = vmul.f32 %v2193_v10, %v1344_v56  ;;  %v2813_v56 = vld [vmem:[%s3214_s4] ss:$0 sm:$0xff]  ;;  %v1493_v20 = vmul.f32 %v1182_v4, %v2579_v1 }
 0x1ba   : > { %v1337_v28 = vsub.f32 1.5, %v1336_v25  ;;  %v1052_v12 = vpop.xlane.xlu2 %1051  ;;  %v1346_v16 = vmul.f32 0.5, %v1345_v23 }
 0x1bb   : > { %v2195_v13 = vpop.eup %2194  ;;  %v1112_v39 = vmul.f32 %v1052_v12, %v2567_v46 }
 0x1bc   : > { %v1338_v45 = vmul.f32 %v2191_v60, %v1337_v28  ;;  %v1184_v51 = vmul.f32 %v2195_v13, %v2779_v59  ;;  %v1084_v29 = vpop.xlane.xlu0 %1083  ;;  %v1347_v53 = vsub.f32 1.5, %v1346_v16  ;;  %vm1190_vm10 = vweird.f32 %v2195_v13 }
 0x1bd   : > { %v2798_v17 = vpop.eup %2196  ;;  %v2800_v55 = vadd.f32 1e-12, %v1112_v39  ;;  %v1128_v0 = vmul.f32 %v1084_v29, %v2567_v46  ;;  %v1529_v39 = vmul.f32 %v2813_v56, %v1493_v20  ;;  %vm1191_vm12 = vmor %vm1189_vm11, %vm1190_vm10 }
 0x1be   : > { %v2803_v61 = vpop.eup %2198  ;;  %v1342_v49 = vsel %vm1341_vm6, %v2191_v60, %v1338_v45  ;;  %v1185_v43 = vmul.f32 %v2195_v13, %v1184_v51  ;;  %v1194_v37 = vmul.f32 %v2798_v17, %v2784_v26  ;;  %v1348_v7 = vmul.f32 %v2193_v10, %v1347_v53 }
 0x1bf   : > { %v1509_v33 = vmul.f32 %v1342_v49, %v2591_v48  ;;  %v1354_v11 = vmul.f32 %v2803_v61, %v2786_v14  ;;  %2200 = vrsqrt.f32 %v2800_v55  ;;  %v2819_v40 = vadd.f32 1e-12, %v1128_v0 }
 0x1c0   : > { %v1186_v60 = vmul.f32 0.5, %v1185_v43  ;;  %v1195_v25 = vmul.f32 %v2798_v17, %v1194_v37  ;;  %v1352_v23 = vsel %vm1351_vm9, %v2193_v10, %v1348_v7  ;;  %v2828_v10 = vld [vmem:[%s3215_s5] ss:$0 sm:$0xff]  ;;  %vm1200_vm13 = vweird.f32 %v2798_v17 }
 0x1c1   : > { %v1355_v48 = vmul.f32 %v2803_v61, %v1354_v11  ;;  %v1545_v28 = vmul.f32 %v2813_v56, %v1509_v33  ;;  %v1510_v12 = vmul.f32 %v1352_v23, %v2596_v27  ;;  %2202 = vrsqrt.f32 %v2819_v40  ;;  %vm2858_vm0 = vmor %vm1199_vm15, %vm1200_vm13 }
 0x1c2   : > { %v1187_v3 = vsub.f32 1.5, %v1186_v60  ;;  %v1196_v16 = vmul.f32 0.5, %v1195_v25  ;;  %vm1360_vm14 = vweird.f32 %v2803_v61  ;;  %vm1209_vm4 = vweird.f32 %v2800_v55 }
 0x1c3   : > { %v1356_v1 = vmul.f32 0.5, %v1355_v48  ;;  %v1546_v4 = vmul.f32 %v2813_v56, %v1510_v12  ;;  %v1581_v43 = vadd.f32 %v2828_v10, %v1545_v28  ;;  %vm2867_vm2 = vmor %vm1359_vm1, %vm1360_vm14  ;;  %vm1369_vm6 = vweird.f32 %v2819_v40 }
 0x1c4   : > { %v1188_v45 = vmul.f32 %v2195_v13, %v1187_v3  ;;  %v1197_v51 = vsub.f32 1.5, %v1196_v16  ;;  %v1086_v27 = vpop.xlane.xlu1 %1085  ;;  %v1054_v29 = vpop.xlane.xlu0 %1053 }
 0x1c5   : > { %v1357_v59 = vsub.f32 1.5, %v1356_v1  ;;  %v1129_v53 = vmul.f32 %v1086_v27, %v2567_v46  ;;  %v1113_v0 = vmul.f32 %v1054_v29, %v2567_v46  ;;  %v2201_v49 = vpop.eup %2200  ;;  %v1582_v37 = vadd.f32 %v2828_v10, %v1546_v4 }
 0x1c6   : > { %v1192_v33 = vsel %vm1191_vm12, %v2195_v13, %v1188_v45  ;;  %v1198_v7 = vmul.f32 %v2798_v17, %v1197_v51  ;;  %v1204_v60 = vmul.f32 %v2201_v49, %v2800_v55  ;;  %v1565_v4 = vadd.f32 %v2828_v10, %v1529_v39 }
 0x1c7   : > { %v1494_v11 = vmul.f32 %v1192_v33, %v2604_v32  ;;  %v1358_v20 = vmul.f32 %v2803_v61, %v1357_v59  ;;  %v2091_v25 = vpack.c.bf16 %v1582_v37, %v1581_v43  ;;  %v2851_v13 = vadd.f32 1e-12, %v1129_v53  ;;  %v2203_v48 = vpop.eup %2202 }
 0x1c8   : > { %v2853_v23 = vadd.f32 1e-12, %v1113_v0  ;;  %v1205_v12 = vmul.f32 %v2201_v49, %v1204_v60  ;;  %v1202_v26 = vsel %vm2858_vm0, %v2798_v17, %v1198_v7  ;;  %v1364_v16 = vmul.f32 %v2203_v48, %v2819_v40 }
 0x1c9   : > { %v1530_v28 = vmul.f32 %v2813_v56, %v1494_v11  ;;  %2150 = vst [vmem:[%s2844_s27 + $0x40] sm:$0xff] %v2091_v25   ;;  %2204 = vrsqrt.f32 %v2851_v13  ;;  %v1362_v45 = vsel %vm2867_vm2, %v2803_v61, %v1358_v20  ;;  %vm1210_vm3 = vweird.f32 %v2201_v49 }
 0x1ca   : > { %v1088_v1 = vpop.xlane.xlu2 %1087  ;;  %v1206_v51 = vmul.f32 0.5, %v1205_v12  ;;  %v1365_v17 = vmul.f32 %v2203_v48, %v1364_v16  ;;  %2206 = vrsqrt.f32 %v2853_v23  ;;  %v1495_v59 = vmul.f32 %v1202_v26, %v2607_v34  ;;  %vm1211_vm5 = vmor %vm1209_vm4, %vm1210_vm3 }
 0x1cb   : > { %v1566_v14 = vadd.f32 %v2828_v10, %v1530_v28  ;;  %v1130_v0 = vmul.f32 %v1088_v1, %v2567_v46  ;;  %v1511_v39 = vmul.f32 %v1362_v45, %v2611_v38  ;;  %vm1370_vm7 = vweird.f32 %v2203_v48 }
 0x1cc   : > { %v1056_v27 = vpop.xlane.xlu1 %1055  ;;  %v1207_v53 = vsub.f32 1.5, %v1206_v51  ;;  %v1366_v43 = vmul.f32 0.5, %v1365_v17  ;;  %v1531_v38 = vmul.f32 %v2813_v56, %v1495_v59  ;;  %vm1371_vm8 = vmor %vm1369_vm6, %vm1370_vm7  ;;  %vm1379_vm9 = vweird.f32 %v2851_v13 }
 0x1cd   : > { %v2051_v29 = vpack.c.bf16 %v1566_v14, %v1565_v4  ;;  %v1114_v37 = vmul.f32 %v1056_v27, %v2567_v46  ;;  %v2885_v61 = vadd.f32 1e-12, %v1130_v0  ;;  %v1547_v25 = vmul.f32 %v2813_v56, %v1511_v39 }
 0x1ce   : > { %v1208_v33 = vmul.f32 %v2201_v49, %v1207_v53  ;;  %v1367_v11 = vsub.f32 1.5, %v1366_v43  ;;  %v1567_v4 = vadd.f32 %v2828_v10, %v1531_v38  ;;  %vm1219_vm13 = vweird.f32 %v2853_v23 }
 0x1cf   : > { %2052 = vst [vmem:[%s2844_s27] sm:$0xff] %v2051_v29   ;;  %v2887_v7 = vpop.eup %2204  ;;  %v2891_v34 = vadd.f32 1e-12, %v1114_v37  ;;  %2208 = vrsqrt.f32 %v2885_v61  ;;  %v1583_v17 = vadd.f32 %v2828_v10, %v1547_v25  ;;  %vm1389_vm15 = vweird.f32 %v2885_v61 }
 0x1d0   : > { %v1212_v20 = vsel %vm1211_vm5, %v2201_v49, %v1208_v33  ;;  %v1374_v60 = vmul.f32 %v2887_v7, %v2851_v13  ;;  %v2897_v55 = vpop.eup %2206  ;;  %v1368_v32 = vmul.f32 %v2203_v48, %v1367_v11  ;;  %vm1380_vm10 = vweird.f32 %v2887_v7 }
 0x1d1   : > { %v1496_v28 = vmul.f32 %v1212_v20, %v2621_v18  ;;  %2210 = vrsqrt.f32 %v2891_v34  ;;  %v1214_v49 = vmul.f32 %v2897_v55, %v2853_v23  ;;  %vm1220_vm11 = vweird.f32 %v2897_v55  ;;  %vm1381_vm12 = vmor %vm1379_vm9, %vm1380_vm10 }
 0x1d2   : > { %v1058_v40 = vpop.xlane.xlu2 %1057  ;;  %v1090_v12 = vpop.xlane.xlu0 %1089  ;;  %v1375_v26 = vmul.f32 %v2887_v7, %v1374_v60  ;;  %v1372_v16 = vsel %vm1371_vm8, %v2203_v48, %v1368_v32  ;;  %vm2935_vm14 = vmor %vm1219_vm13, %vm1220_vm11  ;;  %vm1229_vm2 = vweird.f32 %v2891_v34 }
 0x1d3   : > { %v1532_v3 = vmul.f32 %v2813_v56, %v1496_v28  ;;  %v1115_v1 = vmul.f32 %v1058_v40, %v2567_v46  ;;  %v1131_v18 = vmul.f32 %v1090_v12, %v2567_v46  ;;  %v1512_v14 = vmul.f32 %v1372_v16, %v2625_v57 }
 0x1d4   : > { %v1376_v45 = vmul.f32 0.5, %v1375_v26  ;;  %v1215_v51 = vmul.f32 %v2897_v55, %v1214_v49 }
 0x1d5   : > { %v1568_v27 = vadd.f32 %v2828_v10, %v1532_v3  ;;  %v2914_v29 = vadd.f32 1e-12, %v1115_v1  ;;  %v2916_v59 = vadd.f32 1e-12, %v1131_v18  ;;  %v2209_v48 = vpop.eup %2208  ;;  %v1548_v53 = vmul.f32 %v2813_v56, %v1512_v14 }
 0x1d6   : > { %v1377_v0 = vsub.f32 1.5, %v1376_v45  ;;  %v1216_v39 = vmul.f32 0.5, %v1215_v51  ;;  %v1384_v37 = vmul.f32 %v2209_v48, %v2885_v61  ;;  %vm1390_vm0 = vweird.f32 %v2209_v48 }
 0x1d7   : > { %v2211_v57 = vpop.eup %2210  ;;  %v2056_v43 = vpack.c.bf16 %v1568_v27, %v1567_v4  ;;  %2212 = vrsqrt.f32 %v2914_v29  ;;  %v1584_v33 = vadd.f32 %v2828_v10, %v1548_v53  ;;  %vm1391_vm3 = vmor %vm1389_vm15, %vm1390_vm0  ;;  %vm1239_vm7 = vweird.f32 %v2914_v29 }
 0x1d8   : > { %v1378_v11 = vmul.f32 %v2887_v7, %v1377_v0  ;;  %v1217_v38 = vsub.f32 1.5, %v1216_v39  ;;  %v1224_v20 = vmul.f32 %v2211_v57, %v2891_v34  ;;  %v1385_v60 = vmul.f32 %v2209_v48, %v1384_v37 }
 0x1d9   : > { %2143 = vst [vmem:[%s2844_s27 + $0x8] sm:$0xff] %v2056_v43   ;;  %2214 = vrsqrt.f32 %v2916_v59  ;;  %v2096_v32 = vpack.c.bf16 %v1584_v33, %v1583_v17  ;;  %vm1230_vm1 = vweird.f32 %v2211_v57  ;;  %vm1399_vm9 = vweird.f32 %v2916_v59 }
 0x1da   : > { %v1092_v25 = vpop.xlane.xlu1 %1091  ;;  %v1060_v28 = vpop.xlane.xlu0 %1059  ;;  %v1382_v40 = vsel %vm1381_vm12, %v2887_v7, %v1378_v11  ;;  %v1218_v12 = vmul.f32 %v2897_v55, %v1217_v38  ;;  %v1225_v26 = vmul.f32 %v2211_v57, %v1224_v20  ;;  %v1386_v13 = vmul.f32 0.5, %v1385_v60  ;;  %vm1231_vm4 = vmor %vm1229_vm2, %vm1230_vm1 }
 0x1db   : > { %v1132_v23 = vmul.f32 %v1092_v25, %v2567_v46  ;;  %2151 = vst [vmem:[%s2844_s27 + $0x48] sm:$0xff] %v2096_v32   ;;  %v1513_v3 = vmul.f32 %v1382_v40, %v2637_v63  ;;  %v1116_v1 = vmul.f32 %v1060_v28, %v2567_v46 }
 0x1dc   : > { %v1222_v16 = vsel %vm2935_vm14, %v2897_v55, %v1218_v12  ;;  %v1226_v7 = vmul.f32 0.5, %v1225_v26  ;;  %v1387_v4 = vsub.f32 1.5, %v1386_v13 }
 0x1dd   : > { %v2946_v18 = vpop.eup %2212  ;;  %v2949_v14 = vadd.f32 1e-12, %v1132_v23  ;;  %v2953_v51 = vadd.f32 1e-12, %v1116_v1  ;;  %v1497_v55 = vmul.f32 %v1222_v16, %v2633_v30  ;;  %v1549_v61 = vmul.f32 %v2813_v56, %v1513_v3 }
 0x1de   : > { %v1227_v45 = vsub.f32 1.5, %v1226_v7  ;;  %v1234_v63 = vmul.f32 %v2946_v18, %v2914_v29  ;;  %v1388_v27 = vmul.f32 %v2209_v48, %v1387_v4  ;;  %vm1240_vm5 = vweird.f32 %v2946_v18 }
 0x1df   : > { %v2955_v17 = vpop.eup %2214  ;;  %2216 = vrsqrt.f32 %v2949_v14  ;;  %v1533_v20 = vmul.f32 %v2813_v56, %v1497_v55  ;;  %v1585_v28 = vadd.f32 %v2828_v10, %v1549_v61  ;;  %vm2989_vm8 = vmor %vm1239_vm7, %vm1240_vm5  ;;  %vm1409_vm12 = vweird.f32 %v2949_v14 }
 0x1e0   : > { %v1228_v53 = vmul.f32 %v2211_v57, %v1227_v45  ;;  %v1235_v0 = vmul.f32 %v2946_v18, %v1234_v63  ;;  %v1394_v39 = vmul.f32 %v2955_v17, %v2916_v59  ;;  %v1392_v43 = vsel %vm1391_vm3, %v2209_v48, %v1388_v27 }
 0x1e1   : > { %2218 = vrsqrt.f32 %v2953_v51  ;;  %v1514_v34 = vmul.f32 %v1392_v43, %v2645_v42  ;;  %vm1400_vm6 = vweird.f32 %v2955_v17  ;;  %v1569_v7 = vadd.f32 %v2828_v10, %v1533_v20 }
 0x1e2   : > { %v1062_v30 = vpop.xlane.xlu1 %1061  ;;  %v1094_v37 = vpop.xlane.xlu2 %1093  ;;  %v1232_v33 = vsel %vm1231_vm4, %v2211_v57, %v1228_v53  ;;  %v1236_v11 = vmul.f32 0.5, %v1235_v0  ;;  %v1395_v38 = vmul.f32 %v2955_v17, %v1394_v39  ;;  %vm3000_vm10 = vmor %vm1399_vm9, %vm1400_vm6  ;;  %vm1249_vm14 = vweird.f32 %v2953_v51 }
 0x1e3   : > { %v1498_v60 = vmul.f32 %v1232_v33, %v2649_v54  ;;  %v1117_v25 = vmul.f32 %v1062_v30, %v2567_v46  ;;  %v1133_v48 = vmul.f32 %v1094_v37, %v2567_v46  ;;  %v1550_v32 = vmul.f32 %v2813_v56, %v1514_v34 }
 0x1e4   : > { %v1237_v40 = vsub.f32 1.5, %v1236_v11  ;;  %v1396_v12 = vmul.f32 0.5, %v1395_v38 }
 0x1e5   : > { %v2217_v26 = vpop.eup %2216  ;;  %v1534_v42 = vmul.f32 %v2813_v56, %v1498_v60  ;;  %v2976_v57 = vadd.f32 1e-12, %v1117_v25  ;;  %v2978_v49 = vadd.f32 1e-12, %v1133_v48  ;;  %v1586_v54 = vadd.f32 %v2828_v10, %v1550_v32 }
 0x1e6   : > { %v1238_v13 = vmul.f32 %v2946_v18, %v1237_v40  ;;  %v1397_v23 = vsub.f32 1.5, %v1396_v12  ;;  %v1404_v3 = vmul.f32 %v2217_v26, %v2949_v14  ;;  %vm1410_vm11 = vweird.f32 %v2217_v26 }
 0x1e7   : > { %v2219_v16 = vpop.eup %2218  ;;  %v1570_v1 = vadd.f32 %v2828_v10, %v1534_v42  ;;  %2220 = vrsqrt.f32 %v2976_v57  ;;  %v2101_v4 = vpack.c.bf16 %v1586_v54, %v1585_v28  ;;  %vm1411_vm13 = vmor %vm1409_vm12, %vm1410_vm11  ;;  %vm1259_vm1 = vweird.f32 %v2976_v57 }
 0x1e8   : > { %v1398_v63 = vmul.f32 %v2955_v17, %v1397_v23  ;;  %v1405_v55 = vmul.f32 %v2217_v26, %v1404_v3  ;;  %v1242_v29 = vsel %vm2989_vm8, %v2946_v18, %v1238_v13  ;;  %v1244_v53 = vmul.f32 %v2219_v16, %v2953_v51 }
 0x1e9   : > { %v2061_v27 = vpack.c.bf16 %v1570_v1, %v1569_v7  ;;  %2152 = vst [vmem:[%s2844_s27 + $0x50] sm:$0xff] %v2101_v4   ;;  %2222 = vrsqrt.f32 %v2978_v49  ;;  %v1499_v37 = vmul.f32 %v1242_v29, %v2661_v8  ;;  %vm1250_vm15 = vweird.f32 %v2219_v16 }
 0x1ea   : > { %v1064_v0 = vpop.xlane.xlu2 %1063  ;;  %v1096_v39 = vpop.xlane.xlu0 %1095  ;;  %v1402_v59 = vsel %vm3000_vm10, %v2955_v17, %v1398_v63  ;;  %v1406_v43 = vmul.f32 0.5, %v1405_v55  ;;  %v1245_v18 = vmul.f32 %v2219_v16, %v1244_v53  ;;  %vm1251_vm0 = vmor %vm1249_vm14, %vm1250_vm15  ;;  %vm1419_vm5 = vweird.f32 %v2978_v49 }
 0x1eb   : > { %2144 = vst [vmem:[%s2844_s27 + $0x10] sm:$0xff] %v2061_v27   ;;  %v1118_v30 = vmul.f32 %v1064_v0, %v2567_v46  ;;  %v1134_v33 = vmul.f32 %v1096_v39, %v2567_v46  ;;  %v1515_v38 = vmul.f32 %v1402_v59, %v2658_v5  ;;  %v1535_v5 = vmul.f32 %v2813_v56, %v1499_v37 }
 0x1ec   : > { %v1407_v34 = vsub.f32 1.5, %v1406_v43  ;;  %v1246_v20 = vmul.f32 0.5, %v1245_v18 }
 0x1ed   : > { %v3014_v11 = vpop.eup %2220  ;;  %v3017_v60 = vadd.f32 1e-12, %v1118_v30  ;;  %v3022_v48 = vadd.f32 1e-12, %v1134_v33  ;;  %v1551_v14 = vmul.f32 %v2813_v56, %v1515_v38  ;;  %v1571_v27 = vadd.f32 %v2828_v10, %v1535_v5 }
 0x1ee   : > { %v1408_v17 = vmul.f32 %v2217_v26, %v1407_v34  ;;  %v1254_v25 = vmul.f32 %v3014_v11, %v2976_v57  ;;  %v1247_v8 = vsub.f32 1.5, %v1246_v20  ;;  %vm1260_vm2 = vweird.f32 %v3014_v11 }
 0x1ef   : > { %2224 = vrsqrt.f32 %v3017_v60  ;;  %v2223_v28 = vpop.eup %2222  ;;  %v1587_v29 = vadd.f32 %v2828_v10, %v1551_v14  ;;  %vm3050_vm3 = vmor %vm1259_vm1, %vm1260_vm2  ;;  %vm1269_vm9 = vweird.f32 %v3017_v60  ;;  %vm1429_vm10 = vweird.f32 %v3022_v48 }
 0x1f0   : > { %v1412_v32 = vsel %vm1411_vm13, %v2217_v26, %v1408_v17  ;;  %v1255_v40 = vmul.f32 %v3014_v11, %v1254_v25  ;;  %2226 = vrsqrt.f32 %v3022_v48  ;;  %v1248_v42 = vmul.f32 %v2219_v16, %v1247_v8 }
 0x1f1   : > { %v1516_v12 = vmul.f32 %v1412_v32, %v2670_v21  ;;  %v1414_v54 = vmul.f32 %v2223_v28, %v2978_v49  ;;  %vm1420_vm4 = vweird.f32 %v2223_v28 }
 0x1f2   : > { %v1098_v13 = vpop.xlane.xlu1 %1097  ;;  %v1066_v51 = vpop.xlane.xlu0 %1065  ;;  %v1256_v23 = vmul.f32 0.5, %v1255_v40  ;;  %v1252_v1 = vsel %vm1251_vm0, %v2219_v16, %v1248_v42  ;;  %vm1421_vm6 = vmor %vm1419_vm5, %vm1420_vm4 }
 0x1f3   : > { %v1135_v3 = vmul.f32 %v1098_v13, %v2567_v46  ;;  %v1119_v7 = vmul.f32 %v1066_v51, %v2567_v46  ;;  %v1552_v26 = vmul.f32 %v2813_v56, %v1516_v12  ;;  %v1415_v4 = vmul.f32 %v2223_v28, %v1414_v54 }
 0x1f4   : > { %v1500_v45 = vmul.f32 %v1252_v1, %v2673_v19  ;;  %v1257_v21 = vsub.f32 1.5, %v1256_v23 }
 0x1f5   : > { %v3038_v63 = vadd.f32 1e-12, %v1135_v3  ;;  %v2225_v55 = vpop.eup %2224  ;;  %v1588_v61 = vadd.f32 %v2828_v10, %v1552_v26  ;;  %v1416_v53 = vmul.f32 0.5, %v1415_v4  ;;  %v3046_v59 = vadd.f32 1e-12, %v1119_v7 }
 0x1f6   : > { %v2227_v16 = vpop.eup %2226  ;;  %v1536_v0 = vmul.f32 %v2813_v56, %v1500_v45  ;;  %v1258_v39 = vmul.f32 %v3014_v11, %v1257_v21  ;;  %v1264_v19 = vmul.f32 %v2225_v55, %v3017_v60  ;;  %vm1270_vm7 = vweird.f32 %v2225_v55 }
 0x1f7   : > { %v2106_v43 = vpack.c.bf16 %v1588_v61, %v1587_v29  ;;  %v1417_v30 = vsub.f32 1.5, %v1416_v53  ;;  %v1424_v37 = vmul.f32 %v2227_v16, %v3022_v48  ;;  %2228 = vrsqrt.f32 %v3038_v63  ;;  %vm1271_vm11 = vmor %vm1269_vm9, %vm1270_vm7 }
 0x1f8   : > { %v1572_v34 = vadd.f32 %v2828_v10, %v1536_v0  ;;  %v1262_v33 = vsel %vm3050_vm3, %v3014_v11, %v1258_v39  ;;  %v1265_v38 = vmul.f32 %v2225_v55, %v1264_v19  ;;  %2230 = vrsqrt.f32 %v3046_v59 }
 0x1f9   : > { %2153 = vst [vmem:[%s2844_s27 + $0x58] sm:$0xff] %v2106_v43   ;;  %v1418_v57 = vmul.f32 %v2223_v28, %v1417_v30  ;;  %v1425_v20 = vmul.f32 %v2227_v16, %v1424_v37  ;;  %v1501_v32 = vmul.f32 %v1262_v33, %v2682_v35  ;;  %vm1430_vm8 = vweird.f32 %v2227_v16 }
 0x1fa   : > { %v1068_v17 = vpop.xlane.xlu1 %1067  ;;  %v1100_v25 = vpop.xlane.xlu2 %1099  ;;  %v2066_v8 = vpack.c.bf16 %v1572_v34, %v1571_v27  ;;  %v1266_v5 = vmul.f32 0.5, %v1265_v38  ;;  %vm1431_vm12 = vmor %vm1429_vm10, %vm1430_vm8  ;;  %vm1439_vm15 = vweird.f32 %v3038_v63  ;;  %vm1279_vm1 = vweird.f32 %v3046_v59 }
 0x1fb   : > { %v1422_v40 = vsel %vm1421_vm6, %v2223_v28, %v1418_v57  ;;  %v1426_v11 = vmul.f32 0.5, %v1425_v20  ;;  %v1120_v14 = vmul.f32 %v1068_v17, %v2567_v46  ;;  %v1136_v49 = vmul.f32 %v1100_v25, %v2567_v46 }
 0x1fc   : > { %2145 = vst [vmem:[%s2844_s27 + $0x18] sm:$0xff] %v2066_v8   ;;  %v1517_v12 = vmul.f32 %v1422_v40, %v2685_v36  ;;  %v1267_v42 = vsub.f32 1.5, %v1266_v5  ;;  %v1537_v28 = vmul.f32 %v2813_v56, %v1501_v32 }
 0x1fd   : > { %v1427_v54 = vsub.f32 1.5, %v1426_v11  ;;  %v3068_v13 = vadd.f32 1e-12, %v1120_v14  ;;  %v3070_v51 = vpop.eup %2228  ;;  %v3074_v35 = vadd.f32 1e-12, %v1136_v49 }
 0x1fe   : > { %v1268_v23 = vmul.f32 %v2225_v55, %v1267_v42  ;;  %v1434_v3 = vmul.f32 %v3070_v51, %v3038_v63  ;;  %v2231_v7 = vpop.eup %2230  ;;  %v1553_v26 = vmul.f32 %v2813_v56, %v1517_v12  ;;  %v1573_v53 = vadd.f32 %v2828_v10, %v1537_v28 }
 0x1ff   : > { %v1428_v36 = vmul.f32 %v2227_v16, %v1427_v54  ;;  %2232 = vrsqrt.f32 %v3068_v13  ;;  %v1274_v45 = vmul.f32 %v2231_v7, %v3046_v59  ;;  %vm1440_vm13 = vweird.f32 %v3070_v51 }
 0x200   : > { %v1272_v1 = vsel %vm1271_vm11, %v2225_v55, %v1268_v23  ;;  %2234 = vrsqrt.f32 %v3074_v35  ;;  %v1435_v4 = vmul.f32 %v3070_v51, %v1434_v3  ;;  %v1589_v18 = vadd.f32 %v2828_v10, %v1553_v26  ;;  %vm3108_vm0 = vmor %vm1439_vm15, %vm1440_vm13 }
 0x201   : > { %v1502_v60 = vmul.f32 %v1272_v1, %v2697_v52  ;;  %v1432_v48 = vsel %vm1431_vm12, %v2227_v16, %v1428_v36  ;;  %v1275_v39 = vmul.f32 %v2231_v7, %v1274_v45  ;;  %vm1280_vm14 = vweird.f32 %v2231_v7 }
 0x202   : > { %v1070_v21 = vpop.xlane.xlu2 %1069  ;;  %v1102_v27 = vpop.xlane.xlu0 %1101  ;;  %v1518_v29 = vmul.f32 %v1432_v48, %v2694_v50  ;;  %v1436_v0 = vmul.f32 0.5, %v1435_v4  ;;  %vm1281_vm2 = vmor %vm1279_vm1, %vm1280_vm14  ;;  %vm1289_vm5 = vweird.f32 %v3068_v13  ;;  %vm1449_vm7 = vweird.f32 %v3074_v35 }
 0x203   : > { %v1121_v61 = vmul.f32 %v1070_v21, %v2567_v46  ;;  %v1538_v55 = vmul.f32 %v2813_v56, %v1502_v60  ;;  %v1137_v16 = vmul.f32 %v1102_v27, %v2567_v46  ;;  %v1276_v37 = vmul.f32 0.5, %v1275_v39 }
 0x204   : > { %v1554_v19 = vmul.f32 %v2813_v56, %v1518_v29  ;;  %v1437_v30 = vsub.f32 1.5, %v1436_v0 }
 0x205   : > { %v3092_v52 = vadd.f32 1e-12, %v1121_v61  ;;  %v2233_v43 = vpop.eup %2232  ;;  %v1574_v50 = vadd.f32 %v2828_v10, %v1538_v55  ;;  %v1277_v17 = vsub.f32 1.5, %v1276_v37  ;;  %v3103_v32 = vadd.f32 1e-12, %v1137_v16 }
 0x206   : > { %v2235_v34 = vpop.eup %2234  ;;  %v1590_v33 = vadd.f32 %v2828_v10, %v1554_v19  ;;  %v1284_v38 = vmul.f32 %v2233_v43, %v3068_v13  ;;  %v1438_v20 = vmul.f32 %v3070_v51, %v1437_v30  ;;  %vm1290_vm3 = vweird.f32 %v2233_v43 }
 0x207   : > { %2236 = vrsqrt.f32 %v3092_v52  ;;  %v2071_v57 = vpack.c.bf16 %v1574_v50, %v1573_v53  ;;  %v1444_v25 = vmul.f32 %v2235_v34, %v3074_v35  ;;  %v1278_v11 = vmul.f32 %v2231_v7, %v1277_v17  ;;  %vm1291_vm6 = vmor %vm1289_vm5, %vm1290_vm3 }
 0x208   : > { %v2111_v8 = vpack.c.bf16 %v1590_v33, %v1589_v18  ;;  %v1285_v5 = vmul.f32 %v2233_v43, %v1284_v38  ;;  %v1442_v49 = vsel %vm3108_vm0, %v3070_v51, %v1438_v20  ;;  %2238 = vrsqrt.f32 %v3103_v32 }
 0x209   : > { %2146 = vst [vmem:[%s2844_s27 + $0x20] sm:$0xff] %v2071_v57   ;;  %v1445_v14 = vmul.f32 %v2235_v34, %v1444_v25  ;;  %v1282_v54 = vsel %vm1281_vm2, %v2231_v7, %v1278_v11  ;;  %vm1450_vm4 = vweird.f32 %v2235_v34  ;;  %v1519_v60 = vmul.f32 %v1442_v49, %v2706_v2 }
 0x20a   : > { %v1072_v12 = vpop.xlane.xlu0 %1071  ;;  %2154 = vst [vmem:[%s2844_s27 + $0x60] sm:$0xff] %v2111_v8   ;;  %v1286_v42 = vmul.f32 0.5, %v1285_v5  ;;  %v1503_v36 = vmul.f32 %v1282_v54, %v2709_v6  ;;  %vm1451_vm8 = vmor %vm1449_vm7, %vm1450_vm4  ;;  %vm1299_vm10 = vweird.f32 %v3092_v52  ;;  %vm1459_vm0 = vweird.f32 %v3103_v32 }
 0x20b   : > { %v1122_v63 = vmul.f32 %v1072_v12, %v2567_v46  ;;  %v1446_v23 = vmul.f32 0.5, %v1445_v14  ;;  %v1555_v13 = vmul.f32 %v2813_v56, %v1519_v60 }
 0x20c   : > { %v1287_v3 = vsub.f32 1.5, %v1286_v42  ;;  %v1539_v7 = vmul.f32 %v2813_v56, %v1503_v36 }
 0x20d   : > { %v2237_v28 = vpop.eup %2236  ;;  %v3121_v59 = vadd.f32 1e-12, %v1122_v63  ;;  %v1447_v26 = vsub.f32 1.5, %v1446_v23  ;;  %v1591_v50 = vadd.f32 %v2828_v10, %v1555_v13 }
 0x20e   : > { %v1294_v1 = vmul.f32 %v2237_v28, %v3092_v52  ;;  %v1288_v48 = vmul.f32 %v2233_v43, %v1287_v3  ;;  %v3130_v2 = vpop.eup %2238  ;;  %v1575_v39 = vadd.f32 %v2828_v10, %v1539_v7  ;;  %vm1300_vm9 = vweird.f32 %v2237_v28 }
 0x20f   : > { %2240 = vrsqrt.f32 %v3121_v59  ;;  %v1448_v51 = vmul.f32 %v2235_v34, %v1447_v26  ;;  %vm1301_vm11 = vmor %vm1299_vm10, %vm1300_vm9  ;;  %vm1309_vm13 = vweird.f32 %v3121_v59  ;;  %vm1460_vm15 = vweird.f32 %v3130_v2 }
 0x210   : > { %v1295_v6 = vmul.f32 %v2237_v28, %v1294_v1  ;;  %v1292_v4 = vsel %vm1291_vm6, %v2233_v43, %v1288_v48  ;;  %vm1461_vm2 = vmor %vm1459_vm0, %vm1460_vm15 }
 0x211   : > { %v1504_v45 = vmul.f32 %v1292_v4, %v2718_v24  ;;  %v1452_v21 = vsel %vm1451_vm8, %v2235_v34, %v1448_v51 }
 0x212   : > { %v1296_v27 = vmul.f32 0.5, %v1295_v6  ;;  %v1074_v29 = vpop.xlane.xlu1 %1073  ;;  %v1520_v61 = vmul.f32 %v1452_v21, %v2721_v22  ;;  %v1454_v22 = vmul.f32 %v3130_v2, %v3103_v32 }
 0x213   : > { %v1123_v53 = vmul.f32 %v1074_v29, %v2567_v46  ;;  %v1540_v35 = vmul.f32 %v2813_v56, %v1504_v45 }
 0x214   : > { %v1297_v55 = vsub.f32 1.5, %v1296_v27  ;;  %v1556_v24 = vmul.f32 %v2813_v56, %v1520_v61  ;;  %v1455_v57 = vmul.f32 %v3130_v2, %v1454_v22 }
 0x215   : > { %v2241_v0 = vpop.eup %2240  ;;  %v3138_v19 = vadd.f32 1e-12, %v1123_v53  ;;  %v1576_v16 = vadd.f32 %v2828_v10, %v1540_v35 }
 0x216   : > { %v1298_v43 = vmul.f32 %v2237_v28, %v1297_v55  ;;  %v1304_v18 = vmul.f32 %v2241_v0, %v3121_v59  ;;  %v1592_v30 = vadd.f32 %v2828_v10, %v1556_v24  ;;  %vm1310_vm12 = vweird.f32 %v2241_v0 }
 0x217   : > { %2242 = vrsqrt.f32 %v3138_v19  ;;  %v2076_v37 = vpack.c.bf16 %v1576_v16, %v1575_v39  ;;  %v1456_v49 = vmul.f32 0.5, %v1455_v57  ;;  %vm1311_vm14 = vmor %vm1309_vm13, %vm1310_vm12  ;;  %vm1319_vm3 = vweird.f32 %v3138_v19 }
 0x218   : > { %v1305_v34 = vmul.f32 %v2241_v0, %v1304_v18  ;;  %v2116_v33 = vpack.c.bf16 %v1592_v30, %v1591_v50  ;;  %v1302_v38 = vsel %vm1301_vm11, %v2237_v28, %v1298_v43 }
 0x219   : > { %2147 = vst [vmem:[%s2844_s27 + $0x28] sm:$0xff] %v2076_v37   ;;  %v1505_v12 = vmul.f32 %v1302_v38, %v2733_v44  ;;  %v1457_v1 = vsub.f32 1.5, %v1456_v49 }
 0x21a   : > { %v1306_v20 = vmul.f32 0.5, %v1305_v34  ;;  %v1104_v17 = vpop.xlane.xlu1 %1103  ;;  %v1108_v25 = vpop.xlane.xlu0 %1107  ;;  %2155 = vst [vmem:[%s2844_s27 + $0x68] sm:$0xff] %v2116_v33  }
 0x21b   : > { %v1138_v8 = vmul.f32 %v1104_v17, %v2567_v46  ;;  %v1076_v5 = vpop.xlane.xlu2 %1075  ;;  %v1140_v40 = vmul.f32 %v1108_v25, %v2567_v46  ;;  %v1541_v26 = vmul.f32 %v2813_v56, %v1505_v12  ;;  %v1458_v27 = vmul.f32 %v3130_v2, %v1457_v1 }
 0x21c   : > { %v1307_v11 = vsub.f32 1.5, %v1306_v20  ;;  %v1124_v52 = vmul.f32 %v1076_v5, %v2567_v46 }
 0x21d   : > { %v2243_v14 = vpop.eup %2242  ;;  %v1170_v42 = vadd.f32 1e-12, %v1138_v8  ;;  %v3155_v63 = vadd.f32 1e-12, %v1140_v40  ;;  %v1577_v4 = vadd.f32 %v2828_v10, %v1541_v26  ;;  %v1462_v39 = vsel %vm1461_vm2, %v3130_v2, %v1458_v27 }
 0x21e   : > { %v1308_v54 = vmul.f32 %v2241_v0, %v1307_v11  ;;  %v1314_v23 = vmul.f32 %v2243_v14, %v3138_v19  ;;  %v1156_v28 = vadd.f32 1e-12, %v1124_v52  ;;  %vm1320_vm1 = vweird.f32 %v2243_v14 }
 0x21f   : > { %2244 = vrsqrt.f32 %v1170_v42  ;;  %vm1321_vm4 = vmor %vm1319_vm3, %vm1320_vm1  ;;  %v1521_v50 = vmul.f32 %v1462_v39, %v2730_v41  ;;  %vm1469_vm6 = vweird.f32 %v1170_v42  ;;  %vm1489_vm12 = vweird.f32 %v3155_v63 }
 0x220   : > { %v1312_v36 = vsel %vm1311_vm14, %v2241_v0, %v1308_v54  ;;  %v1315_v3 = vmul.f32 %v2243_v14, %v1314_v23  ;;  %2246 = vrsqrt.f32 %v3155_v63  ;;  %vm1329_vm9 = vweird.f32 %v1156_v28 }
 0x221   : > { %v1506_v44 = vmul.f32 %v1312_v36, %v2741_v58  ;;  %2248 = vrsqrt.f32 %v1156_v28  ;;  %v1557_v41 = vmul.f32 %v2813_v56, %v1521_v50 }
 0x222   : > { %v1316_v60 = vmul.f32 0.5, %v1315_v3 }
 0x223   : > { %v1542_v48 = vmul.f32 %v2813_v56, %v1506_v44  ;;  %v1106_v51 = vpop.xlane.xlu2 %1105 }
 0x224   : > { %v1317_v59 = vsub.f32 1.5, %v1316_v60  ;;  %v1139_v6 = vmul.f32 %v1106_v51, %v2567_v46 }
 0x225   : > { %v2245_v7 = vpop.eup %2244  ;;  %v1578_v45 = vadd.f32 %v2828_v10, %v1542_v48 }
 0x226   : > { %v3166_v21 = vpop.eup %2246  ;;  %v1464_v58 = vmul.f32 %v2245_v7, %v1170_v42  ;;  %v3170_v29 = vadd.f32 1e-12, %v1139_v6  ;;  %v1318_v53 = vmul.f32 %v2243_v14, %v1317_v59  ;;  %vm1470_vm5 = vweird.f32 %v2245_v7 }
 0x227   : > { %v2249_v13 = vpop.eup %2248  ;;  %v2081_v61 = vpack.c.bf16 %v1578_v45, %v1577_v4  ;;  %v1484_v46 = vmul.f32 %v3166_v21, %v3155_v63  ;;  %vm1471_vm8 = vmor %vm1469_vm6, %vm1470_vm5  ;;  %vm1490_vm10 = vweird.f32 %v3166_v21 }
 0x228   : > { %v1465_v35 = vmul.f32 %v2245_v7, %v1464_v58  ;;  %v1324_v55 = vmul.f32 %v2249_v13, %v1156_v28  ;;  %2250 = vrsqrt.f32 %v3170_v29  ;;  %v1322_v43 = vsel %vm1321_vm4, %v2243_v14, %v1318_v53  ;;  %vm1491_vm13 = vmor %vm1489_vm12, %vm1490_vm10 }
 0x229   : > { %2148 = vst [vmem:[%s2844_s27 + $0x30] sm:$0xff] %v2081_v61   ;;  %v1485_v0 = vmul.f32 %v3166_v21, %v1484_v46  ;;  %vm1330_vm7 = vweird.f32 %v2249_v13  ;;  %v1507_v2 = vmul.f32 %v1322_v43, %v2747_v62  ;;  %v1593_v14 = vadd.f32 %v2828_v10, %v1557_v41 }
 0x22a   : > { %v1466_v24 = vmul.f32 0.5, %v1465_v35  ;;  %v1325_v32 = vmul.f32 %v2249_v13, %v1324_v55  ;;  %vm1331_vm11 = vmor %vm1329_vm9, %vm1330_vm7  ;;  %vm1479_vm15 = vweird.f32 %v3170_v29 }
 0x22b   : > { %v1486_v16 = vmul.f32 0.5, %v1485_v0  ;;  %v1543_v62 = vmul.f32 %v2813_v56, %v1507_v2 }
 0x22c   : > { %v1467_v22 = vsub.f32 1.5, %v1466_v24  ;;  %v1326_v18 = vmul.f32 0.5, %v1325_v32 }
 0x22d   : > { %v1487_v30 = vsub.f32 1.5, %v1486_v16  ;;  %v1579_v63 = vadd.f32 %v2828_v10, %v1543_v62 }
 0x22e   : > { %v1468_v37 = vmul.f32 %v2245_v7, %v1467_v22  ;;  %v1327_v34 = vsub.f32 1.5, %v1326_v18  ;;  %v2251_v33 = vpop.eup %2250 }
 0x22f   : > { %v1488_v57 = vmul.f32 %v3166_v21, %v1487_v30  ;;  %v1474_v20 = vmul.f32 %v2251_v33, %v3170_v29  ;;  %vm1480_vm14 = vweird.f32 %v2251_v33 }
 0x230   : > { %v1472_v19 = vsel %vm1471_vm8, %v2245_v7, %v1468_v37  ;;  %v1328_v38 = vmul.f32 %v2249_v13, %v1327_v34  ;;  %vm1481_vm0 = vmor %vm1479_vm15, %vm1480_vm14 }
 0x231   : > { %v1522_v17 = vmul.f32 %v1472_v19, %v2753_v9  ;;  %v1475_v8 = vmul.f32 %v2251_v33, %v1474_v20  ;;  %v1492_v11 = vsel %vm1491_vm13, %v3166_v21, %v1488_v57 }
 0x232   : > { %v1332_v25 = vsel %vm1331_vm11, %v2249_v13, %v1328_v38 }
 0x233   : > { %v1558_v5 = vmul.f32 %v2813_v56, %v1522_v17  ;;  %v1508_v40 = vmul.f32 %v1332_v25, %v2762_v15  ;;  %v1476_v52 = vmul.f32 0.5, %v1475_v8  ;;  %v1524_v15 = vmul.f32 %v1492_v11, %v2759_v47 }
 0x235   : > { %v1594_v9 = vadd.f32 %v2828_v10, %v1558_v5  ;;  %v1544_v12 = vmul.f32 %v2813_v56, %v1508_v40  ;;  %v1477_v42 = vsub.f32 1.5, %v1476_v52  ;;  %v1560_v3 = vmul.f32 %v2813_v56, %v1524_v15 }
 0x237   : > { %v2121_v49 = vpack.c.bf16 %v1594_v9, %v1593_v14  ;;  %v1580_v54 = vadd.f32 %v2828_v10, %v1544_v12  ;;  %v1478_v23 = vmul.f32 %v2251_v33, %v1477_v42  ;;  %v1596_v1 = vadd.f32 %v2828_v10, %v1560_v3 }
 0x239   : > { %2156 = vst [vmem:[%s2844_s27 + $0x70] sm:$0xff] %v2121_v49   ;;  %v2086_v28 = vpack.c.bf16 %v1580_v54, %v1579_v63  ;;  %v1482_v36 = vsel %vm1481_vm0, %v2251_v33, %v1478_v23 }
 0x23a   : > { %v1523_v26 = vmul.f32 %v1482_v36, %v2773_v31 }
 0x23b   : > { %2149 = vst [vmem:[%s2844_s27 + $0x38] sm:$0xff] %v2086_v28  }
 0x23c   : > { %v1559_v44 = vmul.f32 %v2813_v56, %v1523_v26 }
 0x23e   : > { %v1595_v60 = vadd.f32 %v2828_v10, %v1559_v44 }
 0x240   : > { %v2126_v48 = vpack.c.bf16 %v1596_v1, %v1595_v60 }
 0x242   : > { %2157 = vst [vmem:[%s2844_s27 + $0x78] sm:$0xff] %v2126_v48  }
 0x243 PF: > { %s16_s21 = sadd.s32 1, %s2258_s21  }
 0x244   : > { %p13_p4 = scmp.ge.s32.totalorder %s16_s21, 4  }
 0x246   :  { %15 = sbr.rel (!%p13_p4) target bundleno = 1 (0x1), region = 77 }

// kernel: forward.17
= control target key start
LH: loop header
LB: loop body
LE: loop exit
PB: predicated region body
PF: predicated region fallthrough
CT: control target
= control target key end

     0   :  { %s3747_s12 = smov 0   ;;  %s6047_s0 = inlined_call_operand.vmem [shape: bf16[512,128], index: 0, kind: input, shape index: {}]   ;;  %s6048_s1 = inlined_call_operand.vmem [shape: bf16[128,256], index: 1, kind: input, shape index: {}]   ;;  %s6049_s2 = inlined_call_operand.vmem [shape: f32[1,256], index: 2, kind: input, shape index: {}]   ;;  %s6050_s3 = inlined_call_operand.vmem [shape: bf16[512,256], index: 3, kind: output, shape index: {}]  }
   0x1 LB: > { %s3266_s13 = sadd.s32 4294967295, %s3725_s12   ;;  %p3270_p0 = scmp.ge.s32.totalorder %s3725_s12, 1  ;;  %s3725_s12 = sphi %s3747_s12, %s13_s12  }
   0x2   : > { %p138_p1 = scmp.lt.s32.totalorder %s3725_s12, 3 }
   0x4   : > { %p139_p2 = pnand %p3270_p0, %p138_p1 }
   0x5   : > { %s3271_s29 = sshll.u32 (!%p139_p2), %s3266_s13, 5 }
   0x6   : > { %142 = sbr.rel (%p139_p2) target bundleno = 835 (0x343), region = 32  ;;  %p164_p3 = scmp.lt.s32.totalorder (!%p139_p2), %s3271_s29, 63 }
   0xb   : > { %v3398_v0 = vld [vmem:[%s6048_s1 + $0x70] sm:$0xf]  ;;  %v3438_v1 = vld [vmem:[%s6048_s1 + $0x74] sm:$0xf0]  ;;  %v3437_v2 = vld [vmem:[%s6048_s1 + $0x74] sm:$0xf] }
   0xc   : > { %v3399_v3 = vor.u32 %v3438_v1, %v3398_v0  ;;  %v3400_v4 = vld [vmem:[%s6048_s1 + $0x78] sm:$0xf0]  ;;  %v3390_v5 = vld [vmem:[%s6048_s1 + $0x60] sm:$0xf]  ;;  %v3436_v6 = vld [vmem:[%s6048_s1 + $0x64] sm:$0xf0] }
   0xd   : > { %v3403_v7 = vor.u32 %v3437_v2, %v3400_v4  ;;  %v3435_v8 = vld [vmem:[%s6048_s1 + $0x64] sm:$0xf]  ;;  %v3392_v9 = vld [vmem:[%s6048_s1 + $0x68] sm:$0xf0]  ;;  %v3391_v10 = vor.u32 %v3436_v6, %v3390_v5  ;;  %v3382_v12 = vld [vmem:[%s6048_s1 + $0x50] sm:$0xf] }
   0xe   : > { %406 = vmatpush.bf16.msra.mxu0 %v3399_v3  ;;  %3439 = vmatpush.bf16.msra.mxu2 %v3399_v3  ;;  %v3395_v11 = vor.u32 %v3435_v8, %v3392_v9  ;;  %v3434_v13 = vld [vmem:[%s6048_s1 + $0x54] sm:$0xf0]  ;;  %v3433_v14 = vld [vmem:[%s6048_s1 + $0x54] sm:$0xf]  ;;  %v3384_v15 = vld [vmem:[%s6048_s1 + $0x58] sm:$0xf0] }
   0xf   : > { %495 = vmatpush.bf16.msra.mxu1 %v3403_v7  ;;  %3447 = vmatpush.bf16.msra.mxu3 %v3403_v7  ;;  %v3383_v16 = vor.u32 %v3434_v13, %v3382_v12  ;;  %v3387_v17 = vor.u32 %v3433_v14, %v3384_v15  ;;  %v3374_v18 = vld [vmem:[%s6048_s1 + $0x40] sm:$0xf]  ;;  %v3432_v19 = vld [vmem:[%s6048_s1 + $0x44] sm:$0xf0]  ;;  %v3431_v20 = vld [vmem:[%s6048_s1 + $0x44] sm:$0xf] }
  0x10   : > { %v3376_v21 = vld [vmem:[%s6048_s1 + $0x48] sm:$0xf0]  ;;  %v3375_v22 = vor.u32 %v3432_v19, %v3374_v18  ;;  %v3366_v24 = vld [vmem:[%s6048_s1 + $0x30] sm:$0xf]  ;;  %v3430_v25 = vld [vmem:[%s6048_s1 + $0x34] sm:$0xf0] }
  0x11   : > { %v3379_v23 = vor.u32 %v3431_v20, %v3376_v21  ;;  %v3429_v26 = vld [vmem:[%s6048_s1 + $0x34] sm:$0xf]  ;;  %v3368_v27 = vld [vmem:[%s6048_s1 + $0x38] sm:$0xf0]  ;;  %v3367_v28 = vor.u32 %v3430_v25, %v3366_v24  ;;  %v3358_v30 = vld [vmem:[%s6048_s1 + $0x20] sm:$0xf] }
  0x12   : > { %407 = vmatpush.bf16.msra.mxu0 %v3391_v10  ;;  %3440 = vmatpush.bf16.msra.mxu2 %v3391_v10  ;;  %v3371_v29 = vor.u32 %v3429_v26, %v3368_v27  ;;  %v3428_v31 = vld [vmem:[%s6048_s1 + $0x24] sm:$0xf0]  ;;  %v3427_v32 = vld [vmem:[%s6048_s1 + $0x24] sm:$0xf]  ;;  %v3360_v33 = vld [vmem:[%s6048_s1 + $0x28] sm:$0xf0] }
  0x13   : > { %496 = vmatpush.bf16.msra.mxu1 %v3395_v11  ;;  %3448 = vmatpush.bf16.msra.mxu3 %v3395_v11  ;;  %v3359_v34 = vor.u32 %v3428_v31, %v3358_v30  ;;  %v3363_v35 = vor.u32 %v3427_v32, %v3360_v33  ;;  %v3350_v36 = vld [vmem:[%s6048_s1 + $0x10] sm:$0xf]  ;;  %v3426_v37 = vld [vmem:[%s6048_s1 + $0x14] sm:$0xf0]  ;;  %s6098_s29 = smov (!%p164_p3, %s3271_s29), 63 }
  0x14   : > { %v3425_v38 = vld [vmem:[%s6048_s1 + $0x14] sm:$0xf]  ;;  %v3352_v39 = vld [vmem:[%s6048_s1 + $0x18] sm:$0xf0]  ;;  %v3351_v40 = vor.u32 %v3426_v37, %v3350_v36  ;;  %v3342_v42 = vld [vmem:[%s6048_s1] sm:$0xf] }
  0x15   : > { %v3355_v41 = vor.u32 %v3425_v38, %v3352_v39  ;;  %v3424_v43 = vld [vmem:[%s6048_s1 + $0x4] sm:$0xf0]  ;;  %s3272_s24 = sshll.u32 %s6098_s29, 2  ;;  %v3423_v44 = vld [vmem:[%s6048_s1 + $0x4] sm:$0xf]  ;;  %s3406_s8 = sshll.u32 %s6098_s29, 3 }
  0x16   : > { %408 = vmatpush.bf16.msra.mxu0 %v3383_v16  ;;  %3441 = vmatpush.bf16.msra.mxu2 %v3383_v16  ;;  %v3344_v45 = vld [vmem:[%s6048_s1 + $0x8] sm:$0xf0]  ;;  %v3343_v46 = vor.u32 %v3424_v43, %v3342_v42  ;;  %s3859_s5 = scalar_lea.vmem %s6047_s0, %s3272_s24  ;;  %v224_v0 = vld [vmem:[%s6049_s2] sm:$0x3]  ;;  %s4069_s9 = scalar_lea.vmem %s6050_s3, %s3406_s8 }
  0x17   : > { %497 = vmatpush.bf16.msra.mxu1 %v3387_v17  ;;  %3449 = vmatpush.bf16.msra.mxu3 %v3387_v17  ;;  %v3347_v47 = vor.u32 %v3423_v44, %v3344_v45  ;;  %v3407_v48 = vld [vmem:[%s3859_s5] sm:$0xff]  ;;  %v3408_v50 = vld [vmem:[%s3859_s5 + $0x8] sm:$0xff]  ;;  %v3409_v52 = vld [vmem:[%s3859_s5 + $0x10] sm:$0xff]  ;;  %v3880_v1 = vperm.slane %v224_v0, 0  ;;  %v3882_v2 = vperm.slane %v224_v0, 1 }
  0x18   : > { %v3415_v49 = vld [vmem:[%s3859_s5 + $0x40] sm:$0xff]  ;;  %v3416_v51 = vld [vmem:[%s3859_s5 + $0x48] sm:$0xff]  ;;  %v3417_v53 = vld [vmem:[%s3859_s5 + $0x50] sm:$0xff] }
  0x19   : > { %v3410_v54 = vld [vmem:[%s3859_s5 + $0x18] sm:$0xff]  ;;  %v3411_v56 = vld [vmem:[%s3859_s5 + $0x20] sm:$0xff]  ;;  %v3412_v58 = vld [vmem:[%s3859_s5 + $0x28] sm:$0xff] }
  0x1a   : > { %409 = vmatpush.bf16.msra.mxu0 %v3375_v22  ;;  %3442 = vmatpush.bf16.msra.mxu2 %v3375_v22  ;;  %v3418_v55 = vld [vmem:[%s3859_s5 + $0x58] sm:$0xff]  ;;  %v3419_v57 = vld [vmem:[%s3859_s5 + $0x60] sm:$0xff]  ;;  %v3420_v59 = vld [vmem:[%s3859_s5 + $0x68] sm:$0xff] }
  0x1b   : > { %498 = vmatpush.bf16.msra.mxu1 %v3379_v23  ;;  %3450 = vmatpush.bf16.msra.mxu3 %v3379_v23  ;;  %v3413_v60 = vld [vmem:[%s3859_s5 + $0x30] sm:$0xff]  ;;  %v3414_v62 = vld [vmem:[%s3859_s5 + $0x38] sm:$0xff] }
  0x1c   : > { %v3421_v61 = vld [vmem:[%s3859_s5 + $0x70] sm:$0xff]  ;;  %v3422_v63 = vld [vmem:[%s3859_s5 + $0x78] sm:$0xff] }
  0x1e   : > { %410 = vmatpush.bf16.msra.mxu0 %v3367_v28  ;;  %3443 = vmatpush.bf16.msra.mxu2 %v3367_v28 }
  0x1f   : > { %499 = vmatpush.bf16.msra.mxu1 %v3371_v29  ;;  %3451 = vmatpush.bf16.msra.mxu3 %v3371_v29 }
  0x22   : > { %411 = vmatpush.bf16.msra.mxu0 %v3359_v34  ;;  %3444 = vmatpush.bf16.msra.mxu2 %v3359_v34 }
  0x23   : > { %500 = vmatpush.bf16.msra.mxu1 %v3363_v35  ;;  %3452 = vmatpush.bf16.msra.mxu3 %v3363_v35 }
  0x26   : > { %412 = vmatpush.bf16.msra.mxu0 %v3351_v40  ;;  %3445 = vmatpush.bf16.msra.mxu2 %v3351_v40 }
  0x27   : > { %501 = vmatpush.bf16.msra.mxu1 %v3355_v41  ;;  %3453 = vmatpush.bf16.msra.mxu3 %v3355_v41 }
  0x2a   : > { %413 = vmatpush.bf16.msra.mxu0 %v3343_v46  ;;  %3446 = vmatpush.bf16.msra.mxu2 %v3343_v46 }
  0x2b   : > { %502 = vmatpush.bf16.msra.mxu1 %v3347_v47  ;;  %3454 = vmatpush.bf16.msra.mxu3 %v3347_v47 }
  0x2d   : > { %414 = vmatmul.bf16.vlgmr.msra.gmra.mxu0 %v3407_v48  ;;  %454 = vmatmul.bf16.vlgmr.msra.gmra.mxu2 %v3415_v49 }
  0x2e   : > { %503 = vmatmul.bf16.vlgmr.msra.gmra.mxu1 %v3407_v48  ;;  %543 = vmatmul.bf16.vlgmr.msra.gmra.mxu3 %v3415_v49 }
  0x3d   : > { %419 = vmatmul.bf16.gmra.mxu0 %v3408_v50  ;;  %459 = vmatmul.bf16.gmra.mxu2 %v3416_v51 }
  0x3e   : > { %508 = vmatmul.bf16.gmra.mxu1 %v3408_v50  ;;  %548 = vmatmul.bf16.gmra.mxu3 %v3416_v51 }
  0x4d   : > { %424 = vmatmul.bf16.gmra.mxu0 %v3409_v52  ;;  %464 = vmatmul.bf16.gmra.mxu2 %v3417_v53 }
  0x4e   : > { %513 = vmatmul.bf16.gmra.mxu1 %v3409_v52  ;;  %553 = vmatmul.bf16.gmra.mxu3 %v3417_v53 }
  0x5d   : > { %429 = vmatmul.bf16.gmra.mxu0 %v3410_v54  ;;  %469 = vmatmul.bf16.gmra.mxu2 %v3418_v55 }
  0x5e   : > { %518 = vmatmul.bf16.gmra.mxu1 %v3410_v54  ;;  %558 = vmatmul.bf16.gmra.mxu3 %v3418_v55 }
  0x6d   : > { %434 = vmatmul.bf16.gmra.mxu0 %v3411_v56  ;;  %474 = vmatmul.bf16.gmra.mxu2 %v3419_v57 }
  0x6e   : > { %523 = vmatmul.bf16.gmra.mxu1 %v3411_v56  ;;  %563 = vmatmul.bf16.gmra.mxu3 %v3419_v57 }
  0x7d   : > { %439 = vmatmul.bf16.gmra.mxu0 %v3412_v58  ;;  %479 = vmatmul.bf16.gmra.mxu2 %v3420_v59 }
  0x7e   : > { %528 = vmatmul.bf16.gmra.mxu1 %v3412_v58  ;;  %568 = vmatmul.bf16.gmra.mxu3 %v3420_v59 }
  0x8d   : > { %444 = vmatmul.bf16.gmra.mxu0 %v3413_v60  ;;  %484 = vmatmul.bf16.gmra.mxu2 %v3421_v61 }
  0x8e   : > { %533 = vmatmul.bf16.gmra.mxu1 %v3413_v60  ;;  %573 = vmatmul.bf16.gmra.mxu3 %v3421_v61 }
  0x9d   : > { %449 = vmatmul.bf16.gmra.mxu0 %v3414_v62  ;;  %489 = vmatmul.bf16.gmra.mxu2 %v3422_v63 }
  0x9e   : > { %538 = vmatmul.bf16.gmra.mxu1 %v3414_v62  ;;  %578 = vmatmul.bf16.gmra.mxu3 %v3422_v63 }
  0xaa   : > { %v415_v3 = vpop.f32.mrf.mxu0 }
  0xab   : > { %v416_v4 = vadd.f32 %v415_v3, %v3880_v1  ;;  %v504_v5 = vpop.f32.mrf.mxu1 }
  0xac   : > { %v505_v6 = vadd.f32 %v504_v5, %v3882_v2 }
  0xad   : > { %v3886_v7 = vmul.f32 0.70710677, %v416_v4  ;;  %v3906_v29 = vmul.f32 0.5, %v416_v4 }
  0xae   : > { %v3888_v8 = vmul.f32 0.70710677, %v505_v6  ;;  %v3908_v30 = vmul.f32 0.5, %v505_v6 }
  0xaf   : > { %v712_v9 = vand.u32 2147483647, %v3886_v7 }
  0xb0   : > { %v713_v10 = vand.u32 2147483647, %v3888_v8  ;;  %v455_v11 = vpop.f32.mrf.mxu2 }
  0xb1   : > { %v776_v12 = vmul.f32 0.3275911, %v712_v9  ;;  %v2440_v13 = vsub.f32 0.0, %v712_v9  ;;  %v3893_v14 = vadd.f32 %v455_v11, %v3880_v1  ;;  %v544_v15 = vpop.f32.mrf.mxu3 }
  0xb2   : > { %v777_v16 = vmul.f32 0.3275911, %v713_v10  ;;  %v3896_v17 = vadd.f32 %v544_v15, %v3882_v2  ;;  %v2441_v23 = vsub.f32 0.0, %v713_v10  ;;  %v417_v41 = vpop.f32.mrf.mxu0 }
  0xb3   : > { %v840_v18 = vadd.f32 1.0, %v776_v12  ;;  %v3899_v20 = vmul.f32 0.70710677, %v3893_v14  ;;  %v2504_v21 = vmul.f32 %v2440_v13, %v712_v9  ;;  %v506_v45 = vpop.f32.mrf.mxu1  ;;  %v3921_v51 = vadd.f32 %v417_v41, %v3880_v1 }
  0xb4   : > { %v841_v19 = vadd.f32 1.0, %v777_v16  ;;  %v3902_v22 = vmul.f32 0.70710677, %v3896_v17  ;;  %v2505_v31 = vmul.f32 %v2441_v23, %v713_v10  ;;  %v3924_v55 = vadd.f32 %v506_v45, %v3882_v2 }
  0xb5   : > { %3463 = vrcp.f32 %v840_v18  ;;  %v913_v24 = vand.u32 2147483647, %v840_v18  ;;  %v744_v25 = vand.u32 2147483647, %v3899_v20  ;;  %v915_v26 = vand.u32 2147483648, %v840_v18 }
  0xb6   : > { %3465 = vrcp.f32 %v841_v19  ;;  %v2568_v27 = vmul.f32 1.442695, %v2504_v21  ;;  %v745_v28 = vand.u32 2147483647, %v3902_v22  ;;  %vm909_vm0 = vweird.f32 %v840_v18 }
  0xb7   : > { %v808_v32 = vmul.f32 0.3275911, %v744_v25  ;;  %vm924_vm1 = vweird.f32 %v841_v19  ;;  %v928_v34 = vand.u32 2147483647, %v841_v19  ;;  %vm3910_vm2 = vcmp.eq.f32.partialorder %v913_v24, 8.507059e+37 }
  0xb8   : > { %v809_v35 = vmul.f32 0.3275911, %v745_v28  ;;  %v2472_v40 = vsub.f32 0.0, %v744_v25  ;;  %v916_v42 = vor.u32 1.1754944e-38, %v915_v26  ;;  %3467 = vpow2.f32 %v2568_v27  ;;  %v457_v52 = vpop.f32.mrf.mxu2 }
  0xb9   : > { %v3914_v39 = vadd.f32 1.0, %v808_v32  ;;  %v930_v47 = vand.u32 2147483648, %v841_v19  ;;  %v2570_v48 = vmul.f32 1.442695, %v2505_v31  ;;  %v2473_v50 = vsub.f32 0.0, %v745_v28 }
  0xba   : > { %v3916_v44 = vadd.f32 1.0, %v809_v35  ;;  %v2536_v54 = vmul.f32 %v2472_v40, %v744_v25  ;;  %vm3926_vm5 = vcmp.eq.f32.partialorder %v928_v34, 8.507059e+37  ;;  %v3932_v61 = vadd.f32 %v457_v52, %v3880_v1 }
  0xbb   : > { %v3464_v33 = vpop.eup %3463  ;;  %3469 = vrcp.f32 %v3914_v39  ;;  %v1393_v58 = vand.u32 2147483647, %v3914_v39  ;;  %v931_v60 = vor.u32 1.1754944e-38, %v930_v47  ;;  %vm1389_vm7 = vweird.f32 %v3914_v39 }
  0xbc   : > { %v3466_v36 = vpop.eup %3465  ;;  %v905_v37 = vmul.f32 %v3464_v33, %v840_v18  ;;  %3471 = vrcp.f32 %v3916_v44  ;;  %vm910_vm3 = vweird.f32 %v3464_v33  ;;  %v2537_v0 = vmul.f32 %v2473_v50, %v745_v28 }
  0xbd   : > { %v920_v43 = vmul.f32 %v3466_v36, %v841_v19  ;;  %vm925_vm4 = vweird.f32 %v3466_v36  ;;  %3473 = vpow2.f32 %v2570_v48  ;;  %vm911_vm6 = vmor %vm909_vm0, %vm910_vm3  ;;  %v3939_v3 = vmul.f32 0.70710677, %v3921_v51 }
  0xbe   : > { %v906_v46 = vsub.f32 1.0, %v905_v37  ;;  %v3934_v62 = vpop.eup %3467  ;;  %vm926_vm8 = vmor %vm924_vm1, %vm925_vm4  ;;  %v1395_v6 = vand.u32 2147483648, %v3914_v39  ;;  %v2632_v9 = vmul.f32 1.442695, %v2536_v54  ;;  %v3945_v10 = vmul.f32 0.70710677, %v3924_v55 }
  0xbf   : > { %v921_v49 = vsub.f32 1.0, %v920_v43  ;;  %vm3952_vm9 = vcmp.eq.f32.partialorder %v1393_v58, 8.507059e+37  ;;  %v1408_v23 = vand.u32 2147483647, %v3916_v44  ;;  %vm1404_vm10 = vweird.f32 %v3916_v44 }
  0xc0   : > { %v907_v53 = vmul.f32 %v3464_v33, %v906_v46  ;;  %v714_v26 = vand.u32 2147483647, %v3939_v3  ;;  %v1410_v32 = vand.u32 2147483648, %v3916_v44  ;;  %v1396_v43 = vor.u32 1.1754944e-38, %v1395_v6 }
  0xc1   : > { %v922_v56 = vmul.f32 %v3466_v36, %v921_v49  ;;  %v3470_v4 = vpop.eup %3469  ;;  %vm1409_vm14 = vcmp.eq.f32.partialorder %v1408_v23, 8.507059e+37  ;;  %vm2825_vm4 = vcmp.ge.f32.partialorder %v3888_v8, 0.0  ;;  %v546_v8 = vpop.f32.mrf.mxu3 }
  0xc2   : > { %v908_v59 = vadd.f32 %v3464_v33, %v907_v53  ;;  %v3472_v11 = vpop.eup %3471  ;;  %v1385_v15 = vmul.f32 %v3470_v4, %v3914_v39  ;;  %vm1390_vm11 = vweird.f32 %v3470_v4  ;;  %v1411_v52 = vor.u32 1.1754944e-38, %v1410_v32 }
  0xc3   : > { %v923_v63 = vadd.f32 %v3466_v36, %v922_v56  ;;  %v1400_v21 = vmul.f32 %v3472_v11, %v3916_v44  ;;  %v3966_v27 = vpop.eup %3473  ;;  %vm1405_vm12 = vweird.f32 %v3472_v11  ;;  %vm1391_vm13 = vmor %vm1389_vm7, %vm1390_vm11  ;;  %v2634_v56 = vmul.f32 1.442695, %v2537_v0 }
  0xc4   : > { %v912_v5 = vsel %vm911_vm6, %v3464_v33, %v908_v59  ;;  %v1386_v25 = vsub.f32 1.0, %v1385_v15  ;;  %v3970_v33 = vand.u32 2147483647, %v3945_v10  ;;  %vm1406_vm15 = vmor %vm1404_vm10, %vm1405_vm12  ;;  %vm2856_vm10 = vcmp.ge.f32.partialorder %v3899_v20, 0.0 }
  0xc5   : > { %v3949_v12 = vsel %vm3910_vm2, %v916_v42, %v912_v5  ;;  %v927_v13 = vsel %vm926_vm8, %v3466_v36, %v923_v63  ;;  %v1401_v31 = vsub.f32 1.0, %v1400_v21  ;;  %v778_v36 = vmul.f32 0.3275911, %v714_v26 }
  0xc6   : > { %v1864_v18 = vmul.f32 1.0614054, %v3949_v12  ;;  %v3959_v19 = vsel %vm3926_vm5, %v931_v60, %v927_v13  ;;  %v1387_v35 = vmul.f32 %v3470_v4, %v1386_v25  ;;  %v779_v40 = vmul.f32 0.3275911, %v3970_v33 }
  0xc7   : > { %v1865_v24 = vmul.f32 1.0614054, %v3959_v19  ;;  %v1402_v38 = vmul.f32 %v3472_v11, %v1401_v31  ;;  %v3975_v45 = vadd.f32 1.0, %v778_v36  ;;  %v2442_v60 = vsub.f32 0.0, %v714_v26 }
  0xc8   : > { %v1928_v28 = vadd.f32 -1.4531521, %v1864_v18  ;;  %v1388_v42 = vadd.f32 %v3470_v4, %v1387_v35  ;;  %v3979_v48 = vadd.f32 1.0, %v779_v40  ;;  %v2443_v15 = vsub.f32 0.0, %v3970_v33 }
  0xc9   : > { %v1929_v34 = vadd.f32 -1.4531521, %v1865_v24  ;;  %v1403_v47 = vadd.f32 %v3472_v11, %v1402_v38  ;;  %3475 = vrcp.f32 %v3975_v45  ;;  %vm939_vm0 = vweird.f32 %v3975_v45 }
  0xca   : > { %v1992_v37 = vmul.f32 %v1928_v28, %v3949_v12  ;;  %v1392_v50 = vsel %vm1391_vm13, %v3470_v4, %v1388_v42  ;;  %v943_v4 = vand.u32 2147483647, %v3975_v45  ;;  %3477 = vrcp.f32 %v3979_v48 }
  0xcb   : > { %v1993_v41 = vmul.f32 %v1929_v34, %v3959_v19  ;;  %v3987_v54 = vsel %vm3952_vm9, %v1396_v43, %v1392_v50  ;;  %v1407_v39 = vsel %vm1406_vm15, %v3472_v11, %v1403_v47  ;;  %3479 = vpow2.f32 %v2632_v9 }
  0xcc   : > { %v2056_v46 = vadd.f32 1.4214138, %v1992_v37  ;;  %v1896_v58 = vmul.f32 1.0614054, %v3987_v54  ;;  %v3991_v59 = vsel %vm1409_vm14, %v1411_v52, %v1407_v39  ;;  %v945_v11 = vand.u32 2147483648, %v3975_v45 }
  0xcd   : > { %v2057_v49 = vadd.f32 1.4214138, %v1993_v41  ;;  %v1897_v63 = vmul.f32 1.0614054, %v3991_v59  ;;  %3481 = vpow2.f32 %v2634_v56  ;;  %v4002_v23 = vmul.f32 %v2442_v60, %v714_v26 }
  0xce   : > { %v2120_v53 = vmul.f32 %v2056_v46, %v3949_v12  ;;  %v1960_v6 = vadd.f32 -1.4531521, %v1896_v58  ;;  %vm4006_vm1 = vcmp.eq.f32.partialorder %v943_v4, 8.507059e+37  ;;  %v958_v31 = vand.u32 2147483647, %v3979_v48 }
  0xcf   : > { %v2121_v57 = vmul.f32 %v2057_v49, %v3959_v19  ;;  %v1961_v13 = vadd.f32 -1.4531521, %v1897_v63  ;;  %v3476_v16 = vpop.eup %3475  ;;  %vm2824_vm2 = vcmp.ge.f32.partialorder %v3886_v7, 0.0  ;;  %v946_v35 = vor.u32 1.1754944e-38, %v945_v11 }
  0xd0   : > { %v2184_v44 = vadd.f32 -0.28449672, %v2120_v53  ;;  %v2024_v21 = vmul.f32 %v1960_v6, %v3987_v54  ;;  %v935_v25 = vmul.f32 %v3476_v16, %v3975_v45  ;;  %vm954_vm3 = vweird.f32 %v3979_v48  ;;  %v3478_v26 = vpop.eup %3477 }
  0xd1   : > { %v2185_v5 = vadd.f32 -0.28449672, %v2121_v57  ;;  %v2025_v9 = vmul.f32 %v1961_v13, %v3991_v59  ;;  %v960_v40 = vand.u32 2147483648, %v3979_v48  ;;  %v3480_v41 = vpop.eup %3479  ;;  %vm940_vm5 = vweird.f32 %v3476_v16 }
  0xd2   : > { %v2248_v0 = vmul.f32 %v2184_v44, %v3949_v12  ;;  %v2088_v34 = vadd.f32 1.4214138, %v2024_v21  ;;  %v936_v38 = vsub.f32 1.0, %v935_v25  ;;  %v950_v46 = vmul.f32 %v3478_v26, %v3979_v48  ;;  %vm941_vm8 = vmor %vm939_vm0, %vm940_vm5 }
  0xd3   : > { %v2249_v18 = vmul.f32 %v2185_v5, %v3959_v19  ;;  %v2089_v37 = vadd.f32 1.4214138, %v2025_v9  ;;  %v3482_v47 = vpop.eup %3481  ;;  %vm4021_vm6 = vcmp.eq.f32.partialorder %v958_v31, 8.507059e+37  ;;  %vm955_vm7 = vweird.f32 %v3478_v26 }
  0xd4   : > { %v2312_v24 = vadd.f32 0.2548296, %v2248_v0  ;;  %v2152_v43 = vmul.f32 %v2088_v34, %v3987_v54  ;;  %v951_v56 = vsub.f32 1.0, %v950_v46  ;;  %v961_v11 = vor.u32 1.1754944e-38, %v960_v40  ;;  %vm956_vm9 = vmor %vm954_vm3, %vm955_vm7 }
  0xd5   : > { %v2313_v32 = vadd.f32 0.2548296, %v2249_v18  ;;  %v2153_v50 = vmul.f32 %v2089_v37, %v3991_v59  ;;  %vm2857_vm11 = vcmp.ge.f32.partialorder %v3902_v22, 0.0  ;;  %vm2826_vm0 = vcmp.ge.f32.partialorder %v3939_v3, 0.0 }
  0xd6   : > { %v2376_v36 = vmul.f32 %v2312_v24, %v3949_v12  ;;  %v937_v12 = vmul.f32 %v3476_v16, %v936_v38  ;;  %v2216_v39 = vadd.f32 -0.28449672, %v2152_v43  ;;  %v952_v63 = vmul.f32 %v3478_v26, %v951_v56 }
  0xd7   : > { %v2377_v42 = vmul.f32 %v2313_v32, %v3959_v19  ;;  %v4027_v19 = vmul.f32 0.70710677, %v3932_v61  ;;  %v2217_v58 = vadd.f32 -0.28449672, %v2153_v50 }
  0xd8   : > { %v2696_v49 = vmul.f32 %v3934_v62, %v2376_v36  ;;  %v938_v60 = vadd.f32 %v3476_v16, %v937_v12  ;;  %v2280_v62 = vmul.f32 %v2216_v39, %v3987_v54  ;;  %v953_v21 = vadd.f32 %v3478_v26, %v952_v63  ;;  %v420_v39 = vpop.f32.mrf.mxu0 }
  0xd9   : > { %v2697_v53 = vmul.f32 %v3966_v27, %v2377_v42  ;;  %v4034_v4 = vand.u32 2147483647, %v4027_v19  ;;  %v2281_v5 = vmul.f32 %v2217_v58, %v3991_v59 }
  0xda   : > { %v2760_v57 = vsub.f32 1.0, %v2696_v49  ;;  %v942_v6 = vsel %vm941_vm8, %v3476_v16, %v938_v60  ;;  %v2344_v13 = vadd.f32 0.2548296, %v2280_v62  ;;  %v957_v32 = vsel %vm956_vm9, %v3478_v26, %v953_v21 }
  0xdb   : > { %v2761_v44 = vsub.f32 1.0, %v2697_v53  ;;  %v4039_v18 = vsel %vm4006_vm1, %v946_v35, %v942_v6  ;;  %v2345_v24 = vadd.f32 0.2548296, %v2281_v5  ;;  %v810_v16 = vmul.f32 0.3275911, %v4034_v4 }
  0xdc   : > { %v2888_v27 = vsub.f32 0.0, %v2760_v57  ;;  %v1866_v9 = vmul.f32 1.0614054, %v4039_v18  ;;  %v2408_v28 = vmul.f32 %v2344_v13, %v3987_v54  ;;  %v4055_v36 = vsel %vm4021_vm6, %v961_v11, %v957_v32 }
  0xdd   : > { %v2889_v0 = vsub.f32 0.0, %v2761_v44  ;;  %v2409_v7 = vmul.f32 %v2345_v24, %v3991_v59  ;;  %v1867_v38 = vmul.f32 1.0614054, %v4055_v36  ;;  %v4059_v40 = vadd.f32 1.0, %v810_v16 }
  0xde   : > { %v2952_v45 = vsel %vm2824_vm2, %v2760_v57, %v2888_v27  ;;  %v1930_v35 = vadd.f32 -1.4531521, %v1866_v9  ;;  %v2728_v37 = vmul.f32 %v3480_v41, %v2408_v28  ;;  %v2507_v59 = vmul.f32 %v2443_v15, %v3970_v33 }
  0xdf   : > { %v3016_v25 = vadd.f32 1.0, %v2952_v45  ;;  %v2953_v31 = vsel %vm2825_vm4, %v2761_v44, %v2889_v0  ;;  %v2729_v26 = vmul.f32 %v3482_v47, %v2409_v7  ;;  %v1931_v41 = vadd.f32 -1.4531521, %v1867_v38 }
  0xe0   : > { %v3017_v34 = vadd.f32 1.0, %v2953_v31  ;;  %v1994_v42 = vmul.f32 %v1930_v35, %v4039_v18  ;;  %3483 = vrcp.f32 %v4059_v40  ;;  %v4073_v47 = vadd.f32 %v546_v8, %v3882_v2 }
  0xe1   : > { %v3080_v48 = vmul.f32 %v3016_v25, %v3906_v29  ;;  %v2792_v29 = vsub.f32 1.0, %v2728_v37  ;;  %v2793_v46 = vsub.f32 1.0, %v2729_v26  ;;  %v616_v49 = vmul.f32 0.5, %v3893_v14 }
  0xe2   : > { %v3081_v54 = vmul.f32 %v3017_v34, %v3908_v30  ;;  %v2058_v30 = vadd.f32 1.4214138, %v1994_v42  ;;  %v2572_v33 = vmul.f32 1.442695, %v4002_v23  ;;  %v1995_v15 = vmul.f32 %v1931_v41, %v4055_v36 }
  0xe3   : > { %v2920_v50 = vsub.f32 0.0, %v2792_v29  ;;  %v2921_v12 = vsub.f32 0.0, %v2793_v46  ;;  %v2574_v53 = vmul.f32 1.442695, %v2507_v59  ;;  %v617_v57 = vmul.f32 0.5, %v3896_v17 }
  0xe4   : > { %v3144_v43 = vpack.c.bf16 %v3081_v54, %v3080_v48  ;;  %v2122_v52 = vmul.f32 %v2058_v30, %v4039_v18  ;;  %v2059_v58 = vadd.f32 1.4214138, %v1995_v15  ;;  %v4084_v23 = vmul.f32 0.70710677, %v4073_v47 }
  0xe5   : > { %v2984_v56 = vsel %vm2856_vm10, %v2792_v29, %v2920_v50  ;;  %v2985_v60 = vsel %vm2857_vm11, %v2793_v46, %v2921_v12  ;;  %3485 = vpow2.f32 %v2572_v33  ;;  %v4088_v27 = vadd.f32 %v420_v39, %v3880_v1 }
  0xe6   : > { %3176 = vst [vmem:[%s4069_s9] sm:$0xff] %v3144_v43  ;;  %v3048_v14 = vadd.f32 1.0, %v2984_v56  ;;  %v2186_v44 = vadd.f32 -0.28449672, %v2122_v52  ;;  %v3484_v62 = vpop.eup %3483  ;;  %v3049_v63 = vadd.f32 1.0, %v2985_v60  ;;  %v2123_v20 = vmul.f32 %v2059_v58, %v4055_v36  ;;  %v509_v43 = vpop.f32.mrf.mxu1 }
  0xe7   : > { %3487 = vpow2.f32 %v2574_v53  ;;  %v1415_v22 = vmul.f32 %v3484_v62, %v4059_v40  ;;  %v1423_v0 = vand.u32 2147483647, %v4059_v40  ;;  %v747_v13 = vand.u32 2147483647, %v4084_v23 }
  0xe8   : > { %v3112_v5 = vmul.f32 %v3048_v14, %v616_v49  ;;  %v2250_v17 = vmul.f32 %v2186_v44, %v4039_v18  ;;  %v3113_v6 = vmul.f32 %v3049_v63, %v617_v57  ;;  %v2187_v11 = vadd.f32 -0.28449672, %v2123_v20 }
  0xe9   : > { %v1416_v45 = vsub.f32 1.0, %v1415_v22  ;;  %v2474_v24 = vsub.f32 0.0, %v4034_v4  ;;  %v4096_v9 = vmul.f32 0.70710677, %v4088_v27  ;;  %v1425_v31 = vand.u32 2147483648, %v4059_v40 }
  0xea   : > { %v2314_v21 = vadd.f32 0.2548296, %v2250_v17  ;;  %v3160_v16 = vpack.c.bf16 %v3113_v6, %v3112_v5  ;;  %v2251_v25 = vmul.f32 %v2187_v11, %v4055_v36  ;;  %v811_v28 = vmul.f32 0.3275911, %v747_v13 }
  0xeb   : > { %v1417_v34 = vmul.f32 %v3484_v62, %v1416_v45  ;;  %vm1420_vm12 = vweird.f32 %v3484_v62  ;;  %v4102_v7 = vand.u32 2147483647, %v4096_v9  ;;  %v3486_v35 = vpop.eup %3485  ;;  %vm1419_vm13 = vweird.f32 %v4059_v40 }
  0xec   : > { %v2378_v32 = vmul.f32 %v2314_v21, %v4039_v18  ;;  %3192 = vst [vmem:[%s4069_s9 + $0x80] sm:$0xff] %v3160_v16  ;;  %v2315_v48 = vadd.f32 0.2548296, %v2251_v25  ;;  %v4106_v37 = vadd.f32 1.0, %v811_v28  ;;  %v2538_v26 = vmul.f32 %v2474_v24, %v4034_v4  ;;  %vm1421_vm14 = vmor %vm1419_vm13, %vm1420_vm12  ;;  %v549_v16 = vpop.f32.mrf.mxu3 }
  0xed   : > { %v3488_v38 = vpop.eup %3487  ;;  %v1418_v54 = vadd.f32 %v3484_v62, %v1417_v34  ;;  %v780_v42 = vmul.f32 0.3275911, %v4102_v7  ;;  %v1426_v59 = vor.u32 1.1754944e-38, %v1425_v31  ;;  %vm1424_vm15 = vcmp.eq.f32.partialorder %v1423_v0, 8.507059e+37 }
  0xee   : > { %v2698_v8 = vmul.f32 %v3486_v35, %v2378_v32  ;;  %v2379_v18 = vmul.f32 %v2315_v48, %v4055_v36  ;;  %3489 = vrcp.f32 %v4106_v37  ;;  %v2636_v50 = vmul.f32 1.442695, %v2538_v26 }
  0xef   : > { %v1422_v41 = vsel %vm1421_vm14, %v3484_v62, %v1418_v54  ;;  %v4114_v30 = vadd.f32 1.0, %v780_v42  ;;  %v2475_v33 = vsub.f32 0.0, %v747_v13  ;;  %v4120_v15 = vadd.f32 %v509_v43, %v3882_v2  ;;  %v460_v62 = vpop.f32.mrf.mxu2 }
  0xf0   : > { %v2762_v29 = vsub.f32 1.0, %v2698_v8  ;;  %v2699_v40 = vmul.f32 %v3488_v38, %v2379_v18  ;;  %v4112_v46 = vsel %vm1424_vm15, %v1426_v59, %v1422_v41  ;;  %v586_v12 = vmul.f32 0.5, %v3921_v51 }
  0xf1   : > { %v1898_v4 = vmul.f32 1.0614054, %v4112_v46  ;;  %3491 = vrcp.f32 %v4114_v30  ;;  %v587_v53 = vmul.f32 0.5, %v3924_v55  ;;  %vm2827_vm1 = vcmp.ge.f32.partialorder %v3945_v10, 0.0 }
  0xf2   : > { %v2890_v49 = vsub.f32 0.0, %v2762_v29  ;;  %v2763_v36 = vsub.f32 1.0, %v2699_v40  ;;  %v1438_v14 = vand.u32 2147483647, %v4106_v37  ;;  %3493 = vpow2.f32 %v2636_v50 }
  0xf3   : > { %v1962_v39 = vadd.f32 -1.4531521, %v1898_v4  ;;  %v2539_v44 = vmul.f32 %v2475_v33, %v747_v13  ;;  %vm1434_vm2 = vweird.f32 %v4106_v37  ;;  %v1440_v51 = vand.u32 2147483648, %v4106_v37 }
  0xf4   : > { %v2954_v52 = vsel %vm2826_vm0, %v2762_v29, %v2890_v49  ;;  %v3490_v56 = vpop.eup %3489  ;;  %v2891_v58 = vsub.f32 0.0, %v2763_v36  ;;  %v4131_v55 = vmul.f32 0.70710677, %v4120_v15  ;;  %vm4133_vm4 = vcmp.eq.f32.partialorder %v1438_v14, 8.507059e+37 }
  0xf5   : > { %v3018_v57 = vadd.f32 1.0, %v2954_v52  ;;  %v2026_v3 = vmul.f32 %v1962_v39, %v4112_v46  ;;  %v1430_v60 = vmul.f32 %v3490_v56, %v4106_v37  ;;  %vm1435_vm3 = vweird.f32 %v3490_v56 }
  0xf6   : > { %v2955_v63 = vsel %vm2827_vm1, %v2763_v36, %v2891_v58  ;;  %v4138_v11 = vand.u32 2147483647, %v4131_v55  ;;  %v4141_v0 = vadd.f32 %v460_v62, %v3880_v1  ;;  %v1441_v25 = vor.u32 1.1754944e-38, %v1440_v51  ;;  %vm1436_vm6 = vmor %vm1434_vm2, %vm1435_vm3 }
  0xf7   : > { %v3082_v20 = vmul.f32 %v3018_v57, %v586_v12  ;;  %v3019_v10 = vadd.f32 1.0, %v2955_v63  ;;  %v2090_v5 = vadd.f32 1.4214138, %v2026_v3  ;;  %v1431_v17 = vsub.f32 1.0, %v1430_v60  ;;  %v3492_v22 = vpop.eup %3491 }
  0xf8   : > { %v965_v24 = vmul.f32 %v3492_v22, %v4114_v30  ;;  %vm969_vm5 = vweird.f32 %v4114_v30  ;;  %v973_v31 = vand.u32 2147483647, %v4114_v30  ;;  %v781_v28 = vmul.f32 0.3275911, %v4138_v11  ;;  %v3494_v32 = vpop.eup %3493 }
  0xf9   : > { %v3083_v13 = vmul.f32 %v3019_v10, %v587_v53  ;;  %v2154_v21 = vmul.f32 %v2090_v5, %v4112_v46  ;;  %v1432_v45 = vmul.f32 %v3490_v56, %v1431_v17  ;;  %v975_v8 = vand.u32 2147483648, %v4114_v30 }
  0xfa   : > { %v966_v38 = vsub.f32 1.0, %v965_v24  ;;  %v4152_v54 = vadd.f32 1.0, %v781_v28  ;;  %v4155_v26 = vmul.f32 0.70710677, %v4141_v0  ;;  %v4158_v42 = vadd.f32 %v549_v16, %v3882_v2 }
  0xfb   : > { %v3145_v34 = vpack.c.bf16 %v3083_v13, %v3082_v20  ;;  %v2218_v35 = vadd.f32 -0.28449672, %v2154_v21  ;;  %v1433_v48 = vadd.f32 %v3490_v56, %v1432_v45  ;;  %vm970_vm7 = vweird.f32 %v3492_v22 }
  0xfc   : > { %v967_v29 = vmul.f32 %v3492_v22, %v966_v38  ;;  %v2444_v41 = vsub.f32 0.0, %v4102_v7  ;;  %3495 = vrcp.f32 %v4152_v54  ;;  %v2638_v49 = vmul.f32 1.442695, %v2539_v44  ;;  %vm971_vm8 = vmor %vm969_vm5, %vm970_vm7 }
  0xfd   : > { %3177 = vst [vmem:[%s4069_s9 + $0x8] sm:$0xff] %v3145_v34  ;;  %v2282_v18 = vmul.f32 %v2218_v35, %v4112_v46  ;;  %v1437_v59 = vsel %vm1436_vm6, %v3490_v56, %v1433_v48  ;;  %v976_v50 = vor.u32 1.1754944e-38, %v975_v8  ;;  %v4172_v33 = vand.u32 2147483647, %v4155_v26 }
  0xfe   : > { %v4164_v37 = vsel %vm4133_vm4, %v1441_v25, %v1437_v59  ;;  %v968_v4 = vadd.f32 %v3492_v22, %v967_v29  ;;  %v4175_v36 = vmul.f32 0.70710677, %v4158_v42  ;;  %vm974_vm9 = vcmp.eq.f32.partialorder %v973_v31, 8.507059e+37  ;;  %v422_v31 = vpop.f32.mrf.mxu0 }
  0xff   : > { %v2346_v43 = vadd.f32 0.2548296, %v2282_v18  ;;  %v1899_v40 = vmul.f32 1.0614054, %v4164_v37  ;;  %v4179_v39 = vmul.f32 0.5, %v3932_v61  ;;  %v2508_v30 = vmul.f32 %v2444_v41, %v4102_v7 }
 0x100   : > { %v972_v53 = vsel %vm971_vm8, %v3492_v22, %v968_v4  ;;  %v812_v57 = vmul.f32 0.3275911, %v4172_v33  ;;  %vm2858_vm10 = vcmp.ge.f32.partialorder %v4027_v19, 0.0  ;;  %v4190_v44 = vmul.f32 0.5, %v4073_v47 }
 0x101   : > { %v2410_v12 = vmul.f32 %v2346_v43, %v4112_v46  ;;  %v1963_v52 = vadd.f32 -1.4531521, %v1899_v40  ;;  %v4181_v56 = vsel %vm974_vm9, %v976_v50, %v972_v53  ;;  %v2445_v46 = vsub.f32 0.0, %v4138_v11 }
 0x102   : > { %v1868_v3 = vmul.f32 1.0614054, %v4181_v56  ;;  %v3496_v60 = vpop.eup %3495  ;;  %3497 = vpow2.f32 %v2638_v49  ;;  %v4192_v61 = vadd.f32 1.0, %v812_v57  ;;  %v4195_v7 = vand.u32 2147483647, %v4175_v36 }
 0x103   : > { %v2730_v58 = vmul.f32 %v3494_v32, %v2410_v12  ;;  %v2027_v14 = vmul.f32 %v1963_v52, %v4164_v37  ;;  %v980_v20 = vmul.f32 %v3496_v60, %v4152_v54  ;;  %v4199_v10 = vmul.f32 0.5, %v4088_v27 }
 0x104   : > { %v1932_v51 = vadd.f32 -1.4531521, %v1868_v3  ;;  %v2576_v5 = vmul.f32 1.442695, %v2508_v30  ;;  %v988_v17 = vand.u32 2147483647, %v4152_v54  ;;  %3499 = vrcp.f32 %v4192_v61 }
 0x105   : > { %v2794_v62 = vsub.f32 1.0, %v2730_v58  ;;  %v2091_v63 = vadd.f32 1.4214138, %v2027_v14  ;;  %v981_v6 = vsub.f32 1.0, %v980_v20  ;;  %v2509_v13 = vmul.f32 %v2445_v46, %v4138_v11 }
 0x106   : > { %v1996_v22 = vmul.f32 %v1932_v51, %v4181_v56  ;;  %vm984_vm11 = vweird.f32 %v4152_v54  ;;  %v990_v45 = vand.u32 2147483648, %v4152_v54  ;;  %v813_v27 = vmul.f32 0.3275911, %v4195_v7 }
 0x107   : > { %v2155_v47 = vmul.f32 %v2091_v63, %v4164_v37  ;;  %v2922_v21 = vsub.f32 0.0, %v2794_v62  ;;  %v982_v25 = vmul.f32 %v3496_v60, %v981_v6  ;;  %vm985_vm12 = vweird.f32 %v3496_v60 }
 0x108   : > { %v2060_v16 = vadd.f32 1.4214138, %v1996_v22  ;;  %v3498_v28 = vpop.eup %3497  ;;  %3501 = vpow2.f32 %v2576_v5  ;;  %vm4209_vm13 = vcmp.eq.f32.partialorder %v988_v17, 8.507059e+37  ;;  %v2476_v11 = vsub.f32 0.0, %v4172_v33  ;;  %vm986_vm14 = vmor %vm984_vm11, %vm985_vm12 }
 0x109   : > { %v2219_v24 = vadd.f32 -0.28449672, %v2155_v47  ;;  %v4214_v34 = vadd.f32 1.0, %v813_v27  ;;  %v983_v38 = vadd.f32 %v3496_v60, %v982_v25  ;;  %v2578_v8 = vmul.f32 1.442695, %v2509_v13 }
 0x10a   : > { %v2124_v48 = vmul.f32 %v2060_v16, %v4181_v56  ;;  %v3500_v18 = vpop.eup %3499  ;;  %v2986_v59 = vsel %vm2858_vm10, %v2794_v62, %v2922_v21  ;;  %v991_v29 = vor.u32 1.1754944e-38, %v990_v45  ;;  %v4224_v41 = vadd.f32 %v422_v31, %v3880_v1 }
 0x10b   : > { %v2283_v35 = vmul.f32 %v2219_v24, %v4164_v37  ;;  %3503 = vrcp.f32 %v4214_v34  ;;  %v987_v49 = vsel %vm986_vm14, %v3496_v60, %v983_v38  ;;  %v1445_v4 = vmul.f32 %v3500_v18, %v4192_v61  ;;  %v511_v38 = vpop.f32.mrf.mxu1 }
 0x10c   : > { %v2188_v40 = vadd.f32 -0.28449672, %v2124_v48  ;;  %vm2859_vm15 = vcmp.ge.f32.partialorder %v4084_v23, 0.0  ;;  %v4230_v19 = vsel %vm4209_vm13, %v991_v29, %v987_v49  ;;  %v1453_v54 = vand.u32 2147483647, %v4192_v61 }
 0x10d   : > { %v2347_v43 = vadd.f32 0.2548296, %v2283_v35  ;;  %v1455_v50 = vand.u32 2147483648, %v4192_v61  ;;  %v2540_v12 = vmul.f32 %v2476_v11, %v4172_v33  ;;  %v1869_v30 = vmul.f32 1.0614054, %v4230_v19 }
 0x10e   : > { %v2252_v53 = vmul.f32 %v2188_v40, %v4181_v56  ;;  %v1446_v57 = vsub.f32 1.0, %v1445_v4  ;;  %v3502_v58 = vpop.eup %3501  ;;  %v3050_v14 = vadd.f32 1.0, %v2986_v59  ;;  %vm1449_vm0 = vweird.f32 %v4192_v61 }
 0x10f   : > { %v2411_v52 = vmul.f32 %v2347_v43, %v4164_v37  ;;  %vm1450_vm1 = vweird.f32 %v3500_v18  ;;  %v4240_v3 = vmul.f32 0.70710677, %v4224_v41  ;;  %v1933_v62 = vadd.f32 -1.4531521, %v1869_v30 }
 0x110   : > { %v2316_v60 = vadd.f32 0.2548296, %v2252_v53  ;;  %v1447_v63 = vmul.f32 %v3500_v18, %v1446_v57  ;;  %vm4242_vm2 = vcmp.eq.f32.partialorder %v1453_v54, 8.507059e+37  ;;  %v1456_v51 = vor.u32 1.1754944e-38, %v1455_v50  ;;  %vm1451_vm3 = vmor %vm1449_vm0, %vm1450_vm1 }
 0x111   : > { %v2731_v46 = vmul.f32 %v3498_v28, %v2411_v52  ;;  %v3504_v33 = vpop.eup %3503  ;;  %v2640_v20 = vmul.f32 1.442695, %v2540_v12  ;;  %v4247_v5 = vand.u32 2147483647, %v4240_v3  ;;  %v1997_v22 = vmul.f32 %v1933_v62, %v4230_v19 }
 0x112   : > { %v2380_v47 = vmul.f32 %v2316_v60, %v4181_v56  ;;  %v1448_v6 = vadd.f32 %v3500_v18, %v1447_v63  ;;  %v3114_v13 = vmul.f32 %v3050_v14, %v4179_v39  ;;  %v1460_v21 = vmul.f32 %v3504_v33, %v4214_v34 }
 0x113   : > { %v2795_v17 = vsub.f32 1.0, %v2731_v46  ;;  %v2477_v45 = vsub.f32 0.0, %v4195_v7  ;;  %v782_v27 = vmul.f32 0.3275911, %v4247_v5  ;;  %v2061_v25 = vadd.f32 1.4214138, %v1997_v22 }
 0x114   : > { %v2700_v16 = vmul.f32 %v3502_v58, %v2380_v47  ;;  %v1452_v31 = vsel %vm1451_vm3, %v3500_v18, %v1448_v6  ;;  %v1461_v28 = vsub.f32 1.0, %v1460_v21  ;;  %v1468_v39 = vand.u32 2147483647, %v4214_v34 }
 0x115   : > { %v2923_v24 = vsub.f32 0.0, %v2795_v17  ;;  %v4260_v56 = vsel %vm4242_vm2, %v1456_v51, %v1452_v31  ;;  %v4263_v32 = vadd.f32 1.0, %v782_v27  ;;  %v2125_v11 = vmul.f32 %v2061_v25, %v4230_v19  ;;  %v462_v51 = vpop.f32.mrf.mxu2 }
 0x116   : > { %v1900_v35 = vmul.f32 1.0614054, %v4260_v56  ;;  %v1470_v48 = vand.u32 2147483648, %v4214_v34  ;;  %vm2828_vm4 = vcmp.ge.f32.partialorder %v4096_v9, 0.0  ;;  %v1462_v59 = vmul.f32 %v3504_v33, %v1461_v28 }
 0x117   : > { %v2987_v61 = vsel %vm2859_vm15, %v2795_v17, %v2923_v24  ;;  %vm1465_vm5 = vweird.f32 %v3504_v33  ;;  %3505 = vrcp.f32 %v4263_v32  ;;  %v2764_v29 = vsub.f32 1.0, %v2700_v16 }
 0x118   : > { %v3051_v18 = vadd.f32 1.0, %v2987_v61  ;;  %v2189_v43 = vadd.f32 -0.28449672, %v2125_v11  ;;  %3507 = vpow2.f32 %v2578_v8  ;;  %v1964_v40 = vadd.f32 -1.4531521, %v1900_v35  ;;  %v551_v11 = vpop.f32.mrf.mxu3 }
 0x119   : > { %v1463_v49 = vadd.f32 %v3504_v33, %v1462_v59  ;;  %vm1464_vm6 = vweird.f32 %v4214_v34  ;;  %v4275_v4 = vadd.f32 %v511_v38, %v3882_v2  ;;  %v1471_v12 = vor.u32 1.1754944e-38, %v1470_v48 }
 0x11a   : > { %v3115_v23 = vmul.f32 %v3051_v18, %v4190_v44  ;;  %v2253_v54 = vmul.f32 %v2189_v43, %v4230_v19  ;;  %v2028_v50 = vmul.f32 %v1964_v40, %v4260_v56  ;;  %vm1466_vm7 = vmor %vm1464_vm6, %vm1465_vm5  ;;  %v2541_v52 = vmul.f32 %v2477_v45, %v4195_v7 }
 0x11b   : > { %v4281_v8 = vmul.f32 0.5, %v4120_v15  ;;  %v1467_v44 = vsel %vm1466_vm7, %v3504_v33, %v1463_v49  ;;  %vm1469_vm8 = vcmp.eq.f32.partialorder %v1468_v39, 8.507059e+37  ;;  %v2892_v30 = vsub.f32 0.0, %v2764_v29 }
 0x11c   : > { %v3161_v53 = vpack.c.bf16 %v3115_v23, %v3114_v13  ;;  %v2317_v34 = vadd.f32 0.2548296, %v2253_v54  ;;  %v2092_v57 = vadd.f32 1.4214138, %v2028_v50  ;;  %v4283_v58 = vsel %vm1469_vm8, %v1471_v12, %v1467_v44 }
 0x11d   : > { %v3506_v14 = vpop.eup %3505  ;;  %vm2829_vm9 = vcmp.ge.f32.partialorder %v4131_v55, 0.0  ;;  %v4288_v46 = vmul.f32 0.5, %v4141_v0  ;;  %3509 = vpow2.f32 %v2640_v20  ;;  %v1901_v7 = vmul.f32 1.0614054, %v4283_v58 }
 0x11e   : > { %3193 = vst [vmem:[%s4069_s9 + $0x88] sm:$0xff] %v3161_v53  ;;  %v4292_v15 = vmul.f32 0.70710677, %v4275_v4  ;;  %v3508_v60 = vpop.eup %3507  ;;  %v2381_v62 = vmul.f32 %v2317_v34, %v4230_v19  ;;  %v2156_v63 = vmul.f32 %v2092_v57, %v4260_v56  ;;  %v2642_v33 = vmul.f32 1.442695, %v2541_v52 }
 0x11f   : > { %v995_v37 = vmul.f32 %v3506_v14, %v4263_v32  ;;  %v1965_v17 = vadd.f32 -1.4531521, %v1901_v7  ;;  %v1005_v47 = vand.u32 2147483648, %v4263_v32  ;;  %v2446_v0 = vsub.f32 0.0, %v4247_v5 }
 0x120   : > { %v4300_v20 = vand.u32 2147483647, %v4292_v15  ;;  %v2956_v22 = vsel %vm2828_vm4, %v2764_v29, %v2892_v30  ;;  %v2701_v6 = vmul.f32 %v3508_v60, %v2381_v62  ;;  %v2220_v13 = vadd.f32 -0.28449672, %v2156_v63 }
 0x121   : > { %v996_v19 = vsub.f32 1.0, %v995_v37  ;;  %v2029_v21 = vmul.f32 %v1965_v17, %v4283_v58  ;;  %v1003_v45 = vand.u32 2147483647, %v4263_v32  ;;  %v4308_v24 = vadd.f32 %v462_v51, %v3880_v1 }
 0x122   : > { %v783_v27 = vmul.f32 0.3275911, %v4300_v20  ;;  %v2765_v16 = vsub.f32 1.0, %v2701_v6  ;;  %v2284_v25 = vmul.f32 %v2220_v13, %v4260_v56  ;;  %vm1000_vm10 = vweird.f32 %v3506_v14 }
 0x123   : > { %v997_v31 = vmul.f32 %v3506_v14, %v996_v19  ;;  %v3510_v28 = vpop.eup %3509  ;;  %v3020_v9 = vadd.f32 1.0, %v2956_v22  ;;  %v2093_v39 = vadd.f32 1.4214138, %v2029_v21  ;;  %vm999_vm11 = vweird.f32 %v4263_v32 }
 0x124   : > { %v4312_v61 = vadd.f32 1.0, %v783_v27  ;;  %v2893_v35 = vsub.f32 0.0, %v2765_v16  ;;  %v2348_v48 = vadd.f32 0.2548296, %v2284_v25  ;;  %v1006_v18 = vor.u32 1.1754944e-38, %v1005_v47  ;;  %vm1001_vm12 = vmor %vm999_vm11, %vm1000_vm10 }
 0x125   : > { %v998_v38 = vadd.f32 %v3506_v14, %v997_v31  ;;  %v2157_v59 = vmul.f32 %v2093_v39, %v4283_v58  ;;  %vm1004_vm13 = vcmp.eq.f32.partialorder %v1003_v45, 8.507059e+37  ;;  %v4317_v29 = vmul.f32 0.70710677, %v4308_v24 }
 0x126   : > { %3511 = vrcp.f32 %v4312_v61  ;;  %v2957_v43 = vsel %vm2829_vm9, %v2765_v16, %v2893_v35  ;;  %v2412_v32 = vmul.f32 %v2348_v48, %v4260_v56  ;;  %v4323_v23 = vadd.f32 %v551_v11, %v3882_v2 }
 0x127   : > { %v1002_v40 = vsel %vm1001_vm12, %v3506_v14, %v998_v38  ;;  %v3084_v49 = vmul.f32 %v3020_v9, %v4199_v10  ;;  %v3021_v54 = vadd.f32 1.0, %v2957_v43  ;;  %v2221_v50 = vadd.f32 -0.28449672, %v2157_v59  ;;  %v425_v43 = vpop.f32.mrf.mxu0 }
 0x128   : > { %v4326_v12 = vsel %vm1004_vm13, %v1006_v18, %v1002_v40  ;;  %v2732_v52 = vmul.f32 %v3510_v28, %v2412_v32  ;;  %v4329_v53 = vmul.f32 0.5, %v4158_v42  ;;  %3513 = vpow2.f32 %v2642_v33  ;;  %v514_v32 = vpop.f32.mrf.mxu1 }
 0x129   : > { %v1870_v55 = vmul.f32 1.0614054, %v4326_v12  ;;  %v3085_v44 = vmul.f32 %v3021_v54, %v4281_v8  ;;  %v2285_v56 = vmul.f32 %v2221_v50, %v4283_v58  ;;  %v2510_v30 = vmul.f32 %v2446_v0, %v4247_v5 }
 0x12a   : > { %v750_v10 = vand.u32 2147483647, %v4317_v29  ;;  %v2796_v34 = vsub.f32 1.0, %v2732_v52  ;;  %vm2860_vm14 = vcmp.ge.f32.partialorder %v4155_v26, 0.0  ;;  %v4338_v14 = vmul.f32 0.70710677, %v4323_v23 }
 0x12b   : > { %v1934_v57 = vadd.f32 -1.4531521, %v1870_v55  ;;  %v3146_v7 = vpack.c.bf16 %v3085_v44, %v3084_v49  ;;  %v2349_v60 = vadd.f32 0.2548296, %v2285_v56  ;;  %v2447_v62 = vsub.f32 0.0, %v4300_v20 }
 0x12c   : > { %v3512_v42 = vpop.eup %3511  ;;  %v814_v8 = vmul.f32 0.3275911, %v750_v10  ;;  %v2924_v63 = vsub.f32 0.0, %v2796_v34  ;;  %vm2861_vm15 = vcmp.ge.f32.partialorder %v4175_v36, 0.0  ;;  %v2580_v51 = vmul.f32 1.442695, %v2510_v30 }
 0x12d   : > { %v1998_v5 = vmul.f32 %v1934_v57, %v4326_v12  ;;  %v1010_v33 = vmul.f32 %v3512_v42, %v4312_v61  ;;  %3178 = vst [vmem:[%s4069_s9 + $0x10] sm:$0xff] %v3146_v7  ;;  %v2413_v37 = vmul.f32 %v2349_v60, %v4283_v58  ;;  %v4349_v47 = vand.u32 2147483647, %v4338_v14 }
 0x12e   : > { %v4346_v17 = vadd.f32 1.0, %v814_v8  ;;  %v3514_v0 = vpop.eup %3513  ;;  %v2988_v22 = vsel %vm2860_vm14, %v2796_v34, %v2924_v63  ;;  %v1020_v19 = vand.u32 2147483648, %v4312_v61  ;;  %v4355_v45 = vmul.f32 0.5, %v4224_v41 }
 0x12f   : > { %v2062_v6 = vadd.f32 1.4214138, %v1998_v5  ;;  %v1011_v13 = vsub.f32 1.0, %v1010_v33  ;;  %v2733_v21 = vmul.f32 %v3514_v0, %v2413_v37  ;;  %v2511_v58 = vmul.f32 %v2447_v62, %v4300_v20 }
 0x130   : > { %3515 = vrcp.f32 %v4346_v17  ;;  %vm1015_vm0 = vweird.f32 %v3512_v42  ;;  %v1018_v25 = vand.u32 2147483647, %v4312_v61  ;;  %v3052_v26 = vadd.f32 1.0, %v2988_v22 }
 0x131   : > { %v2126_v27 = vmul.f32 %v2062_v6, %v4326_v12  ;;  %v1012_v16 = vmul.f32 %v3512_v42, %v1011_v13  ;;  %v2797_v31 = vsub.f32 1.0, %v2733_v21  ;;  %3517 = vpow2.f32 %v2580_v51 }
 0x132   : > { %v815_v28 = vmul.f32 0.3275911, %v4349_v47  ;;  %vm1014_vm1 = vweird.f32 %v4312_v61  ;;  %v1021_v41 = vor.u32 1.1754944e-38, %v1020_v19  ;;  %v2582_v20 = vmul.f32 1.442695, %v2511_v58 }
 0x133   : > { %v2190_v9 = vadd.f32 -0.28449672, %v2126_v27  ;;  %v1013_v39 = vadd.f32 %v3512_v42, %v1012_v16  ;;  %v2925_v11 = vsub.f32 0.0, %v2797_v31  ;;  %vm1016_vm2 = vmor %vm1014_vm1, %vm1015_vm0  ;;  %v2478_v35 = vsub.f32 0.0, %v750_v10 }
 0x134   : > { %v4363_v48 = vadd.f32 1.0, %v815_v28  ;;  %vm1019_vm3 = vcmp.eq.f32.partialorder %v1018_v25, 8.507059e+37  ;;  %v1483_v59 = vand.u32 2147483647, %v4346_v17  ;;  %v3116_v49 = vmul.f32 %v3052_v26, %v4288_v46 }
 0x135   : > { %v2254_v38 = vmul.f32 %v2190_v9, %v4326_v12  ;;  %v1017_v18 = vsel %vm1016_vm2, %v3512_v42, %v1013_v39  ;;  %v2989_v61 = vsel %vm2861_vm15, %v2797_v31, %v2925_v11  ;;  %v2542_v30 = vmul.f32 %v2478_v35, %v750_v10 }
 0x136   : > { %v3516_v40 = vpop.eup %3515  ;;  %v4370_v54 = vsel %vm1019_vm3, %v1021_v41, %v1017_v18  ;;  %3519 = vrcp.f32 %v4363_v48  ;;  %v3053_v50 = vadd.f32 1.0, %v2989_v61  ;;  %v4376_v34 = vadd.f32 %v425_v43, %v3880_v1 }
 0x137   : > { %v2318_v52 = vadd.f32 0.2548296, %v2254_v38  ;;  %v1871_v55 = vmul.f32 1.0614054, %v4370_v54  ;;  %v1475_v44 = vmul.f32 %v3516_v40, %v4346_v17  ;;  %v3518_v56 = vpop.eup %3517  ;;  %3521 = vpow2.f32 %v2582_v20 }
 0x138   : > { %v4379_v46 = vadd.f32 %v514_v32, %v3882_v2  ;;  %v3117_v36 = vmul.f32 %v3053_v50, %v4329_v53  ;;  %vm2830_vm4 = vcmp.ge.f32.partialorder %v4240_v3, 0.0  ;;  %vm1480_vm5 = vweird.f32 %v3516_v40 }
 0x139   : > { %v2382_v57 = vmul.f32 %v2318_v52, %v4326_v12  ;;  %v1935_v42 = vadd.f32 -1.4531521, %v1871_v55  ;;  %v1476_v7 = vsub.f32 1.0, %v1475_v44  ;;  %vm4384_vm6 = vcmp.eq.f32.partialorder %v1483_v59, 8.507059e+37 }
 0x13a   : > { %v1485_v10 = vand.u32 2147483648, %v4346_v17  ;;  %v2479_v62 = vsub.f32 0.0, %v4349_v47  ;;  %v3162_v8 = vpack.c.bf16 %v3117_v36, %v3116_v49  ;;  %vm1479_vm7 = vweird.f32 %v4346_v17 }
 0x13b   : > { %v2702_v63 = vmul.f32 %v3518_v56, %v2382_v57  ;;  %v1999_v53 = vmul.f32 %v1935_v42, %v4370_v54  ;;  %v1477_v5 = vmul.f32 %v3516_v40, %v1476_v7  ;;  %v1498_v33 = vand.u32 2147483647, %v4363_v48  ;;  %vm1481_vm8 = vmor %vm1479_vm7, %vm1480_vm5  ;;  %v465_v42 = vpop.f32.mrf.mxu2 }
 0x13c   : > { %v3520_v12 = vpop.eup %3519  ;;  %v4394_v37 = vmul.f32 0.70710677, %v4376_v34  ;;  %v4397_v51 = vmul.f32 0.70710677, %v4379_v46  ;;  %3194 = vst [vmem:[%s4069_s9 + $0x90] sm:$0xff] %v3162_v8  ;;  %v1486_v21 = vor.u32 1.1754944e-38, %v1485_v10  ;;  %v2543_v9 = vmul.f32 %v2479_v62, %v4349_v47 }
 0x13d   : > { %v2766_v0 = vsub.f32 1.0, %v2702_v63  ;;  %v2063_v22 = vadd.f32 1.4214138, %v1999_v53  ;;  %v1478_v6 = vadd.f32 %v3516_v40, %v1477_v5  ;;  %v1490_v13 = vmul.f32 %v3520_v12, %v4363_v48  ;;  %v3522_v19 = vpop.eup %3521 }
 0x13e   : > { %v1500_v17 = vand.u32 2147483648, %v4363_v48  ;;  %v720_v58 = vand.u32 2147483647, %v4394_v37  ;;  %v4405_v27 = vand.u32 2147483647, %v4397_v51  ;;  %vm1495_vm9 = vweird.f32 %v3520_v12 }
 0x13f   : > { %v2894_v16 = vsub.f32 0.0, %v2766_v0  ;;  %v2127_v25 = vmul.f32 %v2063_v22, %v4370_v54  ;;  %v1482_v26 = vsel %vm1481_vm8, %v3516_v40, %v1478_v6  ;;  %v1491_v31 = vsub.f32 1.0, %v1490_v13 }
 0x140   : > { %v4410_v28 = vsel %vm4384_vm6, %v1486_v21, %v1482_v26  ;;  %v784_v39 = vmul.f32 0.3275911, %v720_v58  ;;  %v785_v41 = vmul.f32 0.3275911, %v4405_v27  ;;  %v2644_v38 = vmul.f32 1.442695, %v2542_v30 }
 0x141   : > { %v2191_v11 = vadd.f32 -0.28449672, %v2127_v25  ;;  %v1902_v20 = vmul.f32 1.0614054, %v4410_v28  ;;  %v1492_v35 = vmul.f32 %v3520_v12, %v1491_v31  ;;  %vm1494_vm10 = vweird.f32 %v4363_v48 }
 0x142   : > { %v4416_v18 = vadd.f32 1.0, %v784_v39  ;;  %v4418_v59 = vadd.f32 1.0, %v785_v41  ;;  %v2958_v43 = vsel %vm2830_vm4, %v2766_v0, %v2894_v16  ;;  %vm1496_vm11 = vmor %vm1494_vm10, %vm1495_vm9  ;;  %vm1499_vm12 = vcmp.eq.f32.partialorder %v1498_v33, 8.507059e+37 }
 0x143   : > { %v2255_v47 = vmul.f32 %v2191_v11, %v4370_v54  ;;  %v1966_v32 = vadd.f32 -1.4531521, %v1902_v20  ;;  %v1493_v40 = vadd.f32 %v3520_v12, %v1492_v35  ;;  %v1501_v49 = vor.u32 1.1754944e-38, %v1500_v17 }
 0x144   : > { %v2646_v61 = vmul.f32 1.442695, %v2543_v9  ;;  %3523 = vrcp.f32 %v4416_v18  ;;  %v2448_v55 = vsub.f32 0.0, %v720_v58  ;;  %v3022_v44 = vadd.f32 1.0, %v2958_v43 }
 0x145   : > { %v2319_v50 = vadd.f32 0.2548296, %v2255_v47  ;;  %v2030_v48 = vmul.f32 %v1966_v32, %v4410_v28  ;;  %v1497_v52 = vsel %vm1496_vm11, %v3520_v12, %v1493_v40  ;;  %v591_v56 = vmul.f32 0.5, %v4275_v4 }
 0x146   : > { %v4426_v3 = vsel %vm1499_vm12, %v1501_v49, %v1497_v52  ;;  %3525 = vrcp.f32 %v4418_v59  ;;  %vm2831_vm13 = vcmp.ge.f32.partialorder %v4292_v15, 0.0  ;;  %v1033_v7 = vand.u32 2147483647, %v4416_v18 }
 0x147   : > { %v2383_v30 = vmul.f32 %v2319_v50, %v4370_v54  ;;  %v2094_v36 = vadd.f32 1.4214138, %v2030_v48  ;;  %3527 = vpow2.f32 %v2644_v38  ;;  %v1903_v57 = vmul.f32 1.0614054, %v4426_v3 }
 0x148   : > { %3529 = vpow2.f32 %v2646_v61  ;;  %v1035_v60 = vand.u32 2147483648, %v4416_v18  ;;  %v2512_v8 = vmul.f32 %v2448_v55, %v720_v58  ;;  %v3086_v54 = vmul.f32 %v3022_v44, %v4355_v45 }
 0x149   : > { %v2703_v10 = vmul.f32 %v3522_v19, %v2383_v30  ;;  %v2158_v4 = vmul.f32 %v2094_v36, %v4410_v28  ;;  %v1967_v62 = vadd.f32 -1.4531521, %v1903_v57  ;;  %vm1029_vm14 = vweird.f32 %v4416_v18 }
 0x14a   : > { %v3524_v63 = vpop.eup %3523  ;;  %v2449_v53 = vsub.f32 0.0, %v4405_v27  ;;  %v4439_v5 = vadd.f32 %v465_v42, %v3880_v1  ;;  %vm4443_vm15 = vcmp.eq.f32.partialorder %v1033_v7, 8.507059e+37  ;;  %v1036_v19 = vor.u32 1.1754944e-38, %v1035_v60 }
 0x14b   : > { %v2767_v12 = vsub.f32 1.0, %v2703_v10  ;;  %v2222_v33 = vadd.f32 -0.28449672, %v2158_v4  ;;  %v2031_v0 = vmul.f32 %v1967_v62, %v4426_v3  ;;  %v1025_v22 = vmul.f32 %v3524_v63, %v4416_v18 }
 0x14c   : > { %v3526_v6 = vpop.eup %3525  ;;  %vm1044_vm0 = vweird.f32 %v4418_v59  ;;  %v4449_v45 = vmul.f32 0.70710677, %v4439_v5  ;;  %vm1030_vm1 = vweird.f32 %v3524_v63  ;;  %v1048_v9 = vand.u32 2147483647, %v4418_v59 }
 0x14d   : > { %v3528_v21 = vpop.eup %3527  ;;  %v2895_v17 = vsub.f32 0.0, %v2767_v12  ;;  %v2286_v58 = vmul.f32 %v2222_v33, %v4410_v28  ;;  %v2095_v16 = vadd.f32 1.4214138, %v2031_v0  ;;  %v1026_v25 = vsub.f32 1.0, %v1025_v22  ;;  %vm1031_vm2 = vmor %vm1029_vm14, %vm1030_vm1  ;;  %v427_v0 = vpop.f32.mrf.mxu0 }
 0x14e   : > { %v3530_v26 = vpop.eup %3529  ;;  %v1040_v31 = vmul.f32 %v3526_v6, %v4418_v59  ;;  %v4455_v39 = vand.u32 2147483647, %v4449_v45  ;;  %v1050_v47 = vand.u32 2147483648, %v4418_v59  ;;  %v2513_v50 = vmul.f32 %v2449_v53, %v4405_v27 }
 0x14f   : > { %v2959_v41 = vsel %vm2831_vm13, %v2767_v12, %v2895_v17  ;;  %v2350_v11 = vadd.f32 0.2548296, %v2286_v58  ;;  %v2159_v20 = vmul.f32 %v2095_v16, %v4426_v3  ;;  %v1027_v35 = vmul.f32 %v3524_v63, %v1026_v25 }
 0x150   : > { %v3023_v38 = vadd.f32 1.0, %v2959_v41  ;;  %v1041_v43 = vsub.f32 1.0, %v1040_v31  ;;  %v816_v32 = vmul.f32 0.3275911, %v4455_v39  ;;  %vm1045_vm3 = vweird.f32 %v3526_v6 }
 0x151   : > { %v2414_v40 = vmul.f32 %v2350_v11, %v4410_v28  ;;  %v2223_v49 = vadd.f32 -0.28449672, %v2159_v20  ;;  %v1028_v61 = vadd.f32 %v3524_v63, %v1027_v35  ;;  %v2584_v36 = vmul.f32 1.442695, %v2512_v8  ;;  %v554_v28 = vpop.f32.mrf.mxu3  ;;  %vm1046_vm4 = vmor %vm1044_vm0, %vm1045_vm3 }
 0x152   : > { %v3087_v48 = vmul.f32 %v3023_v38, %v591_v56  ;;  %v1042_v15 = vmul.f32 %v3526_v6, %v1041_v43  ;;  %v4467_v52 = vadd.f32 1.0, %v816_v32  ;;  %v1051_v60 = vor.u32 1.1754944e-38, %v1050_v47 }
 0x153   : > { %v2734_v55 = vmul.f32 %v3528_v21, %v2414_v40  ;;  %v2287_v44 = vmul.f32 %v2223_v49, %v4426_v3  ;;  %v1032_v30 = vsel %vm1031_vm2, %v3524_v63, %v1028_v61  ;;  %vm1049_vm5 = vcmp.eq.f32.partialorder %v1048_v9, 8.507059e+37 }
 0x154   : > { %v3147_v57 = vpack.c.bf16 %v3087_v48, %v3086_v54  ;;  %v4472_v27 = vsel %vm4443_vm15, %v1036_v19, %v1032_v30  ;;  %v1043_v56 = vadd.f32 %v3526_v6, %v1042_v15  ;;  %3531 = vrcp.f32 %v4467_v52 }
 0x155   : > { %v2798_v18 = vsub.f32 1.0, %v2734_v55  ;;  %v2351_v42 = vadd.f32 0.2548296, %v2287_v44  ;;  %v1872_v7 = vmul.f32 1.0614054, %v4472_v27  ;;  %v4480_v62 = vadd.f32 %v554_v28, %v3882_v2 }
 0x156   : > { %3179 = vst [vmem:[%s4069_s9 + $0x18] sm:$0xff] %v3147_v57  ;;  %v1047_v10 = vsel %vm1046_vm4, %v3526_v6, %v1043_v56  ;;  %v2586_v4 = vmul.f32 1.442695, %v2513_v50  ;;  %v622_v12 = vmul.f32 0.5, %v4308_v24  ;;  %vm2862_vm6 = vcmp.ge.f32.partialorder %v4317_v29, 0.0 }
 0x157   : > { %v2926_v8 = vsub.f32 0.0, %v2798_v18  ;;  %v2415_v63 = vmul.f32 %v2351_v42, %v4426_v3  ;;  %v1936_v54 = vadd.f32 -1.4531521, %v1872_v7  ;;  %v4483_v53 = vsel %vm1049_vm5, %v1051_v60, %v1047_v10 }
 0x158   : > { %v623_v59 = vmul.f32 0.5, %v4323_v23  ;;  %v1873_v33 = vmul.f32 1.0614054, %v4483_v53  ;;  %3533 = vpow2.f32 %v2584_v36  ;;  %vm2863_vm7 = vcmp.ge.f32.partialorder %v4338_v14, 0.0  ;;  %v516_v14 = vpop.f32.mrf.mxu1 }
 0x159   : > { %v2990_v22 = vsel %vm2862_vm6, %v2798_v18, %v2926_v8  ;;  %v2735_v6 = vmul.f32 %v3530_v26, %v2415_v63  ;;  %v2000_v13 = vmul.f32 %v1936_v54, %v4472_v27  ;;  %3535 = vpow2.f32 %v2586_v4 }
 0x15a   : > { %v3532_v19 = vpop.eup %3531  ;;  %v1937_v3 = vadd.f32 -1.4531521, %v1873_v33  ;;  %v4492_v21 = vmul.f32 0.70710677, %v4480_v62  ;;  %v4496_v17 = vadd.f32 %v427_v0, %v3880_v1  ;;  %v3054_v58 = vadd.f32 1.0, %v2990_v22 }
 0x15b   : > { %v2799_v24 = vsub.f32 1.0, %v2735_v6  ;;  %v2064_v29 = vadd.f32 1.4214138, %v2000_v13  ;;  %v1505_v23 = vmul.f32 %v3532_v19, %v4467_v52  ;;  %v2480_v25 = vsub.f32 0.0, %v4455_v39 }
 0x15c   : > { %v2001_v16 = vmul.f32 %v1937_v3, %v4483_v53  ;;  %v4501_v26 = vand.u32 2147483647, %v4492_v21  ;;  %v1515_v11 = vand.u32 2147483648, %v4467_v52  ;;  %vm1510_vm8 = vweird.f32 %v3532_v19 }
 0x15d   : > { %v2927_v31 = vsub.f32 0.0, %v2799_v24  ;;  %v2128_v9 = vmul.f32 %v2064_v29, %v4472_v27  ;;  %v1506_v41 = vsub.f32 1.0, %v1505_v23  ;;  %v1513_v35 = vand.u32 2147483647, %v4467_v52 }
 0x15e   : > { %v2065_v20 = vadd.f32 1.4214138, %v2001_v16  ;;  %v817_v38 = vmul.f32 0.3275911, %v4501_v26  ;;  %v3534_v43 = vpop.eup %3533  ;;  %v4510_v49 = vmul.f32 0.70710677, %v4496_v17  ;;  %v3118_v50 = vmul.f32 %v3054_v58, %v622_v12 }
 0x15f   : > { %v2991_v47 = vsel %vm2863_vm7, %v2799_v24, %v2927_v31  ;;  %v2192_v32 = vadd.f32 -0.28449672, %v2128_v9  ;;  %v1507_v40 = vmul.f32 %v3532_v19, %v1506_v41  ;;  %v3536_v61 = vpop.eup %3535  ;;  %vm1509_vm9 = vweird.f32 %v4467_v52 }
 0x160   : > { %v3055_v48 = vadd.f32 1.0, %v2991_v47  ;;  %v2129_v15 = vmul.f32 %v2065_v20, %v4483_v53  ;;  %v4513_v55 = vadd.f32 1.0, %v817_v38  ;;  %v1516_v36 = vor.u32 1.1754944e-38, %v1515_v11  ;;  %vm1511_vm10 = vmor %vm1509_vm9, %vm1510_vm8 }
 0x161   : > { %v2256_v44 = vmul.f32 %v2192_v32, %v4472_v27  ;;  %v1508_v30 = vadd.f32 %v3532_v19, %v1507_v40  ;;  %v4520_v56 = vand.u32 2147483647, %v4510_v49  ;;  %vm1514_vm11 = vcmp.eq.f32.partialorder %v1513_v35, 8.507059e+37  ;;  %v467_v35 = vpop.f32.mrf.mxu2 }
 0x162   : > { %v3119_v28 = vmul.f32 %v3055_v48, %v623_v59  ;;  %v2193_v57 = vadd.f32 -0.28449672, %v2129_v15  ;;  %3537 = vrcp.f32 %v4513_v55  ;;  %v2544_v7 = vmul.f32 %v2480_v25, %v4455_v39 }
 0x163   : > { %v2320_v18 = vadd.f32 0.2548296, %v2256_v44  ;;  %v1512_v42 = vsel %vm1511_vm10, %v3532_v19, %v1508_v30  ;;  %v4527_v4 = vadd.f32 %v516_v14, %v3882_v2  ;;  %v592_v54 = vmul.f32 0.5, %v4376_v34 }
 0x164   : > { %v3163_v60 = vpack.c.bf16 %v3119_v28, %v3118_v50  ;;  %v2257_v52 = vmul.f32 %v2193_v57, %v4483_v53  ;;  %v4524_v10 = vsel %vm1514_vm11, %v1516_v36, %v1512_v42  ;;  %v786_v59 = vmul.f32 0.3275911, %v4520_v56 }
 0x165   : > { %v2384_v8 = vmul.f32 %v2320_v18, %v4472_v27  ;;  %v1904_v63 = vmul.f32 1.0614054, %v4524_v10  ;;  %v593_v39 = vmul.f32 0.5, %v4379_v46  ;;  %v2648_v22 = vmul.f32 1.442695, %v2544_v7 }
 0x166   : > { %3195 = vst [vmem:[%s4069_s9 + $0x98] sm:$0xff] %v3163_v60  ;;  %v2321_v12 = vadd.f32 0.2548296, %v2257_v52  ;;  %v2481_v19 = vsub.f32 0.0, %v4501_v26  ;;  %v4537_v3 = vadd.f32 1.0, %v786_v59  ;;  %vm2832_vm12 = vcmp.ge.f32.partialorder %v4394_v37, 0.0 }
 0x167   : > { %v2704_v33 = vmul.f32 %v3534_v43, %v2384_v8  ;;  %v1968_v0 = vadd.f32 -1.4531521, %v1904_v63  ;;  %v4540_v27 = vmul.f32 0.70710677, %v4527_v4  ;;  %vm2833_vm13 = vcmp.ge.f32.partialorder %v4397_v51, 0.0 }
 0x168   : > { %v3538_v6 = vpop.eup %3537  ;;  %v2385_v13 = vmul.f32 %v2321_v12, %v4483_v53  ;;  %v1528_v23 = vand.u32 2147483647, %v4513_v55  ;;  %3539 = vrcp.f32 %v4537_v3  ;;  %v1530_v25 = vand.u32 2147483648, %v4513_v55 }
 0x169   : > { %v2768_v24 = vsub.f32 1.0, %v2704_v33  ;;  %v2032_v34 = vmul.f32 %v1968_v0, %v4524_v10  ;;  %v1520_v29 = vmul.f32 %v3538_v6, %v4513_v55  ;;  %3541 = vpow2.f32 %v2648_v22 }
 0x16a   : > { %v2705_v46 = vmul.f32 %v3536_v61, %v2385_v13  ;;  %v2545_v37 = vmul.f32 %v2481_v19, %v4501_v26  ;;  %v4551_v9 = vand.u32 2147483647, %v4540_v27  ;;  %vm1525_vm14 = vweird.f32 %v3538_v6 }
 0x16b   : > { %v2896_v53 = vsub.f32 0.0, %v2768_v24  ;;  %v2096_v58 = vadd.f32 1.4214138, %v2032_v34  ;;  %v1521_v16 = vsub.f32 1.0, %v1520_v29  ;;  %vm1524_vm15 = vweird.f32 %v4513_v55 }
 0x16c   : > { %v2769_v31 = vsub.f32 1.0, %v2705_v46  ;;  %v787_v47 = vmul.f32 0.3275911, %v4551_v9  ;;  %vm1529_vm0 = vcmp.eq.f32.partialorder %v1528_v23, 8.507059e+37  ;;  %v1531_v61 = vor.u32 1.1754944e-38, %v1530_v25  ;;  %vm1526_vm1 = vmor %vm1524_vm15, %vm1525_vm14 }
 0x16d   : > { %v2960_v41 = vsel %vm2832_vm12, %v2768_v24, %v2896_v53  ;;  %v2160_v11 = vmul.f32 %v2096_v58, %v4524_v10  ;;  %v1522_v20 = vmul.f32 %v3538_v6, %v1521_v16  ;;  %v4561_v44 = vadd.f32 %v467_v35, %v3880_v1 }
 0x16e   : > { %v3024_v38 = vadd.f32 1.0, %v2960_v41  ;;  %v2897_v43 = vsub.f32 0.0, %v2769_v31  ;;  %v3540_v26 = vpop.eup %3539  ;;  %v4558_v15 = vadd.f32 1.0, %v787_v47  ;;  %v2650_v18 = vmul.f32 1.442695, %v2545_v37 }
 0x16f   : > { %v2224_v32 = vadd.f32 -0.28449672, %v2160_v11  ;;  %v1523_v40 = vadd.f32 %v3538_v6, %v1522_v20  ;;  %v1055_v14 = vmul.f32 %v3540_v26, %v4537_v3  ;;  %v3542_v28 = vpop.eup %3541  ;;  %v2450_v42 = vsub.f32 0.0, %v4520_v56 }
 0x170   : > { %v3088_v50 = vmul.f32 %v3024_v38, %v592_v54  ;;  %v2961_v48 = vsel %vm2833_vm13, %v2769_v31, %v2897_v43  ;;  %3543 = vrcp.f32 %v4558_v15  ;;  %vm1060_vm2 = vweird.f32 %v3540_v26 }
 0x171   : > { %v3025_v30 = vadd.f32 1.0, %v2961_v48  ;;  %v2288_v55 = vmul.f32 %v2224_v32, %v4524_v10  ;;  %v1527_v36 = vsel %vm1526_vm1, %v3538_v6, %v1523_v40  ;;  %v1056_v52 = vsub.f32 1.0, %v1055_v14  ;;  %v430_v32 = vpop.f32.mrf.mxu0 }
 0x172   : > { %v4565_v57 = vsel %vm1529_vm0, %v1531_v61, %v1527_v36  ;;  %v1063_v8 = vand.u32 2147483647, %v4537_v3  ;;  %v1065_v63 = vand.u32 2147483648, %v4537_v3  ;;  %v4573_v54 = vmul.f32 0.70710677, %v4561_v44 }
 0x173   : > { %v3089_v51 = vmul.f32 %v3025_v30, %v593_v39  ;;  %v2352_v7 = vadd.f32 0.2548296, %v2288_v55  ;;  %v1905_v60 = vmul.f32 1.0614054, %v4565_v57  ;;  %v1057_v0 = vmul.f32 %v3540_v26, %v1056_v52 }
 0x174   : > { %v2514_v22 = vmul.f32 %v2450_v42, %v4520_v56  ;;  %v4578_v39 = vand.u32 2147483647, %v4573_v54  ;;  %v4582_v6 = vmul.f32 0.5, %v4439_v5  ;;  %vm1059_vm3 = vweird.f32 %v4537_v3  ;;  %v556_v5 = vpop.f32.mrf.mxu3 }
 0x175   : > { %v3148_v12 = vpack.c.bf16 %v3089_v51, %v3088_v50  ;;  %v2416_v59 = vmul.f32 %v2352_v7, %v4524_v10  ;;  %v1969_v33 = vadd.f32 -1.4531521, %v1905_v60  ;;  %v1058_v19 = vadd.f32 %v3540_v26, %v1057_v0  ;;  %vm1061_vm4 = vmor %vm1059_vm3, %vm1060_vm2 }
 0x176   : > { %v3544_v24 = vpop.eup %3543  ;;  %3545 = vpow2.f32 %v2650_v18  ;;  %v1066_v10 = vor.u32 1.1754944e-38, %v1065_v63  ;;  %v818_v56 = vmul.f32 0.3275911, %v4578_v39  ;;  %vm1064_vm5 = vcmp.eq.f32.partialorder %v1063_v8, 8.507059e+37 }
 0x177   : > { %3180 = vst [vmem:[%s4069_s9 + $0x20] sm:$0xff] %v3148_v12  ;;  %v2033_v13 = vmul.f32 %v1969_v33, %v4565_v57  ;;  %v2736_v34 = vmul.f32 %v3542_v28, %v2416_v59  ;;  %v1062_v46 = vsel %vm1061_vm4, %v3540_v26, %v1058_v19  ;;  %v1070_v23 = vmul.f32 %v3544_v24, %v4558_v15 }
 0x178   : > { %v4589_v53 = vsel %vm1064_vm5, %v1066_v10, %v1062_v46  ;;  %v2588_v58 = vmul.f32 1.442695, %v2514_v22  ;;  %v2451_v16 = vsub.f32 0.0, %v4551_v9  ;;  %v4592_v3 = vadd.f32 1.0, %v818_v56 }
 0x179   : > { %v2097_v29 = vadd.f32 1.4214138, %v2033_v13  ;;  %vm2864_vm6 = vcmp.ge.f32.partialorder %v4449_v45, 0.0  ;;  %v1874_v31 = vmul.f32 1.0614054, %v4589_v53  ;;  %v1071_v37 = vsub.f32 1.0, %v1070_v23 }
 0x17a   : > { %v1078_v41 = vand.u32 2147483647, %v4558_v15  ;;  %v2800_v11 = vsub.f32 1.0, %v2736_v34  ;;  %v1080_v20 = vand.u32 2147483648, %v4558_v15  ;;  %3547 = vrcp.f32 %v4592_v3 }
 0x17b   : > { %v2161_v25 = vmul.f32 %v2097_v29, %v4565_v57  ;;  %v4601_v35 = vadd.f32 %v556_v5, %v3882_v2  ;;  %v1938_v43 = vadd.f32 -1.4531521, %v1874_v31  ;;  %v1072_v47 = vmul.f32 %v3544_v24, %v1071_v37 }
 0x17c   : > { %vm1075_vm7 = vweird.f32 %v3544_v24  ;;  %v3546_v40 = vpop.eup %3545  ;;  %v4604_v61 = vmul.f32 0.5, %v4480_v62  ;;  %v4607_v26 = vmul.f32 0.5, %v4496_v17  ;;  %3549 = vpow2.f32 %v2588_v58 }
 0x17d   : > { %v2225_v38 = vadd.f32 -0.28449672, %v2161_v25  ;;  %v2515_v50 = vmul.f32 %v2451_v16, %v4551_v9  ;;  %v2002_v30 = vmul.f32 %v1938_v43, %v4589_v53  ;;  %v1073_v55 = vadd.f32 %v3544_v24, %v1072_v47  ;;  %v519_v47 = vpop.f32.mrf.mxu1 }
 0x17e   : > { %vm1074_vm8 = vweird.f32 %v4558_v15  ;;  %v2928_v36 = vsub.f32 0.0, %v2800_v11  ;;  %v1081_v14 = vor.u32 1.1754944e-38, %v1080_v20  ;;  %v4614_v28 = vmul.f32 0.70710677, %v4601_v35 }
 0x17f   : > { %v2289_v48 = vmul.f32 %v2225_v38, %v4565_v57  ;;  %vm1076_vm9 = vmor %vm1074_vm8, %vm1075_vm7  ;;  %v4617_v62 = vadd.f32 %v430_v32, %v3880_v1  ;;  %v2066_v18 = vadd.f32 1.4214138, %v2002_v30  ;;  %vm1079_vm10 = vcmp.eq.f32.partialorder %v1078_v41, 8.507059e+37 }
 0x180   : > { %v1077_v42 = vsel %vm1076_vm9, %v3544_v24, %v1073_v55  ;;  %v3548_v9 = vpop.eup %3547  ;;  %vm2865_vm11 = vcmp.ge.f32.partialorder %v4492_v21, 0.0  ;;  %v2590_v7 = vmul.f32 1.442695, %v2515_v50  ;;  %v2482_v15 = vsub.f32 0.0, %v4578_v39 }
 0x181   : > { %v2353_v17 = vadd.f32 0.2548296, %v2289_v48  ;;  %v4620_v51 = vsel %vm1079_vm10, %v1081_v14, %v1077_v42  ;;  %v4624_v60 = vand.u32 2147483647, %v4614_v28  ;;  %v2130_v8 = vmul.f32 %v2066_v18, %v4589_v53 }
 0x182   : > { %v1875_v63 = vmul.f32 1.0614054, %v4620_v51  ;;  %v1535_v12 = vmul.f32 %v3548_v9, %v4592_v3  ;;  %v3550_v59 = vpop.eup %3549  ;;  %v2992_v33 = vsel %vm2864_vm6, %v2800_v11, %v2928_v36  ;;  %v1543_v0 = vand.u32 2147483647, %v4592_v3 }
 0x183   : > { %v2417_v52 = vmul.f32 %v2353_v17, %v4565_v57  ;;  %v819_v22 = vmul.f32 0.3275911, %v4624_v60  ;;  %v4635_v13 = vmul.f32 0.70710677, %v4617_v62  ;;  %v2194_v24 = vadd.f32 -0.28449672, %v2130_v8 }
 0x184   : > { %v1939_v57 = vadd.f32 -1.4531521, %v1875_v63  ;;  %v1536_v34 = vsub.f32 1.0, %v1535_v12  ;;  %vm1540_vm12 = vweird.f32 %v3548_v9  ;;  %v1545_v10 = vand.u32 2147483648, %v4592_v3 }
 0x185   : > { %v2737_v19 = vmul.f32 %v3546_v40, %v2417_v52  ;;  %v4638_v56 = vadd.f32 1.0, %v819_v22  ;;  %v4641_v29 = vand.u32 2147483647, %v4635_v13  ;;  %v2258_v46 = vmul.f32 %v2194_v24, %v4589_v53 }
 0x186   : > { %v2003_v23 = vmul.f32 %v1939_v57, %v4620_v51  ;;  %v1537_v5 = vmul.f32 %v3548_v9, %v1536_v34  ;;  %v3056_v58 = vadd.f32 1.0, %v2992_v33  ;;  %vm1539_vm13 = vweird.f32 %v4592_v3 }
 0x187   : > { %v2801_v45 = vsub.f32 1.0, %v2737_v19  ;;  %v2546_v16 = vmul.f32 %v2482_v15, %v4578_v39  ;;  %3551 = vrcp.f32 %v4638_v56  ;;  %v2322_v31 = vadd.f32 0.2548296, %v2258_v46  ;;  %vm1541_vm14 = vmor %vm1539_vm13, %vm1540_vm12 }
 0x188   : > { %v2067_v37 = vadd.f32 1.4214138, %v2003_v23  ;;  %v1538_v41 = vadd.f32 %v3548_v9, %v1537_v5  ;;  %3553 = vpow2.f32 %v2590_v7  ;;  %vm1544_vm15 = vcmp.eq.f32.partialorder %v1543_v0, 8.507059e+37 }
 0x189   : > { %v2929_v25 = vsub.f32 0.0, %v2801_v45  ;;  %v1546_v11 = vor.u32 1.1754944e-38, %v1545_v10  ;;  %v788_v20 = vmul.f32 0.3275911, %v4641_v29  ;;  %v2386_v3 = vmul.f32 %v2322_v31, %v4589_v53 }
 0x18a   : > { %v2131_v39 = vmul.f32 %v2067_v37, %v4620_v51  ;;  %v1542_v43 = vsel %vm1541_vm14, %v3548_v9, %v1538_v41  ;;  %v3120_v32 = vmul.f32 %v3056_v58, %v4582_v6  ;;  %v2652_v14 = vmul.f32 1.442695, %v2546_v16 }
 0x18b   : > { %v2993_v38 = vsel %vm2865_vm11, %v2801_v45, %v2929_v25  ;;  %v4655_v50 = vsel %vm1544_vm15, %v1546_v11, %v1542_v43  ;;  %v4657_v48 = vadd.f32 1.0, %v788_v20  ;;  %v2706_v30 = vmul.f32 %v3550_v59, %v2386_v3  ;;  %v470_v20 = vpop.f32.mrf.mxu2 }
 0x18c   : > { %v3057_v40 = vadd.f32 1.0, %v2993_v38  ;;  %v2195_v55 = vadd.f32 -0.28449672, %v2131_v39  ;;  %v1906_v36 = vmul.f32 1.0614054, %v4655_v50  ;;  %v2483_v53 = vsub.f32 0.0, %v4624_v60 }
 0x18d   : > { %v3552_v21 = vpop.eup %3551  ;;  %3555 = vrcp.f32 %v4657_v48  ;;  %v4664_v6 = vadd.f32 %v519_v47, %v3882_v2  ;;  %v2770_v18 = vsub.f32 1.0, %v2706_v30  ;;  %vm2834_vm0 = vcmp.ge.f32.partialorder %v4510_v49, 0.0 }
 0x18e   : > { %v3121_v17 = vmul.f32 %v3057_v40, %v4604_v61  ;;  %v2259_v42 = vmul.f32 %v2195_v55, %v4620_v51  ;;  %v1970_v9 = vadd.f32 -1.4531521, %v1906_v36  ;;  %v1550_v7 = vmul.f32 %v3552_v21, %v4638_v56  ;;  %v3554_v15 = vpop.eup %3553 }
 0x18f   : > { %v1558_v61 = vand.u32 2147483647, %v4638_v56  ;;  %v1560_v8 = vand.u32 2147483648, %v4638_v56  ;;  %v2898_v63 = vsub.f32 0.0, %v2770_v18  ;;  %3557 = vpow2.f32 %v2652_v14 }
 0x190   : > { %v3164_v52 = vpack.c.bf16 %v3121_v17, %v3120_v32  ;;  %v2323_v12 = vadd.f32 0.2548296, %v2259_v42  ;;  %v2034_v59 = vmul.f32 %v1970_v9, %v4655_v50  ;;  %v1551_v33 = vsub.f32 1.0, %v1550_v7 }
 0x191   : > { %vm1554_vm1 = vweird.f32 %v4638_v56  ;;  %v2547_v0 = vmul.f32 %v2483_v53, %v4624_v60  ;;  %v4676_v22 = vmul.f32 0.70710677, %v4664_v6  ;;  %vm1555_vm2 = vweird.f32 %v3552_v21 }
 0x192   : > { %3196 = vst [vmem:[%s4069_s9 + $0xa0] sm:$0xff] %v3164_v52  ;;  %v2387_v19 = vmul.f32 %v2323_v12, %v4620_v51  ;;  %v2098_v24 = vadd.f32 1.4214138, %v2034_v59  ;;  %v1552_v57 = vmul.f32 %v3552_v21, %v1551_v33  ;;  %v2962_v10 = vsel %vm2834_vm0, %v2770_v18, %v2898_v63  ;;  %vm1556_vm4 = vmor %vm1554_vm1, %vm1555_vm2 }
 0x193   : > { %v3556_v34 = vpop.eup %3555  ;;  %vm4681_vm3 = vcmp.eq.f32.partialorder %v1558_v61, 8.507059e+37  ;;  %v1561_v46 = vor.u32 1.1754944e-38, %v1560_v8  ;;  %v4686_v23 = vand.u32 2147483647, %v4676_v22  ;;  %vm1089_vm5 = vweird.f32 %v4657_v48 }
 0x194   : > { %v2707_v60 = vmul.f32 %v3554_v15, %v2387_v19  ;;  %v2162_v5 = vmul.f32 %v2098_v24, %v4655_v50  ;;  %v1553_v58 = vadd.f32 %v3552_v21, %v1552_v57  ;;  %v1085_v51 = vmul.f32 %v3556_v34, %v4657_v48  ;;  %v559_v15 = vpop.f32.mrf.mxu3 }
 0x195   : > { %v1093_v49 = vand.u32 2147483647, %v4657_v48  ;;  %v1095_v16 = vand.u32 2147483648, %v4657_v48  ;;  %v789_v25 = vmul.f32 0.3275911, %v4686_v23  ;;  %v3558_v38 = vpop.eup %3557  ;;  %v3026_v3 = vadd.f32 1.0, %v2962_v10 }
 0x196   : > { %v2771_v31 = vsub.f32 1.0, %v2707_v60  ;;  %v2226_v37 = vadd.f32 -0.28449672, %v2162_v5  ;;  %v1557_v41 = vsel %vm1556_vm4, %v3552_v21, %v1553_v58  ;;  %v1086_v11 = vsub.f32 1.0, %v1085_v51 }
 0x197   : > { %v4698_v39 = vsel %vm4681_vm3, %v1561_v46, %v1557_v41  ;;  %vm1090_vm6 = vweird.f32 %v3556_v34  ;;  %v4700_v56 = vadd.f32 1.0, %v789_v25  ;;  %v595_v30 = vmul.f32 0.5, %v4527_v4 }
 0x198   : > { %v2899_v43 = vsub.f32 0.0, %v2771_v31  ;;  %v2290_v47 = vmul.f32 %v2226_v37, %v4655_v50  ;;  %v1907_v32 = vmul.f32 1.0614054, %v4698_v39  ;;  %v1087_v40 = vmul.f32 %v3556_v34, %v1086_v11  ;;  %vm1091_vm8 = vmor %vm1089_vm5, %vm1090_vm6  ;;  %v432_v37 = vpop.f32.mrf.mxu0 }
 0x199   : > { %vm2835_vm7 = vcmp.ge.f32.partialorder %v4540_v27, 0.0  ;;  %3559 = vrcp.f32 %v4700_v56  ;;  %v4708_v55 = vadd.f32 %v470_v20, %v3880_v1  ;;  %v3090_v53 = vmul.f32 %v3026_v3, %v4607_v26 }
 0x19a   : > { %v2963_v36 = vsel %vm2835_vm7, %v2771_v31, %v2899_v43  ;;  %v2354_v14 = vadd.f32 0.2548296, %v2290_v47  ;;  %v1971_v21 = vadd.f32 -1.4531521, %v1907_v32  ;;  %v1088_v17 = vadd.f32 %v3556_v34, %v1087_v40 }
 0x19b   : > { %v3027_v18 = vadd.f32 1.0, %v2963_v36  ;;  %v2654_v42 = vmul.f32 1.442695, %v2547_v0  ;;  %v1096_v4 = vor.u32 1.1754944e-38, %v1095_v16  ;;  %vm1094_vm9 = vcmp.eq.f32.partialorder %v1093_v49, 8.507059e+37 }
 0x19c   : > { %v2418_v27 = vmul.f32 %v2354_v14, %v4655_v50  ;;  %v2035_v9 = vmul.f32 %v1971_v21, %v4698_v39  ;;  %v1092_v7 = vsel %vm1091_vm8, %v3556_v34, %v1088_v17  ;;  %v2452_v26 = vsub.f32 0.0, %v4641_v29 }
 0x19d   : > { %v3091_v52 = vmul.f32 %v3027_v18, %v595_v30  ;;  %v4716_v61 = vsel %vm1094_vm9, %v1096_v4, %v1092_v7  ;;  %v4720_v8 = vmul.f32 0.70710677, %v4708_v55  ;;  %v4727_v0 = vadd.f32 %v559_v15, %v3882_v2 }
 0x19e   : > { %v2738_v63 = vmul.f32 %v3558_v38, %v2418_v27  ;;  %v2099_v48 = vadd.f32 1.4214138, %v2035_v9  ;;  %v1876_v12 = vmul.f32 1.0614054, %v4716_v61  ;;  %v4730_v19 = vmul.f32 0.5, %v4561_v44 }
 0x19f   : > { %v3560_v59 = vpop.eup %3559  ;;  %v3149_v50 = vpack.c.bf16 %v3091_v52, %v3090_v53  ;;  %v4724_v33 = vand.u32 2147483647, %v4720_v8  ;;  %3561 = vpow2.f32 %v2654_v42  ;;  %v2516_v10 = vmul.f32 %v2452_v26, %v4641_v29 }
 0x1a0   : > { %v2163_v24 = vmul.f32 %v2099_v48, %v4698_v39  ;;  %v1940_v57 = vadd.f32 -1.4531521, %v1876_v12  ;;  %v1100_v34 = vmul.f32 %v3560_v59, %v4700_v56  ;;  %vm1104_vm10 = vweird.f32 %v4700_v56 }
 0x1a1   : > { %3181 = vst [vmem:[%s4069_s9 + $0x28] sm:$0xff] %v3149_v50  ;;  %v820_v45 = vmul.f32 0.3275911, %v4724_v33  ;;  %v2802_v46 = vsub.f32 1.0, %v2738_v63  ;;  %v1108_v44 = vand.u32 2147483647, %v4700_v56  ;;  %vm1105_vm11 = vweird.f32 %v3560_v59 }
 0x1a2   : > { %v2227_v60 = vadd.f32 -0.28449672, %v2163_v24  ;;  %v2004_v5 = vmul.f32 %v1940_v57, %v4716_v61  ;;  %v1101_v58 = vsub.f32 1.0, %v1100_v34  ;;  %v1110_v51 = vand.u32 2147483648, %v4700_v56  ;;  %vm1106_vm13 = vmor %vm1104_vm10, %vm1105_vm11 }
 0x1a3   : > { %v4741_v49 = vadd.f32 1.0, %v820_v45  ;;  %v4744_v16 = vmul.f32 0.70710677, %v4727_v0  ;;  %vm2866_vm12 = vcmp.ge.f32.partialorder %v4573_v54, 0.0  ;;  %v2592_v41 = vmul.f32 1.442695, %v2516_v10 }
 0x1a4   : > { %v2291_v29 = vmul.f32 %v2227_v60, %v4698_v39  ;;  %v2068_v25 = vadd.f32 1.4214138, %v2004_v5  ;;  %v1102_v31 = vmul.f32 %v3560_v59, %v1101_v58  ;;  %v2453_v11 = vsub.f32 0.0, %v4686_v23 }
 0x1a5   : > { %3563 = vrcp.f32 %v4741_v49  ;;  %v2930_v20 = vsub.f32 0.0, %v2802_v46  ;;  %v3562_v47 = vpop.eup %3561  ;;  %v627_v32 = vmul.f32 0.5, %v4601_v35  ;;  %v1111_v40 = vor.u32 1.1754944e-38, %v1110_v51 }
 0x1a6   : > { %v2355_v38 = vadd.f32 0.2548296, %v2291_v29  ;;  %v2132_v3 = vmul.f32 %v2068_v25, %v4716_v61  ;;  %v1103_v43 = vadd.f32 %v3560_v59, %v1102_v31  ;;  %v4755_v30 = vand.u32 2147483647, %v4744_v16 }
 0x1a7   : > { %v4758_v36 = vadd.f32 %v432_v37, %v3880_v1  ;;  %vm1109_vm14 = vcmp.eq.f32.partialorder %v1108_v44, 8.507059e+37  ;;  %3565 = vpow2.f32 %v2592_v41  ;;  %v2517_v35 = vmul.f32 %v2453_v11, %v4686_v23 }
 0x1a8   : > { %v2419_v14 = vmul.f32 %v2355_v38, %v4698_v39  ;;  %v2196_v21 = vadd.f32 -0.28449672, %v2132_v3  ;;  %v1107_v17 = vsel %vm1106_vm13, %v3560_v59, %v1103_v43  ;;  %v821_v56 = vmul.f32 0.3275911, %v4755_v30  ;;  %v521_v3 = vpop.f32.mrf.mxu1 }
 0x1a9   : > { %v4761_v53 = vsel %vm1109_vm14, %v1111_v40, %v1107_v17  ;;  %v2994_v18 = vsel %vm2866_vm12, %v2802_v46, %v2930_v20  ;;  %vm2867_vm15 = vcmp.ge.f32.partialorder %v4614_v28, 0.0  ;;  %v4771_v39 = vmul.f32 0.5, %v4617_v62 }
 0x1aa   : > { %v2739_v42 = vmul.f32 %v3562_v47, %v2419_v14  ;;  %v2260_v4 = vmul.f32 %v2196_v21, %v4716_v61  ;;  %v1877_v27 = vmul.f32 1.0614054, %v4761_v53  ;;  %v4773_v7 = vadd.f32 1.0, %v821_v56 }
 0x1ab   : > { %v3564_v9 = vpop.eup %3563  ;;  %v4776_v23 = vmul.f32 0.70710677, %v4758_v36  ;;  %v3058_v63 = vadd.f32 1.0, %v2994_v18  ;;  %v2594_v48 = vmul.f32 1.442695, %v2517_v35  ;;  %v2484_v12 = vsub.f32 0.0, %v4724_v33 }
 0x1ac   : > { %v2803_v15 = vsub.f32 1.0, %v2739_v42  ;;  %v2324_v52 = vadd.f32 0.2548296, %v2260_v4  ;;  %v1941_v54 = vadd.f32 -1.4531521, %v1877_v27  ;;  %v1565_v26 = vmul.f32 %v3564_v9, %v4741_v49 }
 0x1ad   : > { %3567 = vrcp.f32 %v4773_v7  ;;  %v3566_v57 = vpop.eup %3565  ;;  %vm1570_vm0 = vweird.f32 %v3564_v9  ;;  %v1573_v34 = vand.u32 2147483647, %v4741_v49  ;;  %v1575_v10 = vand.u32 2147483648, %v4741_v49 }
 0x1ae   : > { %v2931_v59 = vsub.f32 0.0, %v2803_v15  ;;  %v2388_v62 = vmul.f32 %v2324_v52, %v4716_v61  ;;  %v2005_v50 = vmul.f32 %v1941_v54, %v4761_v53  ;;  %v1566_v24 = vsub.f32 1.0, %v1565_v26 }
 0x1af   : > { %v4786_v45 = vand.u32 2147483647, %v4776_v23  ;;  %v3122_v61 = vmul.f32 %v3058_v63, %v4730_v19  ;;  %vm2836_vm1 = vcmp.ge.f32.partialorder %v4635_v13, 0.0  ;;  %v2548_v51 = vmul.f32 %v2484_v12, %v4724_v33 }
 0x1b0   : > { %v2995_v46 = vsel %vm2867_vm15, %v2803_v15, %v2931_v59  ;;  %v2708_v60 = vmul.f32 %v3566_v57, %v2388_v62  ;;  %v2069_v5 = vadd.f32 1.4214138, %v2005_v50  ;;  %v1567_v58 = vmul.f32 %v3564_v9, %v1566_v24  ;;  %v472_v24 = vpop.f32.mrf.mxu2 }
 0x1b1   : > { %v3059_v44 = vadd.f32 1.0, %v2995_v46  ;;  %v790_v29 = vmul.f32 0.3275911, %v4786_v45  ;;  %vm1569_vm2 = vweird.f32 %v4741_v49  ;;  %3569 = vpow2.f32 %v2594_v48 }
 0x1b2   : > { %v2772_v25 = vsub.f32 1.0, %v2708_v60  ;;  %v2133_v31 = vmul.f32 %v2069_v5, %v4761_v53  ;;  %v1568_v37 = vadd.f32 %v3564_v9, %v1567_v58  ;;  %vm1571_vm3 = vmor %vm1569_vm2, %vm1570_vm0  ;;  %v1576_v19 = vor.u32 1.1754944e-38, %v1575_v10 }
 0x1b3   : > { %v3568_v28 = vpop.eup %3567  ;;  %v3123_v41 = vmul.f32 %v3059_v44, %v627_v32  ;;  %v4797_v11 = vadd.f32 1.0, %v790_v29  ;;  %vm1574_vm4 = vcmp.eq.f32.partialorder %v1573_v34, 8.507059e+37  ;;  %v2656_v40 = vmul.f32 1.442695, %v2548_v51 }
 0x1b4   : > { %v2197_v20 = vadd.f32 -0.28449672, %v2133_v31  ;;  %v1572_v38 = vsel %vm1571_vm3, %v3564_v9, %v1568_v37  ;;  %v1580_v33 = vmul.f32 %v3568_v28, %v4773_v7  ;;  %v2900_v49 = vsub.f32 0.0, %v2772_v25 }
 0x1b5   : > { %v3165_v43 = vpack.c.bf16 %v3123_v41, %v3122_v61  ;;  %v4800_v47 = vsel %vm1574_vm4, %v1576_v19, %v1572_v38  ;;  %3571 = vrcp.f32 %v4797_v11  ;;  %v1588_v17 = vand.u32 2147483647, %v4773_v7 }
 0x1b6   : > { %v2261_v32 = vmul.f32 %v2197_v20, %v4761_v53  ;;  %v1908_v14 = vmul.f32 1.0614054, %v4800_v47  ;;  %v1581_v21 = vsub.f32 1.0, %v1580_v33  ;;  %v1590_v35 = vand.u32 2147483648, %v4773_v7  ;;  %v561_v20 = vpop.f32.mrf.mxu3 }
 0x1b7   : > { %3197 = vst [vmem:[%s4069_s9 + $0xa8] sm:$0xff] %v3165_v43  ;;  %v2485_v56 = vsub.f32 0.0, %v4755_v30  ;;  %v4810_v18 = vadd.f32 %v521_v3, %v3882_v2  ;;  %vm1585_vm5 = vweird.f32 %v3568_v28  ;;  %v3570_v9 = vpop.eup %3569  ;;  %v597_v15 = vmul.f32 0.5, %v4664_v6 }
 0x1b8   : > { %v2325_v42 = vadd.f32 0.2548296, %v2261_v32  ;;  %v1972_v4 = vadd.f32 -1.4531521, %v1908_v14  ;;  %v1582_v27 = vmul.f32 %v3568_v28, %v1581_v21  ;;  %vm2837_vm6 = vcmp.ge.f32.partialorder %v4676_v22, 0.0 }
 0x1b9   : > { %3573 = vpow2.f32 %v2656_v40  ;;  %vm1584_vm7 = vweird.f32 %v4773_v7  ;;  %v2964_v52 = vsel %vm2836_vm1, %v2772_v25, %v2900_v49  ;;  %vm1589_vm9 = vcmp.eq.f32.partialorder %v1588_v17, 8.507059e+37 }
 0x1ba   : > { %v2389_v54 = vmul.f32 %v2325_v42, %v4761_v53  ;;  %v2036_v26 = vmul.f32 %v1972_v4, %v4800_v47  ;;  %v1583_v63 = vadd.f32 %v3568_v28, %v1582_v27  ;;  %vm1586_vm8 = vmor %vm1584_vm7, %vm1585_vm5  ;;  %v1591_v12 = vor.u32 1.1754944e-38, %v1590_v35 }
 0x1bb   : > { %v3572_v48 = vpop.eup %3571  ;;  %v2549_v59 = vmul.f32 %v2485_v56, %v4755_v30  ;;  %v4821_v6 = vmul.f32 0.70710677, %v4810_v18  ;;  %v3028_v57 = vadd.f32 1.0, %v2964_v52  ;;  %v1123_v34 = vand.u32 2147483647, %v4797_v11 }
 0x1bc   : > { %v2709_v62 = vmul.f32 %v3570_v9, %v2389_v54  ;;  %v2100_v50 = vadd.f32 1.4214138, %v2036_v26  ;;  %v1587_v7 = vsel %vm1586_vm8, %v3568_v28, %v1583_v63  ;;  %v1115_v13 = vmul.f32 %v3572_v48, %v4797_v11 }
 0x1bd   : > { %v4824_v53 = vsel %vm1589_vm9, %v1591_v12, %v1587_v7  ;;  %v4828_v10 = vand.u32 2147483647, %v4821_v6  ;;  %vm1120_vm10 = vweird.f32 %v3572_v48  ;;  %v1125_v61 = vand.u32 2147483648, %v4797_v11 }
 0x1be   : > { %v2773_v46 = vsub.f32 1.0, %v2709_v62  ;;  %v2164_v30 = vmul.f32 %v2100_v50, %v4800_v47  ;;  %v1909_v60 = vmul.f32 1.0614054, %v4824_v53  ;;  %v1116_v5 = vsub.f32 1.0, %v1115_v13 }
 0x1bf   : > { %v3574_v58 = vpop.eup %3573  ;;  %v791_v44 = vmul.f32 0.3275911, %v4828_v10  ;;  %v4835_v51 = vadd.f32 %v472_v24, %v3880_v1  ;;  %v3092_v28 = vmul.f32 %v3028_v57, %v4771_v39  ;;  %vm1119_vm11 = vweird.f32 %v4797_v11 }
 0x1c0   : > { %v2901_v29 = vsub.f32 0.0, %v2773_v46  ;;  %v2228_v25 = vadd.f32 -0.28449672, %v2164_v30  ;;  %v1973_v31 = vadd.f32 -1.4531521, %v1909_v60  ;;  %v1117_v37 = vmul.f32 %v3572_v48, %v1116_v5  ;;  %vm1121_vm13 = vmor %vm1119_vm11, %vm1120_vm10  ;;  %v435_v5 = vpop.f32.mrf.mxu0 }
 0x1c1   : > { %vm4839_vm12 = vcmp.eq.f32.partialorder %v1123_v34, 8.507059e+37  ;;  %v4843_v19 = vadd.f32 1.0, %v791_v44  ;;  %v1126_v39 = vor.u32 1.1754944e-38, %v1125_v61  ;;  %v4852_v11 = vmul.f32 0.70710677, %v4835_v51 }
 0x1c2   : > { %v2965_v38 = vsel %vm2837_vm6, %v2773_v46, %v2901_v29  ;;  %v2292_v33 = vmul.f32 %v2228_v25, %v4800_v47  ;;  %v2037_v3 = vmul.f32 %v1973_v31, %v4824_v53  ;;  %v1118_v43 = vadd.f32 %v3572_v48, %v1117_v37 }
 0x1c3   : > { %v3029_v40 = vadd.f32 1.0, %v2965_v38  ;;  %3575 = vrcp.f32 %v4843_v19  ;;  %v4855_v22 = vadd.f32 %v561_v20, %v3882_v2  ;;  %v2658_v17 = vmul.f32 1.442695, %v2549_v59 }
 0x1c4   : > { %v2356_v49 = vadd.f32 0.2548296, %v2292_v33  ;;  %v2101_v32 = vadd.f32 1.4214138, %v2037_v3  ;;  %v1122_v14 = vsel %vm1121_vm13, %v3572_v48, %v1118_v43  ;;  %v2454_v56 = vsub.f32 0.0, %v4786_v45 }
 0x1c5   : > { %v3093_v21 = vmul.f32 %v3029_v40, %v597_v15  ;;  %v4859_v35 = vsel %vm4839_vm12, %v1126_v39, %v1122_v14  ;;  %v4866_v52 = vmul.f32 0.5, %v4708_v55  ;;  %vm2868_vm14 = vcmp.ge.f32.partialorder %v4720_v8, 0.0 }
 0x1c6   : > { %v2420_v42 = vmul.f32 %v2356_v49, %v4800_v47  ;;  %v2165_v4 = vmul.f32 %v2101_v32, %v4824_v53  ;;  %v1878_v27 = vmul.f32 1.0614054, %v4859_v35  ;;  %v758_v15 = vand.u32 2147483647, %v4852_v11 }
 0x1c7   : > { %v3150_v9 = vpack.c.bf16 %v3093_v21, %v3092_v28  ;;  %v4871_v48 = vmul.f32 0.70710677, %v4855_v22  ;;  %v4875_v47 = vmul.f32 0.5, %v4727_v0  ;;  %3577 = vpow2.f32 %v2658_v17 }
 0x1c8   : > { %v2740_v54 = vmul.f32 %v3574_v58, %v2420_v42  ;;  %v2229_v26 = vadd.f32 -0.28449672, %v2165_v4  ;;  %v1942_v63 = vadd.f32 -1.4531521, %v1878_v27  ;;  %v2518_v59 = vmul.f32 %v2454_v56, %v4786_v45 }
 0x1c9   : > { %v3576_v12 = vpop.eup %3575  ;;  %3182 = vst [vmem:[%s4069_s9 + $0x30] sm:$0xff] %v3150_v9  ;;  %v822_v55 = vmul.f32 0.3275911, %v758_v15  ;;  %v4882_v24 = vmul.f32 0.5, %v4758_v36  ;;  %v4885_v57 = vmul.f32 0.5, %v4810_v18  ;;  %vm2869_vm15 = vcmp.ge.f32.partialorder %v4744_v16, 0.0 }
 0x1ca   : > { %v2804_v62 = vsub.f32 1.0, %v2740_v54  ;;  %v2293_v50 = vmul.f32 %v2229_v26, %v4824_v53  ;;  %v2006_v7 = vmul.f32 %v1942_v63, %v4859_v35  ;;  %v1130_v13 = vmul.f32 %v3576_v12, %v4843_v19 }
 0x1cb   : > { %v4887_v34 = vadd.f32 1.0, %v822_v55  ;;  %v4890_v0 = vand.u32 2147483647, %v4871_v48  ;;  %v2596_v58 = vmul.f32 1.442695, %v2518_v59  ;;  %v1140_v36 = vand.u32 2147483648, %v4843_v19  ;;  %v524_v59 = vpop.f32.mrf.mxu1 }
 0x1cc   : > { %v2932_v45 = vsub.f32 0.0, %v2804_v62  ;;  %v2357_v46 = vadd.f32 0.2548296, %v2293_v50  ;;  %v2070_v30 = vadd.f32 1.4214138, %v2006_v7  ;;  %v1131_v60 = vsub.f32 1.0, %v1130_v13 }
 0x1cd   : > { %v1138_v61 = vand.u32 2147483647, %v4843_v19  ;;  %3579 = vrcp.f32 %v4887_v34  ;;  %vm1135_vm0 = vweird.f32 %v3576_v12  ;;  %v3578_v25 = vpop.eup %3577  ;;  %vm1134_vm1 = vweird.f32 %v4843_v19 }
 0x1ce   : > { %v2421_v18 = vmul.f32 %v2357_v46, %v4824_v53  ;;  %v2134_v44 = vmul.f32 %v2070_v30, %v4859_v35  ;;  %v1132_v29 = vmul.f32 %v3576_v12, %v1131_v60  ;;  %v2996_v31 = vsel %vm2868_vm14, %v2804_v62, %v2932_v45  ;;  %vm1136_vm2 = vmor %vm1134_vm1, %vm1135_vm0 }
 0x1cf   : > { %v2455_v37 = vsub.f32 0.0, %v4828_v10  ;;  %v4903_v28 = vadd.f32 %v435_v5, %v3880_v1  ;;  %v823_v53 = vmul.f32 0.3275911, %v4890_v0  ;;  %3581 = vpow2.f32 %v2596_v58 }
 0x1d0   : > { %v2741_v41 = vmul.f32 %v3578_v25, %v2421_v18  ;;  %v2198_v20 = vadd.f32 -0.28449672, %v2134_v44  ;;  %v1133_v38 = vadd.f32 %v3576_v12, %v1132_v29  ;;  %vm1139_vm3 = vcmp.eq.f32.partialorder %v1138_v61, 8.507059e+37 }
 0x1d1   : > { %v1141_v33 = vor.u32 1.1754944e-38, %v1140_v36  ;;  %v2486_v3 = vsub.f32 0.0, %v758_v15  ;;  %v4907_v19 = vadd.f32 1.0, %v823_v53  ;;  %v3060_v49 = vadd.f32 1.0, %v2996_v31 }
 0x1d2   : > { %v2805_v43 = vsub.f32 1.0, %v2741_v41  ;;  %v2262_v8 = vmul.f32 %v2198_v20, %v4859_v35  ;;  %v1137_v40 = vsel %vm1136_vm2, %v3576_v12, %v1133_v38  ;;  %v2519_v14 = vmul.f32 %v2455_v37, %v4828_v10 }
 0x1d3   : > { %v3580_v39 = vpop.eup %3579  ;;  %v4909_v32 = vsel %vm1139_vm3, %v1141_v33, %v1137_v40  ;;  %v4913_v21 = vmul.f32 0.70710677, %v4903_v28  ;;  %v1603_v27 = vand.u32 2147483647, %v4887_v34  ;;  %v1605_v9 = vand.u32 2147483648, %v4887_v34  ;;  %v475_v33 = vpop.f32.mrf.mxu2 }
 0x1d4   : > { %v2933_v17 = vsub.f32 0.0, %v2805_v43  ;;  %v2326_v56 = vadd.f32 0.2548296, %v2262_v8  ;;  %v1879_v42 = vmul.f32 1.0614054, %v4909_v32  ;;  %v1595_v4 = vmul.f32 %v3580_v39, %v4887_v34 }
 0x1d5   : > { %v2550_v54 = vmul.f32 %v2486_v3, %v758_v15  ;;  %3583 = vrcp.f32 %v4907_v19  ;;  %v3582_v55 = vpop.eup %3581  ;;  %v3124_v62 = vmul.f32 %v3060_v49, %v4866_v52  ;;  %vm1600_vm4 = vweird.f32 %v3580_v39 }
 0x1d6   : > { %v2997_v26 = vsel %vm2869_vm15, %v2805_v43, %v2933_v17  ;;  %v2390_v10 = vmul.f32 %v2326_v56, %v4859_v35  ;;  %v1943_v63 = vadd.f32 -1.4531521, %v1879_v42  ;;  %v1596_v12 = vsub.f32 1.0, %v1595_v4 }
 0x1d7   : > { %v3061_v50 = vadd.f32 1.0, %v2997_v26  ;;  %v2487_v7 = vsub.f32 0.0, %v4890_v0  ;;  %v728_v46 = vand.u32 2147483647, %v4913_v21  ;;  %v2598_v30 = vmul.f32 1.442695, %v2519_v14 }
 0x1d8   : > { %v2710_v13 = vmul.f32 %v3582_v55, %v2390_v10  ;;  %v2007_v15 = vmul.f32 %v1943_v63, %v4909_v32  ;;  %v1597_v45 = vmul.f32 %v3580_v39, %v1596_v12  ;;  %vm1599_vm5 = vweird.f32 %v4887_v34 }
 0x1d9   : > { %v3125_v16 = vmul.f32 %v3061_v50, %v4875_v47  ;;  %v4930_v35 = vadd.f32 %v524_v59, %v3882_v2  ;;  %vm1604_vm6 = vcmp.eq.f32.partialorder %v1603_v27, 8.507059e+37  ;;  %v792_v5 = vmul.f32 0.3275911, %v728_v46  ;;  %vm1601_vm8 = vmor %vm1599_vm5, %vm1600_vm4 }
 0x1da   : > { %v2071_v52 = vadd.f32 1.4214138, %v2007_v15  ;;  %v1598_v60 = vadd.f32 %v3580_v39, %v1597_v45  ;;  %v2774_v36 = vsub.f32 1.0, %v2710_v13  ;;  %vm2838_vm7 = vcmp.ge.f32.partialorder %v4776_v23, 0.0 }
 0x1db   : > { %v3584_v58 = vpop.eup %3583  ;;  %v3166_v61 = vpack.c.bf16 %v3125_v16, %v3124_v62  ;;  %v1606_v18 = vor.u32 1.1754944e-38, %v1605_v9  ;;  %v2551_v47 = vmul.f32 %v2487_v7, %v4890_v0  ;;  %v2660_v29 = vmul.f32 1.442695, %v2550_v54 }
 0x1dc   : > { %v2135_v34 = vmul.f32 %v2071_v52, %v4909_v32  ;;  %v1602_v44 = vsel %vm1601_vm8, %v3580_v39, %v1598_v60  ;;  %v1610_v25 = vmul.f32 %v3584_v58, %v4907_v19  ;;  %v1618_v37 = vand.u32 2147483647, %v4907_v19 }
 0x1dd   : > { %3198 = vst [vmem:[%s4069_s9 + $0xb0] sm:$0xff] %v3166_v61  ;;  %v4938_v31 = vsel %vm1604_vm6, %v1606_v18, %v1602_v44  ;;  %v4941_v41 = vadd.f32 1.0, %v792_v5  ;;  %v4944_v20 = vmul.f32 0.70710677, %v4930_v35  ;;  %3585 = vpow2.f32 %v2598_v30 }
 0x1de   : > { %v2199_v38 = vadd.f32 -0.28449672, %v2135_v34  ;;  %v1910_v0 = vmul.f32 1.0614054, %v4938_v31  ;;  %v1611_v53 = vsub.f32 1.0, %v1610_v25  ;;  %v2902_v3 = vsub.f32 0.0, %v2774_v36 }
 0x1df   : > { %v1620_v43 = vand.u32 2147483648, %v4907_v19  ;;  %v2662_v8 = vmul.f32 1.442695, %v2551_v47  ;;  %3587 = vrcp.f32 %v4941_v41  ;;  %vm1615_vm9 = vweird.f32 %v3584_v58 }
 0x1e0   : > { %v2263_v40 = vmul.f32 %v2199_v38, %v4909_v32  ;;  %v1974_v39 = vadd.f32 -1.4531521, %v1910_v0  ;;  %v1612_v49 = vmul.f32 %v3584_v58, %v1611_v53  ;;  %3589 = vpow2.f32 %v2660_v29 }
 0x1e1   : > { %v2456_v14 = vsub.f32 0.0, %v728_v46  ;;  %v729_v17 = vand.u32 2147483647, %v4944_v20  ;;  %v4952_v56 = vadd.f32 %v475_v33, %v3880_v1  ;;  %vm1614_vm10 = vweird.f32 %v4907_v19 }
 0x1e2   : > { %v2327_v42 = vadd.f32 0.2548296, %v2263_v40  ;;  %v2038_v4 = vmul.f32 %v1974_v39, %v4938_v31  ;;  %v1613_v27 = vadd.f32 %v3584_v58, %v1612_v49  ;;  %vm2839_vm11 = vcmp.ge.f32.partialorder %v4821_v6, 0.0  ;;  %vm1616_vm12 = vmor %vm1614_vm10, %vm1615_vm9 }
 0x1e3   : > { %vm1619_vm13 = vcmp.eq.f32.partialorder %v1618_v37, 8.507059e+37  ;;  %v1621_v9 = vor.u32 1.1754944e-38, %v1620_v43  ;;  %3591 = vpow2.f32 %v2662_v8  ;;  %v793_v54 = vmul.f32 0.3275911, %v729_v17  ;;  %v3586_v26 = vpop.eup %3585 }
 0x1e4   : > { %v2966_v10 = vsel %vm2838_vm7, %v2774_v36, %v2902_v3  ;;  %v2391_v63 = vmul.f32 %v2327_v42, %v4909_v32  ;;  %v2102_v12 = vadd.f32 1.4214138, %v2038_v4  ;;  %v1617_v59 = vsel %vm1616_vm12, %v3584_v58, %v1613_v27 }
 0x1e5   : > { %v3588_v55 = vpop.eup %3587  ;;  %v4960_v62 = vsel %vm1619_vm13, %v1621_v9, %v1617_v59  ;;  %v2520_v50 = vmul.f32 %v2456_v14, %v728_v46  ;;  %v4962_v19 = vadd.f32 1.0, %v793_v54  ;;  %v4965_v7 = vmul.f32 0.70710677, %v4952_v56 }
 0x1e6   : > { %v2711_v13 = vmul.f32 %v3586_v26, %v2391_v63  ;;  %v2166_v15 = vmul.f32 %v2102_v12, %v4938_v31  ;;  %v1911_v45 = vmul.f32 1.0614054, %v4960_v62  ;;  %v1145_v23 = vmul.f32 %v3588_v55, %v4941_v41  ;;  %v3590_v16 = vpop.eup %3589  ;;  %v564_v26 = vpop.f32.mrf.mxu3 }
 0x1e7   : > { %v3030_v32 = vadd.f32 1.0, %v2966_v10  ;;  %vm1149_vm14 = vweird.f32 %v4941_v41  ;;  %v1153_v30 = vand.u32 2147483647, %v4941_v41  ;;  %3593 = vrcp.f32 %v4962_v19 }
 0x1e8   : > { %v2775_v46 = vsub.f32 1.0, %v2711_v13  ;;  %v2230_v52 = vadd.f32 -0.28449672, %v2166_v15  ;;  %v1975_v60 = vadd.f32 -1.4531521, %v1911_v45  ;;  %v1146_v5 = vsub.f32 1.0, %v1145_v23 }
 0x1e9   : > { %v4973_v58 = vpop.eup %3591  ;;  %vm1150_vm15 = vweird.f32 %v3588_v55  ;;  %v1155_v61 = vand.u32 2147483648, %v4941_v41  ;;  %v2457_v36 = vsub.f32 0.0, %v729_v17  ;;  %v4977_v18 = vand.u32 2147483647, %v4965_v7 }
 0x1ea   : > { %v2903_v47 = vsub.f32 0.0, %v2775_v46  ;;  %v2294_v34 = vmul.f32 %v2230_v52, %v4938_v31  ;;  %v2039_v44 = vmul.f32 %v1975_v60, %v4960_v62  ;;  %v1147_v29 = vmul.f32 %v3588_v55, %v1146_v5  ;;  %vm1151_vm1 = vmor %vm1149_vm14, %vm1150_vm15 }
 0x1eb   : > { %v3094_v25 = vmul.f32 %v3030_v32, %v4882_v24  ;;  %vm4982_vm0 = vcmp.eq.f32.partialorder %v1153_v30, 8.507059e+37  ;;  %v2600_v38 = vmul.f32 1.442695, %v2520_v50  ;;  %v824_v0 = vmul.f32 0.3275911, %v4977_v18 }
 0x1ec   : > { %v2967_v53 = vsel %vm2839_vm11, %v2775_v46, %v2903_v47  ;;  %v2358_v33 = vadd.f32 0.2548296, %v2294_v34  ;;  %v2103_v3 = vadd.f32 1.4214138, %v2039_v44  ;;  %v1148_v43 = vadd.f32 %v3588_v55, %v1147_v29  ;;  %v437_v46 = vpop.f32.mrf.mxu0 }
 0x1ed   : > { %v3594_v8 = vpop.eup %3593  ;;  %v3031_v40 = vadd.f32 1.0, %v2967_v53  ;;  %v1156_v24 = vor.u32 1.1754944e-38, %v1155_v61  ;;  %v2521_v39 = vmul.f32 %v2457_v36, %v729_v17  ;;  %v4992_v49 = vadd.f32 1.0, %v824_v0 }
 0x1ee   : > { %v2422_v14 = vmul.f32 %v2358_v33, %v4938_v31  ;;  %v2167_v42 = vmul.f32 %v2103_v3, %v4960_v62  ;;  %v1152_v4 = vsel %vm1151_vm1, %v3588_v55, %v1148_v43  ;;  %v1160_v6 = vmul.f32 %v3594_v8, %v4962_v19 }
 0x1ef   : > { %v3095_v27 = vmul.f32 %v3031_v40, %v4885_v57  ;;  %v5000_v9 = vsel %vm4982_vm0, %v1156_v24, %v1152_v4  ;;  %vm1164_vm2 = vweird.f32 %v4962_v19  ;;  %3595 = vrcp.f32 %v4992_v49 }
 0x1f0   : > { %v2742_v41 = vmul.f32 %v3590_v16, %v2422_v14  ;;  %v2231_v17 = vadd.f32 -0.28449672, %v2167_v42  ;;  %v1880_v31 = vmul.f32 1.0614054, %v5000_v9  ;;  %v1161_v54 = vsub.f32 1.0, %v1160_v6 }
 0x1f1   : > { %v3151_v10 = vpack.c.bf16 %v3095_v27, %v3094_v25  ;;  %vm1165_vm3 = vweird.f32 %v3594_v8  ;;  %v1168_v63 = vand.u32 2147483647, %v4962_v19  ;;  %v1170_v57 = vand.u32 2147483648, %v4962_v19 }
 0x1f2   : > { %v2806_v12 = vsub.f32 1.0, %v2742_v41  ;;  %v2295_v59 = vmul.f32 %v2231_v17, %v4960_v62  ;;  %v1944_v55 = vadd.f32 -1.4531521, %v1880_v31  ;;  %v1162_v50 = vmul.f32 %v3594_v8, %v1161_v54  ;;  %vm1166_vm6 = vmor %vm1164_vm2, %vm1165_vm3 }
 0x1f3   : > { %3183 = vst [vmem:[%s4069_s9 + $0x38] sm:$0xff] %v3151_v10  ;;  %v630_v13 = vmul.f32 0.5, %v4835_v51  ;;  %vm2870_vm4 = vcmp.ge.f32.partialorder %v4852_v11, 0.0  ;;  %v631_v15 = vmul.f32 0.5, %v4855_v22  ;;  %v5013_v45 = vadd.f32 %v564_v26, %v3882_v2 }
 0x1f4   : > { %v2934_v23 = vsub.f32 0.0, %v2806_v12  ;;  %v2359_v16 = vadd.f32 0.2548296, %v2295_v59  ;;  %v2008_v32 = vmul.f32 %v1944_v55, %v5000_v9  ;;  %v1163_v30 = vadd.f32 %v3594_v8, %v1162_v50 }
 0x1f5   : > { %v3596_v52 = vpop.eup %3595  ;;  %vm2871_vm5 = vcmp.ge.f32.partialorder %v4871_v48, 0.0  ;;  %3597 = vpow2.f32 %v2600_v38  ;;  %vm1169_vm7 = vcmp.eq.f32.partialorder %v1168_v63, 8.507059e+37  ;;  %v1171_v51 = vor.u32 1.1754944e-38, %v1170_v57 }
 0x1f6   : > { %v5021_v22 = vmul.f32 0.70710677, %v5013_v45  ;;  %v2423_v60 = vmul.f32 %v2359_v16, %v4960_v62  ;;  %v2072_v5 = vadd.f32 1.4214138, %v2008_v32  ;;  %v1167_v61 = vsel %vm1166_vm6, %v3594_v8, %v1163_v30 }
 0x1f7   : > { %v2602_v36 = vmul.f32 1.442695, %v2521_v39  ;;  %v2998_v47 = vsel %vm2870_vm4, %v2806_v12, %v2934_v23  ;;  %v5026_v34 = vsel %vm1169_vm7, %v1171_v51, %v1167_v61  ;;  %v1625_v44 = vmul.f32 %v3596_v52, %v4992_v49 }
 0x1f8   : > { %v5030_v19 = vadd.f32 %v437_v46, %v3880_v1  ;;  %v2743_v29 = vmul.f32 %v4973_v58, %v2423_v60  ;;  %v2136_v25 = vmul.f32 %v2072_v5, %v5000_v9  ;;  %v1881_v37 = vmul.f32 1.0614054, %v5026_v34 }
 0x1f9   : > { %v5036_v62 = vand.u32 2147483647, %v5021_v22  ;;  %v1626_v38 = vsub.f32 1.0, %v1625_v44  ;;  %v1633_v11 = vand.u32 2147483647, %v4992_v49  ;;  %v1635_v0 = vand.u32 2147483648, %v4992_v49 }
 0x1fa   : > { %v2488_v53 = vsub.f32 0.0, %v4977_v18  ;;  %v3062_v33 = vadd.f32 1.0, %v2998_v47  ;;  %v2807_v3 = vsub.f32 1.0, %v2743_v29  ;;  %v2200_v43 = vadd.f32 -0.28449672, %v2136_v25  ;;  %v477_v25 = vpop.f32.mrf.mxu2 }
 0x1fb   : > { %v1945_v8 = vadd.f32 -1.4531521, %v1881_v37  ;;  %v3598_v40 = vpop.eup %3597  ;;  %v1627_v58 = vmul.f32 %v3596_v52, %v1626_v38  ;;  %vm1630_vm8 = vweird.f32 %v3596_v52  ;;  %v825_v24 = vmul.f32 0.3275911, %v5036_v62 }
 0x1fc   : > { %v5043_v39 = vmul.f32 0.70710677, %v5030_v19  ;;  %v2935_v14 = vsub.f32 0.0, %v2807_v3  ;;  %v2264_v42 = vmul.f32 %v2200_v43, %v5000_v9  ;;  %vm1629_vm9 = vweird.f32 %v4992_v49  ;;  %v526_v49 = vpop.f32.mrf.mxu1 }
 0x1fd   : > { %v2009_v4 = vmul.f32 %v1945_v8, %v5026_v34  ;;  %v1628_v6 = vadd.f32 %v3596_v52, %v1627_v58  ;;  %vm1634_vm10 = vcmp.eq.f32.partialorder %v1633_v11, 8.507059e+37  ;;  %v1636_v27 = vor.u32 1.1754944e-38, %v1635_v0  ;;  %vm1631_vm11 = vmor %vm1629_vm9, %vm1630_vm8 }
 0x1fe   : > { %v5048_v41 = vadd.f32 1.0, %v825_v24  ;;  %v2999_v17 = vsel %vm2871_vm5, %v2807_v3, %v2935_v14  ;;  %v2328_v31 = vadd.f32 0.2548296, %v2264_v42  ;;  %v5053_v26 = vand.u32 2147483647, %v5043_v39 }
 0x1ff   : > { %v2073_v54 = vadd.f32 1.4214138, %v2009_v4  ;;  %v3126_v10 = vmul.f32 %v3062_v33, %v630_v13  ;;  %v3063_v63 = vadd.f32 1.0, %v2999_v17  ;;  %v1632_v57 = vsel %vm1631_vm11, %v3596_v52, %v1628_v6 }
 0x200   : > { %3599 = vrcp.f32 %v5048_v41  ;;  %v2392_v12 = vmul.f32 %v2328_v31, %v5000_v9  ;;  %v5058_v55 = vsel %vm1634_vm10, %v1636_v27, %v1632_v57  ;;  %v794_v32 = vmul.f32 0.3275911, %v5053_v26 }
 0x201   : > { %v2137_v59 = vmul.f32 %v2073_v54, %v5026_v34  ;;  %v3127_v48 = vmul.f32 %v3063_v63, %v631_v15  ;;  %v1912_v50 = vmul.f32 1.0614054, %v5058_v55  ;;  %v5063_v13 = vadd.f32 %v526_v49, %v3882_v2 }
 0x202   : > { %v2712_v23 = vmul.f32 %v3598_v40, %v2392_v12  ;;  %3601 = vpow2.f32 %v2602_v36  ;;  %v2552_v9 = vmul.f32 %v2488_v53, %v4977_v18  ;;  %v5067_v60 = vadd.f32 1.0, %v794_v32 }
 0x203   : > { %v2201_v16 = vadd.f32 -0.28449672, %v2137_v59  ;;  %v3167_v30 = vpack.c.bf16 %v3127_v48, %v3126_v10  ;;  %v1976_v46 = vadd.f32 -1.4531521, %v1912_v50  ;;  %v600_v5 = vmul.f32 0.5, %v4903_v28 }
 0x204   : > { %v2776_v52 = vsub.f32 1.0, %v2712_v23  ;;  %vm2840_vm12 = vcmp.ge.f32.partialorder %v4913_v21, 0.0  ;;  %v601_v61 = vmul.f32 0.5, %v4930_v35  ;;  %v5076_v18 = vmul.f32 0.70710677, %v5063_v13 }
 0x205   : > { %v2265_v51 = vmul.f32 %v2201_v16, %v5026_v34  ;;  %3199 = vst [vmem:[%s4069_s9 + $0xb8] sm:$0xff] %v3167_v30  ;;  %v2040_v47 = vmul.f32 %v1976_v46, %v5058_v55  ;;  %vm2841_vm13 = vcmp.ge.f32.partialorder %v4944_v20, 0.0  ;;  %v2664_v38 = vmul.f32 1.442695, %v2552_v9 }
 0x206   : > { %v3600_v15 = vpop.eup %3599  ;;  %v2904_v44 = vsub.f32 0.0, %v2776_v52  ;;  %v2489_v28 = vsub.f32 0.0, %v5036_v62  ;;  %3603 = vrcp.f32 %v5067_v60  ;;  %v1648_v0 = vand.u32 2147483647, %v5048_v41 }
 0x207   : > { %v2329_v36 = vadd.f32 0.2548296, %v2265_v51  ;;  %v1640_v29 = vmul.f32 %v3600_v15, %v5048_v41  ;;  %v2104_v37 = vadd.f32 1.4214138, %v2040_v47  ;;  %v1650_v53 = vand.u32 2147483648, %v5048_v41 }
 0x208   : > { %v3602_v33 = vpop.eup %3601  ;;  %vm1645_vm14 = vweird.f32 %v3600_v15  ;;  %v2458_v43 = vsub.f32 0.0, %v5053_v26  ;;  %v5087_v8 = vadd.f32 %v477_v25, %v3880_v1  ;;  %v2968_v40 = vsel %vm2840_vm12, %v2776_v52, %v2904_v44 }
 0x209   : > { %v2393_v35 = vmul.f32 %v2329_v36, %v5026_v34  ;;  %v1641_v11 = vsub.f32 1.0, %v1640_v29  ;;  %v2168_v3 = vmul.f32 %v2104_v37, %v5058_v55  ;;  %v5092_v34 = vand.u32 2147483647, %v5076_v18 }
 0x20a   : > { %3605 = vpow2.f32 %v2664_v38  ;;  %vm1644_vm15 = vweird.f32 %v5048_v41  ;;  %v2553_v42 = vmul.f32 %v2489_v28, %v5036_v62  ;;  %vm1649_vm0 = vcmp.eq.f32.partialorder %v1648_v0, 8.507059e+37 }
 0x20b   : > { %v2713_v58 = vmul.f32 %v3602_v33, %v2393_v35  ;;  %v1642_v24 = vmul.f32 %v3600_v15, %v1641_v11  ;;  %v2232_v14 = vadd.f32 -0.28449672, %v2168_v3  ;;  %v795_v27 = vmul.f32 0.3275911, %v5092_v34  ;;  %vm1646_vm1 = vmor %vm1644_vm15, %vm1645_vm14  ;;  %v566_v11 = vpop.f32.mrf.mxu3 }
 0x20c   : > { %v3604_v17 = vpop.eup %3603  ;;  %v3032_v31 = vadd.f32 1.0, %v2968_v40  ;;  %v1651_v54 = vor.u32 1.1754944e-38, %v1650_v53  ;;  %v5100_v10 = vmul.f32 0.70710677, %v5087_v8  ;;  %v2522_v62 = vmul.f32 %v2458_v43, %v5053_v26 }
 0x20d   : > { %v2777_v4 = vsub.f32 1.0, %v2713_v58  ;;  %v1643_v6 = vadd.f32 %v3600_v15, %v1642_v24  ;;  %v2296_v21 = vmul.f32 %v2232_v14, %v5058_v55  ;;  %v1175_v41 = vmul.f32 %v3604_v17, %v5067_v60 }
 0x20e   : > { %v1185_v59 = vand.u32 2147483648, %v5067_v60  ;;  %v5107_v48 = vadd.f32 1.0, %v795_v27  ;;  %v5113_v32 = vand.u32 2147483647, %v5100_v10  ;;  %v3096_v46 = vmul.f32 %v3032_v31, %v600_v5  ;;  %v440_v27 = vpop.f32.mrf.mxu0 }
 0x20f   : > { %v2905_v63 = vsub.f32 0.0, %v2777_v4  ;;  %v1647_v57 = vsel %vm1646_vm1, %v3600_v15, %v1643_v6  ;;  %v2360_v49 = vadd.f32 0.2548296, %v2296_v21  ;;  %v1176_v16 = vsub.f32 1.0, %v1175_v41 }
 0x210   : > { %v5104_v12 = vsel %vm1649_vm0, %v1651_v54, %v1647_v57  ;;  %v3606_v30 = vpop.eup %3605  ;;  %3607 = vrcp.f32 %v5107_v48  ;;  %vm1180_vm2 = vweird.f32 %v3604_v17  ;;  %v1183_v15 = vand.u32 2147483647, %v5067_v60 }
 0x211   : > { %v2969_v50 = vsel %vm2841_vm13, %v2777_v4, %v2905_v63  ;;  %v1913_v23 = vmul.f32 1.0614054, %v5104_v12  ;;  %v2424_v26 = vmul.f32 %v2360_v49, %v5058_v55  ;;  %v1177_v51 = vmul.f32 %v3604_v17, %v1176_v16 }
 0x212   : > { %v3033_v9 = vadd.f32 1.0, %v2969_v50  ;;  %v826_v44 = vmul.f32 0.3275911, %v5113_v32  ;;  %v5120_v36 = vmul.f32 0.5, %v4952_v56  ;;  %vm1179_vm3 = vweird.f32 %v5067_v60 }
 0x213   : > { %v1977_v52 = vadd.f32 -1.4531521, %v1913_v23  ;;  %v2744_v47 = vmul.f32 %v3606_v30, %v2424_v26  ;;  %v1178_v29 = vadd.f32 %v3604_v17, %v1177_v51  ;;  %v2666_v25 = vmul.f32 1.442695, %v2553_v42  ;;  %vm1181_vm4 = vmor %vm1179_vm3, %vm1180_vm2 }
 0x214   : > { %v3097_v20 = vmul.f32 %v3033_v9, %v601_v61  ;;  %v1186_v37 = vor.u32 1.1754944e-38, %v1185_v59  ;;  %v5124_v38 = vadd.f32 1.0, %v826_v44  ;;  %vm1184_vm5 = vcmp.eq.f32.partialorder %v1183_v15, 8.507059e+37 }
 0x215   : > { %v2041_v5 = vmul.f32 %v1977_v52, %v5104_v12  ;;  %v1182_v61 = vsel %vm1181_vm4, %v3604_v17, %v1178_v29  ;;  %v2604_v35 = vmul.f32 1.442695, %v2522_v62  ;;  %v2808_v56 = vsub.f32 1.0, %v2744_v47 }
 0x216   : > { %v3152_v55 = vpack.c.bf16 %v3097_v20, %v3096_v46  ;;  %v3608_v0 = vpop.eup %3607  ;;  %v5127_v53 = vsel %vm1184_vm5, %v1186_v37, %v1182_v61  ;;  %v2459_v33 = vsub.f32 0.0, %v5092_v34  ;;  %3609 = vrcp.f32 %v5124_v38 }
 0x217   : > { %v2105_v28 = vadd.f32 1.4214138, %v2041_v5  ;;  %vm2872_vm6 = vcmp.ge.f32.partialorder %v4965_v7, 0.0  ;;  %v1882_v3 = vmul.f32 1.0614054, %v5127_v53  ;;  %v1190_v43 = vmul.f32 %v3608_v0, %v5107_v48 }
 0x218   : > { %3184 = vst [vmem:[%s4069_s9 + $0x40] sm:$0xff] %v3152_v55  ;;  %v5136_v40 = vmul.f32 0.5, %v5013_v45  ;;  %v1198_v58 = vand.u32 2147483647, %v5107_v48  ;;  %v1200_v24 = vand.u32 2147483648, %v5107_v48  ;;  %v5141_v14 = vadd.f32 %v566_v11, %v3882_v2 }
 0x219   : > { %v2169_v60 = vmul.f32 %v2105_v28, %v5104_v12  ;;  %3611 = vpow2.f32 %v2666_v25  ;;  %v1946_v4 = vadd.f32 -1.4531521, %v1882_v3  ;;  %v1191_v6 = vsub.f32 1.0, %v1190_v43 }
 0x21a   : > { %v2936_v17 = vsub.f32 0.0, %v2808_v56  ;;  %3613 = vpow2.f32 %v2604_v35  ;;  %vm1194_vm7 = vweird.f32 %v5107_v48  ;;  %v2523_v31 = vmul.f32 %v2459_v33, %v5092_v34 }
 0x21b   : > { %v2233_v42 = vadd.f32 -0.28449672, %v2169_v60  ;;  %v2010_v21 = vmul.f32 %v1946_v4, %v5127_v53  ;;  %v1192_v54 = vmul.f32 %v3608_v0, %v1191_v6  ;;  %vm1195_vm8 = vweird.f32 %v3608_v0  ;;  %v529_v4 = vpop.f32.mrf.mxu1 }
 0x21c   : > { %v3610_v63 = vpop.eup %3609  ;;  %vm5147_vm9 = vcmp.eq.f32.partialorder %v1198_v58, 8.507059e+37  ;;  %v1201_v41 = vor.u32 1.1754944e-38, %v1200_v24  ;;  %v5152_v62 = vmul.f32 0.70710677, %v5141_v14  ;;  %v5155_v49 = vadd.f32 %v440_v27, %v3880_v1  ;;  %vm1196_vm10 = vmor %vm1194_vm7, %vm1195_vm8 }
 0x21d   : > { %v2297_v45 = vmul.f32 %v2233_v42, %v5104_v12  ;;  %v2074_v34 = vadd.f32 1.4214138, %v2010_v21  ;;  %v1193_v50 = vadd.f32 %v3608_v0, %v1192_v54  ;;  %v1655_v23 = vmul.f32 %v3610_v63, %v5124_v38 }
 0x21e   : > { %v3000_v16 = vsel %vm2872_vm6, %v2808_v56, %v2936_v17  ;;  %v1663_v30 = vand.u32 2147483647, %v5124_v38  ;;  %v1665_v46 = vand.u32 2147483648, %v5124_v38  ;;  %v5165_v9 = vand.u32 2147483647, %v5152_v62 }
 0x21f   : > { %v2361_v59 = vadd.f32 0.2548296, %v2297_v45  ;;  %v3612_v26 = vpop.eup %3611  ;;  %v2138_v51 = vmul.f32 %v2074_v34, %v5127_v53  ;;  %v1197_v15 = vsel %vm1196_vm10, %v3608_v0, %v1193_v50  ;;  %v1656_v20 = vsub.f32 1.0, %v1655_v23 }
 0x220   : > { %v3614_v47 = vpop.eup %3613  ;;  %v5171_v7 = vsel %vm5147_vm9, %v1201_v41, %v1197_v15  ;;  %vm1660_vm11 = vweird.f32 %v3610_v63  ;;  %v827_v48 = vmul.f32 0.3275911, %v5165_v9  ;;  %v5175_v44 = vmul.f32 0.70710677, %v5155_v49 }
 0x221   : > { %v2425_v52 = vmul.f32 %v2361_v59, %v5104_v12  ;;  %v2202_v29 = vadd.f32 -0.28449672, %v2138_v51  ;;  %v1883_v55 = vmul.f32 1.0614054, %v5171_v7  ;;  %v1657_v12 = vmul.f32 %v3610_v63, %v1656_v20 }
 0x222   : > { %v3064_v25 = vadd.f32 1.0, %v3000_v16  ;;  %vm1659_vm12 = vweird.f32 %v5124_v38  ;;  %v2490_v37 = vsub.f32 0.0, %v5113_v32  ;;  %v5180_v28 = vadd.f32 1.0, %v827_v48 }
 0x223   : > { %v2745_v5 = vmul.f32 %v3612_v26, %v2425_v52  ;;  %v2266_v35 = vmul.f32 %v2202_v29, %v5127_v53  ;;  %v1947_v11 = vadd.f32 -1.4531521, %v1883_v55  ;;  %v1658_v0 = vadd.f32 %v3610_v63, %v1657_v12  ;;  %vm1661_vm13 = vmor %vm1659_vm12, %vm1660_vm11 }
 0x224   : > { %vm1664_vm14 = vcmp.eq.f32.partialorder %v1663_v30, 8.507059e+37  ;;  %v1666_v56 = vor.u32 1.1754944e-38, %v1665_v46  ;;  %3615 = vrcp.f32 %v5180_v28  ;;  %v5186_v33 = vand.u32 2147483647, %v5175_v44  ;;  %v480_v30 = vpop.f32.mrf.mxu2 }
 0x225   : > { %v2809_v61 = vsub.f32 1.0, %v2745_v5  ;;  %v2330_v38 = vadd.f32 0.2548296, %v2266_v35  ;;  %v2011_v3 = vmul.f32 %v1947_v11, %v5171_v7  ;;  %v1662_v43 = vsel %vm1661_vm13, %v3610_v63, %v1658_v0 }
 0x226   : > { %vm2873_vm15 = vcmp.ge.f32.partialorder %v5021_v22, 0.0  ;;  %v2606_v58 = vmul.f32 1.442695, %v2523_v31  ;;  %v5190_v24 = vsel %vm1664_vm14, %v1666_v56, %v1662_v43  ;;  %v2554_v42 = vmul.f32 %v2490_v37, %v5113_v32 }
 0x227   : > { %v2937_v60 = vsub.f32 0.0, %v2809_v61  ;;  %v2394_v27 = vmul.f32 %v2330_v38, %v5127_v53  ;;  %v2075_v17 = vadd.f32 1.4214138, %v2011_v3  ;;  %v1914_v45 = vmul.f32 1.0614054, %v5190_v24 }
 0x228   : > { %v3128_v21 = vmul.f32 %v3064_v25, %v5120_v36  ;;  %v5197_v57 = vmul.f32 0.5, %v5030_v19  ;;  %v796_v22 = vmul.f32 0.3275911, %v5186_v33  ;;  %v5202_v32 = vadd.f32 %v529_v4, %v3882_v2 }
 0x229   : > { %v3001_v6 = vsel %vm2873_vm15, %v2809_v61, %v2937_v60  ;;  %v2714_v31 = vmul.f32 %v3614_v47, %v2394_v27  ;;  %v2139_v63 = vmul.f32 %v2075_v17, %v5171_v7  ;;  %v1978_v41 = vadd.f32 -1.4531521, %v1914_v45 }
 0x22a   : > { %v3065_v54 = vadd.f32 1.0, %v3001_v6  ;;  %v3616_v59 = vpop.eup %3615  ;;  %3617 = vpow2.f32 %v2606_v58  ;;  %v2668_v34 = vmul.f32 1.442695, %v2554_v42  ;;  %v5205_v36 = vadd.f32 1.0, %v796_v22 }
 0x22b   : > { %v2778_v50 = vsub.f32 1.0, %v2714_v31  ;;  %v2203_v19 = vadd.f32 -0.28449672, %v2139_v63  ;;  %v2042_v23 = vmul.f32 %v1978_v41, %v5190_v24  ;;  %v1670_v16 = vmul.f32 %v3616_v59, %v5180_v28 }
 0x22c   : > { %v3129_v53 = vmul.f32 %v3065_v54, %v5136_v40  ;;  %v1678_v26 = vand.u32 2147483647, %v5180_v28  ;;  %v2491_v52 = vsub.f32 0.0, %v5165_v9  ;;  %3619 = vrcp.f32 %v5205_v36 }
 0x22d   : > { %v2267_v40 = vmul.f32 %v2203_v19, %v5171_v7  ;;  %v2106_v51 = vadd.f32 1.4214138, %v2042_v23  ;;  %v1671_v15 = vsub.f32 1.0, %v1670_v16  ;;  %v5214_v20 = vmul.f32 0.70710677, %v5202_v32 }
 0x22e   : > { %v3168_v46 = vpack.c.bf16 %v3129_v53, %v3128_v21  ;;  %vm2842_vm0 = vcmp.ge.f32.partialorder %v5043_v39, 0.0  ;;  %v2906_v47 = vsub.f32 0.0, %v2778_v50  ;;  %v1680_v48 = vand.u32 2147483648, %v5180_v28 }
 0x22f   : > { %v5220_v5 = vadd.f32 %v480_v30, %v3880_v1  ;;  %v2331_v29 = vadd.f32 0.2548296, %v2267_v40  ;;  %v2170_v55 = vmul.f32 %v2106_v51, %v5190_v24  ;;  %v1672_v12 = vmul.f32 %v3616_v59, %v1671_v15 }
 0x230   : > { %3200 = vst [vmem:[%s4069_s9 + $0xc0] sm:$0xff] %v3168_v46  ;;  %vm1675_vm1 = vweird.f32 %v3616_v59  ;;  %v3618_v25 = vpop.eup %3617  ;;  %3621 = vpow2.f32 %v2668_v34  ;;  %vm1674_vm2 = vweird.f32 %v5180_v28  ;;  %vm5224_vm3 = vcmp.eq.f32.partialorder %v1678_v26, 8.507059e+37 }
 0x231   : > { %v2555_v61 = vmul.f32 %v2491_v52, %v5165_v9  ;;  %v2395_v35 = vmul.f32 %v2331_v29, %v5171_v7  ;;  %v2234_v11 = vadd.f32 -0.28449672, %v2170_v55  ;;  %v1673_v0 = vadd.f32 %v3616_v59, %v1672_v12  ;;  %vm1676_vm4 = vmor %vm1674_vm2, %vm1675_vm1  ;;  %v569_v12 = vpop.f32.mrf.mxu3 }
 0x232   : > { %v5231_v56 = vand.u32 2147483647, %v5214_v20  ;;  %v3620_v60 = vpop.eup %3619  ;;  %v2970_v38 = vsel %vm2842_vm0, %v2778_v50, %v2906_v47  ;;  %v1681_v3 = vor.u32 1.1754944e-38, %v1680_v48  ;;  %vm1209_vm5 = vweird.f32 %v5205_v36 }
 0x233   : > { %v5237_v28 = vmul.f32 0.70710677, %v5220_v5  ;;  %v2715_v43 = vmul.f32 %v3618_v25, %v2395_v35  ;;  %v2298_v9 = vmul.f32 %v2234_v11, %v5190_v24  ;;  %v1677_v7 = vsel %vm1676_vm4, %v3616_v59, %v1673_v0 }
 0x234   : > { %v1205_v58 = vmul.f32 %v3620_v60, %v5205_v36  ;;  %v5243_v42 = vsel %vm5224_vm3, %v1681_v3, %v1677_v7  ;;  %v1213_v39 = vand.u32 2147483647, %v5205_v36  ;;  %v1215_v4 = vand.u32 2147483648, %v5205_v36 }
 0x235   : > { %v797_v6 = vmul.f32 0.3275911, %v5231_v56  ;;  %v2779_v27 = vsub.f32 1.0, %v2715_v43  ;;  %v2362_v17 = vadd.f32 0.2548296, %v2298_v9  ;;  %v3034_v22 = vadd.f32 1.0, %v2970_v38  ;;  %v442_v38 = vpop.f32.mrf.mxu0 }
 0x236   : > { %v1915_v45 = vmul.f32 1.0614054, %v5243_v42  ;;  %v1206_v21 = vsub.f32 1.0, %v1205_v58  ;;  %v3622_v54 = vpop.eup %3621  ;;  %vm1210_vm6 = vweird.f32 %v3620_v60  ;;  %v5252_v63 = vand.u32 2147483647, %v5237_v28 }
 0x237   : > { %v5249_v31 = vadd.f32 1.0, %v797_v6  ;;  %v2907_v41 = vsub.f32 0.0, %v2779_v27  ;;  %v2426_v59 = vmul.f32 %v2362_v17, %v5190_v24  ;;  %v603_v50 = vmul.f32 0.5, %v5063_v13  ;;  %vm1211_vm8 = vmor %vm1209_vm5, %vm1210_vm6 }
 0x238   : > { %v1979_v53 = vadd.f32 -1.4531521, %v1915_v45  ;;  %v1207_v34 = vmul.f32 %v3620_v60, %v1206_v21  ;;  %vm2843_vm7 = vcmp.ge.f32.partialorder %v5076_v18, 0.0  ;;  %v2670_v19 = vmul.f32 1.442695, %v2555_v61 }
 0x239   : > { %3623 = vrcp.f32 %v5249_v31  ;;  %v2971_v23 = vsel %vm2843_vm7, %v2779_v27, %v2907_v41  ;;  %v2746_v16 = vmul.f32 %v3622_v54, %v2426_v59  ;;  %v3098_v26 = vmul.f32 %v3034_v22, %v5197_v57 }
 0x23a   : > { %v2043_v30 = vmul.f32 %v1979_v53, %v5243_v42  ;;  %v1208_v46 = vadd.f32 %v3620_v60, %v1207_v34  ;;  %v3035_v52 = vadd.f32 1.0, %v2971_v23  ;;  %v1216_v24 = vor.u32 1.1754944e-38, %v1215_v4 }
 0x23b   : > { %v2460_v13 = vsub.f32 0.0, %v5186_v33  ;;  %vm1214_vm9 = vcmp.eq.f32.partialorder %v1213_v39, 8.507059e+37  ;;  %v828_v51 = vmul.f32 0.3275911, %v5252_v63  ;;  %v5266_v47 = vmul.f32 0.5, %v5087_v8 }
 0x23c   : > { %v2107_v40 = vadd.f32 1.4214138, %v2043_v30  ;;  %v1212_v18 = vsel %vm1211_vm8, %v3620_v60, %v1208_v46  ;;  %v3099_v15 = vmul.f32 %v3035_v52, %v603_v50  ;;  %vm2874_vm10 = vcmp.ge.f32.partialorder %v5100_v10, 0.0 }
 0x23d   : > { %v5269_v57 = vsel %vm1214_vm9, %v1216_v24, %v1212_v18  ;;  %v2810_v48 = vsub.f32 1.0, %v2746_v16  ;;  %v5273_v55 = vadd.f32 1.0, %v828_v51  ;;  %v5276_v61 = vmul.f32 0.5, %v5141_v14 }
 0x23e   : > { %v2171_v36 = vmul.f32 %v2107_v40, %v5243_v42  ;;  %v1884_v29 = vmul.f32 1.0614054, %v5269_v57  ;;  %v3153_v37 = vpack.c.bf16 %v3099_v15, %v3098_v26  ;;  %v2524_v8 = vmul.f32 %v2460_v13, %v5186_v33 }
 0x23f   : > { %v3624_v25 = vpop.eup %3623  ;;  %v2461_v35 = vsub.f32 0.0, %v5231_v56  ;;  %3625 = vpow2.f32 %v2670_v19  ;;  %v1228_v3 = vand.u32 2147483647, %v5249_v31  ;;  %v1230_v43 = vand.u32 2147483648, %v5249_v31 }
 0x240   : > { %v2235_v11 = vadd.f32 -0.28449672, %v2171_v36  ;;  %v1948_v0 = vadd.f32 -1.4531521, %v1884_v29  ;;  %v1220_v60 = vmul.f32 %v3624_v25, %v5249_v31  ;;  %3185 = vst [vmem:[%s4069_s9 + $0x48] sm:$0xff] %v3153_v37  ;;  %3627 = vrcp.f32 %v5273_v55 }
 0x241   : > { %v5286_v14 = vadd.f32 %v569_v12, %v3882_v2  ;;  %v2938_v9 = vsub.f32 0.0, %v2810_v48  ;;  %v2608_v39 = vmul.f32 1.442695, %v2524_v8  ;;  %vm1224_vm11 = vweird.f32 %v5249_v31  ;;  %v531_v8 = vpop.f32.mrf.mxu1 }
 0x242   : > { %v2299_v33 = vmul.f32 %v2235_v11, %v5243_v42  ;;  %v2012_v7 = vmul.f32 %v1948_v0, %v5269_v57  ;;  %v1221_v58 = vsub.f32 1.0, %v1220_v60  ;;  %v2525_v4 = vmul.f32 %v2461_v35, %v5231_v56 }
 0x243   : > { %v5293_v6 = vadd.f32 %v442_v38, %v3880_v1  ;;  %vm1225_vm12 = vweird.f32 %v3624_v25  ;;  %vm2875_vm13 = vcmp.ge.f32.partialorder %v5152_v62, 0.0  ;;  %vm5296_vm14 = vcmp.eq.f32.partialorder %v1228_v3, 8.507059e+37 }
 0x244   : > { %v2363_v27 = vadd.f32 0.2548296, %v2299_v33  ;;  %v2076_v17 = vadd.f32 1.4214138, %v2012_v7  ;;  %v1222_v45 = vmul.f32 %v3624_v25, %v1221_v58  ;;  %v1231_v54 = vor.u32 1.1754944e-38, %v1230_v43  ;;  %vm1226_vm15 = vmor %vm1224_vm11, %vm1225_vm12 }
 0x245   : > { %v5301_v22 = vmul.f32 0.70710677, %v5286_v14  ;;  %v3626_v41 = vpop.eup %3625  ;;  %v3002_v56 = vsel %vm2874_vm10, %v2810_v48, %v2938_v9  ;;  %3629 = vpow2.f32 %v2608_v39  ;;  %v2610_v19 = vmul.f32 1.442695, %v2525_v4 }
 0x246   : > { %v2427_v59 = vmul.f32 %v2363_v27, %v5243_v42  ;;  %v2140_v53 = vmul.f32 %v2076_v17, %v5269_v57  ;;  %v1223_v34 = vadd.f32 %v3624_v25, %v1222_v45  ;;  %v3628_v50 = vpop.eup %3627  ;;  %v5313_v16 = vmul.f32 0.70710677, %v5293_v6 }
 0x247   : > { %v5310_v23 = vand.u32 2147483647, %v5301_v22  ;;  %v1685_v42 = vmul.f32 %v3628_v50, %v5273_v55  ;;  %v3066_v26 = vadd.f32 1.0, %v3002_v56  ;;  %v1693_v31 = vand.u32 2147483647, %v5273_v55 }
 0x248   : > { %v2747_v30 = vmul.f32 %v3626_v41, %v2427_v59  ;;  %v2204_v10 = vadd.f32 -0.28449672, %v2140_v53  ;;  %v1227_v46 = vsel %vm1226_vm15, %v3624_v25, %v1223_v34  ;;  %vm1690_vm0 = vweird.f32 %v3628_v50 }
 0x249   : > { %v5318_v52 = vsel %vm5296_vm14, %v1231_v54, %v1227_v46  ;;  %v829_v24 = vmul.f32 0.3275911, %v5310_v23  ;;  %v1686_v51 = vsub.f32 1.0, %v1685_v42  ;;  %v1695_v15 = vand.u32 2147483648, %v5273_v55  ;;  %v482_v42 = vpop.f32.mrf.mxu2 }
 0x24a   : > { %v2811_v13 = vsub.f32 1.0, %v2747_v30  ;;  %v2268_v40 = vmul.f32 %v2204_v10, %v5269_v57  ;;  %v1885_v18 = vmul.f32 1.0614054, %v5318_v52  ;;  %v5328_v36 = vand.u32 2147483647, %v5313_v16 }
 0x24b   : > { %v5325_v48 = vadd.f32 1.0, %v829_v24  ;;  %v1687_v37 = vmul.f32 %v3628_v50, %v1686_v51  ;;  %v3630_v35 = vpop.eup %3629  ;;  %v3130_v11 = vmul.f32 %v3066_v26, %v5266_v47  ;;  %vm1689_vm1 = vweird.f32 %v5273_v55 }
 0x24c   : > { %v2939_v29 = vsub.f32 0.0, %v2811_v13  ;;  %v2332_v12 = vadd.f32 0.2548296, %v2268_v40  ;;  %v1949_v25 = vadd.f32 -1.4531521, %v1885_v18  ;;  %v2492_v0 = vsub.f32 0.0, %v5252_v63  ;;  %vm1691_vm2 = vmor %vm1689_vm1, %vm1690_vm0 }
 0x24d   : > { %3631 = vrcp.f32 %v5325_v48  ;;  %v1688_v43 = vadd.f32 %v3628_v50, %v1687_v37  ;;  %vm1694_vm3 = vcmp.eq.f32.partialorder %v1693_v31, 8.507059e+37  ;;  %v1696_v33 = vor.u32 1.1754944e-38, %v1695_v15 }
 0x24e   : > { %v3003_v60 = vsel %vm2875_vm13, %v2811_v13, %v2939_v29  ;;  %v2396_v38 = vmul.f32 %v2332_v12, %v5269_v57  ;;  %v2013_v3 = vmul.f32 %v1949_v25, %v5318_v52  ;;  %v5340_v47 = vadd.f32 %v531_v8, %v3882_v2 }
 0x24f   : > { %v3067_v9 = vadd.f32 1.0, %v3003_v60  ;;  %v1692_v58 = vsel %vm1691_vm2, %v3628_v50, %v1688_v43  ;;  %v798_v39 = vmul.f32 0.3275911, %v5328_v36  ;;  %v2556_v4 = vmul.f32 %v2492_v0, %v5252_v63 }
 0x250   : > { %v2716_v55 = vmul.f32 %v3630_v35, %v2396_v38  ;;  %v2077_v7 = vadd.f32 1.4214138, %v2013_v3  ;;  %v5344_v57 = vsel %vm1694_vm3, %v1696_v33, %v1692_v58  ;;  %v5348_v27 = vmul.f32 0.5, %v5155_v49 }
 0x251   : > { %v3131_v62 = vmul.f32 %v3067_v9, %v5276_v61  ;;  %v1916_v45 = vmul.f32 1.0614054, %v5344_v57  ;;  %v5352_v21 = vadd.f32 1.0, %v798_v39  ;;  %vm2844_vm4 = vcmp.ge.f32.partialorder %v5175_v44, 0.0 }
 0x252   : > { %v2141_v17 = vmul.f32 %v2077_v7, %v5318_v52  ;;  %v2780_v56 = vsub.f32 1.0, %v2716_v55  ;;  %3633 = vpow2.f32 %v2610_v19  ;;  %v5357_v63 = vmul.f32 0.70710677, %v5340_v47 }
 0x253   : > { %v3632_v54 = vpop.eup %3631  ;;  %v3169_v41 = vpack.c.bf16 %v3131_v62, %v3130_v11  ;;  %v1980_v59 = vadd.f32 -1.4531521, %v1916_v45  ;;  %v5361_v49 = vmul.f32 0.5, %v5202_v32  ;;  %v2672_v34 = vmul.f32 1.442695, %v2556_v4 }
 0x254   : > { %v2205_v61 = vadd.f32 -0.28449672, %v2141_v17  ;;  %v1700_v53 = vmul.f32 %v3632_v54, %v5325_v48  ;;  %v2493_v50 = vsub.f32 0.0, %v5310_v23  ;;  %3635 = vrcp.f32 %v5352_v21 }
 0x255   : > { %3201 = vst [vmem:[%s4069_s9 + $0xc8] sm:$0xff] %v3169_v41  ;;  %v5367_v19 = vmul.f32 0.5, %v5220_v5  ;;  %v2044_v10 = vmul.f32 %v1980_v59, %v5344_v57  ;;  %v2908_v26 = vsub.f32 0.0, %v2780_v56  ;;  %vm1705_vm5 = vweird.f32 %v3632_v54 }
 0x256   : > { %v2269_v30 = vmul.f32 %v2205_v61, %v5318_v52  ;;  %v1701_v46 = vsub.f32 1.0, %v1700_v53  ;;  %v1708_v31 = vand.u32 2147483647, %v5325_v48  ;;  %v1710_v32 = vand.u32 2147483648, %v5325_v48 }
 0x257   : > { %v2108_v13 = vadd.f32 1.4214138, %v2044_v10  ;;  %v5373_v18 = vand.u32 2147483647, %v5357_v63  ;;  %vm2845_vm6 = vcmp.ge.f32.partialorder %v5214_v20, 0.0  ;;  %3637 = vpow2.f32 %v2672_v34 }
 0x258   : > { %v2333_v24 = vadd.f32 0.2548296, %v2269_v30  ;;  %v1702_v40 = vmul.f32 %v3632_v54, %v1701_v46  ;;  %v3634_v51 = vpop.eup %3633  ;;  %vm1704_vm7 = vweird.f32 %v5325_v48  ;;  %v2557_v5 = vmul.f32 %v2493_v50, %v5310_v23 }
 0x259   : > { %v5379_v15 = vadd.f32 %v482_v42, %v3880_v1  ;;  %v2172_v12 = vmul.f32 %v2108_v13, %v5344_v57  ;;  %v799_v37 = vmul.f32 0.3275911, %v5373_v18  ;;  %v2972_v35 = vsel %vm2844_vm4, %v2780_v56, %v2908_v26  ;;  %vm1706_vm8 = vmor %vm1704_vm7, %vm1705_vm5 }
 0x25a   : > { %v2397_v29 = vmul.f32 %v2333_v24, %v5318_v52  ;;  %v1703_v25 = vadd.f32 %v3632_v54, %v1702_v40  ;;  %v3636_v8 = vpop.eup %3635  ;;  %vm1709_vm9 = vcmp.eq.f32.partialorder %v1708_v31, 8.507059e+37  ;;  %v1711_v48 = vor.u32 1.1754944e-38, %v1710_v32 }
 0x25b   : > { %v2462_v23 = vsub.f32 0.0, %v5328_v36  ;;  %v2236_v0 = vadd.f32 -0.28449672, %v2172_v12  ;;  %v1235_v52 = vmul.f32 %v3636_v8, %v5352_v21  ;;  %v1243_v3 = vand.u32 2147483647, %v5352_v21  ;;  %v571_v12 = vpop.f32.mrf.mxu3 }
 0x25c   : > { %v2717_v11 = vmul.f32 %v3634_v51, %v2397_v29  ;;  %v1707_v60 = vsel %vm1706_vm8, %v3632_v54, %v1703_v25  ;;  %v5392_v43 = vadd.f32 1.0, %v799_v37  ;;  %v5395_v44 = vmul.f32 0.70710677, %v5379_v15  ;;  %v445_v25 = vpop.f32.mrf.mxu0 }
 0x25d   : > { %v5389_v38 = vsel %vm1709_vm9, %v1711_v48, %v1707_v60  ;;  %v2300_v33 = vmul.f32 %v2236_v0, %v5344_v57  ;;  %v1236_v7 = vsub.f32 1.0, %v1235_v52  ;;  %v3638_v58 = vpop.eup %3637  ;;  %v3036_v39 = vadd.f32 1.0, %v2972_v35 }
 0x25e   : > { %v2781_v9 = vsub.f32 1.0, %v2717_v11  ;;  %v1917_v55 = vmul.f32 1.0614054, %v5389_v38  ;;  %vm1240_vm10 = vweird.f32 %v3636_v8  ;;  %v1245_v62 = vand.u32 2147483648, %v5352_v21 }
 0x25f   : > { %3639 = vrcp.f32 %v5392_v43  ;;  %v2364_v17 = vadd.f32 0.2548296, %v2300_v33  ;;  %v1237_v54 = vmul.f32 %v3636_v8, %v1236_v7  ;;  %vm1239_vm11 = vweird.f32 %v5352_v21 }
 0x260   : > { %v2909_v4 = vsub.f32 0.0, %v2781_v9  ;;  %v1981_v45 = vadd.f32 -1.4531521, %v1917_v55  ;;  %vm5402_vm12 = vcmp.eq.f32.partialorder %v1243_v3, 8.507059e+37  ;;  %v2526_v56 = vmul.f32 %v2462_v23, %v5328_v36  ;;  %vm1241_vm13 = vmor %vm1239_vm11, %vm1240_vm10 }
 0x261   : > { %v5408_v61 = vand.u32 2147483647, %v5395_v44  ;;  %v2428_v53 = vmul.f32 %v2364_v17, %v5344_v57  ;;  %v1238_v50 = vadd.f32 %v3636_v8, %v1237_v54  ;;  %v3100_v30 = vmul.f32 %v3036_v39, %v5348_v27 }
 0x262   : > { %v2973_v59 = vsel %vm2845_vm6, %v2781_v9, %v2909_v4  ;;  %v2045_v34 = vmul.f32 %v1981_v45, %v5389_v38  ;;  %v1246_v10 = vor.u32 1.1754944e-38, %v1245_v62  ;;  %v2463_v31 = vsub.f32 0.0, %v5373_v18 }
 0x263   : > { %v3037_v21 = vadd.f32 1.0, %v2973_v59  ;;  %v830_v46 = vmul.f32 0.3275911, %v5408_v61  ;;  %v2748_v36 = vmul.f32 %v3638_v58, %v2428_v53  ;;  %v1242_v26 = vsel %vm1241_vm13, %v3636_v8, %v1238_v50 }
 0x264   : > { %v2109_v42 = vadd.f32 1.4214138, %v2045_v34  ;;  %v2674_v57 = vmul.f32 1.442695, %v2557_v5  ;;  %v5421_v24 = vsel %vm5402_vm12, %v1246_v10, %v1242_v26  ;;  %vm2876_vm14 = vcmp.ge.f32.partialorder %v5237_v28, 0.0 }
 0x265   : > { %v3640_v20 = vpop.eup %3639  ;;  %v3101_v32 = vmul.f32 %v3037_v21, %v5361_v49  ;;  %v5423_v27 = vadd.f32 1.0, %v830_v46  ;;  %v1886_v40 = vmul.f32 1.0614054, %v5421_v24  ;;  %v2612_v51 = vmul.f32 1.442695, %v2526_v56 }
 0x266   : > { %v2173_v13 = vmul.f32 %v2109_v42, %v5389_v38  ;;  %v1250_v29 = vmul.f32 %v3640_v20, %v5392_v43  ;;  %v2812_v5 = vsub.f32 1.0, %v2748_v36  ;;  %v1258_v37 = vand.u32 2147483647, %v5392_v43 }
 0x267   : > { %v3154_v49 = vpack.c.bf16 %v3101_v32, %v3100_v30  ;;  %3641 = vrcp.f32 %v5423_v27  ;;  %v1950_v35 = vadd.f32 -1.4531521, %v1886_v40  ;;  %v2527_v23 = vmul.f32 %v2463_v31, %v5373_v18 }
 0x268   : > { %v2237_v8 = vadd.f32 -0.28449672, %v2173_v13  ;;  %v1251_v48 = vsub.f32 1.0, %v1250_v29  ;;  %3643 = vpow2.f32 %v2674_v57  ;;  %v1260_v11 = vand.u32 2147483648, %v5392_v43 }
 0x269   : > { %3186 = vst [vmem:[%s4069_s9 + $0x50] sm:$0xff] %v3154_v49  ;;  %v5435_v0 = vadd.f32 %v571_v12, %v3882_v2  ;;  %v5438_v60 = vadd.f32 %v445_v25, %v3880_v1  ;;  %v2014_v3 = vmul.f32 %v1950_v35, %v5421_v24  ;;  %vm1255_vm15 = vweird.f32 %v3640_v20 }
 0x26a   : > { %v2301_v52 = vmul.f32 %v2237_v8, %v5389_v38  ;;  %v1252_v9 = vmul.f32 %v3640_v20, %v1251_v48  ;;  %v2940_v33 = vsub.f32 0.0, %v2812_v5  ;;  %3645 = vpow2.f32 %v2612_v51 }
 0x26b   : > { %vm1254_vm0 = vweird.f32 %v5392_v43  ;;  %vm5443_vm1 = vcmp.eq.f32.partialorder %v1258_v37, 8.507059e+37  ;;  %v2078_v7 = vadd.f32 1.4214138, %v2014_v3  ;;  %v2614_v39 = vmul.f32 1.442695, %v2527_v23 }
 0x26c   : > { %v2365_v55 = vadd.f32 0.2548296, %v2301_v52  ;;  %v1253_v58 = vadd.f32 %v3640_v20, %v1252_v9  ;;  %vm2877_vm2 = vcmp.ge.f32.partialorder %v5301_v22, 0.0  ;;  %vm1256_vm3 = vmor %vm1254_vm0, %vm1255_vm15  ;;  %v1261_v4 = vor.u32 1.1754944e-38, %v1260_v11 }
 0x26d   : > { %v3642_v62 = vpop.eup %3641  ;;  %v2494_v17 = vsub.f32 0.0, %v5408_v61  ;;  %v5450_v45 = vmul.f32 0.70710677, %v5435_v0  ;;  %v5453_v43 = vmul.f32 0.70710677, %v5438_v60  ;;  %v2142_v41 = vmul.f32 %v2078_v7, %v5421_v24 }
 0x26e   : > { %v2429_v54 = vmul.f32 %v2365_v55, %v5389_v38  ;;  %v1257_v56 = vsel %vm1256_vm3, %v3640_v20, %v1253_v58  ;;  %v1715_v59 = vmul.f32 %v3642_v62, %v5423_v27  ;;  %v3644_v53 = vpop.eup %3643  ;;  %v3004_v34 = vsel %vm2876_vm14, %v2812_v5, %v2940_v33  ;;  %v534_v55 = vpop.f32.mrf.mxu1 }
 0x26f   : > { %v5462_v50 = vsel %vm5443_vm1, %v1261_v4, %v1257_v56  ;;  %v1723_v30 = vand.u32 2147483647, %v5423_v27  ;;  %v5466_v21 = vand.u32 2147483647, %v5450_v45  ;;  %v2206_v38 = vadd.f32 -0.28449672, %v2142_v41 }
 0x270   : > { %v2749_v10 = vmul.f32 %v3644_v53, %v2429_v54  ;;  %v1887_v46 = vmul.f32 1.0614054, %v5462_v50  ;;  %v1716_v36 = vsub.f32 1.0, %v1715_v59  ;;  %v3646_v42 = vpop.eup %3645  ;;  %vm1720_vm4 = vweird.f32 %v3642_v62 }
 0x271   : > { %v1725_v26 = vand.u32 2147483648, %v5423_v27  ;;  %v831_v28 = vmul.f32 0.3275911, %v5466_v21  ;;  %v5472_v31 = vand.u32 2147483647, %v5453_v43  ;;  %v2270_v32 = vmul.f32 %v2206_v38, %v5421_v24 }
 0x272   : > { %v2813_v20 = vsub.f32 1.0, %v2749_v10  ;;  %v1951_v57 = vadd.f32 -1.4531521, %v1887_v46  ;;  %v1717_v13 = vmul.f32 %v3642_v62, %v1716_v36  ;;  %v3068_v40 = vadd.f32 1.0, %v3004_v34  ;;  %v485_v36 = vpop.f32.mrf.mxu2 }
 0x273   : > { %vm1719_vm5 = vweird.f32 %v5423_v27  ;;  %v2558_v51 = vmul.f32 %v2494_v17, %v5408_v61  ;;  %v5477_v29 = vadd.f32 1.0, %v831_v28  ;;  %v2334_v25 = vadd.f32 0.2548296, %v2270_v32 }
 0x274   : > { %v2941_v12 = vsub.f32 0.0, %v2813_v20  ;;  %v2015_v49 = vmul.f32 %v1951_v57, %v5462_v50  ;;  %v1718_v5 = vadd.f32 %v3642_v62, %v1717_v13  ;;  %vm1721_vm6 = vmor %vm1719_vm5, %vm1720_vm4  ;;  %vm1724_vm7 = vcmp.eq.f32.partialorder %v1723_v30, 8.507059e+37 }
 0x275   : > { %v1726_v37 = vor.u32 1.1754944e-38, %v1725_v26  ;;  %3647 = vrcp.f32 %v5477_v29  ;;  %v800_v8 = vmul.f32 0.3275911, %v5472_v31  ;;  %v2398_v61 = vmul.f32 %v2334_v25, %v5421_v24 }
 0x276   : > { %v3005_v27 = vsel %vm2877_vm2, %v2813_v20, %v2941_v12  ;;  %v2079_v35 = vadd.f32 1.4214138, %v2015_v49  ;;  %v1722_v48 = vsel %vm1721_vm6, %v3642_v62, %v1718_v5  ;;  %v3132_v23 = vmul.f32 %v3068_v40, %v5367_v19 }
 0x277   : > { %v637_v11 = vmul.f32 0.5, %v5286_v14  ;;  %v3069_v52 = vadd.f32 1.0, %v3005_v27  ;;  %v5488_v3 = vsel %vm1724_vm7, %v1726_v37, %v1722_v48  ;;  %v2718_v9 = vmul.f32 %v3646_v42, %v2398_v61 }
 0x278   : > { %v2143_v33 = vmul.f32 %v2079_v35, %v5462_v50  ;;  %v1918_v18 = vmul.f32 1.0614054, %v5488_v3  ;;  %v5493_v22 = vmul.f32 0.5, %v5293_v6  ;;  %v2676_v24 = vmul.f32 1.442695, %v2558_v51 }
 0x279   : > { %v3133_v7 = vmul.f32 %v3069_v52, %v637_v11  ;;  %v5495_v58 = vadd.f32 1.0, %v800_v8  ;;  %v2782_v19 = vsub.f32 1.0, %v2718_v9  ;;  %3649 = vpow2.f32 %v2614_v39 }
 0x27a   : > { %v2207_v62 = vadd.f32 -0.28449672, %v2143_v33  ;;  %v1982_v14 = vadd.f32 -1.4531521, %v1918_v18  ;;  %vm2846_vm8 = vcmp.ge.f32.partialorder %v5313_v16, 0.0  ;;  %v5500_v54 = vadd.f32 %v534_v55, %v3882_v2 }
 0x27b   : > { %v3648_v4 = vpop.eup %3647  ;;  %v3170_v17 = vpack.c.bf16 %v3133_v7, %v3132_v23  ;;  %3651 = vrcp.f32 %v5495_v58  ;;  %v2910_v41 = vsub.f32 0.0, %v2782_v19  ;;  %v5507_v39 = vmul.f32 0.5, %v5340_v47 }
 0x27c   : > { %v2271_v6 = vmul.f32 %v2207_v62, %v5462_v50  ;;  %v2046_v56 = vmul.f32 %v1982_v14, %v5488_v3  ;;  %v1730_v59 = vmul.f32 %v3648_v4, %v5477_v29  ;;  %3653 = vpow2.f32 %v2676_v24 }
 0x27d   : > { %3202 = vst [vmem:[%s4069_s9 + $0xd0] sm:$0xff] %v3170_v17  ;;  %v1738_v53 = vand.u32 2147483647, %v5477_v29  ;;  %v1740_v34 = vand.u32 2147483648, %v5477_v29  ;;  %v2495_v46 = vsub.f32 0.0, %v5466_v21  ;;  %v2974_v42 = vsel %vm2846_vm8, %v2782_v19, %v2910_v41 }
 0x27e   : > { %v2335_v30 = vadd.f32 0.2548296, %v2271_v6  ;;  %v2110_v10 = vadd.f32 1.4214138, %v2046_v56  ;;  %v1731_v38 = vsub.f32 1.0, %v1730_v59  ;;  %vm2847_vm9 = vcmp.ge.f32.partialorder %v5357_v63, 0.0  ;;  %v574_v56 = vpop.f32.mrf.mxu3 }
 0x27f   : > { %vm1734_vm10 = vweird.f32 %v5477_v29  ;;  %vm1735_vm11 = vweird.f32 %v3648_v4  ;;  %v2464_v47 = vsub.f32 0.0, %v5472_v31  ;;  %v3650_v26 = vpop.eup %3649  ;;  %v5520_v57 = vmul.f32 0.70710677, %v5500_v54 }
 0x280   : > { %v2399_v28 = vmul.f32 %v2335_v30, %v5462_v50  ;;  %v2174_v20 = vmul.f32 %v2110_v10, %v5488_v3  ;;  %v1732_v32 = vmul.f32 %v3648_v4, %v1731_v38  ;;  %vm5522_vm12 = vcmp.eq.f32.partialorder %v1738_v53, 8.507059e+37  ;;  %vm1736_vm14 = vmor %vm1734_vm10, %vm1735_vm11 }
 0x281   : > { %v3652_v13 = vpop.eup %3651  ;;  %v1741_v40 = vor.u32 1.1754944e-38, %v1740_v34  ;;  %vm1269_vm13 = vweird.f32 %v5495_v58  ;;  %v5528_v51 = vadd.f32 %v485_v36, %v3880_v1  ;;  %v3038_v37 = vadd.f32 1.0, %v2974_v42 }
 0x282   : > { %v2719_v12 = vmul.f32 %v3650_v26, %v2399_v28  ;;  %v2238_v25 = vadd.f32 -0.28449672, %v2174_v20  ;;  %v1733_v50 = vadd.f32 %v3648_v4, %v1732_v32  ;;  %v1265_v49 = vmul.f32 %v3652_v13, %v5495_v58  ;;  %v3654_v5 = vpop.eup %3653 }
 0x283   : > { %v1273_v8 = vand.u32 2147483647, %v5495_v58  ;;  %v1275_v27 = vand.u32 2147483648, %v5495_v58  ;;  %v5537_v61 = vand.u32 2147483647, %v5520_v57  ;;  %vm1270_vm15 = vweird.f32 %v3652_v13 }
 0x284   : > { %v2783_v35 = vsub.f32 1.0, %v2719_v12  ;;  %v2302_v48 = vmul.f32 %v2238_v25, %v5488_v3  ;;  %v1737_v23 = vsel %vm1736_vm14, %v3648_v4, %v1733_v50  ;;  %v1266_v11 = vsub.f32 1.0, %v1265_v49  ;;  %vm1271_vm0 = vmor %vm1269_vm13, %vm1270_vm15 }
 0x285   : > { %v5542_v52 = vsel %vm5522_vm12, %v1741_v40, %v1737_v23  ;;  %v801_v29 = vmul.f32 0.3275911, %v5537_v61  ;;  %v5546_v9 = vmul.f32 0.70710677, %v5528_v51  ;;  %v2559_v24 = vmul.f32 %v2495_v46, %v5466_v21 }
 0x286   : > { %v2911_v33 = vsub.f32 0.0, %v2783_v35  ;;  %v2366_v18 = vadd.f32 0.2548296, %v2302_v48  ;;  %v1919_v55 = vmul.f32 1.0614054, %v5542_v52  ;;  %v1267_v7 = vmul.f32 %v3652_v13, %v1266_v11 }
 0x287   : > { %v1276_v19 = vor.u32 1.1754944e-38, %v1275_v27  ;;  %v2528_v62 = vmul.f32 %v2464_v47, %v5472_v31  ;;  %v5551_v14 = vadd.f32 1.0, %v801_v29  ;;  %v3102_v59 = vmul.f32 %v3038_v37, %v5493_v22  ;;  %v447_v27 = vpop.f32.mrf.mxu0 }
 0x288   : > { %v2975_v4 = vsel %vm2847_vm9, %v2783_v35, %v2911_v33  ;;  %v2430_v17 = vmul.f32 %v2366_v18, %v5488_v3  ;;  %v1983_v41 = vadd.f32 -1.4531521, %v1919_v55  ;;  %v1268_v6 = vadd.f32 %v3652_v13, %v1267_v7 }
 0x289   : > { %v3039_v53 = vadd.f32 1.0, %v2975_v4  ;;  %3655 = vrcp.f32 %v5551_v14  ;;  %v5562_v21 = vand.u32 2147483647, %v5546_v9  ;;  %vm1274_vm1 = vcmp.eq.f32.partialorder %v1273_v8, 8.507059e+37 }
 0x28a   : > { %v2750_v31 = vmul.f32 %v3654_v5, %v2430_v17  ;;  %v2047_v63 = vmul.f32 %v1983_v41, %v5542_v52  ;;  %v1272_v34 = vsel %vm1271_vm0, %v3652_v13, %v1268_v6  ;;  %v2678_v30 = vmul.f32 1.442695, %v2559_v24 }
 0x28b   : > { %v3103_v3 = vmul.f32 %v3039_v53, %v5507_v39  ;;  %v5566_v22 = vsel %vm1274_vm1, %v1276_v19, %v1272_v34  ;;  %v5569_v10 = vadd.f32 %v574_v56, %v3882_v2  ;;  %v2616_v46 = vmul.f32 1.442695, %v2528_v62 }
 0x28c   : > { %v2111_v58 = vadd.f32 1.4214138, %v2047_v63  ;;  %v1888_v38 = vmul.f32 1.0614054, %v5566_v22  ;;  %v832_v42 = vmul.f32 0.3275911, %v5562_v21  ;;  %3657 = vpow2.f32 %v2678_v30 }
 0x28d   : > { %v3155_v36 = vpack.c.bf16 %v3103_v3, %v3102_v59  ;;  %v5574_v47 = vmul.f32 0.5, %v5379_v15  ;;  %v2814_v26 = vsub.f32 1.0, %v2750_v31  ;;  %vm2878_vm2 = vcmp.ge.f32.partialorder %v5395_v44, 0.0 }
 0x28e   : > { %v2175_v28 = vmul.f32 %v2111_v58, %v5542_v52  ;;  %v1952_v39 = vadd.f32 -1.4531521, %v1888_v38  ;;  %v5579_v32 = vadd.f32 1.0, %v832_v42  ;;  %v5582_v13 = vmul.f32 0.70710677, %v5569_v10 }
 0x28f   : > { %v3656_v20 = vpop.eup %3655  ;;  %3187 = vst [vmem:[%s4069_s9 + $0x58] sm:$0xff] %v3155_v36  ;;  %3659 = vpow2.f32 %v2616_v46  ;;  %v5587_v12 = vmul.f32 0.5, %v5435_v0  ;;  %v5590_v25 = vmul.f32 0.5, %v5438_v60  ;;  %v2465_v50 = vsub.f32 0.0, %v5537_v61 }
 0x290   : > { %v2239_v16 = vadd.f32 -0.28449672, %v2175_v28  ;;  %v2016_v40 = vmul.f32 %v1952_v39, %v5566_v22  ;;  %v1280_v15 = vmul.f32 %v3656_v20, %v5551_v14  ;;  %3661 = vrcp.f32 %v5579_v32 }
 0x291   : > { %v2942_v49 = vsub.f32 0.0, %v2814_v26  ;;  %vm1284_vm3 = vweird.f32 %v5551_v14  ;;  %v1288_v35 = vand.u32 2147483647, %v5551_v14  ;;  %v1290_v0 = vand.u32 2147483648, %v5551_v14 }
 0x292   : > { %v2303_v5 = vmul.f32 %v2239_v16, %v5542_v52  ;;  %v2080_v37 = vadd.f32 1.4214138, %v2016_v40  ;;  %v1281_v8 = vsub.f32 1.0, %v1280_v15  ;;  %v5599_v48 = vand.u32 2147483647, %v5582_v13  ;;  %v3658_v29 = vpop.eup %3657 }
 0x293   : > { %vm1285_vm4 = vweird.f32 %v3656_v20  ;;  %vm2879_vm5 = vcmp.ge.f32.partialorder %v5450_v45, 0.0  ;;  %v5604_v33 = vmul.f32 0.5, %v5500_v54  ;;  %v2529_v18 = vmul.f32 %v2465_v50, %v5537_v61 }
 0x294   : > { %v2367_v60 = vadd.f32 0.2548296, %v2303_v5  ;;  %v2144_v23 = vmul.f32 %v2080_v37, %v5566_v22  ;;  %v1282_v11 = vmul.f32 %v3656_v20, %v1281_v8  ;;  %v833_v55 = vmul.f32 0.3275911, %v5599_v48  ;;  %vm1286_vm6 = vmor %vm1284_vm3, %vm1285_vm4 }
 0x295   : > { %v5609_v7 = vadd.f32 %v447_v27, %v3880_v1  ;;  %v3660_v24 = vpop.eup %3659  ;;  %v3006_v19 = vsel %vm2878_vm2, %v2814_v26, %v2942_v49  ;;  %vm1289_vm7 = vcmp.eq.f32.partialorder %v1288_v35, 8.507059e+37  ;;  %v1291_v54 = vor.u32 1.1754944e-38, %v1290_v0  ;;  %v536_v49 = vpop.f32.mrf.mxu1 }
 0x296   : > { %v2431_v62 = vmul.f32 %v2367_v60, %v5542_v52  ;;  %v2208_v4 = vadd.f32 -0.28449672, %v2144_v23  ;;  %v1283_v17 = vadd.f32 %v3656_v20, %v1282_v11  ;;  %v3662_v41 = vpop.eup %3661  ;;  %v2496_v61 = vsub.f32 0.0, %v5562_v21 }
 0x297   : > { %v5617_v6 = vadd.f32 1.0, %v833_v55  ;;  %v1745_v44 = vmul.f32 %v3662_v41, %v5579_v32  ;;  %v3070_v31 = vadd.f32 1.0, %v3006_v19  ;;  %v5625_v14 = vmul.f32 0.70710677, %v5609_v7 }
 0x298   : > { %v2751_v56 = vmul.f32 %v3658_v29, %v2431_v62  ;;  %v2272_v59 = vmul.f32 %v2208_v4, %v5566_v22  ;;  %v1287_v53 = vsel %vm1286_vm6, %v3656_v20, %v1283_v17  ;;  %v5629_v58 = vmul.f32 0.5, %v5528_v51  ;;  %v487_v17 = vpop.f32.mrf.mxu2 }
 0x299   : > { %v5621_v52 = vsel %vm1289_vm7, %v1291_v54, %v1287_v53  ;;  %3663 = vrcp.f32 %v5617_v6  ;;  %v1746_v30 = vsub.f32 1.0, %v1745_v44  ;;  %vm1750_vm8 = vweird.f32 %v3662_v41 }
 0x29a   : > { %v2815_v63 = vsub.f32 1.0, %v2751_v56  ;;  %v2336_v34 = vadd.f32 0.2548296, %v2272_v59  ;;  %v1889_v3 = vmul.f32 1.0614054, %v5621_v52  ;;  %v1755_v46 = vand.u32 2147483648, %v5579_v32 }
 0x29b   : > { %v1753_v38 = vand.u32 2147483647, %v5579_v32  ;;  %v1747_v28 = vmul.f32 %v3662_v41, %v1746_v30  ;;  %v2618_v39 = vmul.f32 1.442695, %v2529_v18  ;;  %vm1749_vm9 = vweird.f32 %v5579_v32 }
 0x29c   : > { %v2943_v36 = vsub.f32 0.0, %v2815_v63  ;;  %v2400_v42 = vmul.f32 %v2336_v34, %v5566_v22  ;;  %v1953_v26 = vadd.f32 -1.4531521, %v1889_v3  ;;  %v2560_v20 = vmul.f32 %v2496_v61, %v5562_v21  ;;  %vm1751_vm10 = vmor %vm1749_vm9, %vm1750_vm8 }
 0x29d   : > { %v5637_v16 = vand.u32 2147483647, %v5625_v14  ;;  %v3134_v51 = vmul.f32 %v3070_v31, %v5574_v47  ;;  %v1748_v50 = vadd.f32 %v3662_v41, %v1747_v28  ;;  %v1756_v32 = vor.u32 1.1754944e-38, %v1755_v46 }
 0x29e   : > { %v3007_v40 = vsel %vm2879_vm5, %v2815_v63, %v2943_v36  ;;  %v2017_v15 = vmul.f32 %v1953_v26, %v5621_v52  ;;  %v2720_v37 = vmul.f32 %v3660_v24, %v2400_v42  ;;  %vm1754_vm11 = vcmp.eq.f32.partialorder %v1753_v38, 8.507059e+37 }
 0x29f   : > { %v3664_v22 = vpop.eup %3663  ;;  %v3071_v5 = vadd.f32 1.0, %v3007_v40  ;;  %v802_v21 = vmul.f32 0.3275911, %v5637_v16  ;;  %v1752_v27 = vsel %vm1751_vm10, %v3662_v41, %v1748_v50  ;;  %v5652_v60 = vadd.f32 %v536_v49, %v3882_v2 }
 0x2a0   : > { %v2081_v8 = vadd.f32 1.4214138, %v2017_v15  ;;  %v1760_v47 = vmul.f32 %v3664_v22, %v5617_v6  ;;  %v5647_v35 = vsel %vm1754_vm11, %v1756_v32, %v1752_v27  ;;  %vm2848_vm12 = vcmp.ge.f32.partialorder %v5453_v43, 0.0 }
 0x2a1   : > { %v3135_v45 = vmul.f32 %v3071_v5, %v5587_v12  ;;  %v5649_v0 = vadd.f32 1.0, %v802_v21  ;;  %v1920_v11 = vmul.f32 1.0614054, %v5647_v35  ;;  %v1768_v18 = vand.u32 2147483647, %v5617_v6 }
 0x2a2   : > { %v2145_v23 = vmul.f32 %v2081_v8, %v5621_v52  ;;  %v1761_v29 = vsub.f32 1.0, %v1760_v47  ;;  %v2784_v24 = vsub.f32 1.0, %v2720_v37  ;;  %v1770_v12 = vand.u32 2147483648, %v5617_v6 }
 0x2a3   : > { %v3171_v55 = vpack.c.bf16 %v3135_v45, %v3134_v51  ;;  %3665 = vrcp.f32 %v5649_v0  ;;  %v1984_v62 = vadd.f32 -1.4531521, %v1920_v11  ;;  %vm1765_vm13 = vweird.f32 %v3664_v22 }
 0x2a4   : > { %v2209_v19 = vadd.f32 -0.28449672, %v2145_v23  ;;  %v1762_v4 = vmul.f32 %v3664_v22, %v1761_v29  ;;  %3667 = vpow2.f32 %v2618_v39  ;;  %v2680_v41 = vmul.f32 1.442695, %v2560_v20 }
 0x2a5   : > { %3203 = vst [vmem:[%s4069_s9 + $0xd8] sm:$0xff] %v3171_v55  ;;  %vm1764_vm14 = vweird.f32 %v5617_v6  ;;  %v2497_v54 = vsub.f32 0.0, %v5599_v48  ;;  %v2048_v56 = vmul.f32 %v1984_v62, %v5647_v35  ;;  %v5666_v53 = vmul.f32 0.70710677, %v5652_v60 }
 0x2a6   : > { %v2273_v61 = vmul.f32 %v2209_v19, %v5621_v52  ;;  %v1763_v59 = vadd.f32 %v3664_v22, %v1762_v4  ;;  %v2912_v44 = vsub.f32 0.0, %v2784_v24  ;;  %vm1766_vm15 = vmor %vm1764_vm14, %vm1765_vm13  ;;  %vm1769_vm0 = vcmp.eq.f32.partialorder %v1768_v18, 8.507059e+37 }
 0x2a7   : > { %v1771_v31 = vor.u32 1.1754944e-38, %v1770_v12  ;;  %v5669_v63 = vadd.f32 %v487_v17, %v3880_v1  ;;  %v2112_v3 = vadd.f32 1.4214138, %v2048_v56  ;;  %v5672_v30 = vand.u32 2147483647, %v5666_v53 }
 0x2a8   : > { %v2337_v34 = vadd.f32 0.2548296, %v2273_v61  ;;  %v1767_v6 = vsel %vm1766_vm15, %v3664_v22, %v1763_v59  ;;  %vm2849_vm1 = vcmp.ge.f32.partialorder %v5520_v57, 0.0  ;;  %3669 = vpow2.f32 %v2680_v41 }
 0x2a9   : > { %v3666_v38 = vpop.eup %3665  ;;  %v5675_v46 = vsel %vm1769_vm0, %v1771_v31, %v1767_v6  ;;  %v2561_v36 = vmul.f32 %v2497_v54, %v5599_v48  ;;  %v2466_v42 = vsub.f32 0.0, %v5637_v16  ;;  %v2176_v28 = vmul.f32 %v2112_v3, %v5647_v35 }
 0x2aa   : > { %v2401_v26 = vmul.f32 %v2337_v34, %v5621_v52  ;;  %v1921_v39 = vmul.f32 1.0614054, %v5675_v46  ;;  %v1295_v20 = vmul.f32 %v3666_v38, %v5649_v0  ;;  %v3668_v51 = vpop.eup %3667  ;;  %v2976_v40 = vsel %vm2848_vm12, %v2784_v24, %v2912_v44 }
 0x2ab   : > { %v1303_v15 = vand.u32 2147483647, %v5649_v0  ;;  %v803_v50 = vmul.f32 0.3275911, %v5672_v30  ;;  %v5688_v48 = vmul.f32 0.70710677, %v5669_v63  ;;  %vm1300_vm2 = vweird.f32 %v3666_v38 }
 0x2ac   : > { %v2721_v49 = vmul.f32 %v3668_v51, %v2401_v26  ;;  %v2240_v22 = vadd.f32 -0.28449672, %v2176_v28  ;;  %v1985_v52 = vadd.f32 -1.4531521, %v1921_v39  ;;  %v1296_v5 = vsub.f32 1.0, %v1295_v20 }
 0x2ad   : > { %v1305_v37 = vand.u32 2147483648, %v5649_v0  ;;  %v5691_v32 = vadd.f32 1.0, %v803_v50  ;;  %v5694_v21 = vand.u32 2147483647, %v5688_v48  ;;  %v3040_v23 = vadd.f32 1.0, %v2976_v40 }
 0x2ae   : > { %v2785_v43 = vsub.f32 1.0, %v2721_v49  ;;  %v2304_v8 = vmul.f32 %v2240_v22, %v5647_v35  ;;  %v2049_v27 = vmul.f32 %v1985_v52, %v5675_v46  ;;  %v1297_v47 = vmul.f32 %v3666_v38, %v1296_v5  ;;  %v3670_v45 = vpop.eup %3669 }
 0x2af   : > { %v2682_v11 = vmul.f32 1.442695, %v2561_v36  ;;  %vm1299_vm3 = vweird.f32 %v5649_v0  ;;  %3671 = vrcp.f32 %v5691_v32  ;;  %vm1304_vm5 = vcmp.eq.f32.partialorder %v1303_v15, 8.507059e+37 }
 0x2b0   : > { %v2913_v29 = vsub.f32 0.0, %v2785_v43  ;;  %v2368_v18 = vadd.f32 0.2548296, %v2304_v8  ;;  %v2113_v55 = vadd.f32 1.4214138, %v2049_v27  ;;  %v1298_v24 = vadd.f32 %v3666_v38, %v1297_v47  ;;  %vm1301_vm4 = vmor %vm1299_vm3, %vm1300_vm2 }
 0x2b1   : > { %v1306_v12 = vor.u32 1.1754944e-38, %v1305_v37  ;;  %v2530_v19 = vmul.f32 %v2466_v42, %v5637_v16  ;;  %v834_v62 = vmul.f32 0.3275911, %v5694_v21  ;;  %vm2880_vm6 = vcmp.ge.f32.partialorder %v5546_v9, 0.0  ;;  %v576_v42 = vpop.f32.mrf.mxu3  ;;  %v450_v37 = vpop.f32.mrf.mxu0 }
 0x2b2   : > { %v2977_v4 = vsel %vm2849_vm1, %v2785_v43, %v2913_v29  ;;  %v2432_v17 = vmul.f32 %v2368_v18, %v5647_v35  ;;  %v2177_v0 = vmul.f32 %v2113_v55, %v5675_v46  ;;  %v1302_v41 = vsel %vm1301_vm4, %v3666_v38, %v1298_v24 }
 0x2b3   : > { %v3104_v54 = vmul.f32 %v3040_v23, %v5590_v25  ;;  %v3041_v61 = vadd.f32 1.0, %v2977_v4  ;;  %v5709_v56 = vsel %vm1304_vm5, %v1306_v12, %v1302_v41  ;;  %v5711_v59 = vadd.f32 1.0, %v834_v62 }
 0x2b4   : > { %v2752_v16 = vmul.f32 %v3670_v45, %v2432_v17  ;;  %v2241_v44 = vadd.f32 -0.28449672, %v2177_v0  ;;  %3673 = vpow2.f32 %v2682_v11  ;;  %v1890_v57 = vmul.f32 1.0614054, %v5709_v56 }
 0x2b5   : > { %v3672_v31 = vpop.eup %3671  ;;  %v3105_v35 = vmul.f32 %v3041_v61, %v5604_v33  ;;  %v2620_v34 = vmul.f32 1.442695, %v2530_v19  ;;  %v2467_v3 = vsub.f32 0.0, %v5672_v30  ;;  %3675 = vrcp.f32 %v5711_v59 }
 0x2b6   : > { %v2816_v25 = vsub.f32 1.0, %v2752_v16  ;;  %v2305_v6 = vmul.f32 %v2241_v44, %v5675_v46  ;;  %v1954_v38 = vadd.f32 -1.4531521, %v1890_v57  ;;  %v1310_v36 = vmul.f32 %v3672_v31, %v5691_v32 }
 0x2b7   : > { %v3156_v26 = vpack.c.bf16 %v3105_v35, %v3104_v54  ;;  %v5720_v28 = vmul.f32 0.5, %v5569_v10  ;;  %v1318_v39 = vand.u32 2147483647, %v5691_v32  ;;  %v1320_v33 = vand.u32 2147483648, %v5691_v32 }
 0x2b8   : > { %v2944_v20 = vsub.f32 0.0, %v2816_v25  ;;  %v2369_v51 = vadd.f32 0.2548296, %v2305_v6  ;;  %v2018_v40 = vmul.f32 %v1954_v38, %v5709_v56  ;;  %v1311_v15 = vsub.f32 1.0, %v1310_v36 }
 0x2b9   : > { %3188 = vst [vmem:[%s4069_s9 + $0x60] sm:$0xff] %v3156_v26  ;;  %vm2881_vm7 = vcmp.ge.f32.partialorder %v5582_v13, 0.0  ;;  %3677 = vpow2.f32 %v2620_v34  ;;  %vm1314_vm8 = vweird.f32 %v5691_v32  ;;  %v2531_v50 = vmul.f32 %v2467_v3, %v5672_v30 }
 0x2ba   : > { %v5730_v10 = vadd.f32 %v576_v42, %v3882_v2  ;;  %v3674_v49 = vpop.eup %3673  ;;  %v2433_v22 = vmul.f32 %v2369_v51, %v5675_v46  ;;  %v2082_v52 = vadd.f32 1.4214138, %v2018_v40  ;;  %v1312_v5 = vmul.f32 %v3672_v31, %v1311_v15 }
 0x2bb   : > { %vm1315_vm9 = vweird.f32 %v3672_v31  ;;  %v3676_v43 = vpop.eup %3675  ;;  %v3008_v8 = vsel %vm2880_vm6, %v2816_v25, %v2944_v20  ;;  %vm5735_vm10 = vcmp.eq.f32.partialorder %v1318_v39, 8.507059e+37  ;;  %v1321_v47 = vor.u32 1.1754944e-38, %v1320_v33 }
 0x2bc   : > { %v5740_v30 = vmul.f32 0.70710677, %v5730_v10  ;;  %v2753_v45 = vmul.f32 %v3674_v49, %v2433_v22  ;;  %v2146_v23 = vmul.f32 %v2082_v52, %v5709_v56  ;;  %v1313_v46 = vadd.f32 %v3672_v31, %v1312_v5  ;;  %vm1316_vm11 = vmor %vm1314_vm8, %vm1315_vm9 }
 0x2bd   : > { %v1775_v11 = vmul.f32 %v3676_v43, %v5711_v59  ;;  %v1783_v9 = vand.u32 2147483647, %v5711_v59  ;;  %v1785_v29 = vand.u32 2147483648, %v5711_v59  ;;  %v5752_v55 = vadd.f32 %v450_v37, %v3880_v1 }
 0x2be   : > { %v5749_v18 = vand.u32 2147483647, %v5740_v30  ;;  %v2817_v24 = vsub.f32 1.0, %v2753_v45  ;;  %v2210_v12 = vadd.f32 -0.28449672, %v2146_v23  ;;  %v1317_v19 = vsel %vm1316_vm11, %v3672_v31, %v1313_v46 }
 0x2bf   : > { %v1776_v62 = vsub.f32 1.0, %v1775_v11  ;;  %v3678_v4 = vpop.eup %3677  ;;  %v3072_v17 = vadd.f32 1.0, %v3008_v8  ;;  %v5756_v32 = vsel %vm5735_vm10, %v1321_v47, %v1317_v19  ;;  %vm1780_vm12 = vweird.f32 %v3676_v43  ;;  %v490_v47 = vpop.f32.mrf.mxu2 }
 0x2c0   : > { %v835_v0 = vmul.f32 0.3275911, %v5749_v18  ;;  %v2945_v41 = vsub.f32 0.0, %v2817_v24  ;;  %v2274_v54 = vmul.f32 %v2210_v12, %v5709_v56  ;;  %v1891_v61 = vmul.f32 1.0614054, %v5756_v32 }
 0x2c1   : > { %v1777_v16 = vmul.f32 %v3676_v43, %v1776_v62  ;;  %vm1779_vm13 = vweird.f32 %v5711_v59  ;;  %v1786_v44 = vor.u32 1.1754944e-38, %v1785_v29  ;;  %v2498_v57 = vsub.f32 0.0, %v5694_v21 }
 0x2c2   : > { %v5763_v31 = vadd.f32 1.0, %v835_v0  ;;  %v3009_v35 = vsel %vm2881_vm7, %v2817_v24, %v2945_v41  ;;  %v2338_v34 = vadd.f32 0.2548296, %v2274_v54  ;;  %v1955_v3 = vadd.f32 -1.4531521, %v1891_v61  ;;  %vm1781_vm14 = vmor %vm1779_vm13, %vm1780_vm12 }
 0x2c3   : > { %v1778_v25 = vadd.f32 %v3676_v43, %v1777_v16  ;;  %v3136_v6 = vmul.f32 %v3072_v17, %v5629_v58  ;;  %v3073_v38 = vadd.f32 1.0, %v3009_v35  ;;  %v5771_v59 = vmul.f32 0.70710677, %v5752_v55 }
 0x2c4   : > { %3679 = vrcp.f32 %v5763_v31  ;;  %v2402_v36 = vmul.f32 %v2338_v34, %v5709_v56  ;;  %v2019_v42 = vmul.f32 %v1955_v3, %v5756_v32  ;;  %vm1784_vm15 = vcmp.eq.f32.partialorder %v1783_v9, 8.507059e+37 }
 0x2c5   : > { %v1782_v26 = vsel %vm1781_vm14, %v3676_v43, %v1778_v25  ;;  %v3137_v13 = vmul.f32 %v3073_v38, %v5720_v28  ;;  %v2622_v20 = vmul.f32 1.442695, %v2531_v50  ;;  %v2562_v15 = vmul.f32 %v2498_v57, %v5694_v21  ;;  %v539_v28 = vpop.f32.mrf.mxu1 }
 0x2c6   : > { %v5776_v39 = vsel %vm1784_vm15, %v1786_v44, %v1782_v26  ;;  %v2722_v58 = vmul.f32 %v3678_v4, %v2402_v36  ;;  %v2083_v33 = vadd.f32 1.4214138, %v2019_v42  ;;  %v740_v49 = vand.u32 2147483647, %v5771_v59 }
 0x2c7   : > { %v1922_v51 = vmul.f32 1.0614054, %v5776_v39  ;;  %v3172_v40 = vpack.c.bf16 %v3137_v13, %v3136_v6  ;;  %v5782_v56 = vmul.f32 0.5, %v5609_v7  ;;  %vm2850_vm0 = vcmp.ge.f32.partialorder %v5625_v14, 0.0 }
 0x2c8   : > { %v2786_v22 = vsub.f32 1.0, %v2722_v58  ;;  %v2147_v52 = vmul.f32 %v2083_v33, %v5756_v32  ;;  %v5788_v50 = vmul.f32 0.5, %v5652_v60  ;;  %v5791_v43 = vmul.f32 0.5, %v5669_v63 }
 0x2c9   : > { %v1986_v5 = vadd.f32 -1.4531521, %v1922_v51  ;;  %3204 = vst [vmem:[%s4069_s9 + $0xe0] sm:$0xff] %v3172_v40  ;;  %v804_v21 = vmul.f32 0.3275911, %v740_v49  ;;  %3681 = vpow2.f32 %v2622_v20  ;;  %v2499_v23 = vsub.f32 0.0, %v5749_v18 }
 0x2ca   : > { %v3680_v37 = vpop.eup %3679  ;;  %v2211_v8 = vadd.f32 -0.28449672, %v2147_v52  ;;  %v2684_v45 = vmul.f32 1.442695, %v2562_v15  ;;  %v5799_v11 = vadd.f32 %v539_v28, %v3882_v2  ;;  %v2914_v60 = vsub.f32 0.0, %v2786_v22  ;;  %v579_v28 = vpop.f32.mrf.mxu3 }
 0x2cb   : > { %v2050_v7 = vmul.f32 %v1986_v5, %v5776_v39  ;;  %v1790_v27 = vmul.f32 %v3680_v37, %v5763_v31  ;;  %v5796_v46 = vadd.f32 1.0, %v804_v21  ;;  %v1798_v24 = vand.u32 2147483647, %v5763_v31 }
 0x2cc   : > { %v2275_v63 = vmul.f32 %v2211_v8, %v5756_v32  ;;  %v1800_v12 = vand.u32 2147483648, %v5763_v31  ;;  %v5806_v19 = vadd.f32 %v490_v47, %v3880_v1  ;;  %vm1795_vm1 = vweird.f32 %v3680_v37 }
 0x2cd   : > { %v2114_v9 = vadd.f32 1.4214138, %v2050_v7  ;;  %v1791_v29 = vsub.f32 1.0, %v1790_v27  ;;  %3683 = vrcp.f32 %v5796_v46  ;;  %vm2851_vm2 = vcmp.ge.f32.partialorder %v5666_v53, 0.0 }
 0x2ce   : > { %v2339_v62 = vadd.f32 0.2548296, %v2275_v63  ;;  %3685 = vpow2.f32 %v2684_v45  ;;  %vm1794_vm3 = vweird.f32 %v5763_v31  ;;  %v2468_v0 = vsub.f32 0.0, %v740_v49 }
 0x2cf   : > { %v2178_v4 = vmul.f32 %v2114_v9, %v5776_v39  ;;  %v1792_v17 = vmul.f32 %v3680_v37, %v1791_v29  ;;  %v5812_v41 = vmul.f32 0.70710677, %v5799_v11  ;;  %v3682_v54 = vpop.eup %3681  ;;  %v2978_v61 = vsel %vm2850_vm0, %v2786_v22, %v2914_v60  ;;  %vm1796_vm4 = vmor %vm1794_vm3, %vm1795_vm1 }
 0x2d0   : > { %v2403_v16 = vmul.f32 %v2339_v62, %v5756_v32  ;;  %vm1799_vm5 = vcmp.eq.f32.partialorder %v1798_v24, 8.507059e+37  ;;  %v1801_v35 = vor.u32 1.1754944e-38, %v1800_v12  ;;  %v2563_v34 = vmul.f32 %v2499_v23, %v5749_v18 }
 0x2d1   : > { %v2242_v44 = vadd.f32 -0.28449672, %v2178_v4  ;;  %v1793_v57 = vadd.f32 %v3680_v37, %v1792_v17  ;;  %v741_v3 = vand.u32 2147483647, %v5812_v41  ;;  %v5821_v38 = vmul.f32 0.70710677, %v5806_v19 }
 0x2d2   : > { %v2723_v31 = vmul.f32 %v3682_v54, %v2403_v16  ;;  %v3042_v36 = vadd.f32 1.0, %v2978_v61  ;;  %v2532_v32 = vmul.f32 %v2468_v0, %v740_v49  ;;  %vm1329_vm6 = vweird.f32 %v5796_v46 }
 0x2d3   : > { %v2306_v25 = vmul.f32 %v2242_v44, %v5776_v39  ;;  %v1797_v6 = vsel %vm1796_vm4, %v3680_v37, %v1793_v57  ;;  %v3684_v14 = vpop.eup %3683  ;;  %v805_v26 = vmul.f32 0.3275911, %v741_v3  ;;  %v1333_v51 = vand.u32 2147483647, %v5796_v46 }
 0x2d4   : > { %v5823_v42 = vsel %vm1799_vm5, %v1801_v35, %v1797_v6  ;;  %v2787_v13 = vsub.f32 1.0, %v2723_v31  ;;  %v1325_v18 = vmul.f32 %v3684_v14, %v5796_v46  ;;  %v3686_v20 = vpop.eup %3685  ;;  %v5832_v15 = vand.u32 2147483647, %v5821_v38 }
 0x2d5   : > { %v2370_v58 = vadd.f32 0.2548296, %v2306_v25  ;;  %v1923_v33 = vmul.f32 1.0614054, %v5823_v42  ;;  %v5829_v40 = vadd.f32 1.0, %v805_v26  ;;  %vm1330_vm7 = vweird.f32 %v3684_v14 }
 0x2d6   : > { %v2915_v22 = vsub.f32 0.0, %v2787_v13  ;;  %v1326_v5 = vsub.f32 1.0, %v1325_v18  ;;  %v1335_v37 = vand.u32 2147483648, %v5796_v46  ;;  %v2469_v21 = vsub.f32 0.0, %v741_v3  ;;  %vm1331_vm9 = vmor %vm1329_vm6, %vm1330_vm7 }
 0x2d7   : > { %v2434_v49 = vmul.f32 %v2370_v58, %v5776_v39  ;;  %v1987_v52 = vadd.f32 -1.4531521, %v1923_v33  ;;  %3687 = vrcp.f32 %v5829_v40  ;;  %vm2882_vm8 = vcmp.ge.f32.partialorder %v5688_v48, 0.0 }
 0x2d8   : > { %v2979_v8 = vsel %vm2851_vm2, %v2787_v13, %v2915_v22  ;;  %v1327_v47 = vmul.f32 %v3684_v14, %v1326_v5  ;;  %v3106_v39 = vmul.f32 %v3042_v36, %v5782_v56  ;;  %v2686_v23 = vmul.f32 1.442695, %v2563_v34  ;;  %v452_v5 = vpop.f32.mrf.mxu0 }
 0x2d9   : > { %v2754_v7 = vmul.f32 %v3686_v20, %v2434_v49  ;;  %v2051_v27 = vmul.f32 %v1987_v52, %v5823_v42  ;;  %v3043_v45 = vadd.f32 1.0, %v2979_v8  ;;  %v5843_v60 = vadd.f32 %v579_v28, %v3882_v2 }
 0x2da   : > { %v1328_v29 = vadd.f32 %v3684_v14, %v1327_v47  ;;  %v836_v24 = vmul.f32 0.3275911, %v5832_v15  ;;  %vm1334_vm10 = vcmp.eq.f32.partialorder %v1333_v51, 8.507059e+37  ;;  %v1336_v12 = vor.u32 1.1754944e-38, %v1335_v37 }
 0x2db   : > { %v2818_v63 = vsub.f32 1.0, %v2754_v7  ;;  %v2115_v9 = vadd.f32 1.4214138, %v2051_v27  ;;  %v3107_v53 = vmul.f32 %v3043_v45, %v5788_v50  ;;  %v2533_v56 = vmul.f32 %v2469_v21, %v741_v3 }
 0x2dc   : > { %v1332_v4 = vsel %vm1331_vm9, %v3684_v14, %v1328_v29  ;;  %v2624_v17 = vmul.f32 1.442695, %v2532_v32  ;;  %v5851_v0 = vadd.f32 1.0, %v836_v24  ;;  %v5856_v50 = vmul.f32 0.70710677, %v5843_v60 }
 0x2dd   : > { %v2179_v62 = vmul.f32 %v2115_v9, %v5823_v42  ;;  %v3688_v54 = vpop.eup %3687  ;;  %v3157_v61 = vpack.c.bf16 %v3107_v53, %v3106_v39  ;;  %v2946_v16 = vsub.f32 0.0, %v2818_v63  ;;  %v5853_v44 = vsel %vm1334_vm10, %v1336_v12, %v1332_v4 }
 0x2de   : > { %3689 = vpow2.f32 %v2686_v23  ;;  %v1892_v57 = vmul.f32 1.0614054, %v5853_v44  ;;  %v1340_v35 = vmul.f32 %v3688_v54, %v5829_v40  ;;  %v1348_v34 = vand.u32 2147483647, %v5829_v40 }
 0x2df   : > { %v2243_v46 = vadd.f32 -0.28449672, %v2179_v62  ;;  %3189 = vst [vmem:[%s4069_s9 + $0x68] sm:$0xff] %v3157_v61  ;;  %v1350_v3 = vand.u32 2147483648, %v5829_v40  ;;  %v2626_v31 = vmul.f32 1.442695, %v2533_v56  ;;  %3691 = vrcp.f32 %v5851_v0 }
 0x2e0   : > { %v5865_v25 = vmul.f32 0.5, %v5730_v10  ;;  %v1956_v14 = vadd.f32 -1.4531521, %v1892_v57  ;;  %v1341_v36 = vsub.f32 1.0, %v1340_v35  ;;  %v3010_v32 = vsel %vm2882_vm8, %v2818_v63, %v2946_v16  ;;  %v541_v16 = vpop.f32.mrf.mxu1 }
 0x2e1   : > { %v2307_v6 = vmul.f32 %v2243_v46, %v5823_v42  ;;  %3693 = vpow2.f32 %v2624_v17  ;;  %vm1344_vm11 = vweird.f32 %v5829_v40  ;;  %v773_v26 = vand.u32 2147483647, %v5856_v50 }
 0x2e2   : > { %v2020_v58 = vmul.f32 %v1956_v14, %v5853_v44  ;;  %v1342_v33 = vmul.f32 %v3688_v54, %v1341_v36  ;;  %vm1345_vm12 = vweird.f32 %v3688_v54  ;;  %vm2883_vm13 = vcmp.ge.f32.partialorder %v5740_v30, 0.0 }
 0x2e3   : > { %v2371_v13 = vadd.f32 0.2548296, %v2307_v6  ;;  %vm5874_vm14 = vcmp.eq.f32.partialorder %v1348_v34, 8.507059e+37  ;;  %v1351_v18 = vor.u32 1.1754944e-38, %v1350_v3  ;;  %3695 = vpow2.f32 %v2626_v31  ;;  %vm1346_vm15 = vmor %vm1344_vm11, %vm1345_vm12 }
 0x2e4   : > { %v837_v48 = vmul.f32 0.3275911, %v773_v26  ;;  %v3690_v20 = vpop.eup %3689  ;;  %v2084_v22 = vadd.f32 1.4214138, %v2020_v58  ;;  %v1343_v49 = vadd.f32 %v3688_v54, %v1342_v33  ;;  %v2500_v52 = vsub.f32 0.0, %v5832_v15 }
 0x2e5   : > { %v2435_v51 = vmul.f32 %v2371_v13, %v5823_v42  ;;  %v3692_v28 = vpop.eup %3691  ;;  %v3074_v37 = vadd.f32 1.0, %v3010_v32  ;;  %v1813_v21 = vand.u32 2147483647, %v5851_v0  ;;  %v1815_v8 = vand.u32 2147483648, %v5851_v0 }
 0x2e6   : > { %v5884_v7 = vadd.f32 1.0, %v837_v48  ;;  %v2148_v47 = vmul.f32 %v2084_v22, %v5853_v44  ;;  %v1347_v42 = vsel %vm1346_vm15, %v3688_v54, %v1343_v49  ;;  %v1805_v39 = vmul.f32 %v3692_v28, %v5851_v0 }
 0x2e7   : > { %v2755_v27 = vmul.f32 %v3690_v20, %v2435_v51  ;;  %v3694_v45 = vpop.eup %3693  ;;  %v5890_v23 = vsel %vm5874_vm14, %v1351_v18, %v1347_v42  ;;  %v2501_v40 = vsub.f32 0.0, %v773_v26  ;;  %v5894_v63 = vadd.f32 %v452_v5, %v3880_v1 }
 0x2e8   : > { %3697 = vrcp.f32 %v5884_v7  ;;  %v2212_v29 = vadd.f32 -0.28449672, %v2148_v47  ;;  %v1893_v24 = vmul.f32 1.0614054, %v5890_v23  ;;  %v1806_v53 = vsub.f32 1.0, %v1805_v39 }
 0x2e9   : > { %v2819_v9 = vsub.f32 1.0, %v2755_v27  ;;  %v5897_v12 = vpop.eup %3695  ;;  %v3138_v56 = vmul.f32 %v3074_v37, %v5791_v43  ;;  %vm1809_vm0 = vweird.f32 %v5851_v0  ;;  %vm1810_vm1 = vweird.f32 %v3692_v28 }
 0x2ea   : > { %v2564_v62 = vmul.f32 %v2500_v52, %v5832_v15  ;;  %v2276_v17 = vmul.f32 %v2212_v29, %v5853_v44  ;;  %v1957_v54 = vadd.f32 -1.4531521, %v1893_v24  ;;  %v1807_v61 = vmul.f32 %v3692_v28, %v1806_v53  ;;  %vm1811_vm3 = vmor %vm1809_vm0, %vm1810_vm1 }
 0x2eb   : > { %v2947_v4 = vsub.f32 0.0, %v2819_v9  ;;  %vm5903_vm2 = vcmp.eq.f32.partialorder %v1813_v21, 8.507059e+37  ;;  %v1816_v57 = vor.u32 1.1754944e-38, %v1815_v8  ;;  %v2565_v35 = vmul.f32 %v2501_v40, %v773_v26 }
 0x2ec   : > { %v5908_v34 = vmul.f32 0.70710677, %v5894_v63  ;;  %v2340_v3 = vadd.f32 0.2548296, %v2276_v17  ;;  %v2021_v15 = vmul.f32 %v1957_v54, %v5890_v23  ;;  %v1808_v31 = vadd.f32 %v3692_v28, %v1807_v61 }
 0x2ed   : > { %v3011_v43 = vsel %vm2883_vm13, %v2819_v9, %v2947_v4  ;;  %v1828_v36 = vand.u32 2147483647, %v5884_v7  ;;  %v5921_v26 = vadd.f32 %v541_v16, %v3882_v2  ;;  %v1830_v18 = vand.u32 2147483648, %v5884_v7 }
 0x2ee   : > { %v3698_v6 = vpop.eup %3697  ;;  %v3075_v14 = vadd.f32 1.0, %v3011_v43  ;;  %v5918_v32 = vand.u32 2147483647, %v5908_v34  ;;  %v2404_v30 = vmul.f32 %v2340_v3, %v5853_v44  ;;  %v2085_v13 = vadd.f32 1.4214138, %v2021_v15  ;;  %v492_v3 = vpop.f32.mrf.mxu2 }
 0x2ef   : > { %v1812_v58 = vsel %vm1811_vm3, %v3692_v28, %v1808_v31  ;;  %v1820_v33 = vmul.f32 %v3698_v6, %v5884_v7  ;;  %vm1825_vm4 = vweird.f32 %v3698_v6  ;;  %v2688_v8 = vmul.f32 1.442695, %v2564_v62 }
 0x2f0   : > { %v3139_v10 = vmul.f32 %v3075_v14, %v5865_v25  ;;  %v5928_v0 = vsel %vm5903_vm2, %v1816_v57, %v1812_v58  ;;  %v806_v48 = vmul.f32 0.3275911, %v5918_v32  ;;  %v2724_v20 = vmul.f32 %v3694_v45, %v2404_v30 }
 0x2f1   : > { %v2149_v51 = vmul.f32 %v2085_v13, %v5890_v23  ;;  %v1924_v44 = vmul.f32 1.0614054, %v5928_v0  ;;  %v1821_v22 = vsub.f32 1.0, %v1820_v33  ;;  %v5937_v25 = vmul.f32 0.70710677, %v5921_v26 }
 0x2f2   : > { %v3173_v49 = vpack.c.bf16 %v3139_v10, %v3138_v56  ;;  %v5934_v52 = vadd.f32 1.0, %v806_v48  ;;  %v2788_v5 = vsub.f32 1.0, %v2724_v20  ;;  %vm1824_vm5 = vweird.f32 %v5884_v7 }
 0x2f3   : > { %v2213_v28 = vadd.f32 -0.28449672, %v2149_v51  ;;  %v1988_v37 = vadd.f32 -1.4531521, %v1924_v44  ;;  %v1822_v21 = vmul.f32 %v3698_v6, %v1821_v22  ;;  %vm1826_vm6 = vmor %vm1824_vm5, %vm1825_vm4  ;;  %v1831_v45 = vor.u32 1.1754944e-38, %v1830_v18 }
 0x2f4   : > { %3205 = vst [vmem:[%s4069_s9 + $0xe8] sm:$0xff] %v3173_v49  ;;  %3699 = vrcp.f32 %v5934_v52  ;;  %v2916_v39 = vsub.f32 0.0, %v2788_v5  ;;  %v2690_v40 = vmul.f32 1.442695, %v2565_v35  ;;  %v5946_v9 = vand.u32 2147483647, %v5937_v25 }
 0x2f5   : > { %v2277_v27 = vmul.f32 %v2213_v28, %v5890_v23  ;;  %v2052_v47 = vmul.f32 %v1988_v37, %v5928_v0  ;;  %v1823_v42 = vadd.f32 %v3698_v6, %v1822_v21  ;;  %vm1829_vm7 = vcmp.eq.f32.partialorder %v1828_v36, 8.507059e+37 }
 0x2f6   : > { %vm2852_vm8 = vcmp.ge.f32.partialorder %v5771_v59, 0.0  ;;  %v807_v62 = vmul.f32 0.3275911, %v5946_v9  ;;  %3701 = vpow2.f32 %v2688_v8  ;;  %v612_v61 = vmul.f32 0.5, %v5752_v55 }
 0x2f7   : > { %v2341_v29 = vadd.f32 0.2548296, %v2277_v27  ;;  %v2116_v24 = vadd.f32 1.4214138, %v2052_v47  ;;  %v1827_v53 = vsel %vm1826_vm6, %v3698_v6, %v1823_v42  ;;  %v2980_v16 = vsel %vm2852_vm8, %v2788_v5, %v2916_v39 }
 0x2f8   : > { %v5949_v56 = vsel %vm1829_vm7, %v1831_v45, %v1827_v53  ;;  %3703 = vpow2.f32 %v2690_v40  ;;  %v5956_v46 = vadd.f32 1.0, %v807_v62  ;;  %vm2853_vm9 = vcmp.ge.f32.partialorder %v5812_v41, 0.0  ;;  %v581_v62 = vpop.f32.mrf.mxu3 }
 0x2f9   : > { %v2405_v7 = vmul.f32 %v2341_v29, %v5890_v23  ;;  %v2180_v4 = vmul.f32 %v2116_v24, %v5928_v0  ;;  %v1925_v17 = vmul.f32 1.0614054, %v5949_v56  ;;  %v613_v23 = vmul.f32 0.5, %v5799_v11 }
 0x2fa   : > { %v3700_v54 = vpop.eup %3699  ;;  %v1363_v15 = vand.u32 2147483647, %v5934_v52  ;;  %3705 = vrcp.f32 %v5956_v46  ;;  %v1365_v36 = vand.u32 2147483648, %v5934_v52  ;;  %v5968_v30 = vadd.f32 %v492_v3, %v3880_v1 }
 0x2fb   : > { %v2725_v59 = vmul.f32 %v5897_v12, %v2405_v7  ;;  %v2244_v57 = vadd.f32 -0.28449672, %v2180_v4  ;;  %v1989_v35 = vadd.f32 -1.4531521, %v1925_v17  ;;  %v1355_v43 = vmul.f32 %v3700_v54, %v5934_v52 }
 0x2fc   : > { %v3044_v12 = vadd.f32 1.0, %v2980_v16  ;;  %vm1360_vm10 = vweird.f32 %v3700_v54  ;;  %v3702_v11 = vpop.eup %3701  ;;  %vm1359_vm11 = vweird.f32 %v5934_v52  ;;  %vm5971_vm12 = vcmp.eq.f32.partialorder %v1363_v15, 8.507059e+37 }
 0x2fd   : > { %v2789_v55 = vsub.f32 1.0, %v2725_v59  ;;  %v2308_v31 = vmul.f32 %v2244_v57, %v5928_v0  ;;  %v2053_v6 = vmul.f32 %v1989_v35, %v5949_v56  ;;  %v1356_v14 = vsub.f32 1.0, %v1355_v43  ;;  %vm1361_vm13 = vmor %vm1359_vm11, %vm1360_vm10 }
 0x2fe   : > { %v3704_v18 = vpop.eup %3703  ;;  %v2470_v20 = vsub.f32 0.0, %v5918_v32  ;;  %v5977_v51 = vmul.f32 0.70710677, %v5968_v30  ;;  %v3108_v28 = vmul.f32 %v3044_v12, %v612_v61  ;;  %v1366_v37 = vor.u32 1.1754944e-38, %v1365_v36 }
 0x2ff   : > { %v2917_v13 = vsub.f32 0.0, %v2789_v55  ;;  %v2372_v58 = vadd.f32 0.2548296, %v2308_v31  ;;  %v2117_v33 = vadd.f32 1.4214138, %v2053_v6  ;;  %v1357_v10 = vmul.f32 %v3700_v54, %v1356_v14 }
 0x300   : > { %v3706_v5 = vpop.eup %3705  ;;  %v5985_v21 = vand.u32 2147483647, %v5977_v51  ;;  %v1378_v39 = vand.u32 2147483647, %v5956_v46  ;;  %v1380_v4 = vand.u32 2147483648, %v5956_v46  ;;  %v2534_v57 = vmul.f32 %v2470_v20, %v5918_v32 }
 0x301   : > { %v2981_v1 = vsel %vm2853_vm9, %v2789_v55, %v2917_v13  ;;  %v2436_v44 = vmul.f32 %v2372_v58, %v5928_v0  ;;  %v2181_v22 = vmul.f32 %v2117_v33, %v5949_v56  ;;  %v1358_v49 = vadd.f32 %v3700_v54, %v1357_v10 }
 0x302   : > { %v3045_v52 = vadd.f32 1.0, %v2981_v1  ;;  %v1370_v41 = vmul.f32 %v3706_v5, %v5956_v46  ;;  %v838_v45 = vmul.f32 0.3275911, %v5985_v21  ;;  %vm1375_vm14 = vweird.f32 %v3706_v5 }
 0x303   : > { %v2756_v8 = vmul.f32 %v3702_v11, %v2436_v44  ;;  %v2245_v27 = vadd.f32 -0.28449672, %v2181_v22  ;;  %v1362_v47 = vsel %vm1361_vm13, %v3700_v54, %v1358_v49  ;;  %v6003_v35 = vadd.f32 %v581_v62, %v3882_v2 }
 0x304   : > { %v3109_v42 = vmul.f32 %v3045_v52, %v613_v23  ;;  %v5990_v0 = vsel %vm5971_vm12, %v1366_v37, %v1362_v47  ;;  %v1371_v53 = vsub.f32 1.0, %v1370_v41  ;;  %v5997_v17 = vadd.f32 1.0, %v838_v45 }
 0x305   : > { %v2820_v40 = vsub.f32 1.0, %v2756_v8  ;;  %v2309_v29 = vmul.f32 %v2245_v27, %v5949_v56  ;;  %v1894_v24 = vmul.f32 1.0614054, %v5990_v0  ;;  %vm1374_vm15 = vweird.f32 %v5956_v46 }
 0x306   : > { %v3158_v7 = vpack.c.bf16 %v3109_v42, %v3108_v28  ;;  %v1372_v59 = vmul.f32 %v3706_v5, %v1371_v53  ;;  %3707 = vrcp.f32 %v5997_v17  ;;  %vm2884_vm0 = vcmp.ge.f32.partialorder %v5821_v38, 0.0  ;;  %vm1376_vm1 = vmor %vm1374_vm15, %vm1375_vm14 }
 0x307   : > { %v2948_v54 = vsub.f32 0.0, %v2820_v40  ;;  %v2373_v61 = vadd.f32 0.2548296, %v2309_v29  ;;  %v1958_v16 = vadd.f32 -1.4531521, %v1894_v24  ;;  %vm1379_vm2 = vcmp.eq.f32.partialorder %v1378_v39, 8.507059e+37 }
 0x308   : > { %3190 = vst [vmem:[%s4069_s9 + $0x70] sm:$0xff] %v3158_v7  ;;  %v1373_v23 = vadd.f32 %v3706_v5, %v1372_v59  ;;  %v1381_v15 = vor.u32 1.1754944e-38, %v1380_v4  ;;  %v2628_v14 = vmul.f32 1.442695, %v2534_v57  ;;  %v2471_v12 = vsub.f32 0.0, %v5946_v9 }
 0x309   : > { %v2437_v43 = vmul.f32 %v2373_v61, %v5949_v56  ;;  %v2022_v3 = vmul.f32 %v1958_v16, %v5990_v0  ;;  %v3012_v55 = vsel %vm2884_vm0, %v2820_v40, %v2948_v54  ;;  %v6012_v56 = vmul.f32 0.70710677, %v6003_v35 }
 0x30a   : > { %v1377_v6 = vsel %vm1376_vm1, %v3706_v5, %v1373_v23  ;;  %v644_v36 = vmul.f32 0.5, %v5806_v19  ;;  %v3076_v58 = vadd.f32 1.0, %v3012_v55  ;;  %v645_v33 = vmul.f32 0.5, %v5843_v60 }
 0x30b   : > { %v2757_v32 = vmul.f32 %v3704_v18, %v2437_v43  ;;  %v2086_v31 = vadd.f32 1.4214138, %v2022_v3  ;;  %v1382_v2 = vsel %vm1379_vm2, %v1381_v15, %v1377_v6  ;;  %vm2885_vm3 = vcmp.ge.f32.partialorder %v5856_v50, 0.0 }
 0x30c   : > { %v1895_v11 = vmul.f32 1.0614054, %v1382_v2  ;;  %v3708_v13 = vpop.eup %3707  ;;  %v6019_v10 = vand.u32 2147483647, %v6012_v56  ;;  %3709 = vpow2.f32 %v2628_v14  ;;  %v2535_v19 = vmul.f32 %v2471_v12, %v5946_v9 }
 0x30d   : > { %v2821_v46 = vsub.f32 1.0, %v2757_v32  ;;  %v2150_v38 = vmul.f32 %v2086_v31, %v5990_v0  ;;  %v1835_v1 = vmul.f32 %v3708_v13, %v5997_v17  ;;  %v1843_v44 = vand.u32 2147483647, %v5997_v17 }
 0x30e   : > { %v1959_v20 = vadd.f32 -1.4531521, %v1895_v11  ;;  %v839_v22 = vmul.f32 0.3275911, %v6019_v10  ;;  %v3140_v28 = vmul.f32 %v3076_v58, %v644_v36  ;;  %v1845_v37 = vand.u32 2147483648, %v5997_v17 }
 0x30f   : > { %v2949_v18 = vsub.f32 0.0, %v2821_v46  ;;  %v2214_v48 = vadd.f32 -0.28449672, %v2150_v38  ;;  %v1836_v50 = vsub.f32 1.0, %v1835_v1  ;;  %vm1840_vm4 = vweird.f32 %v3708_v13 }
 0x310   : > { %v2023_v5 = vmul.f32 %v1959_v20, %v1382_v2  ;;  %v903_v8 = vadd.f32 1.0, %v839_v22  ;;  %v2630_v42 = vmul.f32 1.442695, %v2535_v19  ;;  %vm1839_vm5 = vweird.f32 %v5997_v17 }
 0x311   : > { %v3013_v49 = vsel %vm2885_vm3, %v2821_v46, %v2949_v18  ;;  %v2278_v60 = vmul.f32 %v2214_v48, %v5990_v0  ;;  %v1837_v41 = vmul.f32 %v3708_v13, %v1836_v50  ;;  %vm1841_vm6 = vmor %vm1839_vm5, %vm1840_vm4  ;;  %v1846_v53 = vor.u32 1.1754944e-38, %v1845_v37 }
 0x312   : > { %v3077_v52 = vadd.f32 1.0, %v3013_v49  ;;  %v2087_v47 = vadd.f32 1.4214138, %v2023_v5  ;;  %3711 = vrcp.f32 %v903_v8  ;;  %v3710_v29 = vpop.eup %3709  ;;  %vm1844_vm7 = vcmp.eq.f32.partialorder %v1843_v44, 8.507059e+37 }
 0x313   : > { %v2342_v27 = vadd.f32 0.2548296, %v2278_v60  ;;  %v1838_v40 = vadd.f32 %v3708_v13, %v1837_v41  ;;  %3713 = vpow2.f32 %v2630_v42  ;;  %v2502_v61 = vsub.f32 0.0, %v5985_v21 }
 0x314   : > { %v3141_v9 = vmul.f32 %v3077_v52, %v645_v33  ;;  %v2151_v45 = vmul.f32 %v2087_v47, %v1382_v2  ;;  %vm2854_vm8 = vcmp.ge.f32.partialorder %v5908_v34, 0.0  ;;  %v1858_v14 = vand.u32 2147483647, %v903_v8 }
 0x315   : > { %v2406_v39 = vmul.f32 %v2342_v27, %v5990_v0  ;;  %v1842_v4 = vsel %vm1841_vm6, %v3708_v13, %v1838_v40  ;;  %v2566_v15 = vmul.f32 %v2502_v61, %v5985_v21  ;;  %v1860_v12 = vand.u32 2147483648, %v903_v8 }
 0x316   : > { %v3174_v24 = vpack.c.bf16 %v3141_v9, %v3140_v28  ;;  %v2215_v7 = vadd.f32 -0.28449672, %v2151_v45  ;;  %v1847_v54 = vsel %vm1844_vm7, %v1846_v53, %v1842_v4  ;;  %vm1854_vm10 = vweird.f32 %v903_v8 }
 0x317   : > { %v2726_v62 = vmul.f32 %v3710_v29, %v2406_v39  ;;  %v1926_v0 = vmul.f32 1.0614054, %v1847_v54  ;;  %v2692_v13 = vmul.f32 1.442695, %v2566_v15  ;;  %v614_v21 = vmul.f32 0.5, %v5894_v63 }
 0x318   : > { %3206 = vst [vmem:[%s4069_s9 + $0xf0] sm:$0xff] %v3174_v24  ;;  %v2279_v59 = vmul.f32 %v2215_v7, %v1382_v2  ;;  %v3712_v57 = vpop.eup %3711  ;;  %v1861_v48 = vor.u32 1.1754944e-38, %v1860_v12  ;;  %vm1859_vm12 = vcmp.eq.f32.partialorder %v1858_v14, 8.507059e+37  ;;  %vm2855_vm13 = vcmp.ge.f32.partialorder %v5937_v25, 0.0 }
 0x319   : > { %v2790_v16 = vsub.f32 1.0, %v2726_v62  ;;  %v1990_v17 = vadd.f32 -1.4531521, %v1926_v0  ;;  %v1850_v23 = vmul.f32 %v3712_v57, %v903_v8  ;;  %v3714_v6 = vpop.eup %3713  ;;  %vm1855_vm9 = vweird.f32 %v3712_v57 }
 0x31a   : > { %v2343_v3 = vadd.f32 0.2548296, %v2279_v59  ;;  %vm1856_vm11 = vmor %vm1854_vm10, %vm1855_vm9  ;;  %3715 = vpow2.f32 %v2692_v13  ;;  %v2503_v44 = vsub.f32 0.0, %v6019_v10  ;;  %v615_v63 = vmul.f32 0.5, %v5921_v26 }
 0x31b   : > { %v2918_v43 = vsub.f32 0.0, %v2790_v16  ;;  %v2054_v32 = vmul.f32 %v1990_v17, %v1847_v54  ;;  %v1851_v31 = vsub.f32 1.0, %v1850_v23  ;;  %vm2886_vm14 = vcmp.ge.f32.partialorder %v5977_v51, 0.0 }
 0x31c   : > { %v2407_v55 = vmul.f32 %v2343_v3, %v1382_v2  ;;  %v2567_v8 = vmul.f32 %v2503_v44, %v6019_v10  ;;  %v646_v59 = vmul.f32 0.5, %v5968_v30  ;;  %vm2887_vm15 = vcmp.ge.f32.partialorder %v6012_v56, 0.0 }
 0x31d   : > { %v2982_v36 = vsel %vm2854_vm8, %v2790_v16, %v2918_v43  ;;  %v2118_v38 = vadd.f32 1.4214138, %v2054_v32  ;;  %v1852_v11 = vmul.f32 %v3712_v57, %v1851_v31  ;;  %v647_v43 = vmul.f32 0.5, %v6003_v35 }
 0x31e   : > { %v2727_v46 = vmul.f32 %v3714_v6, %v2407_v55  ;;  %v3046_v2 = vadd.f32 1.0, %v2982_v36  ;;  %v2694_v39 = vmul.f32 1.442695, %v2567_v8 }
 0x31f   : > { %v2182_v33 = vmul.f32 %v2118_v38, %v1847_v54  ;;  %v1853_v18 = vadd.f32 %v3712_v57, %v1852_v11 }
 0x320   : > { %v2791_v58 = vsub.f32 1.0, %v2727_v46  ;;  %v3110_v5 = vmul.f32 %v3046_v2, %v614_v21  ;;  %v3716_v25 = vpop.eup %3715  ;;  %3717 = vpow2.f32 %v2694_v39 }
 0x321   : > { %v2246_v1 = vadd.f32 -0.28449672, %v2182_v33  ;;  %v1857_v34 = vsel %vm1856_vm11, %v3712_v57, %v1853_v18 }
 0x322   : > { %v2919_v20 = vsub.f32 0.0, %v2791_v58  ;;  %v1862_v19 = vsel %vm1859_vm12, %v1861_v48, %v1857_v34 }
 0x323   : > { %v2310_v49 = vmul.f32 %v2246_v1, %v1847_v54  ;;  %v1927_v60 = vmul.f32 1.0614054, %v1862_v19 }
 0x324   : > { %v2983_v22 = vsel %vm2855_vm13, %v2791_v58, %v2919_v20 }
 0x325   : > { %v3047_v50 = vadd.f32 1.0, %v2983_v22  ;;  %v2374_v28 = vadd.f32 0.2548296, %v2310_v49  ;;  %v1991_v52 = vadd.f32 -1.4531521, %v1927_v60 }
 0x326   : > { %v3718_v7 = vpop.eup %3717 }
 0x327   : > { %v3111_v37 = vmul.f32 %v3047_v50, %v615_v63  ;;  %v2438_v27 = vmul.f32 %v2374_v28, %v1847_v54  ;;  %v2055_v47 = vmul.f32 %v1991_v52, %v1862_v19 }
 0x329   : > { %v3159_v41 = vpack.c.bf16 %v3111_v37, %v3110_v5  ;;  %v2758_v9 = vmul.f32 %v3716_v25, %v2438_v27  ;;  %v2119_v42 = vadd.f32 1.4214138, %v2055_v47 }
 0x32b   : > { %3191 = vst [vmem:[%s4069_s9 + $0x78] sm:$0xff] %v3159_v41  ;;  %v2183_v45 = vmul.f32 %v2119_v42, %v1862_v19  ;;  %v2822_v40 = vsub.f32 1.0, %v2758_v9 }
 0x32d   : > { %v2247_v29 = vadd.f32 -0.28449672, %v2183_v45  ;;  %v2950_v26 = vsub.f32 0.0, %v2822_v40 }
 0x32f   : > { %v2311_v24 = vmul.f32 %v2247_v29, %v1862_v19  ;;  %v3014_v10 = vsel %vm2886_vm14, %v2822_v40, %v2950_v26 }
 0x330   : > { %v3078_v61 = vadd.f32 1.0, %v3014_v10 }
 0x331   : > { %v2375_v53 = vadd.f32 0.2548296, %v2311_v24 }
 0x332   : > { %v3142_v57 = vmul.f32 %v3078_v61, %v646_v59 }
 0x333   : > { %v2439_v62 = vmul.f32 %v2375_v53, %v1862_v19 }
 0x335   : > { %v2759_v4 = vmul.f32 %v3718_v7, %v2439_v62 }
 0x337   : > { %v2823_v54 = vsub.f32 1.0, %v2759_v4 }
 0x339   : > { %v2951_v16 = vsub.f32 0.0, %v2823_v54 }
 0x33b   : > { %v3015_v0 = vsel %vm2887_vm15, %v2823_v54, %v2951_v16 }
 0x33c   : > { %v3079_v3 = vadd.f32 1.0, %v3015_v0 }
 0x33e   : > { %v3143_v17 = vmul.f32 %v3079_v3, %v647_v43 }
 0x340   : > { %v3175_v23 = vpack.c.bf16 %v3143_v17, %v3142_v57 }
 0x342   : > { %3207 = vst [vmem:[%s4069_s9 + $0xf8] sm:$0xff] %v3175_v23 }
 0x343 PF: > { %s13_s12 = sadd.s32 1, %s3725_s12  }
 0x344   : > { %p10_p4 = scmp.ge.s32.totalorder %s13_s12, 4  }
 0x346   :  { %12 = sbr.rel (!%p10_p4) target bundleno = 1 (0x1), region = 62 }

// kernel: forward.25
= control target key start
LH: loop header
LB: loop body
LE: loop exit
PB: predicated region body
PF: predicated region fallthrough
CT: control target
= control target key end

     0   :  { %s265_s0 = inlined_call_operand.vmem [shape: f32[8,128], index: 0, kind: input, shape index: {}]   ;;  %s266_s1 = inlined_call_operand.vmem [shape: f32[128,2], index: 1, kind: input, shape index: {}]   ;;  %s267_s2 = inlined_call_operand.vmem [shape: f32[1,2], index: 2, kind: input, shape index: {}]   ;;  %s268_s3 = inlined_call_operand.vmem [shape: s32[8,1], index: 3, kind: input, shape index: {}]   ;;  %s269_s4 = inlined_call_operand.vmem [shape: f32[8,2], index: 4, kind: output, shape index: {0}]   ;;  %s270_s5 = inlined_call_operand.hbm [shape: f32[1,1], index: 5, kind: output, shape index: {1}]  }
   0x1   :  { %v36_v0 = vld [vmem:[%s266_s1 + $0x78] sm:$0xff]  ;;  %v35_v1 = vld [vmem:[%s266_s1 + $0x70] sm:$0xff]  ;;  %v34_v2 = vld [vmem:[%s266_s1 + $0x68] sm:$0xff] }
   0x2   :  { %41 = vmatpush.msra.mxu0 %v36_v0  ;;  %v33_v3 = vld [vmem:[%s266_s1 + $0x60] sm:$0xff]  ;;  %v32_v4 = vld [vmem:[%s266_s1 + $0x58] sm:$0xff] }
   0x4   :  { %42 = vmatpush.msra.mxu0 %v35_v1 }
   0x6   :  { %43 = vmatpush.msra.mxu0 %v34_v2 }
   0x7   :  { %11 = vsyncpa [#allocation3], 0  ;;  %v31_v5 = vld [vmem:[%s266_s1 + $0x50] sm:$0xff]  ;;  %v30_v6 = vld [vmem:[%s266_s1 + $0x48] sm:$0xff]  ;;  %v164_v17 = vmov 0   ;;  %vm61_vm0 = vcmask 15360   ;;  %v75_v28 = vlaneseq }
   0x8   :  { %44 = vmatpush.msra.mxu0 %v33_v3  ;;  %v29_v7 = vld [vmem:[%s266_s1 + $0x40] sm:$0xff]  ;;  %v28_v8 = vld [vmem:[%s266_s1 + $0x38] sm:$0xff]  ;;  %v27_v9 = vld [vmem:[%s266_s1 + $0x30] sm:$0xff]  ;;  %130 = vset.pattern.permute.xlu0 %v164_v17  ;;  %v165_v31 = vmov 0.0   ;;  %v166_v35 = vmov 8.0   ;;  %s114_s7 = sshll.u32 %s270_s5, 4  ;;  %s115_s7 = int_to_ptr.hbm [resolvable:$true] %s114_s7 }
   0x9   :  { %v26_v10 = vld [vmem:[%s266_s1 + $0x28] sm:$0xff]  ;;  %v25_v11 = vld [vmem:[%s266_s1 + $0x20] sm:$0xff]  ;;  %v24_v12 = vld [vmem:[%s266_s1 + $0x18] sm:$0xff]  ;;  %v76_v29 = vand.u32 127, %v75_v28  ;;  %vm103_vm3 = vcmask 0  }
   0xa   :  { %45 = vmatpush.msra.mxu0 %v32_v4  ;;  %v23_v13 = vld [vmem:[%s266_s1 + $0x10] sm:$0xff]  ;;  %v22_v14 = vld [vmem:[%s266_s1 + $0x8] sm:$0xff]  ;;  %v21_v15 = vld [vmem:[%s266_s1] sm:$0xff] }
   0xb   :  { %v20_v16 = vld [vmem:[%s265_s0] sm:$0xff] }
   0xc   :  { %46 = vmatpush.msra.mxu0 %v31_v5  ;;  %v131_v18 = vld [vmem:[%s267_s2] ss:$0 sm:$0xff]  ;;  %s167_s2 = smov [#allocation2]  }
   0xd   :  { %v77_v22 = vld [vmem:[%s268_s3] sm:$0xff]  ;;  %s112_s3 = sshll.u32 %s167_s2, 4  ;;  %s113_s3 = int_to_ptr.vmem [resolvable:$true] %s112_s3 }
   0xe   :  { %47 = vmatpush.msra.mxu0 %v30_v6 }
  0x10   :  { %48 = vmatpush.msra.mxu0 %v29_v7 }
  0x12   :  { %49 = vmatpush.msra.mxu0 %v28_v8 }
  0x14   :  { %50 = vmatpush.msra.mxu0 %v27_v9 }
  0x16   :  { %51 = vmatpush.msra.mxu0 %v26_v10 }
  0x18   :  { %52 = vmatpush.msra.mxu0 %v25_v11 }
  0x1a   :  { %53 = vmatpush.msra.mxu0 %v24_v12 }
  0x1c   :  { %54 = vmatpush.msra.mxu0 %v23_v13 }
  0x1e   :  { %55 = vmatpush.msra.mxu0 %v22_v14 }
  0x20   :  { %56 = vmatpush.msra.mxu0 %v21_v15 }
  0x21   :  { %57 = vmatmul.f32.vlgmr.msra.gmra.mxu0 %v20_v16 }
  0x9e   :  { %v58_v19 = vpop.f32.mrf.mxu0 }
  0x9f   :  { %v59_v20 = vadd.f32 %v131_v18, %v58_v19 }
  0xa1   :  { %v63_v21 = vsel %vm61_vm0, %v59_v20, -inf  ;;  %62 = vst.msk [vmem:[%s269_s4] sm:$0xff] %vm61_vm0, %v59_v20 }
  0xa2   :  { %64 = vmax.xlane.f32.xlu0 %v63_v21 }
  0xb6   :  { %79 = vperm.xlu0 %130, %v77_v22  }
 0x115   :  { %v65_v23 = vpop.xlane.xlu0 %64 }
 0x116   :  { %v66_v24 = vsub.f32 %v59_v20, %v65_v23 }
 0x118   :  { %v67_v25 = vmul.f32 1.442695, %v66_v24 }
 0x11a   :  { %132 = vpow2.f32 %v67_v25 }
 0x11b   :  { %134 = vrcp.f32 %v166_v35 }
 0x120   :  { %v133_v26 = vpop.eup %132 }
 0x121   :  { %v69_v27 = vsel %vm61_vm0, %v133_v26, 0.0  ;;  %v135_v37 = vpop.eup %134 }
 0x122   :  { %70 = vadd.xlane.f32.xlu1 %v69_v27  ;;  %v96_v40 = vmul.f32 8.0, %v135_v37  ;;  %vm100_vm2 = vweird.f32 %v135_v37 }
 0x124   :  { %v97_v43 = vsub.f32 1.0, %v96_v40 }
 0x126   :  { %v98_v46 = vmul.f32 %v135_v37, %v97_v43 }
 0x128   :  { %v80_v30 = vpop.permute.xlu0 %79  ;;  %v99_v49 = vadd.f32 %v135_v37, %v98_v46 }
 0x129   :  { %vm81_vm1 = vcmp.eq.s32.totalorder %v76_v29, %v80_v30 }
 0x12a   :  { %v125_v32 = vsel %vm81_vm1, 1.0, %v165_v31  ;;  %v101_v52 = vsel %vm100_vm2, %v135_v37, %v99_v49 }
 0x12b   :  { %v84_v33 = vmul.f32 %v125_v32, %v59_v20 }
 0x12d   :  { %v85_v34 = vsel %vm61_vm0, %v84_v33, 0.0 }
 0x12e   :  { %86 = vadd.xlane.f32.xlu1 %v85_v34 }
 0x195   :  { %v71_v36 = vpop.xlane.xlu1 %70 }
 0x196   :  { %136 = vlog2.f32 %v71_v36 }
 0x19c   :  { %v137_v38 = vpop.eup %136 }
 0x19d   :  { %v73_v39 = vmul.f32 0.6931472, %v137_v38 }
 0x19f   :  { %v74_v41 = vadd.f32 %v73_v39, %v65_v23 }
 0x1a1   :  { %v87_v42 = vpop.xlane.xlu1 %86 }
 0x1a2   :  { %v88_v44 = vsub.f32 %v74_v41, %v87_v42 }
 0x1a4   :  { %v89_v45 = vrot.slane %v88_v44, 4 }
 0x1a6   :  { %v90_v47 = vadd.f32 %v89_v45, %v88_v44 }
 0x1a8   :  { %v91_v48 = vrot.slane %v90_v47, 2 }
 0x1aa   :  { %v92_v50 = vadd.f32 %v91_v48, %v90_v47 }
 0x1ac   :  { %v93_v51 = vrot.slane %v92_v50, 1 }
 0x1ae   :  { %v94_v53 = vadd.f32 %v93_v51, %v92_v50 }
 0x1b0   :  { %v102_v54 = vmul.f32 %v101_v52, %v94_v53 }
 0x1b2   :  { %104 = vst.msk [vmem:[#allocation2] sm:$0x1] %vm103_vm3, %v102_v54 }
 0x1b3   :  { %117 = dma.vmem_to_hbm [thread:$0]  %s113_s3, 16, %s115_s7, [#allocation3]  }
 0x1b4   :  { %162 = dma.done.wait [#allocation3], 16  }
 0x1b5   :  { %163 = vsyncadd [#allocation3], 4294967280 }
 0x1b6   :  { %124 = vsyncpa [#allocation3], 1 }

</bundles_post_ra>
